<compile_context>
chip_gen: v7x
topology: tpu7x:2x2x1
jax: 0.10.0
libtpu: 0.0.40
codegen_flags: <defaults>
</compile_context>

<pallas_src>
import functools

import numpy as np
import jax
import jax.numpy as jnp
from jax.experimental import pallas as pl
from jax.experimental.pallas import tpu as pltpu


def _round_up(x, m):
    return ((x + m - 1) // m) * m


# ----------------------------------------------------------------------------
# Fused GEMM + bias + (optional) LeakyReLU kernels
# ----------------------------------------------------------------------------
def _gemm_bias_act_single_k_kernel(a_ref, b_ref, bias_ref, o_ref, *,
                                   neg_slope, apply_act):
    """Whole-K contraction in one grid step: no accumulator scratch needed."""
    y = jnp.dot(a_ref[...], b_ref[...], preferred_element_type=jnp.float32)
    y = y + bias_ref[...]                      # (tm, tn) + (1, tn), f32
    if apply_act:
        y = jnp.where(y >= 0, y, y * neg_slope)
    o_ref[...] = y.astype(o_ref.dtype)


def _gemm_bias_act_multi_k_kernel(a_ref, b_ref, bias_ref, o_ref, acc_ref, *,
                                  neg_slope, apply_act):
    @pl.when(pl.program_id(2) == 0)
    def _():
        acc_ref[...] = jnp.zeros_like(acc_ref)

    acc_ref[...] += jnp.dot(a_ref[...], b_ref[...],
                            preferred_element_type=jnp.float32)

    @pl.when(pl.program_id(2) == pl.num_programs(2) - 1)
    def _():
        y = acc_ref[...] + bias_ref[...]
        if apply_act:
            y = jnp.where(y >= 0, y, y * neg_slope)
        o_ref[...] = y.astype(o_ref.dtype)


# Conservative budget for the double-buffered A/B input blocks of one grid step
# (well under the 32 MiB default scoped VMEM limit on v5e/v6e/v7x).
_VMEM_BUDGET = 10 * 1024 * 1024


def _pick_tn(N):
    """N is always padded to a multiple of 128 so stores are lane-dense."""
    Np = _round_up(N, 128)
    for cand in (256, 128):
        if Np % cand == 0:
            return cand, Np
    return 128, Np


def _pick_tk(K, tm, tn, compute_bytes):
    """Prefer a single K step (whole contraction in one grid iteration) when
    the double-buffered A/B blocks fit in the VMEM budget; otherwise pick the
    largest 128-multiple divisor of padded K that fits."""
    need = 2 * compute_bytes * (tm * K + K * tn)
    if need <= _VMEM_BUDGET:
        return K, K
    Kp = _round_up(K, 128)
    max_tk = _VMEM_BUDGET // (2 * compute_bytes * (tm + tn))
    max_tk = max(128, (max_tk // 128) * 128)
    for cand in range(min(max_tk, Kp), 127, -128):
        if Kp % cand == 0:
            return cand, Kp
    return 128, Kp


def gemm_bias_act(a, b, bias, *, neg_slope=0.0, apply_act=False,
                  compute_dtype=jnp.bfloat16, out_dtype=jnp.float32):
    """out = act(a @ b + bias);  a:(M,K), b:(K,N), bias:(N,)."""
    M, K = a.shape
    Kb, N = b.shape
    assert K == Kb

    tm = _round_up(M, 8)          # single M tile matched to the (tiny) M
    Mp = tm
    tn, Np = _pick_tn(N)
    compute_bytes = jnp.dtype(compute_dtype).itemsize
    tk, Kp = _pick_tk(K, tm, tn, compute_bytes)

    a_p = a if (Mp, Kp) == (M, K) else jnp.pad(a, ((0, Mp - M), (0, Kp - K)))
    b_p = b if (Kp, Np) == (K, N) else jnp.pad(b, ((0, Kp - K), (0, Np - N)))
    bias_p = bias.reshape(1, N).astype(jnp.float32)
    if Np != N:
        bias_p = jnp.pad(bias_p, ((0, 0), (0, Np - N)))

    a_p = a_p.astype(compute_dtype)
    b_p = b_p.astype(compute_dtype)

    n_k = Kp // tk
    grid = (Mp // tm, Np // tn, n_k)

    if n_k == 1:
        kernel = functools.partial(_gemm_bias_act_single_k_kernel,
                                   neg_slope=neg_slope, apply_act=apply_act)
        scratch_shapes = []
    else:
        kernel = functools.partial(_gemm_bias_act_multi_k_kernel,
                                   neg_slope=neg_slope, apply_act=apply_act)
        scratch_shapes = [pltpu.VMEM((tm, tn), jnp.float32)]

    out = pl.pallas_call(
        kernel,
        out_shape=jax.ShapeDtypeStruct((Mp, Np), out_dtype),
        grid_spec=pltpu.PrefetchScalarGridSpec(
            num_scalar_prefetch=0,
            grid=grid,
            in_specs=[
                pl.BlockSpec((tm, tk), lambda i, j, k: (i, k)),
                pl.BlockSpec((tk, tn), lambda i, j, k: (k, j)),
                pl.BlockSpec((1, tn), lambda i, j, k: (0, j)),
            ],
            out_specs=pl.BlockSpec((tm, tn), lambda i, j, k: (i, j)),
            scratch_shapes=scratch_shapes,
        ),
        compiler_params=pltpu.CompilerParams(
            dimension_semantics=("parallel", "parallel", "arbitrary")),
    )(a_p, b_p, bias_p)

    if (Mp, Np) != (M, N):
        out = out[:M, :N]
    return out


# ----------------------------------------------------------------------------
# Conv2d(kernel=4, stride=2, padding=2) + optional LeakyReLU, NHWC
# ----------------------------------------------------------------------------
def conv4s2p2(x_nhwc, w_oihw, bias, *, neg_slope, apply_act, out_dtype):
    n, h, w, cin = x_nhwc.shape
    cout = w_oihw.shape[0]
    k, s, p = 4, 2, 2
    ho = (h + 2 * p - k) // s + 1
    wo = (w + 2 * p - k) // s + 1

    # TODO(synk): at production resolutions fold this im2col into the GEMM via
    # index_map windows instead of materialising the patch tensor in HBM.
    xp = jnp.pad(x_nhwc, ((0, 0), (p, p), (p, p), (0, 0)))
    cols = []
    for kh in range(k):
        for kw in range(k):
            cols.append(xp[:, kh: kh + s * (ho - 1) + 1: s,
                           kw: kw + s * (wo - 1) + 1: s, :])
    patches = jnp.concatenate(cols, axis=-1)            # (n, ho, wo, k*k*cin)
    a = patches.reshape(n * ho * wo, k * k * cin)
    # weight (cout, cin, kh, kw) -> (kh, kw, cin, cout) -> (k*k*cin, cout)
    b = jnp.transpose(w_oihw, (2, 3, 1, 0)).reshape(k * k * cin, cout)

    out = gemm_bias_act(a, b, bias, neg_slope=neg_slope, apply_act=apply_act,
                        compute_dtype=jnp.bfloat16, out_dtype=out_dtype)
    return out.reshape(n, ho, wo, cout)


# ----------------------------------------------------------------------------
# 5x (bilinear upsample x2, align_corners=True, crop last row/col)
# folded into kron(A_h, A_w) and applied as a single lane-dense GEMM.
# ----------------------------------------------------------------------------
def _bilinear_matrix(n_in, n_out):
    """align_corners=True bilinear 1-D interpolation matrix (n_out, n_in)."""
    i = np.arange(n_out)
    if n_out == 1:
        src = np.zeros(1, dtype=np.float64)
    else:
        src = i * (n_in - 1) / (n_out - 1)
    lo = np.clip(np.floor(src).astype(np.int64), 0, n_in - 1)
    hi = np.minimum(lo + 1, n_in - 1)
    frac = src - lo
    m = np.zeros((n_out, n_in), np.float32)
    m[i, lo] += (1.0 - frac)
    m[i, hi] += frac
    return m


def _upsample_crop_chain_matrix(n_in, steps=5):
    m = np.eye(n_in, dtype=np.float32)
    n = n_in
    for _ in range(steps):
        u = _bilinear_matrix(n, 2 * n)
        m = (u @ m)[:-1]          # crop last row
        n = 2 * n - 1
    return m                      # numpy (n_final, n_in)


def upsample_chain_gemm(x_nhwc):
    """Apply the 5x (upsample x2 + crop) tail.  Returns NCHW f32."""
    n, hi, wi, c = x_nhwc.shape
    ah = _upsample_crop_chain_matrix(hi)               # (Ho, Hi)
    aw = _upsample_crop_chain_matrix(wi)               # (Wo, Wi)
    ho, wo = ah.shape[0], aw.shape[0]
    kron = np.kron(ah, aw)                             # (Ho*Wo, Hi*Wi)
    bt = jnp.asarray(kron.T, jnp.float32)              # (Hi*Wi, Ho*Wo)

    x_flat = jnp.transpose(x_nhwc, (0, 3, 1, 2)).reshape(n * c, hi * wi)
    x_flat = x_flat.astype(jnp.float32)
    zero_bias = jnp.zeros((ho * wo,), jnp.float32)

    out = gemm_bias_act(x_flat, bt, zero_bias, apply_act=False,
                        compute_dtype=jnp.float32, out_dtype=jnp.float32)
    return out.reshape(n, c, ho, wo)                   # already NCHW


# ----------------------------------------------------------------------------
# Parameter init + full forward
# ----------------------------------------------------------------------------
def init_dis_params(key, in_channels):
    chans = [(in_channels, 64), (64, 128), (128, 256), (256, 512), (512, 2)]
    params = []
    for (cin, cout) in chans:
        key, kw, kb = jax.random.split(key, 3)
        fan_in = cin * 4 * 4
        bound = 1.0 / np.sqrt(fan_in)
        w = jax.random.uniform(kw, (cout, cin, 4, 4), jnp.float32, -bound, bound)
        b = jax.random.uniform(kb, (cout,), jnp.float32, -bound, bound)
        params.append((w, b))
    return params


def dis_forward(params, x_nchw, negative_slope=0.2):
    x = jnp.transpose(x_nchw, (0, 2, 3, 1))            # NCHW -> NHWC
    n_layers = len(params)
    for li, (w, b) in enumerate(params):
        is_last = li == n_layers - 1                   # conv5 has no activation
        x = conv4s2p2(x, w, b, neg_slope=negative_slope,
                      apply_act=not is_last,
                      out_dtype=jnp.float32 if is_last else jnp.bfloat16)
    return upsample_chain_gemm(x)                      # NCHW output


if __name__ == "__main__":
    key = jax.random.PRNGKey(0)
    k_in, k_par = jax.random.split(key)

    N, C, H, W = 2, 4, 16, 16
    x = jax.random.normal(k_in, (N, C, H, W), jnp.float32)
    params = init_dis_params(k_par, C)

    fwd = jax.jit(dis_forward)
    out = fwd(params, x)
    jax.block_until_ready(out)

    # sanity: conv spatial chain 16->9->5->3->2->2, then 5x(up2,crop) -> 33
    assert out.shape == (N, 2, 33, 33), out.shape
    print("KERNEL_OK")
</pallas_src>

<mosaic_0001>
module attributes {stable_mosaic.version = 11 : i64} {
  func.func @_gemm_bias_act_single_k_kernel(%arg0: i32, %arg1: i32, %arg2: i32, %arg3: memref<168x64xbf16, #tpu.memory_space<vmem>>, %arg4: memref<64x128xbf16, #tpu.memory_space<vmem>>, %arg5: memref<1x128xf32, #tpu.memory_space<vmem>>, %arg6: memref<168x128xbf16, #tpu.memory_space<vmem>>) attributes {dimension_semantics = [#tpu.dimension_semantics<parallel>, #tpu.dimension_semantics<parallel>, #tpu.dimension_semantics<arbitrary>], iteration_bounds = array<i64: 1, 1, 1>, scalar_prefetch = 0 : i64, scratch_operands = 0 : i64, tpu.core_type = #tpu.core_type<tc>, window_params = [{transform_indices = @transform_0, window_bounds = array<i64: 168, 64>}, {transform_indices = @transform_1, window_bounds = array<i64: 64, 128>}, {transform_indices = @transform_2, window_bounds = array<i64: 1, 128>}, {transform_indices = @transform_3, window_bounds = array<i64: 168, 128>}]} {
    %c0 = arith.constant 0 : index
    %c0_0 = arith.constant 0 : index
    %0 = vector.load %arg3[%c0, %c0_0] : memref<168x64xbf16, #tpu.memory_space<vmem>>, vector<168x64xbf16>
    %c0_1 = arith.constant 0 : index
    %c0_2 = arith.constant 0 : index
    %1 = vector.load %arg4[%c0_1, %c0_2] : memref<64x128xbf16, #tpu.memory_space<vmem>>, vector<64x128xbf16>
    %cst = arith.constant dense<0.000000e+00> : vector<168x128xf32>
    %2 = tpu.matmul %0, %1, %cst {dimension_numbers = #tpu.dot_dimension_numbers<[1], [0], [0], [1], [0, 0, 1, 1], [], []>} : vector<168x64xbf16>, vector<64x128xbf16>, vector<168x128xf32> -> vector<168x128xf32>
    %c0_3 = arith.constant 0 : index
    %c0_4 = arith.constant 0 : index
    %3 = vector.load %arg5[%c0_3, %c0_4] : memref<1x128xf32, #tpu.memory_space<vmem>>, vector<1x128xf32>
    %4 = vector.broadcast %3 : vector<1x128xf32> to vector<168x128xf32>
    %5 = arith.addf %2, %4 : vector<168x128xf32>
    %cst_5 = arith.constant 0.000000e+00 : f32
    %6 = vector.broadcast %cst_5 : f32 to vector<168x128xf32>
    %7 = arith.cmpf oge, %5, %6 : vector<168x128xf32>
    %cst_6 = arith.constant 2.000000e-01 : f32
    %8 = vector.broadcast %cst_6 : f32 to vector<168x128xf32>
    %9 = arith.mulf %5, %8 : vector<168x128xf32>
    %10 = arith.select %7, %5, %9 : vector<168x128xi1>, vector<168x128xf32>
    %11 = arith.truncf %10 : vector<168x128xf32> to vector<168x128xbf16>
    %c0_7 = arith.constant 0 : index
    %c0_8 = arith.constant 0 : index
    %12 = vector.load %arg6[%c0_7, %c0_8] : memref<168x128xbf16, #tpu.memory_space<vmem>>, vector<168x128xbf16>
    tpu.vector_store %arg6[%c0_7, %c0_8], %11 {strides = array<i32>} : memref<168x128xbf16, #tpu.memory_space<vmem>>, vector<168x128xbf16>,
    return
  }
  func.func @transform_0(%arg0: i32, %arg1: i32, %arg2: i32) -> (i32, i32) {
    %c0_i32 = arith.constant 0 : i32
    return %arg0, %arg2 : i32, i32
  }
  func.func @transform_1(%arg0: i32, %arg1: i32, %arg2: i32) -> (i32, i32) {
    %c0_i32 = arith.constant 0 : i32
    return %arg2, %arg1 : i32, i32
  }
  func.func @transform_2(%arg0: i32, %arg1: i32, %arg2: i32) -> (i32, i32) {
    %c0_i32 = arith.constant 0 : i32
    %c0_i32_0 = arith.constant 0 : i32
    return %c0_i32, %arg1 : i32, i32
  }
  func.func @transform_3(%arg0: i32, %arg1: i32, %arg2: i32) -> (i32, i32) {
    %c0_i32 = arith.constant 0 : i32
    return %arg0, %arg1 : i32, i32
  }
}

module attributes {stable_mosaic.version = 11 : i64} {
  func.func @_gemm_bias_act_single_k_kernel(%arg0: i32, %arg1: i32, %arg2: i32, %arg3: memref<56x1024xbf16, #tpu.memory_space<vmem>>, %arg4: memref<1024x128xbf16, #tpu.memory_space<vmem>>, %arg5: memref<1x128xf32, #tpu.memory_space<vmem>>, %arg6: memref<56x128xbf16, #tpu.memory_space<vmem>>) attributes {dimension_semantics = [#tpu.dimension_semantics<parallel>, #tpu.dimension_semantics<parallel>, #tpu.dimension_semantics<arbitrary>], iteration_bounds = array<i64: 1, 1, 1>, scalar_prefetch = 0 : i64, scratch_operands = 0 : i64, tpu.core_type = #tpu.core_type<tc>, window_params = [{transform_indices = @transform_0, window_bounds = array<i64: 56, 1024>}, {transform_indices = @transform_1, window_bounds = array<i64: 1024, 128>}, {transform_indices = @transform_2, window_bounds = array<i64: 1, 128>}, {transform_indices = @transform_3, window_bounds = array<i64: 56, 128>}]} {
    %c0 = arith.constant 0 : index
    %c0_0 = arith.constant 0 : index
    %0 = vector.load %arg3[%c0, %c0_0] : memref<56x1024xbf16, #tpu.memory_space<vmem>>, vector<56x1024xbf16>
    %c0_1 = arith.constant 0 : index
    %c0_2 = arith.constant 0 : index
    %1 = vector.load %arg4[%c0_1, %c0_2] : memref<1024x128xbf16, #tpu.memory_space<vmem>>, vector<1024x128xbf16>
    %cst = arith.constant dense<0.000000e+00> : vector<56x128xf32>
    %2 = tpu.matmul %0, %1, %cst {dimension_numbers = #tpu.dot_dimension_numbers<[1], [0], [0], [1], [0, 0, 1, 1], [], []>} : vector<56x1024xbf16>, vector<1024x128xbf16>, vector<56x128xf32> -> vector<56x128xf32>
    %c0_3 = arith.constant 0 : index
    %c0_4 = arith.constant 0 : index
    %3 = vector.load %arg5[%c0_3, %c0_4] : memref<1x128xf32, #tpu.memory_space<vmem>>, vector<1x128xf32>
    %4 = vector.broadcast %3 : vector<1x128xf32> to vector<56x128xf32>
    %5 = arith.addf %2, %4 : vector<56x128xf32>
    %cst_5 = arith.constant 0.000000e+00 : f32
    %6 = vector.broadcast %cst_5 : f32 to vector<56x128xf32>
    %7 = arith.cmpf oge, %5, %6 : vector<56x128xf32>
    %cst_6 = arith.constant 2.000000e-01 : f32
    %8 = vector.broadcast %cst_6 : f32 to vector<56x128xf32>
    %9 = arith.mulf %5, %8 : vector<56x128xf32>
    %10 = arith.select %7, %5, %9 : vector<56x128xi1>, vector<56x128xf32>
    %11 = arith.truncf %10 : vector<56x128xf32> to vector<56x128xbf16>
    %c0_7 = arith.constant 0 : index
    %c0_8 = arith.constant 0 : index
    %12 = vector.load %arg6[%c0_7, %c0_8] : memref<56x128xbf16, #tpu.memory_space<vmem>>, vector<56x128xbf16>
    tpu.vector_store %arg6[%c0_7, %c0_8], %11 {strides = array<i32>} : memref<56x128xbf16, #tpu.memory_space<vmem>>, vector<56x128xbf16>,
    return
  }
  func.func @transform_0(%arg0: i32, %arg1: i32, %arg2: i32) -> (i32, i32) {
    %c0_i32 = arith.constant 0 : i32
    return %arg0, %arg2 : i32, i32
  }
  func.func @transform_1(%arg0: i32, %arg1: i32, %arg2: i32) -> (i32, i32) {
    %c0_i32 = arith.constant 0 : i32
    return %arg2, %arg1 : i32, i32
  }
  func.func @transform_2(%arg0: i32, %arg1: i32, %arg2: i32) -> (i32, i32) {
    %c0_i32 = arith.constant 0 : i32
    %c0_i32_0 = arith.constant 0 : i32
    return %c0_i32, %arg1 : i32, i32
  }
  func.func @transform_3(%arg0: i32, %arg1: i32, %arg2: i32) -> (i32, i32) {
    %c0_i32 = arith.constant 0 : i32
    return %arg0, %arg1 : i32, i32
  }
}

module attributes {stable_mosaic.version = 11 : i64} {
  func.func @_gemm_bias_act_single_k_kernel(%arg0: i32, %arg1: i32, %arg2: i32, %arg3: memref<24x2048xbf16, #tpu.memory_space<vmem>>, %arg4: memref<2048x256xbf16, #tpu.memory_space<vmem>>, %arg5: memref<1x256xf32, #tpu.memory_space<vmem>>, %arg6: memref<24x256xbf16, #tpu.memory_space<vmem>>) attributes {dimension_semantics = [#tpu.dimension_semantics<parallel>, #tpu.dimension_semantics<parallel>, #tpu.dimension_semantics<arbitrary>], iteration_bounds = array<i64: 1, 1, 1>, scalar_prefetch = 0 : i64, scratch_operands = 0 : i64, tpu.core_type = #tpu.core_type<tc>, window_params = [{transform_indices = @transform_0, window_bounds = array<i64: 24, 2048>}, {transform_indices = @transform_1, window_bounds = array<i64: 2048, 256>}, {transform_indices = @transform_2, window_bounds = array<i64: 1, 256>}, {transform_indices = @transform_3, window_bounds = array<i64: 24, 256>}]} {
    %c0 = arith.constant 0 : index
    %c0_0 = arith.constant 0 : index
    %0 = vector.load %arg3[%c0, %c0_0] : memref<24x2048xbf16, #tpu.memory_space<vmem>>, vector<24x2048xbf16>
    %c0_1 = arith.constant 0 : index
    %c0_2 = arith.constant 0 : index
    %1 = vector.load %arg4[%c0_1, %c0_2] : memref<2048x256xbf16, #tpu.memory_space<vmem>>, vector<2048x256xbf16>
    %cst = arith.constant dense<0.000000e+00> : vector<24x256xf32>
    %2 = tpu.matmul %0, %1, %cst {dimension_numbers = #tpu.dot_dimension_numbers<[1], [0], [0], [1], [0, 0, 1, 1], [], []>} : vector<24x2048xbf16>, vector<2048x256xbf16>, vector<24x256xf32> -> vector<24x256xf32>
    %c0_3 = arith.constant 0 : index
    %c0_4 = arith.constant 0 : index
    %3 = vector.load %arg5[%c0_3, %c0_4] : memref<1x256xf32, #tpu.memory_space<vmem>>, vector<1x256xf32>
    %4 = vector.broadcast %3 : vector<1x256xf32> to vector<24x256xf32>
    %5 = arith.addf %2, %4 : vector<24x256xf32>
    %cst_5 = arith.constant 0.000000e+00 : f32
    %6 = vector.broadcast %cst_5 : f32 to vector<24x256xf32>
    %7 = arith.cmpf oge, %5, %6 : vector<24x256xf32>
    %cst_6 = arith.constant 2.000000e-01 : f32
    %8 = vector.broadcast %cst_6 : f32 to vector<24x256xf32>
    %9 = arith.mulf %5, %8 : vector<24x256xf32>
    %10 = arith.select %7, %5, %9 : vector<24x256xi1>, vector<24x256xf32>
    %11 = arith.truncf %10 : vector<24x256xf32> to vector<24x256xbf16>
    %c0_7 = arith.constant 0 : index
    %c0_8 = arith.constant 0 : index
    %12 = vector.load %arg6[%c0_7, %c0_8] : memref<24x256xbf16, #tpu.memory_space<vmem>>, vector<24x256xbf16>
    tpu.vector_store %arg6[%c0_7, %c0_8], %11 {strides = array<i32>} : memref<24x256xbf16, #tpu.memory_space<vmem>>, vector<24x256xbf16>,
    return
  }
  func.func @transform_0(%arg0: i32, %arg1: i32, %arg2: i32) -> (i32, i32) {
    %c0_i32 = arith.constant 0 : i32
    return %arg0, %arg2 : i32, i32
  }
  func.func @transform_1(%arg0: i32, %arg1: i32, %arg2: i32) -> (i32, i32) {
    %c0_i32 = arith.constant 0 : i32
    return %arg2, %arg1 : i32, i32
  }
  func.func @transform_2(%arg0: i32, %arg1: i32, %arg2: i32) -> (i32, i32) {
    %c0_i32 = arith.constant 0 : i32
    %c0_i32_0 = arith.constant 0 : i32
    return %c0_i32, %arg1 : i32, i32
  }
  func.func @transform_3(%arg0: i32, %arg1: i32, %arg2: i32) -> (i32, i32) {
    %c0_i32 = arith.constant 0 : i32
    return %arg0, %arg1 : i32, i32
  }
}

module attributes {stable_mosaic.version = 11 : i64} {
  func.func @_gemm_bias_act_single_k_kernel(%arg0: i32, %arg1: i32, %arg2: i32, %arg3: memref<8x4096xbf16, #tpu.memory_space<vmem>>, %arg4: memref<4096x256xbf16, #tpu.memory_space<vmem>>, %arg5: memref<1x256xf32, #tpu.memory_space<vmem>>, %arg6: memref<8x256xbf16, #tpu.memory_space<vmem>>) attributes {dimension_semantics = [#tpu.dimension_semantics<parallel>, #tpu.dimension_semantics<parallel>, #tpu.dimension_semantics<arbitrary>], iteration_bounds = array<i64: 1, 2, 1>, scalar_prefetch = 0 : i64, scratch_operands = 0 : i64, tpu.core_type = #tpu.core_type<tc>, window_params = [{transform_indices = @transform_0, window_bounds = array<i64: 8, 4096>}, {transform_indices = @transform_1, window_bounds = array<i64: 4096, 256>}, {transform_indices = @transform_2, window_bounds = array<i64: 1, 256>}, {transform_indices = @transform_3, window_bounds = array<i64: 8, 256>}]} {
    %c0 = arith.constant 0 : index
    %c0_0 = arith.constant 0 : index
    %0 = vector.load %arg3[%c0, %c0_0] : memref<8x4096xbf16, #tpu.memory_space<vmem>>, vector<8x4096xbf16>
    %c0_1 = arith.constant 0 : index
    %c0_2 = arith.constant 0 : index
    %1 = vector.load %arg4[%c0_1, %c0_2] : memref<4096x256xbf16, #tpu.memory_space<vmem>>, vector<4096x256xbf16>
    %cst = arith.constant dense<0.000000e+00> : vector<8x256xf32>
    %2 = tpu.matmul %0, %1, %cst {dimension_numbers = #tpu.dot_dimension_numbers<[1], [0], [0], [1], [0, 0, 1, 1], [], []>} : vector<8x4096xbf16>, vector<4096x256xbf16>, vector<8x256xf32> -> vector<8x256xf32>
    %c0_3 = arith.constant 0 : index
    %c0_4 = arith.constant 0 : index
    %3 = vector.load %arg5[%c0_3, %c0_4] : memref<1x256xf32, #tpu.memory_space<vmem>>, vector<1x256xf32>
    %4 = vector.broadcast %3 : vector<1x256xf32> to vector<8x256xf32>
    %5 = arith.addf %2, %4 : vector<8x256xf32>
    %cst_5 = arith.constant 0.000000e+00 : f32
    %6 = vector.broadcast %cst_5 : f32 to vector<8x256xf32>
    %7 = arith.cmpf oge, %5, %6 : vector<8x256xf32>
    %cst_6 = arith.constant 2.000000e-01 : f32
    %8 = vector.broadcast %cst_6 : f32 to vector<8x256xf32>
    %9 = arith.mulf %5, %8 : vector<8x256xf32>
    %10 = arith.select %7, %5, %9 : vector<8x256xi1>, vector<8x256xf32>
    %11 = arith.truncf %10 : vector<8x256xf32> to vector<8x256xbf16>
    %c0_7 = arith.constant 0 : index
    %c0_8 = arith.constant 0 : index
    %12 = vector.load %arg6[%c0_7, %c0_8] : memref<8x256xbf16, #tpu.memory_space<vmem>>, vector<8x256xbf16>
    tpu.vector_store %arg6[%c0_7, %c0_8], %11 {strides = array<i32>} : memref<8x256xbf16, #tpu.memory_space<vmem>>, vector<8x256xbf16>,
    return
  }
  func.func @transform_0(%arg0: i32, %arg1: i32, %arg2: i32) -> (i32, i32) {
    %c0_i32 = arith.constant 0 : i32
    return %arg0, %arg2 : i32, i32
  }
  func.func @transform_1(%arg0: i32, %arg1: i32, %arg2: i32) -> (i32, i32) {
    %c0_i32 = arith.constant 0 : i32
    return %arg2, %arg1 : i32, i32
  }
  func.func @transform_2(%arg0: i32, %arg1: i32, %arg2: i32) -> (i32, i32) {
    %c0_i32 = arith.constant 0 : i32
    %c0_i32_0 = arith.constant 0 : i32
    return %c0_i32, %arg1 : i32, i32
  }
  func.func @transform_3(%arg0: i32, %arg1: i32, %arg2: i32) -> (i32, i32) {
    %c0_i32 = arith.constant 0 : i32
    return %arg0, %arg1 : i32, i32
  }
}

module attributes {stable_mosaic.version = 11 : i64} {
  func.func @_gemm_bias_act_single_k_kernel(%arg0: i32, %arg1: i32, %arg2: i32, %arg3: memref<8x8192xbf16, #tpu.memory_space<vmem>>, %arg4: memref<8192x128xbf16, #tpu.memory_space<vmem>>, %arg5: memref<1x128xf32, #tpu.memory_space<vmem>>, %arg6: memref<8x128xf32, #tpu.memory_space<vmem>>) attributes {dimension_semantics = [#tpu.dimension_semantics<parallel>, #tpu.dimension_semantics<parallel>, #tpu.dimension_semantics<arbitrary>], iteration_bounds = array<i64: 1, 1, 1>, scalar_prefetch = 0 : i64, scratch_operands = 0 : i64, tpu.core_type = #tpu.core_type<tc>, window_params = [{transform_indices = @transform_0, window_bounds = array<i64: 8, 8192>}, {transform_indices = @transform_1, window_bounds = array<i64: 8192, 128>}, {transform_indices = @transform_2, window_bounds = array<i64: 1, 128>}, {transform_indices = @transform_3, window_bounds = array<i64: 8, 128>}]} {
    %c0 = arith.constant 0 : index
    %c0_0 = arith.constant 0 : index
    %0 = vector.load %arg3[%c0, %c0_0] : memref<8x8192xbf16, #tpu.memory_space<vmem>>, vector<8x8192xbf16>
    %c0_1 = arith.constant 0 : index
    %c0_2 = arith.constant 0 : index
    %1 = vector.load %arg4[%c0_1, %c0_2] : memref<8192x128xbf16, #tpu.memory_space<vmem>>, vector<8192x128xbf16>
    %cst = arith.constant dense<0.000000e+00> : vector<8x128xf32>
    %2 = tpu.matmul %0, %1, %cst {dimension_numbers = #tpu.dot_dimension_numbers<[1], [0], [0], [1], [0, 0, 1, 1], [], []>} : vector<8x8192xbf16>, vector<8192x128xbf16>, vector<8x128xf32> -> vector<8x128xf32>
    %c0_3 = arith.constant 0 : index
    %c0_4 = arith.constant 0 : index
    %3 = vector.load %arg5[%c0_3, %c0_4] : memref<1x128xf32, #tpu.memory_space<vmem>>, vector<1x128xf32>
    %4 = vector.broadcast %3 : vector<1x128xf32> to vector<8x128xf32>
    %5 = arith.addf %2, %4 : vector<8x128xf32>
    %c0_5 = arith.constant 0 : index
    %c0_6 = arith.constant 0 : index
    %6 = vector.load %arg6[%c0_5, %c0_6] : memref<8x128xf32, #tpu.memory_space<vmem>>, vector<8x128xf32>
    tpu.vector_store %arg6[%c0_5, %c0_6], %5 {strides = array<i32>} : memref<8x128xf32, #tpu.memory_space<vmem>>, vector<8x128xf32>,
    return
  }
  func.func @transform_0(%arg0: i32, %arg1: i32, %arg2: i32) -> (i32, i32) {
    %c0_i32 = arith.constant 0 : i32
    return %arg0, %arg2 : i32, i32
  }
  func.func @transform_1(%arg0: i32, %arg1: i32, %arg2: i32) -> (i32, i32) {
    %c0_i32 = arith.constant 0 : i32
    return %arg2, %arg1 : i32, i32
  }
  func.func @transform_2(%arg0: i32, %arg1: i32, %arg2: i32) -> (i32, i32) {
    %c0_i32 = arith.constant 0 : i32
    %c0_i32_0 = arith.constant 0 : i32
    return %c0_i32, %arg1 : i32, i32
  }
  func.func @transform_3(%arg0: i32, %arg1: i32, %arg2: i32) -> (i32, i32) {
    %c0_i32 = arith.constant 0 : i32
    return %arg0, %arg1 : i32, i32
  }
}

module attributes {stable_mosaic.version = 11 : i64} {
  func.func @_gemm_bias_act_single_k_kernel(%arg0: i32, %arg1: i32, %arg2: i32, %arg3: memref<8x4xf32, #tpu.memory_space<vmem>>, %arg4: memref<4x128xf32, #tpu.memory_space<vmem>>, %arg5: memref<1x128xf32, #tpu.memory_space<vmem>>, %arg6: memref<8x128xf32, #tpu.memory_space<vmem>>) attributes {dimension_semantics = [#tpu.dimension_semantics<parallel>, #tpu.dimension_semantics<parallel>, #tpu.dimension_semantics<arbitrary>], iteration_bounds = array<i64: 1, 9, 1>, scalar_prefetch = 0 : i64, scratch_operands = 0 : i64, tpu.core_type = #tpu.core_type<tc>, window_params = [{transform_indices = @transform_0, window_bounds = array<i64: 8, 4>}, {transform_indices = @transform_1, window_bounds = array<i64: 4, 128>}, {transform_indices = @transform_2, window_bounds = array<i64: 1, 128>}, {transform_indices = @transform_3, window_bounds = array<i64: 8, 128>}]} {
    %c0 = arith.constant 0 : index
    %c0_0 = arith.constant 0 : index
    %0 = vector.load %arg3[%c0, %c0_0] : memref<8x4xf32, #tpu.memory_space<vmem>>, vector<8x4xf32>
    %c0_1 = arith.constant 0 : index
    %c0_2 = arith.constant 0 : index
    %1 = vector.load %arg4[%c0_1, %c0_2] : memref<4x128xf32, #tpu.memory_space<vmem>>, vector<4x128xf32>
    %cst = arith.constant dense<0.000000e+00> : vector<8x128xf32>
    %2 = tpu.matmul %0, %1, %cst {dimension_numbers = #tpu.dot_dimension_numbers<[1], [0], [0], [1], [0, 0, 1, 1], [], []>} : vector<8x4xf32>, vector<4x128xf32>, vector<8x128xf32> -> vector<8x128xf32>
    %c0_3 = arith.constant 0 : index
    %c0_4 = arith.constant 0 : index
    %3 = vector.load %arg5[%c0_3, %c0_4] : memref<1x128xf32, #tpu.memory_space<vmem>>, vector<1x128xf32>
    %4 = vector.broadcast %3 : vector<1x128xf32> to vector<8x128xf32>
    %5 = arith.addf %2, %4 : vector<8x128xf32>
    %c0_5 = arith.constant 0 : index
    %c0_6 = arith.constant 0 : index
    %6 = vector.load %arg6[%c0_5, %c0_6] : memref<8x128xf32, #tpu.memory_space<vmem>>, vector<8x128xf32>
    tpu.vector_store %arg6[%c0_5, %c0_6], %5 {strides = array<i32>} : memref<8x128xf32, #tpu.memory_space<vmem>>, vector<8x128xf32>,
    return
  }
  func.func @transform_0(%arg0: i32, %arg1: i32, %arg2: i32) -> (i32, i32) {
    %c0_i32 = arith.constant 0 : i32
    return %arg0, %arg2 : i32, i32
  }
  func.func @transform_1(%arg0: i32, %arg1: i32, %arg2: i32) -> (i32, i32) {
    %c0_i32 = arith.constant 0 : i32
    return %arg2, %arg1 : i32, i32
  }
  func.func @transform_2(%arg0: i32, %arg1: i32, %arg2: i32) -> (i32, i32) {
    %c0_i32 = arith.constant 0 : i32
    %c0_i32_0 = arith.constant 0 : i32
    return %c0_i32, %arg1 : i32, i32
  }
  func.func @transform_3(%arg0: i32, %arg1: i32, %arg2: i32) -> (i32, i32) {
    %c0_i32 = arith.constant 0 : i32
    return %arg0, %arg1 : i32, i32
  }
}

</mosaic_0001>

<bundles_post_ra>
// kernel: dis_forward.6
= control target key start
LH: loop header
LB: loop body
LE: loop exit
PB: predicated region body
PF: predicated region fallthrough
CT: control target
= control target key end

     0   :  { %v675_v0 = vmov 0.0   ;;  %vm676_vm0 = vmmov 0   ;;  %vm128_vm1 = vcmask 523264   ;;  %s823_s1 = inlined_call_operand.vmem [shape: bf16[64,128], index: 1, kind: input, shape index: {}]   ;;  %s824_s0 = inlined_call_operand.vmem [shape: bf16[168,64], index: 0, kind: input, shape index: {}]   ;;  %s825_s2 = inlined_call_operand.vmem [shape: f32[1,128], index: 2, kind: input, shape index: {}]   ;;  %s826_s3 = inlined_call_operand.vmem [shape: bf16[168,128], index: 3, kind: output, shape index: {}]  }
   0x1   :  { %598 = vmatprep.subr.bf16.mxu0 %v675_v0  ;;  %v660_v1 = vld [vmem:[%s823_s1] sm:$0xff]   ;;  %650 = vmatprep.subr.bf16.mxu1 %v675_v0  ;;  %v661_v2 = vld [vmem:[%s823_s1 + $0x8] sm:$0xff]   ;;  %v662_v3 = vld [vmem:[%s823_s1 + $0x10] sm:$0xff]  }
   0x2   :  { %606 = vmatprep.mubr.msk.bf16.mxu0 %vm676_vm0, %v675_v0  ;;  %630 = vmatprep.mubr.msk.bf16.mxu1 %vm676_vm0, %v675_v0  ;;  %v663_v4 = vld [vmem:[%s823_s1 + $0x18] sm:$0xff]   ;;  %v664_v5 = vld [vmem:[%s824_s0] sm:$0xff]   ;;  %v665_v6 = vld [vmem:[%s824_s0 + $0x30] sm:$0xff]  }
   0x3   :  { %599 = vmatpush3.bf16.msra.mxu0 %v660_v1  ;;  %654 = vmatpush3.bf16.msra.mxu1 %v660_v1  ;;  %v666_v7 = vld [vmem:[%s824_s0 + $0x8] sm:$0xff]   ;;  %v667_v8 = vld [vmem:[%s824_s0 + $0x38] sm:$0xff]   ;;  %v668_v9 = vld [vmem:[%s824_s0 + $0x10] sm:$0xff]  }
   0x4   :  { %600 = vmatprep.subr.bf16.mxu0 %v675_v0  ;;  %651 = vmatprep.subr.bf16.mxu1 %v675_v0  ;;  %v669_v10 = vld [vmem:[%s824_s0 + $0x40] sm:$0xff]   ;;  %v670_v11 = vld [vmem:[%s824_s0 + $0x18] sm:$0xff]   ;;  %v671_v12 = vld [vmem:[%s824_s0 + $0x48] sm:$0xff]  }
   0x5   :  { %v672_v13 = vld [vmem:[%s824_s0 + $0x20] sm:$0xff]   ;;  %v673_v14 = vld [vmem:[%s824_s0 + $0x50] ss:$0 sps:$4 sm:$0xff]   ;;  %v674_v15 = vld [vmem:[%s824_s0 + $0x28] sm:$0xff]  }
   0x6   :  { %v767_v16 = vld [vmem:[%s825_s2] ss:$0 sm:$0xff] }
   0x7   :  { %601 = vmatpush3.bf16.msra.mxu0 %v661_v2  ;;  %655 = vmatpush3.bf16.msra.mxu1 %v661_v2 }
   0x8   :  { %602 = vmatprep.subr.bf16.mxu0 %v675_v0  ;;  %652 = vmatprep.subr.bf16.mxu1 %v675_v0 }
   0xb   :  { %603 = vmatpush3.bf16.msra.mxu0 %v662_v3  ;;  %656 = vmatpush3.bf16.msra.mxu1 %v662_v3 }
   0xc   :  { %604 = vmatprep.subr.bf16.mxu0 %v675_v0  ;;  %653 = vmatprep.subr.bf16.mxu1 %v675_v0 }
   0xf   :  { %605 = vmatpush3.bf16.msra.mxu0 %v663_v4  ;;  %657 = vmatpush3.bf16.msra.mxu1 %v663_v4 }
  0x12   :  { %607 = vmatmul.mubr.msk.bf16.vlgmr.msra.gmra.mrb[0].mxu0 %vm128_vm1, %v664_v5  ;;  %631 = vmatmul.mubr.msk.bf16.vlgmr.msra.gmra.mrb[0].mxu1 %vm128_vm1, %v665_v6 }
  0x13   :  { %610 = vmatprep.mubr.msk.bf16.mxu0 %vm676_vm0, %v675_v0  ;;  %634 = vmatprep.mubr.msk.bf16.mxu1 %vm676_vm0, %v675_v0 }
  0x1a   :  { %611 = vmatmul.mubr.msk.bf16.gmra.mrb[4].mxu0 %vm128_vm1, %v666_v7  ;;  %635 = vmatmul.mubr.msk.bf16.gmra.mrb[4].mxu1 %vm128_vm1, %v667_v8 }
  0x1b   :  { %614 = vmatprep.mubr.msk.bf16.mxu0 %vm676_vm0, %v675_v0  ;;  %638 = vmatprep.mubr.msk.bf16.mxu1 %vm676_vm0, %v675_v0 }
  0x22   :  { %615 = vmatmul.mubr.msk.bf16.gmra.mrb[8].mxu0 %vm128_vm1, %v668_v9  ;;  %639 = vmatmul.mubr.msk.bf16.gmra.mrb[8].mxu1 %vm128_vm1, %v669_v10 }
  0x23   :  { %618 = vmatprep.mubr.msk.bf16.mxu0 %vm676_vm0, %v675_v0  ;;  %642 = vmatprep.mubr.msk.bf16.mxu1 %vm676_vm0, %v675_v0 }
  0x2a   :  { %619 = vmatmul.mubr.msk.bf16.gmra.mrb[12].mxu0 %vm128_vm1, %v670_v11  ;;  %643 = vmatmul.mubr.msk.bf16.gmra.mrb[12].mxu1 %vm128_vm1, %v671_v12 }
  0x2b   :  { %622 = vmatprep.mubr.msk.bf16.mxu0 %vm676_vm0, %v675_v0  ;;  %646 = vmatprep.mubr.msk.bf16.mxu1 %vm676_vm0, %v675_v0 }
  0x32   :  { %623 = vmatmul.mubr.msk.bf16.gmra.mrb[16].mxu0 %vm128_vm1, %v672_v13  ;;  %647 = vmatmul.mubr.msk.bf16.gmra.mrb[16].mxu1 %vm128_vm1, %v673_v14 }
  0x33   :  { %626 = vmatprep.mubr.msk.bf16.mxu0 %vm676_vm0, %v675_v0 }
  0x3a   :  { %627 = vmatmul.mubr.msk.bf16.gmra.mrb[20].mxu0 %vm128_vm1, %v674_v15 }
  0xe5   :  { %v196_v17 = vpop.f32.mrb[0].mxu0  ;;  %v244_v18 = vpop.f32.mrb[0].mxu1 }
  0xe6   :  { %v197_v19 = vadd.f32 %v767_v16, %v196_v17  ;;  %v608_v20 = vpop.f32.mrb[1].mxu0  ;;  %v245_v21 = vadd.f32 %v767_v16, %v244_v18  ;;  %v632_v22 = vpop.f32.mrb[1].mxu1 }
  0xe7   :  { %v199_v23 = vpop.f32.mrb[2].mxu0  ;;  %v247_v24 = vpop.f32.mrb[2].mxu1 }
  0xe8   :  { %v303_v25 = vmul.f32 0.2, %v197_v19  ;;  %v200_v26 = vadd.f32 %v767_v16, %v199_v23  ;;  %v609_v27 = vpop.f32.mrb[3].mxu0  ;;  %vm294_vm2 = vcmp.ge.f32.partialorder %v245_v21, 0.0  ;;  %v633_v28 = vpop.f32.mrb[3].mxu1  ;;  %vm282_vm3 = vcmp.ge.f32.partialorder %v197_v19, 0.0 }
  0xe9   :  { %v315_v29 = vmul.f32 0.2, %v245_v21  ;;  %v248_v30 = vadd.f32 %v767_v16, %v247_v24 }
  0xea   :  { %vm283_vm4 = vcmp.ge.f32.partialorder %v200_v26, 0.0  ;;  %v304_v31 = vmul.f32 0.2, %v200_v26  ;;  %v324_v34 = vsel %vm282_vm3, %v197_v19, %v303_v25 }
  0xeb   :  { %v336_v32 = vsel %vm294_vm2, %v245_v21, %v315_v29  ;;  %vm295_vm5 = vcmp.ge.f32.partialorder %v248_v30, 0.0  ;;  %v316_v33 = vmul.f32 0.2, %v248_v30 }
  0xec   :  { %v325_v35 = vsel %vm283_vm4, %v200_v26, %v304_v31 }
  0xed   :  { %v527_v36 = vpack.c.bf16 %v325_v35, %v324_v34  ;;  %v204_v37 = vpop.f32.mrb[4].mxu0  ;;  %v337_v38 = vsel %vm295_vm5, %v248_v30, %v316_v33  ;;  %v252_v39 = vpop.f32.mrb[4].mxu1 }
  0xee   :  { %v205_v40 = vadd.f32 %v767_v16, %v204_v37  ;;  %v557_v41 = vpack.c.bf16 %v337_v38, %v336_v32  ;;  %v612_v42 = vpop.f32.mrb[5].mxu0  ;;  %v253_v43 = vadd.f32 %v767_v16, %v252_v39  ;;  %v636_v44 = vpop.f32.mrb[5].mxu1 }
  0xef   :  { %528 = vst [vmem:[%s826_s3] sm:$0xff] %v527_v36   ;;  %v207_v45 = vpop.f32.mrb[6].mxu0  ;;  %v255_v46 = vpop.f32.mrb[6].mxu1 }
  0xf0   :  { %v305_v47 = vmul.f32 0.2, %v205_v40  ;;  %579 = vst [vmem:[%s826_s3 + $0x30] sm:$0xff] %v557_v41   ;;  %v208_v48 = vadd.f32 %v767_v16, %v207_v45  ;;  %v613_v49 = vpop.f32.mrb[7].mxu0  ;;  %vm296_vm6 = vcmp.ge.f32.partialorder %v253_v43, 0.0  ;;  %v637_v50 = vpop.f32.mrb[7].mxu1  ;;  %v256_v52 = vadd.f32 %v767_v16, %v255_v46 }
  0xf1   :  { %vm284_vm7 = vcmp.ge.f32.partialorder %v205_v40, 0.0  ;;  %v317_v51 = vmul.f32 0.2, %v253_v43 }
  0xf2   :  { %vm285_vm8 = vcmp.ge.f32.partialorder %v208_v48, 0.0  ;;  %v306_v53 = vmul.f32 0.2, %v208_v48  ;;  %vm297_vm9 = vcmp.ge.f32.partialorder %v256_v52, 0.0  ;;  %v318_v55 = vmul.f32 0.2, %v256_v52 }
  0xf3   :  { %v338_v54 = vsel %vm296_vm6, %v253_v43, %v317_v51  ;;  %v326_v56 = vsel %vm284_vm7, %v205_v40, %v305_v47 }
  0xf4   :  { %v327_v57 = vsel %vm285_vm8, %v208_v48, %v306_v53  ;;  %v339_v60 = vsel %vm297_vm9, %v256_v52, %v318_v55 }
  0xf5   :  { %v532_v58 = vpack.c.bf16 %v327_v57, %v326_v56  ;;  %v212_v59 = vpop.f32.mrb[8].mxu0  ;;  %v260_v61 = vpop.f32.mrb[8].mxu1  ;;  %v562_v63 = vpack.c.bf16 %v339_v60, %v338_v54 }
  0xf6   :  { %v213_v62 = vadd.f32 %v767_v16, %v212_v59  ;;  %v616_v0 = vpop.f32.mrb[9].mxu0  ;;  %v261_v1 = vadd.f32 %v767_v16, %v260_v61  ;;  %v640_v2 = vpop.f32.mrb[9].mxu1 }
  0xf7   :  { %574 = vst [vmem:[%s826_s3 + $0x8] sm:$0xff] %v532_v58   ;;  %v215_v3 = vpop.f32.mrb[10].mxu0  ;;  %v263_v4 = vpop.f32.mrb[10].mxu1  ;;  %580 = vst [vmem:[%s826_s3 + $0x38] sm:$0xff] %v562_v63  }
  0xf8   :  { %v307_v5 = vmul.f32 0.2, %v213_v62  ;;  %v216_v6 = vadd.f32 %v767_v16, %v215_v3  ;;  %v617_v7 = vpop.f32.mrb[11].mxu0  ;;  %vm298_vm10 = vcmp.ge.f32.partialorder %v261_v1, 0.0  ;;  %v641_v8 = vpop.f32.mrb[11].mxu1  ;;  %vm286_vm11 = vcmp.ge.f32.partialorder %v213_v62, 0.0 }
  0xf9   :  { %v319_v9 = vmul.f32 0.2, %v261_v1  ;;  %v264_v10 = vadd.f32 %v767_v16, %v263_v4 }
  0xfa   :  { %vm287_vm12 = vcmp.ge.f32.partialorder %v216_v6, 0.0  ;;  %v308_v11 = vmul.f32 0.2, %v216_v6  ;;  %v328_v14 = vsel %vm286_vm11, %v213_v62, %v307_v5 }
  0xfb   :  { %v340_v12 = vsel %vm298_vm10, %v261_v1, %v319_v9  ;;  %vm299_vm13 = vcmp.ge.f32.partialorder %v264_v10, 0.0  ;;  %v320_v13 = vmul.f32 0.2, %v264_v10 }
  0xfc   :  { %v329_v15 = vsel %vm287_vm12, %v216_v6, %v308_v11 }
  0xfd   :  { %v537_v17 = vpack.c.bf16 %v329_v15, %v328_v14  ;;  %v220_v18 = vpop.f32.mrb[12].mxu0  ;;  %v341_v19 = vsel %vm299_vm13, %v264_v10, %v320_v13  ;;  %v268_v20 = vpop.f32.mrb[12].mxu1 }
  0xfe   :  { %v221_v21 = vadd.f32 %v767_v16, %v220_v18  ;;  %v567_v22 = vpack.c.bf16 %v341_v19, %v340_v12  ;;  %v620_v23 = vpop.f32.mrb[13].mxu0  ;;  %v269_v24 = vadd.f32 %v767_v16, %v268_v20  ;;  %v644_v25 = vpop.f32.mrb[13].mxu1 }
  0xff   :  { %575 = vst [vmem:[%s826_s3 + $0x10] sm:$0xff] %v537_v17   ;;  %v223_v26 = vpop.f32.mrb[14].mxu0  ;;  %v271_v27 = vpop.f32.mrb[14].mxu1 }
 0x100   :  { %v309_v28 = vmul.f32 0.2, %v221_v21  ;;  %581 = vst [vmem:[%s826_s3 + $0x40] sm:$0xff] %v567_v22   ;;  %v224_v29 = vadd.f32 %v767_v16, %v223_v26  ;;  %v621_v30 = vpop.f32.mrb[15].mxu0  ;;  %vm300_vm14 = vcmp.ge.f32.partialorder %v269_v24, 0.0  ;;  %v645_v31 = vpop.f32.mrb[15].mxu1  ;;  %v272_v33 = vadd.f32 %v767_v16, %v271_v27 }
 0x101   :  { %vm288_vm15 = vcmp.ge.f32.partialorder %v221_v21, 0.0  ;;  %v321_v32 = vmul.f32 0.2, %v269_v24 }
 0x102   :  { %vm289_vm0 = vcmp.ge.f32.partialorder %v224_v29, 0.0  ;;  %v310_v34 = vmul.f32 0.2, %v224_v29  ;;  %vm301_vm1 = vcmp.ge.f32.partialorder %v272_v33, 0.0  ;;  %v322_v36 = vmul.f32 0.2, %v272_v33 }
 0x103   :  { %v342_v35 = vsel %vm300_vm14, %v269_v24, %v321_v32  ;;  %v330_v37 = vsel %vm288_vm15, %v221_v21, %v309_v28 }
 0x104   :  { %v331_v38 = vsel %vm289_vm0, %v224_v29, %v310_v34  ;;  %v343_v41 = vsel %vm301_vm1, %v272_v33, %v322_v36 }
 0x105   :  { %v542_v39 = vpack.c.bf16 %v331_v38, %v330_v37  ;;  %v228_v40 = vpop.f32.mrb[16].mxu0  ;;  %v276_v42 = vpop.f32.mrb[16].mxu1  ;;  %v572_v44 = vpack.c.bf16 %v343_v41, %v342_v35 }
 0x106   :  { %v229_v43 = vadd.f32 %v767_v16, %v228_v40  ;;  %v624_v45 = vpop.f32.mrb[17].mxu0  ;;  %v277_v46 = vadd.f32 %v767_v16, %v276_v42  ;;  %v648_v47 = vpop.f32.mrb[17].mxu1 }
 0x107   :  { %576 = vst [vmem:[%s826_s3 + $0x18] sm:$0xff] %v542_v39   ;;  %v231_v48 = vpop.f32.mrb[18].mxu0  ;;  %v279_v49 = vpop.f32.mrb[18].mxu1  ;;  %582 = vst [vmem:[%s826_s3 + $0x48] sm:$0xff] %v572_v44  }
 0x108   :  { %v311_v50 = vmul.f32 0.2, %v229_v43  ;;  %v232_v51 = vadd.f32 %v767_v16, %v231_v48  ;;  %v625_v52 = vpop.f32.mrb[19].mxu0  ;;  %vm302_vm2 = vcmp.ge.f32.partialorder %v277_v46, 0.0  ;;  %v649_v53 = vpop.f32.mrb[19].mxu1  ;;  %vm290_vm3 = vcmp.ge.f32.partialorder %v229_v43, 0.0 }
 0x109   :  { %v323_v54 = vmul.f32 0.2, %v277_v46 }
 0x10a   :  { %vm291_vm4 = vcmp.ge.f32.partialorder %v232_v51, 0.0  ;;  %v312_v55 = vmul.f32 0.2, %v232_v51  ;;  %v332_v57 = vsel %vm290_vm3, %v229_v43, %v311_v50 }
 0x10b   :  { %v344_v56 = vsel %vm302_vm2, %v277_v46, %v323_v54 }
 0x10c   :  { %v333_v58 = vsel %vm291_vm4, %v232_v51, %v312_v55  ;;  %v523_v59 = vpack.c.bf16 %v344_v56, %v344_v56 }
 0x10d   :  { %v547_v60 = vpack.c.bf16 %v333_v58, %v332_v57  ;;  %v236_v61 = vpop.f32.mrb[20].mxu0 }
 0x10e   :  { %450 = vst [vmem:[%s826_s3 + $0x50] sm:$0xf] %v523_v59  ;;  %v237_v62 = vadd.f32 %v767_v16, %v236_v61  ;;  %v628_v63 = vpop.f32.mrb[21].mxu0 }
 0x10f   :  { %577 = vst [vmem:[%s826_s3 + $0x20] sm:$0xff] %v547_v60   ;;  %v239_v0 = vpop.f32.mrb[22].mxu0 }
 0x110   :  { %v313_v1 = vmul.f32 0.2, %v237_v62  ;;  %v240_v2 = vadd.f32 %v767_v16, %v239_v0  ;;  %v629_v3 = vpop.f32.mrb[23].mxu0  ;;  %vm292_vm5 = vcmp.ge.f32.partialorder %v237_v62, 0.0 }
 0x112   :  { %vm293_vm6 = vcmp.ge.f32.partialorder %v240_v2, 0.0  ;;  %v314_v4 = vmul.f32 0.2, %v240_v2  ;;  %v334_v5 = vsel %vm292_vm5, %v237_v62, %v313_v1 }
 0x114   :  { %v335_v6 = vsel %vm293_vm6, %v240_v2, %v314_v4 }
 0x115   :  { %v552_v7 = vpack.c.bf16 %v335_v6, %v334_v5 }
 0x117   :  { %578 = vst [vmem:[%s826_s3 + $0x28] sm:$0xff] %v552_v7  }

// kernel: dis_forward.7
= control target key start
LH: loop header
LB: loop body
LE: loop exit
PB: predicated region body
PF: predicated region fallthrough
CT: control target
= control target key end

     0   :  { %s1713_s1 = inlined_call_operand.vmem [shape: bf16[1024,128], index: 1, kind: input, shape index: {}]   ;;  %s1714_s0 = inlined_call_operand.vmem [shape: bf16[56,1024], index: 0, kind: input, shape index: {}]   ;;  %s1715_s2 = inlined_call_operand.vmem [shape: f32[1,128], index: 2, kind: input, shape index: {}]   ;;  %s1716_s3 = inlined_call_operand.vmem [shape: bf16[56,128], index: 3, kind: output, shape index: {}]  }
   0x1   :  { %v1315_v0 = vld [vmem:[%s1713_s1 + $0x40] sm:$0xff]   ;;  %v1319_v4 = vld [vmem:[%s1713_s1 + $0x48] sm:$0xff]   ;;  %v1323_v8 = vld [vmem:[%s1713_s1 + $0x50] sm:$0xff]  }
   0x2   :  { %v1316_v1 = vld [vmem:[%s1713_s1 + $0xc0] sm:$0xff]   ;;  %1155 = vmatprep.subr.bf16.mxu0 %v1315_v0  ;;  %v1320_v5 = vld [vmem:[%s1713_s1 + $0xc8] sm:$0xff]   ;;  %v1324_v9 = vld [vmem:[%s1713_s1 + $0xd0] sm:$0xff]  }
   0x3   :  { %v1317_v2 = vld [vmem:[%s1713_s1] sm:$0xff]   ;;  %1195 = vmatprep.subr.bf16.mxu1 %v1316_v1  ;;  %v1321_v6 = vld [vmem:[%s1713_s1 + $0x8] sm:$0xff]   ;;  %v1325_v10 = vld [vmem:[%s1713_s1 + $0x10] sm:$0xff]  }
   0x4   :  { %v1318_v3 = vld [vmem:[%s1713_s1 + $0x80] sm:$0xff]   ;;  %1156 = vmatpush3.bf16.msra.mxu0 %v1317_v2  ;;  %v1322_v7 = vld [vmem:[%s1713_s1 + $0x88] sm:$0xff]   ;;  %v1326_v11 = vld [vmem:[%s1713_s1 + $0x90] sm:$0xff]  }
   0x5   :  { %1196 = vmatpush3.bf16.msra.mxu1 %v1318_v3  ;;  %1157 = vmatprep.subr.bf16.mxu0 %v1319_v4  ;;  %v1327_v12 = vld [vmem:[%s1713_s1 + $0x58] sm:$0xff]   ;;  %v1331_v16 = vld [vmem:[%s1713_s1 + $0x60] sm:$0xff]   ;;  %v1335_v20 = vld [vmem:[%s1713_s1 + $0x68] sm:$0xff]  }
   0x6   :  { %1197 = vmatprep.subr.bf16.mxu1 %v1320_v5  ;;  %v1328_v13 = vld [vmem:[%s1713_s1 + $0xd8] sm:$0xff]   ;;  %v1332_v17 = vld [vmem:[%s1713_s1 + $0xe0] sm:$0xff]   ;;  %v1336_v21 = vld [vmem:[%s1713_s1 + $0xe8] sm:$0xff]  }
   0x7   :  { %v1329_v14 = vld [vmem:[%s1713_s1 + $0x18] sm:$0xff]   ;;  %v1333_v18 = vld [vmem:[%s1713_s1 + $0x20] sm:$0xff]   ;;  %v1337_v22 = vld [vmem:[%s1713_s1 + $0x28] sm:$0xff]  }
   0x8   :  { %1158 = vmatpush3.bf16.msra.mxu0 %v1321_v6  ;;  %v1330_v15 = vld [vmem:[%s1713_s1 + $0x98] sm:$0xff]   ;;  %v1334_v19 = vld [vmem:[%s1713_s1 + $0xa0] sm:$0xff]   ;;  %v1338_v23 = vld [vmem:[%s1713_s1 + $0xa8] sm:$0xff]  }
   0x9   :  { %1198 = vmatpush3.bf16.msra.mxu1 %v1322_v7  ;;  %1159 = vmatprep.subr.bf16.mxu0 %v1323_v8  ;;  %v1339_v24 = vld [vmem:[%s1713_s1 + $0x70] sm:$0xff]   ;;  %v1343_v28 = vld [vmem:[%s1713_s1 + $0x78] sm:$0xff]   ;;  %v15_v32 = vld [vmem:[%s1714_s0] sm:$0xff] }
   0xa   :  { %1199 = vmatprep.subr.bf16.mxu1 %v1324_v9  ;;  %v1340_v25 = vld [vmem:[%s1713_s1 + $0xf0] sm:$0xff]   ;;  %v1344_v29 = vld [vmem:[%s1713_s1 + $0xf8] sm:$0xff]   ;;  %v19_v33 = vld [vmem:[%s1714_s0 + $0x20] sm:$0xff] }
   0xb   :  { %v1341_v26 = vld [vmem:[%s1713_s1 + $0x30] sm:$0xff]   ;;  %v1345_v30 = vld [vmem:[%s1713_s1 + $0x38] sm:$0xff]   ;;  %v16_v34 = vld [vmem:[%s1714_s0 + $0x8] sm:$0xff]  ;;  %v1028_v35 = vcombine.low %v15_v32, %v19_v33  ;;  %v1029_v36 = vcombine.high %v15_v32, %v19_v33 }
   0xc   :  { %1160 = vmatpush3.bf16.msra.mxu0 %v1325_v10  ;;  %v1342_v27 = vld [vmem:[%s1713_s1 + $0xb0] sm:$0xff]   ;;  %v1346_v31 = vld [vmem:[%s1713_s1 + $0xb8] sm:$0xff]   ;;  %v20_v37 = vld [vmem:[%s1714_s0 + $0x28] sm:$0xff] }
   0xd   :  { %1200 = vmatpush3.bf16.msra.mxu1 %v1326_v11  ;;  %1161 = vmatprep.subr.bf16.mxu0 %v1327_v12  ;;  %v1030_v38 = vcombine.low %v16_v34, %v20_v37  ;;  %v1031_v39 = vcombine.high %v16_v34, %v20_v37  ;;  %v1347_v40 = vld [vmem:[%s1713_s1 + $0x140] sm:$0xff]   ;;  %v1351_v44 = vld [vmem:[%s1713_s1 + $0x148] sm:$0xff]   ;;  %v1355_v56 = vld [vmem:[%s1713_s1 + $0x150] sm:$0xff]  }
   0xe   :  { %1201 = vmatprep.subr.bf16.mxu1 %v1328_v13  ;;  %742 = vmatprep.mubr.bf16.mxu0 %v1029_v36  ;;  %v1348_v41 = vld [vmem:[%s1713_s1 + $0x1c0] sm:$0xff]   ;;  %v1352_v45 = vld [vmem:[%s1713_s1 + $0x1c8] sm:$0xff]   ;;  %v1356_v57 = vld [vmem:[%s1713_s1 + $0x1d0] sm:$0xff]  }
   0xf   :  { %806 = vmatprep.mubr.bf16.mxu1 %v1031_v39  ;;  %v1349_v42 = vld [vmem:[%s1713_s1 + $0x100] sm:$0xff]   ;;  %v1353_v46 = vld [vmem:[%s1713_s1 + $0x108] sm:$0xff]   ;;  %v1357_v58 = vld [vmem:[%s1713_s1 + $0x110] sm:$0xff]  }
  0x10   :  { %1162 = vmatpush3.bf16.msra.mxu0 %v1329_v14  ;;  %v1350_v43 = vld [vmem:[%s1713_s1 + $0x180] sm:$0xff]   ;;  %v1354_v47 = vld [vmem:[%s1713_s1 + $0x188] sm:$0xff]   ;;  %v1358_v59 = vld [vmem:[%s1713_s1 + $0x190] sm:$0xff]  }
  0x11   :  { %1202 = vmatpush3.bf16.msra.mxu1 %v1330_v15  ;;  %1163 = vmatprep.subr.bf16.mxu0 %v1331_v16  ;;  %v23_v48 = vld [vmem:[%s1714_s0 + $0x40] sm:$0xff]  ;;  %v24_v51 = vld [vmem:[%s1714_s0 + $0x48] sm:$0xff]  ;;  %v1359_v60 = vld [vmem:[%s1713_s1 + $0x158] sm:$0xff]  }
  0x12   :  { %1203 = vmatprep.subr.bf16.mxu1 %v1332_v17  ;;  %v27_v49 = vld [vmem:[%s1714_s0 + $0x60] sm:$0xff]  ;;  %v28_v52 = vld [vmem:[%s1714_s0 + $0x68] sm:$0xff]  ;;  %v1360_v61 = vld [vmem:[%s1713_s1 + $0x1d8] sm:$0xff]  }
  0x13   :  { %v1037_v50 = vcombine.high %v23_v48, %v27_v49  ;;  %v1036_v53 = vcombine.low %v23_v48, %v27_v49  ;;  %v1039_v54 = vcombine.high %v24_v51, %v28_v52  ;;  %v1038_v55 = vcombine.low %v24_v51, %v28_v52  ;;  %v1361_v62 = vld [vmem:[%s1713_s1 + $0x118] sm:$0xff]   ;;  %v31_v0 = vld [vmem:[%s1714_s0 + $0x80] sm:$0xff]  ;;  %v32_v2 = vld [vmem:[%s1714_s0 + $0x88] sm:$0xff] }
  0x14   :  { %1164 = vmatpush3.bf16.msra.mxu0 %v1333_v18  ;;  %v1362_v63 = vld [vmem:[%s1713_s1 + $0x198] sm:$0xff]   ;;  %v35_v1 = vld [vmem:[%s1714_s0 + $0xa0] sm:$0xff]  ;;  %v36_v3 = vld [vmem:[%s1714_s0 + $0xa8] sm:$0xff] }
  0x15   :  { %1204 = vmatpush3.bf16.msra.mxu1 %v1334_v19  ;;  %1165 = vmatprep.subr.bf16.mxu0 %v1335_v20  ;;  %v1045_v4 = vcombine.high %v31_v0, %v35_v1  ;;  %v1047_v5 = vcombine.high %v32_v2, %v36_v3  ;;  %v1044_v6 = vcombine.low %v31_v0, %v35_v1  ;;  %v1363_v8 = vld [vmem:[%s1713_s1 + $0x160] sm:$0xff]   ;;  %v1367_v12 = vld [vmem:[%s1713_s1 + $0x168] sm:$0xff]   ;;  %v18_v32 = vld [vmem:[%s1714_s0 + $0x18] sm:$0xff] }
  0x16   :  { %1205 = vmatprep.subr.bf16.mxu1 %v1336_v21  ;;  %v1046_v7 = vcombine.low %v32_v2, %v36_v3  ;;  %v1364_v9 = vld [vmem:[%s1713_s1 + $0x1e0] sm:$0xff]   ;;  %v1368_v13 = vld [vmem:[%s1713_s1 + $0x1e8] sm:$0xff]   ;;  %v1375_v21 = vld [vmem:[%s1713_s1 + $0x170] sm:$0xff]  }
  0x17   :  { %v1365_v10 = vld [vmem:[%s1713_s1 + $0x120] sm:$0xff]   ;;  %v1369_v14 = vld [vmem:[%s1713_s1 + $0x128] sm:$0xff]   ;;  %v22_v33 = vld [vmem:[%s1714_s0 + $0x38] sm:$0xff] }
  0x18   :  { %1166 = vmatpush3.bf16.msra.mxu0 %v1337_v22  ;;  %v1366_v11 = vld [vmem:[%s1713_s1 + $0x1a0] sm:$0xff]   ;;  %v1370_v15 = vld [vmem:[%s1713_s1 + $0x1a8] sm:$0xff]   ;;  %v1034_v36 = vcombine.low %v18_v32, %v22_v33  ;;  %v25_v37 = vld [vmem:[%s1714_s0 + $0x50] sm:$0xff] }
  0x19   :  { %1206 = vmatpush3.bf16.msra.mxu1 %v1338_v23  ;;  %1167 = vmatprep.subr.bf16.mxu0 %v1339_v24  ;;  %v39_v16 = vld [vmem:[%s1714_s0 + $0xc0] sm:$0xff]  ;;  %v40_v17 = vld [vmem:[%s1714_s0 + $0xc8] sm:$0xff]  ;;  %v1376_v23 = vld [vmem:[%s1713_s1 + $0x1f0] sm:$0xff]  }
  0x1a   :  { %1207 = vmatprep.subr.bf16.mxu1 %v1340_v25  ;;  %v1053_v18 = vcombine.high %v39_v16, %v39_v16  ;;  %v1055_v19 = vcombine.high %v40_v17, %v40_v17  ;;  %v1052_v20 = vcombine.low %v39_v16, %v39_v16  ;;  %v1054_v22 = vcombine.low %v40_v17, %v40_v17  ;;  %v1377_v24 = vld [vmem:[%s1713_s1 + $0x130] sm:$0xff]   ;;  %v26_v39 = vld [vmem:[%s1714_s0 + $0x58] sm:$0xff] }
  0x1b   :  { %v1378_v25 = vld [vmem:[%s1713_s1 + $0x1b0] sm:$0xff]  }
  0x1c   :  { %1168 = vmatpush3.bf16.msra.mxu0 %v1341_v26  ;;  %v1379_v26 = vld [vmem:[%s1713_s1 + $0x178] sm:$0xff]   ;;  %v41_v52 = vld [vmem:[%s1714_s0 + $0xd0] sm:$0xff] }
  0x1d   :  { %1208 = vmatpush3.bf16.msra.mxu1 %v1342_v27  ;;  %1169 = vmatprep.subr.bf16.mxu0 %v1343_v28  ;;  %v1380_v27 = vld [vmem:[%s1713_s1 + $0x1f8] sm:$0xff]  }
  0x1e   :  { %1209 = vmatprep.subr.bf16.mxu1 %v1344_v29  ;;  %v1381_v28 = vld [vmem:[%s1713_s1 + $0x138] sm:$0xff]  }
  0x1f   :  { %v1382_v29 = vld [vmem:[%s1713_s1 + $0x1b8] sm:$0xff]  }
  0x20   :  { %1170 = vmatpush3.bf16.msra.mxu0 %v1345_v30  ;;  %v17_v30 = vld [vmem:[%s1714_s0 + $0x10] sm:$0xff] }
  0x21   :  { %1210 = vmatpush3.bf16.msra.mxu1 %v1346_v31  ;;  %1235 = vmatprep.subr.bf16.mxu0 %v1347_v40  ;;  %v21_v31 = vld [vmem:[%s1714_s0 + $0x30] sm:$0xff]  ;;  %v1035_v40 = vcombine.high %v18_v32, %v22_v33 }
  0x22   :  { %1275 = vmatprep.subr.bf16.mxu1 %v1348_v41  ;;  %v1032_v34 = vcombine.low %v17_v30, %v21_v31 }
  0x23   :  { %743 = vmatmul.mubr.bf16.vlgmr.msra.gmra.mrb[0].mxu0 %v1028_v35  ;;  %v1033_v35 = vcombine.high %v17_v30, %v21_v31 }
  0x24   :  { %807 = vmatmul.mubr.bf16.vlgmr.msra.gmra.mrb[0].mxu1 %v1030_v38  ;;  %1236 = vmatpush3.bf16.msra.mxu0 %v1349_v42  ;;  %v29_v38 = vld [vmem:[%s1714_s0 + $0x70] sm:$0xff]  ;;  %v30_v42 = vld [vmem:[%s1714_s0 + $0x78] sm:$0xff] }
  0x25   :  { %1276 = vmatpush3.bf16.msra.mxu1 %v1350_v43  ;;  %1237 = vmatprep.subr.bf16.mxu0 %v1351_v44  ;;  %v1041_v41 = vcombine.high %v25_v37, %v29_v38  ;;  %v1043_v43 = vcombine.high %v26_v39, %v30_v42  ;;  %v33_v44 = vld [vmem:[%s1714_s0 + $0x90] sm:$0xff]  ;;  %v1040_v48 = vcombine.low %v25_v37, %v29_v38 }
  0x26   :  { %1277 = vmatprep.subr.bf16.mxu1 %v1352_v45  ;;  %750 = vmatprep.mubr.bf16.mxu0 %v1037_v50  ;;  %v37_v45 = vld [vmem:[%s1714_s0 + $0xb0] sm:$0xff]  ;;  %v1042_v49 = vcombine.low %v26_v39, %v30_v42 }
  0x27   :  { %814 = vmatprep.mubr.bf16.mxu1 %v1039_v54  ;;  %v1049_v50 = vcombine.high %v33_v44, %v37_v45  ;;  %v1048_v54 = vcombine.low %v33_v44, %v37_v45 }
  0x28   :  { %1238 = vmatpush3.bf16.msra.mxu0 %v1353_v46  ;;  %v34_v46 = vld [vmem:[%s1714_s0 + $0x98] sm:$0xff] }
  0x29   :  { %1278 = vmatpush3.bf16.msra.mxu1 %v1354_v47  ;;  %1239 = vmatprep.subr.bf16.mxu0 %v1355_v56  ;;  %v38_v47 = vld [vmem:[%s1714_s0 + $0xb8] sm:$0xff]  ;;  %v1057_v56 = vcombine.high %v41_v52, %v41_v52 }
  0x2a   :  { %1279 = vmatprep.subr.bf16.mxu1 %v1356_v57  ;;  %v1051_v51 = vcombine.high %v34_v46, %v38_v47 }
  0x2b   :  { %751 = vmatmul.mubr.bf16.gmra.mrb[4].mxu0 %v1036_v53  ;;  %v42_v53 = vld [vmem:[%s1714_s0 + $0xd8] sm:$0xff] }
  0x2c   :  { %815 = vmatmul.mubr.bf16.gmra.mrb[4].mxu1 %v1038_v55  ;;  %1240 = vmatpush3.bf16.msra.mxu0 %v1357_v58  ;;  %v1050_v55 = vcombine.low %v34_v46, %v38_v47  ;;  %v1059_v57 = vcombine.high %v42_v53, %v42_v53  ;;  %v1056_v58 = vcombine.low %v41_v52, %v41_v52 }
  0x2d   :  { %1280 = vmatpush3.bf16.msra.mxu1 %v1358_v59  ;;  %1241 = vmatprep.subr.bf16.mxu0 %v1359_v60  ;;  %v1058_v59 = vcombine.low %v42_v53, %v42_v53 }
  0x2e   :  { %1281 = vmatprep.subr.bf16.mxu1 %v1360_v61  ;;  %758 = vmatprep.mubr.bf16.mxu0 %v1045_v4 }
  0x2f   :  { %822 = vmatprep.mubr.bf16.mxu1 %v1047_v5 }
  0x30   :  { %1242 = vmatpush3.bf16.msra.mxu0 %v1361_v62  ;;  %v1027_v62 = vld [vmem:[%s1715_s2] ss:$0 sm:$0xff] }
  0x31   :  { %1282 = vmatpush3.bf16.msra.mxu1 %v1362_v63  ;;  %1243 = vmatprep.subr.bf16.mxu0 %v1363_v8 }
  0x32   :  { %1283 = vmatprep.subr.bf16.mxu1 %v1364_v9 }
  0x33   :  { %759 = vmatmul.mubr.bf16.gmra.mrb[8].mxu0 %v1044_v6 }
  0x34   :  { %823 = vmatmul.mubr.bf16.gmra.mrb[8].mxu1 %v1046_v7  ;;  %1244 = vmatpush3.bf16.msra.mxu0 %v1365_v10 }
  0x35   :  { %1284 = vmatpush3.bf16.msra.mxu1 %v1366_v11  ;;  %1245 = vmatprep.subr.bf16.mxu0 %v1367_v12 }
  0x36   :  { %1285 = vmatprep.subr.bf16.mxu1 %v1368_v13  ;;  %766 = vmatprep.mubr.bf16.mxu0 %v1053_v18 }
  0x37   :  { %830 = vmatprep.mubr.bf16.mxu1 %v1055_v19 }
  0x38   :  { %1246 = vmatpush3.bf16.msra.mxu0 %v1369_v14 }
  0x39   :  { %1286 = vmatpush3.bf16.msra.mxu1 %v1370_v15  ;;  %1247 = vmatprep.subr.bf16.mxu0 %v1375_v21 }
  0x3a   :  { %1287 = vmatprep.subr.bf16.mxu1 %v1376_v23 }
  0x3b   :  { %767 = vmatmul.mubr.bf16.gmra.mrb[12].mxu0 %v1052_v20 }
  0x3c   :  { %831 = vmatmul.mubr.bf16.gmra.mrb[12].mxu1 %v1054_v22  ;;  %1248 = vmatpush3.bf16.msra.mxu0 %v1377_v24 }
  0x3d   :  { %1288 = vmatpush3.bf16.msra.mxu1 %v1378_v25  ;;  %1249 = vmatprep.subr.bf16.mxu0 %v1379_v26 }
  0x3e   :  { %1289 = vmatprep.subr.bf16.mxu1 %v1380_v27  ;;  %870 = vmatprep.mubr.bf16.mxu0 %v1033_v35 }
  0x3f   :  { %934 = vmatprep.mubr.bf16.mxu1 %v1035_v40 }
  0x40   :  { %1250 = vmatpush3.bf16.msra.mxu0 %v1381_v28 }
  0x41   :  { %1290 = vmatpush3.bf16.msra.mxu1 %v1382_v29 }
  0x43   :  { %871 = vmatmul.mubr.bf16.vlgmr.msra.gmra.mrb[16].mxu0 %v1032_v34 }
  0x44   :  { %935 = vmatmul.mubr.bf16.vlgmr.msra.gmra.mrb[16].mxu1 %v1034_v36  ;;  %878 = vmatprep.mubr.bf16.mxu0 %v1041_v41 }
  0x45   :  { %942 = vmatprep.mubr.bf16.mxu1 %v1043_v43 }
  0x4b   :  { %879 = vmatmul.mubr.bf16.gmra.mrb[20].mxu0 %v1040_v48 }
  0x4c   :  { %943 = vmatmul.mubr.bf16.gmra.mrb[20].mxu1 %v1042_v49  ;;  %886 = vmatprep.mubr.bf16.mxu0 %v1049_v50 }
  0x4d   :  { %950 = vmatprep.mubr.bf16.mxu1 %v1051_v51 }
  0x53   :  { %887 = vmatmul.mubr.bf16.gmra.mrb[24].mxu0 %v1048_v54 }
  0x54   :  { %951 = vmatmul.mubr.bf16.gmra.mrb[24].mxu1 %v1050_v55  ;;  %894 = vmatprep.mubr.bf16.mxu0 %v1057_v56 }
  0x55   :  { %958 = vmatprep.mubr.bf16.mxu1 %v1059_v57 }
  0x5b   :  { %895 = vmatmul.mubr.bf16.gmra.mrb[28].mxu0 %v1056_v58 }
  0x5c   :  { %959 = vmatmul.mubr.bf16.gmra.mrb[28].mxu1 %v1058_v59 }
  0xf6   :  { %v1171_v60 = vpop.f32.mrb[0].mxu0 }
  0xf7   :  { %v1211_v61 = vpop.f32.mrb[0].mxu1  ;;  %v1172_v63 = vpop.f32.mrb[1].mxu0 }
  0xf8   :  { %v1173_v0 = vadd.f32 %v1172_v63, %v1171_v60  ;;  %v1212_v1 = vpop.f32.mrb[1].mxu1  ;;  %v1174_v2 = vpop.f32.mrb[2].mxu0 }
  0xf9   :  { %v1213_v3 = vadd.f32 %v1212_v1, %v1211_v61  ;;  %v1214_v4 = vpop.f32.mrb[2].mxu1  ;;  %v1175_v5 = vpop.f32.mrb[3].mxu0 }
  0xfa   :  { %v745_v6 = vadd.f32 %v1173_v0, %v1027_v62  ;;  %v1176_v7 = vadd.f32 %v1175_v5, %v1174_v2  ;;  %v1215_v8 = vpop.f32.mrb[3].mxu1 }
  0xfb   :  { %v1216_v9 = vadd.f32 %v1215_v8, %v1214_v4 }
  0xfc   :  { %v809_v10 = vadd.f32 %v1213_v3, %v745_v6  ;;  %v748_v11 = vadd.f32 %v1176_v7, %v1027_v62 }
  0xfe   :  { %v812_v12 = vadd.f32 %v1216_v9, %v748_v11  ;;  %v1177_v13 = vpop.f32.mrb[4].mxu0 }
  0xff   :  { %v1217_v14 = vpop.f32.mrb[4].mxu1  ;;  %v1178_v15 = vpop.f32.mrb[5].mxu0 }
 0x100   :  { %v1179_v16 = vadd.f32 %v1178_v15, %v1177_v13  ;;  %v1218_v17 = vpop.f32.mrb[5].mxu1  ;;  %v1180_v18 = vpop.f32.mrb[6].mxu0 }
 0x101   :  { %v1219_v19 = vadd.f32 %v1218_v17, %v1217_v14  ;;  %v1220_v20 = vpop.f32.mrb[6].mxu1  ;;  %v1181_v21 = vpop.f32.mrb[7].mxu0 }
 0x102   :  { %v753_v22 = vadd.f32 %v1179_v16, %v1027_v62  ;;  %v1182_v23 = vadd.f32 %v1181_v21, %v1180_v18  ;;  %v1221_v24 = vpop.f32.mrb[7].mxu1 }
 0x103   :  { %v1222_v25 = vadd.f32 %v1221_v24, %v1220_v20 }
 0x104   :  { %v1686_v26 = vadd.f32 %v1219_v19, %v753_v22  ;;  %v756_v27 = vadd.f32 %v1182_v23, %v1027_v62 }
 0x106   :  { %v1688_v28 = vadd.f32 %v1222_v25, %v756_v27  ;;  %v1183_v29 = vpop.f32.mrb[8].mxu0 }
 0x107   :  { %v1223_v30 = vpop.f32.mrb[8].mxu1  ;;  %v1184_v31 = vpop.f32.mrb[9].mxu0 }
 0x108   :  { %v1224_v32 = vpop.f32.mrb[9].mxu1  ;;  %v1185_v33 = vadd.f32 %v1184_v31, %v1183_v29  ;;  %v1186_v35 = vpop.f32.mrb[10].mxu0 }
 0x109   :  { %v1225_v34 = vadd.f32 %v1224_v32, %v1223_v30  ;;  %v1226_v36 = vpop.f32.mrb[10].mxu1  ;;  %v1187_v37 = vpop.f32.mrb[11].mxu0 }
 0x10a   :  { %v1227_v38 = vpop.f32.mrb[11].mxu1  ;;  %v761_v39 = vadd.f32 %v1185_v33, %v1027_v62  ;;  %v1188_v40 = vadd.f32 %v1187_v37, %v1186_v35 }
 0x10b   :  { %v1228_v41 = vadd.f32 %v1227_v38, %v1226_v36 }
 0x10c   :  { %v1690_v42 = vadd.f32 %v1225_v34, %v761_v39  ;;  %v764_v43 = vadd.f32 %v1188_v40, %v1027_v62 }
 0x10e   :  { %v1692_v44 = vadd.f32 %v1228_v41, %v764_v43  ;;  %v1189_v45 = vpop.f32.mrb[12].mxu0 }
 0x10f   :  { %v1229_v46 = vpop.f32.mrb[12].mxu1  ;;  %v1190_v47 = vpop.f32.mrb[13].mxu0 }
 0x110   :  { %v1230_v48 = vpop.f32.mrb[13].mxu1  ;;  %v1191_v49 = vadd.f32 %v1190_v47, %v1189_v45  ;;  %v1192_v51 = vpop.f32.mrb[14].mxu0 }
 0x111   :  { %v1231_v50 = vadd.f32 %v1230_v48, %v1229_v46  ;;  %v1232_v52 = vpop.f32.mrb[14].mxu1  ;;  %v1193_v53 = vpop.f32.mrb[15].mxu0 }
 0x112   :  { %v1233_v54 = vpop.f32.mrb[15].mxu1  ;;  %v769_v55 = vadd.f32 %v1191_v49, %v1027_v62 }
 0x114   :  { %v1694_v56 = vadd.f32 %v1231_v50, %v769_v55 }
 0x116   :  { %v1251_v57 = vpop.f32.mrb[16].mxu0 }
 0x117   :  { %v1291_v58 = vpop.f32.mrb[16].mxu1  ;;  %v1252_v59 = vpop.f32.mrb[17].mxu0 }
 0x118   :  { %v1253_v60 = vadd.f32 %v1252_v59, %v1251_v57  ;;  %v1292_v61 = vpop.f32.mrb[17].mxu1  ;;  %v1254_v63 = vpop.f32.mrb[18].mxu0 }
 0x119   :  { %v1293_v0 = vadd.f32 %v1292_v61, %v1291_v58  ;;  %v1294_v1 = vpop.f32.mrb[18].mxu1  ;;  %v1255_v2 = vpop.f32.mrb[19].mxu0 }
 0x11a   :  { %v873_v3 = vadd.f32 %v1253_v60, %v809_v10  ;;  %v1256_v4 = vadd.f32 %v1255_v2, %v1254_v63  ;;  %v1295_v5 = vpop.f32.mrb[19].mxu1 }
 0x11b   :  { %v1296_v6 = vadd.f32 %v1295_v5, %v1294_v1 }
 0x11c   :  { %v937_v7 = vadd.f32 %v1293_v0, %v873_v3  ;;  %v876_v8 = vadd.f32 %v1256_v4, %v812_v12 }
 0x11e   :  { %v973_v9 = vmul.f32 0.2, %v937_v7  ;;  %v940_v11 = vadd.f32 %v1296_v6, %v876_v8  ;;  %v1257_v62 = vpop.f32.mrb[20].mxu0  ;;  %vm966_vm0 = vcmp.ge.f32.partialorder %v937_v7, 0.0 }
 0x11f   :  { %v1297_v13 = vpop.f32.mrb[20].mxu1  ;;  %v1258_v14 = vpop.f32.mrb[21].mxu0 }
 0x120   :  { %vm967_vm1 = vcmp.ge.f32.partialorder %v940_v11, 0.0  ;;  %v974_v15 = vmul.f32 0.2, %v940_v11  ;;  %v1259_v16 = vadd.f32 %v1258_v14, %v1257_v62  ;;  %v1298_v17 = vpop.f32.mrb[21].mxu1  ;;  %v1260_v18 = vpop.f32.mrb[22].mxu0  ;;  %v980_v10 = vsel %vm966_vm0, %v937_v7, %v973_v9 }
 0x121   :  { %v1299_v19 = vadd.f32 %v1298_v17, %v1297_v13  ;;  %v1300_v20 = vpop.f32.mrb[22].mxu1  ;;  %v1261_v21 = vpop.f32.mrb[23].mxu0 }
 0x122   :  { %v981_v22 = vsel %vm967_vm1, %v940_v11, %v974_v15  ;;  %v881_v23 = vadd.f32 %v1259_v16, %v1686_v26  ;;  %v1262_v24 = vadd.f32 %v1261_v21, %v1260_v18  ;;  %v1301_v12 = vpop.f32.mrb[23].mxu1 }
 0x123   :  { %v1141_v25 = vpack.c.bf16 %v981_v22, %v980_v10  ;;  %v1302_v27 = vadd.f32 %v1301_v12, %v1300_v20 }
 0x124   :  { %v945_v29 = vadd.f32 %v1299_v19, %v881_v23  ;;  %v884_v30 = vadd.f32 %v1262_v24, %v1688_v28 }
 0x125   :  { %1142 = vst [vmem:[%s1716_s3] sm:$0xff] %v1141_v25  }
 0x126   :  { %v975_v31 = vmul.f32 0.2, %v945_v29  ;;  %v948_v32 = vadd.f32 %v1302_v27, %v884_v30  ;;  %v1263_v33 = vpop.f32.mrb[24].mxu0  ;;  %vm968_vm2 = vcmp.ge.f32.partialorder %v945_v29, 0.0 }
 0x127   :  { %v1303_v34 = vpop.f32.mrb[24].mxu1  ;;  %v1264_v35 = vpop.f32.mrb[25].mxu0 }
 0x128   :  { %vm969_vm3 = vcmp.ge.f32.partialorder %v948_v32, 0.0  ;;  %v976_v36 = vmul.f32 0.2, %v948_v32  ;;  %v1265_v26 = vadd.f32 %v1264_v35, %v1263_v33  ;;  %v1304_v37 = vpop.f32.mrb[25].mxu1  ;;  %v1266_v38 = vpop.f32.mrb[26].mxu0  ;;  %v982_v43 = vsel %vm968_vm2, %v945_v29, %v975_v31 }
 0x129   :  { %v1305_v39 = vadd.f32 %v1304_v37, %v1303_v34  ;;  %v1306_v40 = vpop.f32.mrb[26].mxu1  ;;  %v1267_v41 = vpop.f32.mrb[27].mxu0 }
 0x12a   :  { %v983_v28 = vsel %vm969_vm3, %v948_v32, %v976_v36  ;;  %v889_v45 = vadd.f32 %v1265_v26, %v1690_v42  ;;  %v1268_v46 = vadd.f32 %v1267_v41, %v1266_v38  ;;  %v1307_v47 = vpop.f32.mrb[27].mxu1 }
 0x12b   :  { %v1146_v48 = vpack.c.bf16 %v983_v28, %v982_v43  ;;  %v1308_v49 = vadd.f32 %v1307_v47, %v1306_v40 }
 0x12c   :  { %v953_v50 = vadd.f32 %v1305_v39, %v889_v45  ;;  %v892_v51 = vadd.f32 %v1268_v46, %v1692_v44 }
 0x12d   :  { %1153 = vst [vmem:[%s1716_s3 + $0x8] sm:$0xff] %v1146_v48  }
 0x12e   :  { %v977_v52 = vmul.f32 0.2, %v953_v50  ;;  %v956_v53 = vadd.f32 %v1308_v49, %v892_v51  ;;  %v1269_v54 = vpop.f32.mrb[28].mxu0  ;;  %vm970_vm4 = vcmp.ge.f32.partialorder %v953_v50, 0.0 }
 0x12f   :  { %v1309_v55 = vpop.f32.mrb[28].mxu1  ;;  %v1270_v57 = vpop.f32.mrb[29].mxu0 }
 0x130   :  { %vm971_vm5 = vcmp.ge.f32.partialorder %v956_v53, 0.0  ;;  %v978_v58 = vmul.f32 0.2, %v956_v53  ;;  %v1271_v42 = vadd.f32 %v1270_v57, %v1269_v54  ;;  %v1310_v59 = vpop.f32.mrb[29].mxu1  ;;  %v1272_v60 = vpop.f32.mrb[30].mxu0  ;;  %v984_v1 = vsel %vm970_vm4, %v953_v50, %v977_v52 }
 0x131   :  { %v1311_v61 = vadd.f32 %v1310_v59, %v1309_v55  ;;  %v1312_v63 = vpop.f32.mrb[30].mxu1  ;;  %v1273_v0 = vpop.f32.mrb[31].mxu0 }
 0x132   :  { %v985_v44 = vsel %vm971_vm5, %v956_v53, %v978_v58  ;;  %v897_v2 = vadd.f32 %v1271_v42, %v1694_v56  ;;  %v1313_v3 = vpop.f32.mrb[31].mxu1 }
 0x133   :  { %v1151_v4 = vpack.c.bf16 %v985_v44, %v984_v1 }
 0x134   :  { %v961_v5 = vadd.f32 %v1311_v61, %v897_v2 }
 0x135   :  { %1154 = vst [vmem:[%s1716_s3 + $0x10] sm:$0xff] %v1151_v4  }
 0x136   :  { %vm972_vm6 = vcmp.ge.f32.partialorder %v961_v5, 0.0  ;;  %v979_v6 = vmul.f32 0.2, %v961_v5 }
 0x138   :  { %v986_v7 = vsel %vm972_vm6, %v961_v5, %v979_v6 }
 0x139   :  { %v1137_v8 = vpack.c.bf16 %v986_v7, %v986_v7 }
 0x13b   :  { %1022 = vst [vmem:[%s1716_s3 + $0x18] sm:$0xf] %v1137_v8 }

// kernel: dis_forward.8
= control target key start
LH: loop header
LB: loop body
LE: loop exit
PB: predicated region body
PF: predicated region fallthrough
CT: control target
= control target key end

     0   :  { %s3849_s1 = inlined_call_operand.vmem [shape: bf16[2048,256], index: 1, kind: input, shape index: {}]   ;;  %s3850_s0 = inlined_call_operand.vmem [shape: bf16[24,2048], index: 0, kind: input, shape index: {}]   ;;  %s3851_s2 = inlined_call_operand.vmem [shape: f32[1,256], index: 2, kind: input, shape index: {}]   ;;  %s3852_s3 = inlined_call_operand.vmem [shape: bf16[24,256], index: 3, kind: output, shape index: {}]  }
   0x1   :  { %v2529_v0 = vld [vmem:[%s3849_s1 + $0x4] ss:$8 sps:$4 sm:$0xff]   ;;  %v2533_v2 = vld [vmem:[%s3849_s1] ss:$8 sps:$4 sm:$0xff]   ;;  %v2535_v4 = vld [vmem:[%s3849_s1 + $0x14] ss:$8 sps:$4 sm:$0xff]  }
   0x2   :  { %v2531_v1 = vld [vmem:[%s3849_s1 + $0x404] ss:$8 sps:$4 sm:$0xff]   ;;  %1722 = vmatprep.subr.bf16.mxu1 %v2529_v0  ;;  %v2534_v3 = vld [vmem:[%s3849_s1 + $0x400] ss:$8 sps:$4 sm:$0xff]   ;;  %v2537_v5 = vld [vmem:[%s3849_s1 + $0x414] ss:$8 sps:$4 sm:$0xff]  }
   0x3   :  { %1926 = vmatprep.subr.bf16.mxu0 %v2531_v1  ;;  %1723 = vmatpush1.bf16.msra.mxu1 %v2533_v2  ;;  %v2539_v6 = vld [vmem:[%s3849_s1 + $0x10] ss:$8 sps:$4 sm:$0xff]   ;;  %v2541_v8 = vld [vmem:[%s3849_s1 + $0x24] ss:$8 sps:$4 sm:$0xff]   ;;  %v2545_v10 = vld [vmem:[%s3849_s1 + $0x20] ss:$8 sps:$4 sm:$0xff]  }
   0x4   :  { %1927 = vmatpush1.bf16.msra.mxu0 %v2534_v3  ;;  %1724 = vmatprep.subr.bf16.mxu1 %v2535_v4  ;;  %v2540_v7 = vld [vmem:[%s3849_s1 + $0x410] ss:$8 sps:$4 sm:$0xff]   ;;  %v2543_v9 = vld [vmem:[%s3849_s1 + $0x424] ss:$8 sps:$4 sm:$0xff]   ;;  %v2546_v11 = vld [vmem:[%s3849_s1 + $0x420] ss:$8 sps:$4 sm:$0xff]  }
   0x5   :  { %1928 = vmatprep.subr.bf16.mxu0 %v2537_v5  ;;  %v2547_v12 = vld [vmem:[%s3849_s1 + $0x34] ss:$8 sps:$4 sm:$0xff]   ;;  %v2551_v14 = vld [vmem:[%s3849_s1 + $0x30] ss:$8 sps:$4 sm:$0xff]   ;;  %v2553_v16 = vld [vmem:[%s3849_s1 + $0x44] ss:$8 sps:$4 sm:$0xff]  }
   0x6   :  { %v2549_v13 = vld [vmem:[%s3849_s1 + $0x434] ss:$8 sps:$4 sm:$0xff]   ;;  %v2552_v15 = vld [vmem:[%s3849_s1 + $0x430] ss:$8 sps:$4 sm:$0xff]   ;;  %v2555_v17 = vld [vmem:[%s3849_s1 + $0x444] ss:$8 sps:$4 sm:$0xff]  }
   0x7   :  { %1725 = vmatpush1.bf16.msra.mxu1 %v2539_v6  ;;  %v2557_v18 = vld [vmem:[%s3849_s1 + $0x40] ss:$8 sps:$4 sm:$0xff]   ;;  %v2559_v20 = vld [vmem:[%s3849_s1 + $0x54] ss:$8 sps:$4 sm:$0xff]   ;;  %v2563_v22 = vld [vmem:[%s3849_s1 + $0x50] ss:$8 sps:$4 sm:$0xff]  }
   0x8   :  { %1929 = vmatpush1.bf16.msra.mxu0 %v2540_v7  ;;  %1726 = vmatprep.subr.bf16.mxu1 %v2541_v8  ;;  %v2558_v19 = vld [vmem:[%s3849_s1 + $0x440] ss:$8 sps:$4 sm:$0xff]   ;;  %v2561_v21 = vld [vmem:[%s3849_s1 + $0x454] ss:$8 sps:$4 sm:$0xff]   ;;  %v2564_v23 = vld [vmem:[%s3849_s1 + $0x450] ss:$8 sps:$4 sm:$0xff]  }
   0x9   :  { %1930 = vmatprep.subr.bf16.mxu0 %v2543_v9  ;;  %v2565_v24 = vld [vmem:[%s3849_s1 + $0x64] ss:$8 sps:$4 sm:$0xff]   ;;  %v2569_v26 = vld [vmem:[%s3849_s1 + $0x60] ss:$8 sps:$4 sm:$0xff]   ;;  %v2571_v28 = vld [vmem:[%s3849_s1 + $0x74] ss:$8 sps:$4 sm:$0xff]  }
   0xa   :  { %v2567_v25 = vld [vmem:[%s3849_s1 + $0x464] ss:$8 sps:$4 sm:$0xff]   ;;  %v2570_v27 = vld [vmem:[%s3849_s1 + $0x460] ss:$8 sps:$4 sm:$0xff]   ;;  %v2573_v29 = vld [vmem:[%s3849_s1 + $0x474] ss:$8 sps:$4 sm:$0xff]  }
   0xb   :  { %1727 = vmatpush1.bf16.msra.mxu1 %v2545_v10  ;;  %v2575_v30 = vld [vmem:[%s3849_s1 + $0x70] ss:$8 sps:$4 sm:$0xff]   ;;  %v2577_v32 = vld [vmem:[%s3849_s1 + $0x84] ss:$8 sps:$4 sm:$0xff]   ;;  %v2581_v34 = vld [vmem:[%s3849_s1 + $0x80] ss:$8 sps:$4 sm:$0xff]  }
   0xc   :  { %1931 = vmatpush1.bf16.msra.mxu0 %v2546_v11  ;;  %1728 = vmatprep.subr.bf16.mxu1 %v2547_v12  ;;  %v2576_v31 = vld [vmem:[%s3849_s1 + $0x470] ss:$8 sps:$4 sm:$0xff]   ;;  %v2579_v33 = vld [vmem:[%s3849_s1 + $0x484] ss:$8 sps:$4 sm:$0xff]   ;;  %v2582_v35 = vld [vmem:[%s3849_s1 + $0x480] ss:$8 sps:$4 sm:$0xff]  }
   0xd   :  { %1932 = vmatprep.subr.bf16.mxu0 %v2549_v13  ;;  %v2583_v36 = vld [vmem:[%s3849_s1 + $0x94] ss:$8 sps:$4 sm:$0xff]   ;;  %v2587_v38 = vld [vmem:[%s3849_s1 + $0x90] ss:$8 sps:$4 sm:$0xff]   ;;  %v2589_v40 = vld [vmem:[%s3849_s1 + $0xa4] ss:$8 sps:$4 sm:$0xff]  }
   0xe   :  { %v2585_v37 = vld [vmem:[%s3849_s1 + $0x494] ss:$8 sps:$4 sm:$0xff]   ;;  %v2588_v39 = vld [vmem:[%s3849_s1 + $0x490] ss:$8 sps:$4 sm:$0xff]   ;;  %v2591_v41 = vld [vmem:[%s3849_s1 + $0x4a4] ss:$8 sps:$4 sm:$0xff]  }
   0xf   :  { %1729 = vmatpush1.bf16.msra.mxu1 %v2551_v14  ;;  %v2593_v42 = vld [vmem:[%s3849_s1 + $0xa0] ss:$8 sps:$4 sm:$0xff]   ;;  %v2595_v44 = vld [vmem:[%s3849_s1 + $0xb4] ss:$8 sps:$4 sm:$0xff]   ;;  %v2599_v46 = vld [vmem:[%s3849_s1 + $0xb0] ss:$8 sps:$4 sm:$0xff]  }
  0x10   :  { %1933 = vmatpush1.bf16.msra.mxu0 %v2552_v15  ;;  %1730 = vmatprep.subr.bf16.mxu1 %v2553_v16  ;;  %v2594_v43 = vld [vmem:[%s3849_s1 + $0x4a0] ss:$8 sps:$4 sm:$0xff]   ;;  %v2597_v45 = vld [vmem:[%s3849_s1 + $0x4b4] ss:$8 sps:$4 sm:$0xff]   ;;  %v2600_v47 = vld [vmem:[%s3849_s1 + $0x4b0] ss:$8 sps:$4 sm:$0xff]  }
  0x11   :  { %1934 = vmatprep.subr.bf16.mxu0 %v2555_v17  ;;  %v14_v48 = vld [vmem:[%s3850_s0] sm:$0xff]  ;;  %v2607_v58 = vld [vmem:[%s3849_s1 + $0xd4] ss:$8 sps:$4 sm:$0xff]   ;;  %v2611_v60 = vld [vmem:[%s3849_s1 + $0xd0] ss:$8 sps:$4 sm:$0xff]  }
  0x12   :  { %v22_v49 = vld [vmem:[%s3850_s0 + $0x40] sm:$0xff]  ;;  %v2609_v59 = vld [vmem:[%s3849_s1 + $0x4d4] ss:$8 sps:$4 sm:$0xff]   ;;  %v2612_v61 = vld [vmem:[%s3849_s1 + $0x4d0] ss:$8 sps:$4 sm:$0xff]  }
  0x13   :  { %1731 = vmatpush1.bf16.msra.mxu1 %v2557_v18  ;;  %v2601_v50 = vld [vmem:[%s3849_s1 + $0xc4] ss:$8 sps:$4 sm:$0xff]   ;;  %v2176_v52 = vcombine.high %v14_v48, %v22_v49  ;;  %v2605_v56 = vld [vmem:[%s3849_s1 + $0xc0] ss:$8 sps:$4 sm:$0xff]   ;;  %v2619_v2 = vld [vmem:[%s3849_s1 + $0xf4] ss:$8 sps:$4 sm:$0xff]   ;;  %v2175_v8 = vcombine.low %v14_v48, %v22_v49 }
  0x14   :  { %1935 = vmatpush1.bf16.msra.mxu0 %v2558_v19  ;;  %1732 = vmatprep.subr.bf16.mxu1 %v2559_v20  ;;  %v2603_v51 = vld [vmem:[%s3849_s1 + $0x4c4] ss:$8 sps:$4 sm:$0xff]   ;;  %v2606_v57 = vld [vmem:[%s3849_s1 + $0x4c0] ss:$8 sps:$4 sm:$0xff]   ;;  %v2621_v3 = vld [vmem:[%s3849_s1 + $0x4f4] ss:$8 sps:$4 sm:$0xff]  }
  0x15   :  { %1936 = vmatprep.subr.bf16.mxu0 %v2561_v21  ;;  %v18_v53 = vld [vmem:[%s3850_s0 + $0x20] sm:$0xff]  ;;  %1754 = vmatprep.mubr.bf16.mxu1 %v2176_v52  ;;  %v2623_v4 = vld [vmem:[%s3849_s1 + $0xf0] ss:$8 sps:$4 sm:$0xff]   ;;  %v2633_v12 = vld [vmem:[%s3849_s1 + $0x114] ss:$8 sps:$4 sm:$0xff]  }
  0x16   :  { %v26_v54 = vld [vmem:[%s3850_s0 + $0x60] sm:$0xff]  ;;  %v2624_v5 = vld [vmem:[%s3849_s1 + $0x4f0] ss:$8 sps:$4 sm:$0xff]   ;;  %v2636_v13 = vld [vmem:[%s3849_s1 + $0x514] ss:$8 sps:$4 sm:$0xff]  }
  0x17   :  { %1733 = vmatpush1.bf16.msra.mxu1 %v2563_v22  ;;  %v2184_v55 = vcombine.high %v18_v53, %v26_v54  ;;  %v2613_v62 = vld [vmem:[%s3849_s1 + $0xe4] ss:$8 sps:$4 sm:$0xff]   ;;  %v2617_v0 = vld [vmem:[%s3849_s1 + $0xe0] ss:$8 sps:$4 sm:$0xff]   ;;  %v2183_v10 = vcombine.low %v18_v53, %v26_v54  ;;  %v2631_v14 = vld [vmem:[%s3849_s1 + $0x110] ss:$8 sps:$4 sm:$0xff]  }
  0x18   :  { %1937 = vmatpush1.bf16.msra.mxu0 %v2564_v23  ;;  %1734 = vmatprep.subr.bf16.mxu1 %v2565_v24  ;;  %v2615_v63 = vld [vmem:[%s3849_s1 + $0x4e4] ss:$8 sps:$4 sm:$0xff]   ;;  %v2618_v1 = vld [vmem:[%s3849_s1 + $0x4e0] ss:$8 sps:$4 sm:$0xff]   ;;  %v2634_v15 = vld [vmem:[%s3849_s1 + $0x510] ss:$8 sps:$4 sm:$0xff]  }
  0x19   :  { %1938 = vmatprep.subr.bf16.mxu0 %v2567_v25  ;;  %1958 = vmatprep.mubr.bf16.mxu0 %v2184_v55  ;;  %v2627_v6 = vld [vmem:[%s3849_s1 + $0x104] ss:$8 sps:$4 sm:$0xff]   ;;  %v2625_v9 = vld [vmem:[%s3849_s1 + $0x100] ss:$8 sps:$4 sm:$0xff]   ;;  %v2645_v20 = vld [vmem:[%s3849_s1 + $0x134] ss:$8 sps:$4 sm:$0xff]  }
  0x1a   :  { %v2630_v7 = vld [vmem:[%s3849_s1 + $0x504] ss:$8 sps:$4 sm:$0xff]   ;;  %v2628_v11 = vld [vmem:[%s3849_s1 + $0x500] ss:$8 sps:$4 sm:$0xff]   ;;  %v2648_v21 = vld [vmem:[%s3849_s1 + $0x534] ss:$8 sps:$4 sm:$0xff]  }
  0x1b   :  { %1735 = vmatpush1.bf16.msra.mxu1 %v2569_v26  ;;  %v2639_v16 = vld [vmem:[%s3849_s1 + $0x124] ss:$8 sps:$4 sm:$0xff]   ;;  %v2637_v18 = vld [vmem:[%s3849_s1 + $0x120] ss:$8 sps:$4 sm:$0xff]   ;;  %v2643_v22 = vld [vmem:[%s3849_s1 + $0x130] ss:$8 sps:$4 sm:$0xff]  }
  0x1c   :  { %1939 = vmatpush1.bf16.msra.mxu0 %v2570_v27  ;;  %1736 = vmatprep.subr.bf16.mxu1 %v2571_v28  ;;  %v2642_v17 = vld [vmem:[%s3849_s1 + $0x524] ss:$8 sps:$4 sm:$0xff]   ;;  %v2640_v19 = vld [vmem:[%s3849_s1 + $0x520] ss:$8 sps:$4 sm:$0xff]   ;;  %v2646_v23 = vld [vmem:[%s3849_s1 + $0x530] ss:$8 sps:$4 sm:$0xff]  }
  0x1d   :  { %1940 = vmatprep.subr.bf16.mxu0 %v2573_v29  ;;  %v2651_v24 = vld [vmem:[%s3849_s1 + $0x144] ss:$8 sps:$4 sm:$0xff]   ;;  %v2649_v26 = vld [vmem:[%s3849_s1 + $0x140] ss:$8 sps:$4 sm:$0xff]   ;;  %v2657_v28 = vld [vmem:[%s3849_s1 + $0x154] ss:$8 sps:$4 sm:$0xff]  }
  0x1e   :  { %v2654_v25 = vld [vmem:[%s3849_s1 + $0x544] ss:$8 sps:$4 sm:$0xff]   ;;  %v2652_v27 = vld [vmem:[%s3849_s1 + $0x540] ss:$8 sps:$4 sm:$0xff]   ;;  %v2660_v29 = vld [vmem:[%s3849_s1 + $0x554] ss:$8 sps:$4 sm:$0xff]  }
  0x1f   :  { %1737 = vmatpush1.bf16.msra.mxu1 %v2575_v30  ;;  %v30_v30 = vld [vmem:[%s3850_s0 + $0x80] sm:$0xff]  ;;  %v3269_v48 = vld [vmem:[%s3850_s0 + $0x68] sm:$0xff] }
  0x20   :  { %1941 = vmatpush1.bf16.msra.mxu0 %v2576_v31  ;;  %1738 = vmatprep.subr.bf16.mxu1 %v2577_v32  ;;  %v2192_v31 = vcombine.high %v30_v30, %v30_v30  ;;  %v34_v32 = vld [vmem:[%s3850_s0 + $0xa0] sm:$0xff] }
  0x21   :  { %1942 = vmatprep.subr.bf16.mxu0 %v2579_v33  ;;  %v2191_v33 = vcombine.low %v30_v30, %v30_v30  ;;  %v2675_v52 = vld [vmem:[%s3849_s1 + $0x184] ss:$8 sps:$4 sm:$0xff]   ;;  %v2673_v54 = vld [vmem:[%s3849_s1 + $0x180] ss:$8 sps:$4 sm:$0xff]  }
  0x22   :  { %v2678_v53 = vld [vmem:[%s3849_s1 + $0x584] ss:$8 sps:$4 sm:$0xff]   ;;  %v2676_v55 = vld [vmem:[%s3849_s1 + $0x580] ss:$8 sps:$4 sm:$0xff]  }
  0x23   :  { %1739 = vmatpush1.bf16.msra.mxu1 %v2581_v34  ;;  %v2655_v34 = vld [vmem:[%s3849_s1 + $0x150] ss:$8 sps:$4 sm:$0xff]  }
  0x24   :  { %1943 = vmatpush1.bf16.msra.mxu0 %v2582_v35  ;;  %1740 = vmatprep.subr.bf16.mxu1 %v2583_v36  ;;  %v2658_v35 = vld [vmem:[%s3849_s1 + $0x550] ss:$8 sps:$4 sm:$0xff]   ;;  %v2200_v36 = vcombine.high %v34_v32, %v34_v32 }
  0x25   :  { %1944 = vmatprep.subr.bf16.mxu0 %v2585_v37  ;;  %v2199_v37 = vcombine.low %v34_v32, %v34_v32  ;;  %v2731_v32 = vld [vmem:[%s3849_s1 + $0x210] ss:$8 sps:$4 sm:$0xff]  }
  0x27   :  { %1741 = vmatpush1.bf16.msra.mxu1 %v2587_v38  ;;  %v2663_v38 = vld [vmem:[%s3849_s1 + $0x164] ss:$8 sps:$4 sm:$0xff]  }
  0x28   :  { %1945 = vmatpush1.bf16.msra.mxu0 %v2588_v39  ;;  %1742 = vmatprep.subr.bf16.mxu1 %v2589_v40  ;;  %v2666_v39 = vld [vmem:[%s3849_s1 + $0x564] ss:$8 sps:$4 sm:$0xff]   ;;  %v2661_v40 = vld [vmem:[%s3849_s1 + $0x160] ss:$8 sps:$4 sm:$0xff]  }
  0x29   :  { %1946 = vmatprep.subr.bf16.mxu0 %v2591_v41  ;;  %v2664_v41 = vld [vmem:[%s3849_s1 + $0x560] ss:$8 sps:$4 sm:$0xff]  }
  0x2b   :  { %1743 = vmatpush1.bf16.msra.mxu1 %v2593_v42  ;;  %v3246_v42 = vld [vmem:[%s3850_s0 + $0x8] sm:$0xff] }
  0x2c   :  { %1947 = vmatpush1.bf16.msra.mxu0 %v2594_v43  ;;  %1744 = vmatprep.subr.bf16.mxu1 %v2595_v44  ;;  %v3251_v43 = vld [vmem:[%s3850_s0 + $0x48] sm:$0xff]  ;;  %v2669_v44 = vld [vmem:[%s3849_s1 + $0x174] ss:$8 sps:$4 sm:$0xff]  }
  0x2d   :  { %1948 = vmatprep.subr.bf16.mxu0 %v2597_v45  ;;  %v2178_v45 = vcombine.high %v3246_v42, %v3251_v43 }
  0x2f   :  { %1745 = vmatpush1.bf16.msra.mxu1 %v2599_v46  ;;  %v2672_v46 = vld [vmem:[%s3849_s1 + $0x574] ss:$8 sps:$4 sm:$0xff]  }
  0x30   :  { %1949 = vmatpush1.bf16.msra.mxu0 %v2600_v47  ;;  %1746 = vmatprep.subr.bf16.mxu1 %v2601_v50  ;;  %v3264_v47 = vld [vmem:[%s3850_s0 + $0x28] sm:$0xff]  ;;  %v2667_v50 = vld [vmem:[%s3849_s1 + $0x170] ss:$8 sps:$4 sm:$0xff]  }
  0x31   :  { %1950 = vmatprep.subr.bf16.mxu0 %v2603_v51  ;;  %v2186_v49 = vcombine.high %v3264_v47, %v3269_v48  ;;  %v2670_v51 = vld [vmem:[%s3849_s1 + $0x570] ss:$8 sps:$4 sm:$0xff]  }
  0x33   :  { %1747 = vmatpush1.bf16.msra.mxu1 %v2605_v56  ;;  %v2681_v56 = vld [vmem:[%s3849_s1 + $0x194] ss:$8 sps:$4 sm:$0xff]  }
  0x34   :  { %1951 = vmatpush1.bf16.msra.mxu0 %v2606_v57  ;;  %1748 = vmatprep.subr.bf16.mxu1 %v2607_v58  ;;  %v2684_v57 = vld [vmem:[%s3849_s1 + $0x594] ss:$8 sps:$4 sm:$0xff]   ;;  %v2679_v58 = vld [vmem:[%s3849_s1 + $0x190] ss:$8 sps:$4 sm:$0xff]  }
  0x35   :  { %1952 = vmatprep.subr.bf16.mxu0 %v2609_v59  ;;  %v2682_v59 = vld [vmem:[%s3849_s1 + $0x590] ss:$8 sps:$4 sm:$0xff]  }
  0x37   :  { %1749 = vmatpush1.bf16.msra.mxu1 %v2611_v60  ;;  %v2687_v60 = vld [vmem:[%s3849_s1 + $0x1a4] ss:$8 sps:$4 sm:$0xff]  }
  0x38   :  { %1953 = vmatpush1.bf16.msra.mxu0 %v2612_v61  ;;  %1750 = vmatprep.subr.bf16.mxu1 %v2613_v62  ;;  %v2690_v61 = vld [vmem:[%s3849_s1 + $0x5a4] ss:$8 sps:$4 sm:$0xff]   ;;  %v2685_v62 = vld [vmem:[%s3849_s1 + $0x1a0] ss:$8 sps:$4 sm:$0xff]  }
  0x39   :  { %1954 = vmatprep.subr.bf16.mxu0 %v2615_v63  ;;  %v2688_v63 = vld [vmem:[%s3849_s1 + $0x5a0] ss:$8 sps:$4 sm:$0xff]  }
  0x3b   :  { %1751 = vmatpush1.bf16.msra.mxu1 %v2617_v0  ;;  %v2693_v0 = vld [vmem:[%s3849_s1 + $0x1b4] ss:$8 sps:$4 sm:$0xff]  }
  0x3c   :  { %1955 = vmatpush1.bf16.msra.mxu0 %v2618_v1  ;;  %1752 = vmatprep.subr.bf16.mxu1 %v2619_v2  ;;  %v2696_v1 = vld [vmem:[%s3849_s1 + $0x5b4] ss:$8 sps:$4 sm:$0xff]   ;;  %v2691_v2 = vld [vmem:[%s3849_s1 + $0x1b0] ss:$8 sps:$4 sm:$0xff]  }
  0x3d   :  { %1956 = vmatprep.subr.bf16.mxu0 %v2621_v3  ;;  %v2694_v3 = vld [vmem:[%s3849_s1 + $0x5b0] ss:$8 sps:$4 sm:$0xff]  }
  0x3f   :  { %1753 = vmatpush1.bf16.msra.mxu1 %v2623_v4  ;;  %v2699_v4 = vld [vmem:[%s3849_s1 + $0x1c4] ss:$8 sps:$4 sm:$0xff]  }
  0x40   :  { %1957 = vmatpush1.bf16.msra.mxu0 %v2624_v5  ;;  %1773 = vmatprep.subr.bf16.mxu1 %v2627_v6  ;;  %v2702_v5 = vld [vmem:[%s3849_s1 + $0x5c4] ss:$8 sps:$4 sm:$0xff]   ;;  %v2697_v6 = vld [vmem:[%s3849_s1 + $0x1c0] ss:$8 sps:$4 sm:$0xff]  }
  0x41   :  { %1977 = vmatprep.subr.bf16.mxu0 %v2630_v7  ;;  %v2700_v7 = vld [vmem:[%s3849_s1 + $0x5c0] ss:$8 sps:$4 sm:$0xff]  }
  0x42   :  { %1755 = vmatmul.mubr.bf16.vlgmr.msra.gmra.mrb[0].mxu1 %v2175_v8  ;;  %v2705_v8 = vld [vmem:[%s3849_s1 + $0x1d4] ss:$8 sps:$4 sm:$0xff]  }
  0x43   :  { %1959 = vmatmul.mubr.bf16.vlgmr.msra.gmra.mrb[0].mxu0 %v2183_v10  ;;  %1774 = vmatpush1.bf16.msra.mxu1 %v2625_v9  ;;  %v2708_v9 = vld [vmem:[%s3849_s1 + $0x5d4] ss:$8 sps:$4 sm:$0xff]   ;;  %v2703_v10 = vld [vmem:[%s3849_s1 + $0x1d0] ss:$8 sps:$4 sm:$0xff]  }
  0x44   :  { %1978 = vmatpush1.bf16.msra.mxu0 %v2628_v11  ;;  %1775 = vmatprep.subr.bf16.mxu1 %v2633_v12  ;;  %v2706_v11 = vld [vmem:[%s3849_s1 + $0x5d0] ss:$8 sps:$4 sm:$0xff]   ;;  %v2712_v12 = vld [vmem:[%s3849_s1 + $0x1e4] ss:$8 sps:$4 sm:$0xff]  }
  0x45   :  { %1979 = vmatprep.subr.bf16.mxu0 %v2636_v13  ;;  %1764 = vmatprep.mubr.bf16.mxu1 %v2192_v31  ;;  %v2716_v13 = vld [vmem:[%s3849_s1 + $0x5e4] ss:$8 sps:$4 sm:$0xff]  }
  0x46   :  { %1968 = vmatprep.mubr.bf16.mxu0 %v2200_v36  ;;  %v2737_v36 = vld [vmem:[%s3849_s1 + $0x220] ss:$8 sps:$4 sm:$0xff]  }
  0x47   :  { %1776 = vmatpush1.bf16.msra.mxu1 %v2631_v14  ;;  %v2710_v14 = vld [vmem:[%s3849_s1 + $0x1e0] ss:$8 sps:$4 sm:$0xff]  }
  0x48   :  { %1980 = vmatpush1.bf16.msra.mxu0 %v2634_v15  ;;  %1777 = vmatprep.subr.bf16.mxu1 %v2639_v16  ;;  %v2714_v15 = vld [vmem:[%s3849_s1 + $0x5e0] ss:$8 sps:$4 sm:$0xff]   ;;  %v2721_v16 = vld [vmem:[%s3849_s1 + $0x1f4] ss:$8 sps:$4 sm:$0xff]  }
  0x49   :  { %1981 = vmatprep.subr.bf16.mxu0 %v2642_v17  ;;  %v2724_v17 = vld [vmem:[%s3849_s1 + $0x5f4] ss:$8 sps:$4 sm:$0xff]  }
  0x4a   :  { %1765 = vmatmul.mubr.bf16.gmra.mrb[4].mxu1 %v2191_v33  ;;  %v2734_v33 = vld [vmem:[%s3849_s1 + $0x610] ss:$8 sps:$4 sm:$0xff]  }
  0x4b   :  { %1778 = vmatpush1.bf16.msra.mxu1 %v2637_v18  ;;  %1969 = vmatmul.mubr.bf16.gmra.mrb[4].mxu0 %v2199_v37  ;;  %v2719_v18 = vld [vmem:[%s3849_s1 + $0x1f0] ss:$8 sps:$4 sm:$0xff]   ;;  %v2740_v37 = vld [vmem:[%s3849_s1 + $0x620] ss:$8 sps:$4 sm:$0xff]  }
  0x4c   :  { %1982 = vmatpush1.bf16.msra.mxu0 %v2640_v19  ;;  %1779 = vmatprep.subr.bf16.mxu1 %v2645_v20  ;;  %v2722_v19 = vld [vmem:[%s3849_s1 + $0x5f0] ss:$8 sps:$4 sm:$0xff]   ;;  %v2727_v20 = vld [vmem:[%s3849_s1 + $0x204] ss:$8 sps:$4 sm:$0xff]  }
  0x4d   :  { %1983 = vmatprep.subr.bf16.mxu0 %v2648_v21  ;;  %1805 = vmatprep.mubr.bf16.mxu1 %v2178_v45  ;;  %v2730_v21 = vld [vmem:[%s3849_s1 + $0x604] ss:$8 sps:$4 sm:$0xff]   ;;  %v2748_v45 = vld [vmem:[%s3849_s1 + $0x634] ss:$8 sps:$4 sm:$0xff]  }
  0x4e   :  { %2009 = vmatprep.mubr.bf16.mxu0 %v2186_v49  ;;  %v2746_v49 = vld [vmem:[%s3849_s1 + $0x630] ss:$8 sps:$4 sm:$0xff]  }
  0x4f   :  { %1780 = vmatpush1.bf16.msra.mxu1 %v2643_v22  ;;  %v2725_v22 = vld [vmem:[%s3849_s1 + $0x200] ss:$8 sps:$4 sm:$0xff]  }
  0x50   :  { %1984 = vmatpush1.bf16.msra.mxu0 %v2646_v23  ;;  %1781 = vmatprep.subr.bf16.mxu1 %v2651_v24  ;;  %v2177_v23 = vcombine.low %v3246_v42, %v3251_v43  ;;  %v2185_v24 = vcombine.low %v3264_v47, %v3269_v48  ;;  %v3434_v42 = vld [vmem:[%s3850_s0 + $0x30] sm:$0xff] }
  0x51   :  { %1985 = vmatprep.subr.bf16.mxu0 %v2654_v25  ;;  %v2728_v25 = vld [vmem:[%s3849_s1 + $0x600] ss:$8 sps:$4 sm:$0xff]   ;;  %v3439_v43 = vld [vmem:[%s3850_s0 + $0x70] sm:$0xff] }
  0x52   :  { %v2188_v47 = vcombine.high %v3434_v42, %v3439_v43  ;;  %v2743_v48 = vld [vmem:[%s3849_s1 + $0x230] ss:$8 sps:$4 sm:$0xff]  }
  0x53   :  { %1782 = vmatpush1.bf16.msra.mxu1 %v2649_v26  ;;  %v31_v26 = vld [vmem:[%s3850_s0 + $0x88] sm:$0xff] }
  0x54   :  { %1986 = vmatpush1.bf16.msra.mxu0 %v2652_v27  ;;  %1783 = vmatprep.subr.bf16.mxu1 %v2657_v28  ;;  %v35_v27 = vld [vmem:[%s3850_s0 + $0xa8] sm:$0xff]  ;;  %v2733_v28 = vld [vmem:[%s3849_s1 + $0x214] ss:$8 sps:$4 sm:$0xff]   ;;  %v2194_v30 = vcombine.high %v31_v26, %v31_v26 }
  0x55   :  { %1987 = vmatprep.subr.bf16.mxu0 %v2660_v29  ;;  %v2736_v29 = vld [vmem:[%s3849_s1 + $0x614] ss:$8 sps:$4 sm:$0xff]   ;;  %v2202_v31 = vcombine.high %v35_v27, %v35_v27 }
  0x57   :  { %1784 = vmatpush1.bf16.msra.mxu1 %v2655_v34  ;;  %v2739_v34 = vld [vmem:[%s3849_s1 + $0x224] ss:$8 sps:$4 sm:$0xff]  }
  0x58   :  { %1988 = vmatpush1.bf16.msra.mxu0 %v2658_v35  ;;  %1785 = vmatprep.subr.bf16.mxu1 %v2663_v38  ;;  %v2742_v35 = vld [vmem:[%s3849_s1 + $0x624] ss:$8 sps:$4 sm:$0xff]   ;;  %v3424_v38 = vld [vmem:[%s3850_s0 + $0x10] sm:$0xff] }
  0x59   :  { %1989 = vmatprep.subr.bf16.mxu0 %v2666_v39  ;;  %v3429_v39 = vld [vmem:[%s3850_s0 + $0x50] sm:$0xff] }
  0x5b   :  { %1786 = vmatpush1.bf16.msra.mxu1 %v2661_v40  ;;  %v2193_v40 = vcombine.low %v31_v26, %v31_v26  ;;  %v2812_v26 = vld [vmem:[%s3849_s1 + $0x2e4] ss:$8 sps:$4 sm:$0xff]  }
  0x5c   :  { %1990 = vmatpush1.bf16.msra.mxu0 %v2664_v41  ;;  %1787 = vmatprep.subr.bf16.mxu1 %v2669_v44  ;;  %v2201_v41 = vcombine.low %v35_v27, %v35_v27  ;;  %v2745_v44 = vld [vmem:[%s3849_s1 + $0x234] ss:$8 sps:$4 sm:$0xff]   ;;  %v2816_v27 = vld [vmem:[%s3849_s1 + $0x6e4] ss:$8 sps:$4 sm:$0xff]  }
  0x5d   :  { %1991 = vmatprep.subr.bf16.mxu0 %v2672_v46  ;;  %v2180_v46 = vcombine.high %v3424_v38, %v3429_v39 }
  0x5f   :  { %1788 = vmatpush1.bf16.msra.mxu1 %v2667_v50  ;;  %v2751_v50 = vld [vmem:[%s3849_s1 + $0x244] ss:$8 sps:$4 sm:$0xff]  }
  0x60   :  { %1992 = vmatpush1.bf16.msra.mxu0 %v2670_v51  ;;  %1789 = vmatprep.subr.bf16.mxu1 %v2675_v52  ;;  %v2754_v51 = vld [vmem:[%s3849_s1 + $0x644] ss:$8 sps:$4 sm:$0xff]   ;;  %v2749_v52 = vld [vmem:[%s3849_s1 + $0x240] ss:$8 sps:$4 sm:$0xff]  }
  0x61   :  { %1993 = vmatprep.subr.bf16.mxu0 %v2678_v53  ;;  %v2752_v53 = vld [vmem:[%s3849_s1 + $0x640] ss:$8 sps:$4 sm:$0xff]  }
  0x63   :  { %1790 = vmatpush1.bf16.msra.mxu1 %v2673_v54  ;;  %v2757_v54 = vld [vmem:[%s3849_s1 + $0x254] ss:$8 sps:$4 sm:$0xff]  }
  0x64   :  { %1994 = vmatpush1.bf16.msra.mxu0 %v2676_v55  ;;  %1791 = vmatprep.subr.bf16.mxu1 %v2681_v56  ;;  %v2760_v55 = vld [vmem:[%s3849_s1 + $0x654] ss:$8 sps:$4 sm:$0xff]   ;;  %v2755_v56 = vld [vmem:[%s3849_s1 + $0x250] ss:$8 sps:$4 sm:$0xff]  }
  0x65   :  { %1995 = vmatprep.subr.bf16.mxu0 %v2684_v57  ;;  %v2758_v57 = vld [vmem:[%s3849_s1 + $0x650] ss:$8 sps:$4 sm:$0xff]  }
  0x67   :  { %1792 = vmatpush1.bf16.msra.mxu1 %v2679_v58  ;;  %v2763_v58 = vld [vmem:[%s3849_s1 + $0x264] ss:$8 sps:$4 sm:$0xff]  }
  0x68   :  { %1996 = vmatpush1.bf16.msra.mxu0 %v2682_v59  ;;  %1793 = vmatprep.subr.bf16.mxu1 %v2687_v60  ;;  %v2766_v59 = vld [vmem:[%s3849_s1 + $0x664] ss:$8 sps:$4 sm:$0xff]   ;;  %v2761_v60 = vld [vmem:[%s3849_s1 + $0x260] ss:$8 sps:$4 sm:$0xff]  }
  0x69   :  { %1997 = vmatprep.subr.bf16.mxu0 %v2690_v61  ;;  %v2764_v61 = vld [vmem:[%s3849_s1 + $0x660] ss:$8 sps:$4 sm:$0xff]  }
  0x6b   :  { %1794 = vmatpush1.bf16.msra.mxu1 %v2685_v62  ;;  %v2769_v62 = vld [vmem:[%s3849_s1 + $0x274] ss:$8 sps:$4 sm:$0xff]  }
  0x6c   :  { %1998 = vmatpush1.bf16.msra.mxu0 %v2688_v63  ;;  %1795 = vmatprep.subr.bf16.mxu1 %v2693_v0  ;;  %v2772_v63 = vld [vmem:[%s3849_s1 + $0x674] ss:$8 sps:$4 sm:$0xff]   ;;  %v2767_v0 = vld [vmem:[%s3849_s1 + $0x270] ss:$8 sps:$4 sm:$0xff]  }
  0x6d   :  { %1999 = vmatprep.subr.bf16.mxu0 %v2696_v1  ;;  %v2770_v1 = vld [vmem:[%s3849_s1 + $0x670] ss:$8 sps:$4 sm:$0xff]  }
  0x6f   :  { %1796 = vmatpush1.bf16.msra.mxu1 %v2691_v2  ;;  %v2775_v2 = vld [vmem:[%s3849_s1 + $0x284] ss:$8 sps:$4 sm:$0xff]  }
  0x70   :  { %2000 = vmatpush1.bf16.msra.mxu0 %v2694_v3  ;;  %1797 = vmatprep.subr.bf16.mxu1 %v2699_v4  ;;  %v2778_v3 = vld [vmem:[%s3849_s1 + $0x684] ss:$8 sps:$4 sm:$0xff]   ;;  %v2773_v4 = vld [vmem:[%s3849_s1 + $0x280] ss:$8 sps:$4 sm:$0xff]  }
  0x71   :  { %2001 = vmatprep.subr.bf16.mxu0 %v2702_v5  ;;  %v2776_v5 = vld [vmem:[%s3849_s1 + $0x680] ss:$8 sps:$4 sm:$0xff]  }
  0x73   :  { %1798 = vmatpush1.bf16.msra.mxu1 %v2697_v6  ;;  %v2781_v6 = vld [vmem:[%s3849_s1 + $0x294] ss:$8 sps:$4 sm:$0xff]  }
  0x74   :  { %2002 = vmatpush1.bf16.msra.mxu0 %v2700_v7  ;;  %1799 = vmatprep.subr.bf16.mxu1 %v2705_v8  ;;  %v2784_v7 = vld [vmem:[%s3849_s1 + $0x694] ss:$8 sps:$4 sm:$0xff]   ;;  %v2779_v8 = vld [vmem:[%s3849_s1 + $0x290] ss:$8 sps:$4 sm:$0xff]  }
  0x75   :  { %2003 = vmatprep.subr.bf16.mxu0 %v2708_v9  ;;  %v2782_v9 = vld [vmem:[%s3849_s1 + $0x690] ss:$8 sps:$4 sm:$0xff]  }
  0x77   :  { %1800 = vmatpush1.bf16.msra.mxu1 %v2703_v10  ;;  %v2787_v10 = vld [vmem:[%s3849_s1 + $0x2a4] ss:$8 sps:$4 sm:$0xff]  }
  0x78   :  { %2004 = vmatpush1.bf16.msra.mxu0 %v2706_v11  ;;  %1801 = vmatprep.subr.bf16.mxu1 %v2712_v12  ;;  %v2790_v11 = vld [vmem:[%s3849_s1 + $0x6a4] ss:$8 sps:$4 sm:$0xff]   ;;  %v2785_v12 = vld [vmem:[%s3849_s1 + $0x2a0] ss:$8 sps:$4 sm:$0xff]  }
  0x79   :  { %2005 = vmatprep.subr.bf16.mxu0 %v2716_v13  ;;  %v2788_v13 = vld [vmem:[%s3849_s1 + $0x6a0] ss:$8 sps:$4 sm:$0xff]  }
  0x7b   :  { %1802 = vmatpush1.bf16.msra.mxu1 %v2710_v14  ;;  %v2793_v14 = vld [vmem:[%s3849_s1 + $0x2b4] ss:$8 sps:$4 sm:$0xff]  }
  0x7c   :  { %2006 = vmatpush1.bf16.msra.mxu0 %v2714_v15  ;;  %1803 = vmatprep.subr.bf16.mxu1 %v2721_v16  ;;  %v2796_v15 = vld [vmem:[%s3849_s1 + $0x6b4] ss:$8 sps:$4 sm:$0xff]   ;;  %v2791_v16 = vld [vmem:[%s3849_s1 + $0x2b0] ss:$8 sps:$4 sm:$0xff]  }
  0x7d   :  { %2007 = vmatprep.subr.bf16.mxu0 %v2724_v17  ;;  %v2794_v17 = vld [vmem:[%s3849_s1 + $0x6b0] ss:$8 sps:$4 sm:$0xff]  }
  0x7f   :  { %1804 = vmatpush1.bf16.msra.mxu1 %v2719_v18  ;;  %v2799_v18 = vld [vmem:[%s3849_s1 + $0x2c4] ss:$8 sps:$4 sm:$0xff]  }
  0x80   :  { %2008 = vmatpush1.bf16.msra.mxu0 %v2722_v19  ;;  %1824 = vmatprep.subr.bf16.mxu1 %v2727_v20  ;;  %v2802_v19 = vld [vmem:[%s3849_s1 + $0x6c4] ss:$8 sps:$4 sm:$0xff]   ;;  %v2797_v20 = vld [vmem:[%s3849_s1 + $0x2c0] ss:$8 sps:$4 sm:$0xff]  }
  0x81   :  { %2028 = vmatprep.subr.bf16.mxu0 %v2730_v21  ;;  %v2800_v21 = vld [vmem:[%s3849_s1 + $0x6c0] ss:$8 sps:$4 sm:$0xff]  }
  0x82   :  { %1806 = vmatmul.mubr.bf16.vlgmr.msra.gmra.mrb[0].mxu1 %v2177_v23  ;;  %v2808_v23 = vld [vmem:[%s3849_s1 + $0x6d4] ss:$8 sps:$4 sm:$0xff]  }
  0x83   :  { %2010 = vmatmul.mubr.bf16.vlgmr.msra.gmra.mrb[0].mxu0 %v2185_v24  ;;  %1825 = vmatpush1.bf16.msra.mxu1 %v2725_v22  ;;  %v2805_v22 = vld [vmem:[%s3849_s1 + $0x2d4] ss:$8 sps:$4 sm:$0xff]   ;;  %v2803_v24 = vld [vmem:[%s3849_s1 + $0x2d0] ss:$8 sps:$4 sm:$0xff]  }
  0x84   :  { %2029 = vmatpush1.bf16.msra.mxu0 %v2728_v25  ;;  %1826 = vmatprep.subr.bf16.mxu1 %v2733_v28  ;;  %v2806_v25 = vld [vmem:[%s3849_s1 + $0x6d0] ss:$8 sps:$4 sm:$0xff]   ;;  %v2810_v28 = vld [vmem:[%s3849_s1 + $0x2e0] ss:$8 sps:$4 sm:$0xff]  }
  0x85   :  { %2030 = vmatprep.subr.bf16.mxu0 %v2736_v29  ;;  %1815 = vmatprep.mubr.bf16.mxu1 %v2194_v30  ;;  %v2814_v29 = vld [vmem:[%s3849_s1 + $0x6e0] ss:$8 sps:$4 sm:$0xff]   ;;  %v2821_v30 = vld [vmem:[%s3849_s1 + $0x2f4] ss:$8 sps:$4 sm:$0xff]  }
  0x86   :  { %2019 = vmatprep.mubr.bf16.mxu0 %v2202_v31  ;;  %v2824_v31 = vld [vmem:[%s3849_s1 + $0x6f4] ss:$8 sps:$4 sm:$0xff]  }
  0x87   :  { %1827 = vmatpush1.bf16.msra.mxu1 %v2731_v32  ;;  %v2819_v32 = vld [vmem:[%s3849_s1 + $0x2f0] ss:$8 sps:$4 sm:$0xff]  }
  0x88   :  { %2031 = vmatpush1.bf16.msra.mxu0 %v2734_v33  ;;  %1828 = vmatprep.subr.bf16.mxu1 %v2739_v34  ;;  %v2822_v33 = vld [vmem:[%s3849_s1 + $0x6f0] ss:$8 sps:$4 sm:$0xff]   ;;  %v2827_v34 = vld [vmem:[%s3849_s1 + $0x304] ss:$8 sps:$4 sm:$0xff]  }
  0x89   :  { %2032 = vmatprep.subr.bf16.mxu0 %v2742_v35  ;;  %v2830_v35 = vld [vmem:[%s3849_s1 + $0x704] ss:$8 sps:$4 sm:$0xff]  }
  0x8a   :  { %1816 = vmatmul.mubr.bf16.gmra.mrb[4].mxu1 %v2193_v40  ;;  %v32_v40 = vld [vmem:[%s3850_s0 + $0x90] sm:$0xff] }
  0x8b   :  { %2020 = vmatmul.mubr.bf16.gmra.mrb[4].mxu0 %v2201_v41  ;;  %1829 = vmatpush1.bf16.msra.mxu1 %v2737_v36  ;;  %v2179_v36 = vcombine.low %v3424_v38, %v3429_v39  ;;  %v36_v41 = vld [vmem:[%s3850_s0 + $0xb0] sm:$0xff]  ;;  %v2828_v38 = vld [vmem:[%s3849_s1 + $0x700] ss:$8 sps:$4 sm:$0xff]  }
  0x8c   :  { %2033 = vmatpush1.bf16.msra.mxu0 %v2740_v37  ;;  %1830 = vmatprep.subr.bf16.mxu1 %v2745_v44  ;;  %v2187_v37 = vcombine.low %v3434_v42, %v3439_v43  ;;  %v2825_v44 = vld [vmem:[%s3849_s1 + $0x300] ss:$8 sps:$4 sm:$0xff]   ;;  %v2833_v39 = vld [vmem:[%s3849_s1 + $0x314] ss:$8 sps:$4 sm:$0xff]   ;;  %v2196_v43 = vcombine.high %v32_v40, %v32_v40 }
  0x8d   :  { %2034 = vmatprep.subr.bf16.mxu0 %v2748_v45  ;;  %1856 = vmatprep.mubr.bf16.mxu1 %v2180_v46  ;;  %v2836_v42 = vld [vmem:[%s3849_s1 + $0x714] ss:$8 sps:$4 sm:$0xff]   ;;  %v2204_v45 = vcombine.high %v36_v41, %v36_v41  ;;  %v2831_v46 = vld [vmem:[%s3849_s1 + $0x310] ss:$8 sps:$4 sm:$0xff]  }
  0x8e   :  { %2060 = vmatprep.mubr.bf16.mxu0 %v2188_v47  ;;  %v2834_v47 = vld [vmem:[%s3849_s1 + $0x710] ss:$8 sps:$4 sm:$0xff]  }
  0x8f   :  { %1831 = vmatpush1.bf16.msra.mxu1 %v2743_v48  ;;  %v2839_v48 = vld [vmem:[%s3849_s1 + $0x324] ss:$8 sps:$4 sm:$0xff]  }
  0x90   :  { %2035 = vmatpush1.bf16.msra.mxu0 %v2746_v49  ;;  %1832 = vmatprep.subr.bf16.mxu1 %v2751_v50  ;;  %v2842_v49 = vld [vmem:[%s3849_s1 + $0x724] ss:$8 sps:$4 sm:$0xff]   ;;  %v3644_v50 = vld [vmem:[%s3850_s0 + $0x18] sm:$0xff] }
  0x91   :  { %2036 = vmatprep.subr.bf16.mxu0 %v2754_v51  ;;  %v2195_v51 = vcombine.low %v32_v40, %v32_v40  ;;  %v2903_v40 = vld [vmem:[%s3849_s1 + $0x3d0] ss:$8 sps:$4 sm:$0xff]  }
  0x93   :  { %1833 = vmatpush1.bf16.msra.mxu1 %v2749_v52  ;;  %v2203_v52 = vcombine.low %v36_v41, %v36_v41  ;;  %v2906_v41 = vld [vmem:[%s3849_s1 + $0x7d0] ss:$8 sps:$4 sm:$0xff]  }
  0x94   :  { %2037 = vmatpush1.bf16.msra.mxu0 %v2752_v53  ;;  %1834 = vmatprep.subr.bf16.mxu1 %v2757_v54  ;;  %v3649_v53 = vld [vmem:[%s3850_s0 + $0x58] sm:$0xff] }
  0x95   :  { %2038 = vmatprep.subr.bf16.mxu0 %v2760_v55  ;;  %v3654_v54 = vld [vmem:[%s3850_s0 + $0x38] sm:$0xff] }
  0x96   :  { %v3659_v55 = vld [vmem:[%s3850_s0 + $0x78] sm:$0xff] }
  0x97   :  { %1835 = vmatpush1.bf16.msra.mxu1 %v2755_v56  ;;  %v2837_v56 = vld [vmem:[%s3849_s1 + $0x320] ss:$8 sps:$4 sm:$0xff]  }
  0x98   :  { %2039 = vmatpush1.bf16.msra.mxu0 %v2758_v57  ;;  %1836 = vmatprep.subr.bf16.mxu1 %v2763_v58  ;;  %v2840_v57 = vld [vmem:[%s3849_s1 + $0x720] ss:$8 sps:$4 sm:$0xff]   ;;  %v2845_v58 = vld [vmem:[%s3849_s1 + $0x334] ss:$8 sps:$4 sm:$0xff]  }
  0x99   :  { %2040 = vmatprep.subr.bf16.mxu0 %v2766_v59  ;;  %v2848_v59 = vld [vmem:[%s3849_s1 + $0x734] ss:$8 sps:$4 sm:$0xff]  }
  0x9b   :  { %1837 = vmatpush1.bf16.msra.mxu1 %v2761_v60  ;;  %v2182_v60 = vcombine.high %v3644_v50, %v3649_v53 }
  0x9c   :  { %2041 = vmatpush1.bf16.msra.mxu0 %v2764_v61  ;;  %1838 = vmatprep.subr.bf16.mxu1 %v2769_v62  ;;  %v2190_v61 = vcombine.high %v3654_v54, %v3659_v55  ;;  %v2843_v62 = vld [vmem:[%s3849_s1 + $0x330] ss:$8 sps:$4 sm:$0xff]  }
  0x9d   :  { %2042 = vmatprep.subr.bf16.mxu0 %v2772_v63  ;;  %v2846_v63 = vld [vmem:[%s3849_s1 + $0x730] ss:$8 sps:$4 sm:$0xff]  }
  0x9f   :  { %1839 = vmatpush1.bf16.msra.mxu1 %v2767_v0  ;;  %v2851_v0 = vld [vmem:[%s3849_s1 + $0x344] ss:$8 sps:$4 sm:$0xff]  }
  0xa0   :  { %2043 = vmatpush1.bf16.msra.mxu0 %v2770_v1  ;;  %1840 = vmatprep.subr.bf16.mxu1 %v2775_v2  ;;  %v2854_v1 = vld [vmem:[%s3849_s1 + $0x744] ss:$8 sps:$4 sm:$0xff]   ;;  %v2849_v2 = vld [vmem:[%s3849_s1 + $0x340] ss:$8 sps:$4 sm:$0xff]  }
  0xa1   :  { %2044 = vmatprep.subr.bf16.mxu0 %v2778_v3  ;;  %v2852_v3 = vld [vmem:[%s3849_s1 + $0x740] ss:$8 sps:$4 sm:$0xff]  }
  0xa3   :  { %1841 = vmatpush1.bf16.msra.mxu1 %v2773_v4  ;;  %v2857_v4 = vld [vmem:[%s3849_s1 + $0x354] ss:$8 sps:$4 sm:$0xff]  }
  0xa4   :  { %2045 = vmatpush1.bf16.msra.mxu0 %v2776_v5  ;;  %1842 = vmatprep.subr.bf16.mxu1 %v2781_v6  ;;  %v2860_v5 = vld [vmem:[%s3849_s1 + $0x754] ss:$8 sps:$4 sm:$0xff]   ;;  %v2855_v6 = vld [vmem:[%s3849_s1 + $0x350] ss:$8 sps:$4 sm:$0xff]  }
  0xa5   :  { %2046 = vmatprep.subr.bf16.mxu0 %v2784_v7  ;;  %v2858_v7 = vld [vmem:[%s3849_s1 + $0x750] ss:$8 sps:$4 sm:$0xff]  }
  0xa7   :  { %1843 = vmatpush1.bf16.msra.mxu1 %v2779_v8  ;;  %v2863_v8 = vld [vmem:[%s3849_s1 + $0x364] ss:$8 sps:$4 sm:$0xff]  }
  0xa8   :  { %2047 = vmatpush1.bf16.msra.mxu0 %v2782_v9  ;;  %1844 = vmatprep.subr.bf16.mxu1 %v2787_v10  ;;  %v2866_v9 = vld [vmem:[%s3849_s1 + $0x764] ss:$8 sps:$4 sm:$0xff]   ;;  %v2861_v10 = vld [vmem:[%s3849_s1 + $0x360] ss:$8 sps:$4 sm:$0xff]  }
  0xa9   :  { %2048 = vmatprep.subr.bf16.mxu0 %v2790_v11  ;;  %v2864_v11 = vld [vmem:[%s3849_s1 + $0x760] ss:$8 sps:$4 sm:$0xff]  }
  0xab   :  { %1845 = vmatpush1.bf16.msra.mxu1 %v2785_v12  ;;  %v2869_v12 = vld [vmem:[%s3849_s1 + $0x374] ss:$8 sps:$4 sm:$0xff]  }
  0xac   :  { %2049 = vmatpush1.bf16.msra.mxu0 %v2788_v13  ;;  %1846 = vmatprep.subr.bf16.mxu1 %v2793_v14  ;;  %v2872_v13 = vld [vmem:[%s3849_s1 + $0x774] ss:$8 sps:$4 sm:$0xff]   ;;  %v2867_v14 = vld [vmem:[%s3849_s1 + $0x370] ss:$8 sps:$4 sm:$0xff]  }
  0xad   :  { %2050 = vmatprep.subr.bf16.mxu0 %v2796_v15  ;;  %v2870_v15 = vld [vmem:[%s3849_s1 + $0x770] ss:$8 sps:$4 sm:$0xff]  }
  0xaf   :  { %1847 = vmatpush1.bf16.msra.mxu1 %v2791_v16  ;;  %v2875_v16 = vld [vmem:[%s3849_s1 + $0x384] ss:$8 sps:$4 sm:$0xff]  }
  0xb0   :  { %2051 = vmatpush1.bf16.msra.mxu0 %v2794_v17  ;;  %1848 = vmatprep.subr.bf16.mxu1 %v2799_v18  ;;  %v2878_v17 = vld [vmem:[%s3849_s1 + $0x784] ss:$8 sps:$4 sm:$0xff]   ;;  %v2873_v18 = vld [vmem:[%s3849_s1 + $0x380] ss:$8 sps:$4 sm:$0xff]  }
  0xb1   :  { %2052 = vmatprep.subr.bf16.mxu0 %v2802_v19  ;;  %v2876_v19 = vld [vmem:[%s3849_s1 + $0x780] ss:$8 sps:$4 sm:$0xff]  }
  0xb3   :  { %1849 = vmatpush1.bf16.msra.mxu1 %v2797_v20  ;;  %v2881_v20 = vld [vmem:[%s3849_s1 + $0x394] ss:$8 sps:$4 sm:$0xff]  }
  0xb4   :  { %2053 = vmatpush1.bf16.msra.mxu0 %v2800_v21  ;;  %1850 = vmatprep.subr.bf16.mxu1 %v2805_v22  ;;  %v2884_v21 = vld [vmem:[%s3849_s1 + $0x794] ss:$8 sps:$4 sm:$0xff]   ;;  %v2879_v22 = vld [vmem:[%s3849_s1 + $0x390] ss:$8 sps:$4 sm:$0xff]  }
  0xb5   :  { %2054 = vmatprep.subr.bf16.mxu0 %v2808_v23  ;;  %v2882_v23 = vld [vmem:[%s3849_s1 + $0x790] ss:$8 sps:$4 sm:$0xff]  }
  0xb7   :  { %1851 = vmatpush1.bf16.msra.mxu1 %v2803_v24  ;;  %v2887_v24 = vld [vmem:[%s3849_s1 + $0x3a4] ss:$8 sps:$4 sm:$0xff]  }
  0xb8   :  { %2055 = vmatpush1.bf16.msra.mxu0 %v2806_v25  ;;  %1852 = vmatprep.subr.bf16.mxu1 %v2812_v26  ;;  %v2890_v25 = vld [vmem:[%s3849_s1 + $0x7a4] ss:$8 sps:$4 sm:$0xff]   ;;  %v2885_v26 = vld [vmem:[%s3849_s1 + $0x3a0] ss:$8 sps:$4 sm:$0xff]  }
  0xb9   :  { %2056 = vmatprep.subr.bf16.mxu0 %v2816_v27  ;;  %v2888_v27 = vld [vmem:[%s3849_s1 + $0x7a0] ss:$8 sps:$4 sm:$0xff]  }
  0xbb   :  { %1853 = vmatpush1.bf16.msra.mxu1 %v2810_v28  ;;  %v2893_v28 = vld [vmem:[%s3849_s1 + $0x3b4] ss:$8 sps:$4 sm:$0xff]  }
  0xbc   :  { %2057 = vmatpush1.bf16.msra.mxu0 %v2814_v29  ;;  %1854 = vmatprep.subr.bf16.mxu1 %v2821_v30  ;;  %v2896_v29 = vld [vmem:[%s3849_s1 + $0x7b4] ss:$8 sps:$4 sm:$0xff]   ;;  %v2891_v30 = vld [vmem:[%s3849_s1 + $0x3b0] ss:$8 sps:$4 sm:$0xff]  }
  0xbd   :  { %2058 = vmatprep.subr.bf16.mxu0 %v2824_v31  ;;  %v2894_v31 = vld [vmem:[%s3849_s1 + $0x7b0] ss:$8 sps:$4 sm:$0xff]  }
  0xbf   :  { %1855 = vmatpush1.bf16.msra.mxu1 %v2819_v32  ;;  %v2899_v32 = vld [vmem:[%s3849_s1 + $0x3c4] ss:$8 sps:$4 sm:$0xff]  }
  0xc0   :  { %2059 = vmatpush1.bf16.msra.mxu0 %v2822_v33  ;;  %1875 = vmatprep.subr.bf16.mxu1 %v2827_v34  ;;  %v2902_v33 = vld [vmem:[%s3849_s1 + $0x7c4] ss:$8 sps:$4 sm:$0xff]   ;;  %v2897_v34 = vld [vmem:[%s3849_s1 + $0x3c0] ss:$8 sps:$4 sm:$0xff]  }
  0xc1   :  { %2079 = vmatprep.subr.bf16.mxu0 %v2830_v35  ;;  %v2900_v35 = vld [vmem:[%s3849_s1 + $0x7c0] ss:$8 sps:$4 sm:$0xff]  }
  0xc2   :  { %1857 = vmatmul.mubr.bf16.vlgmr.msra.gmra.mrb[0].mxu1 %v2179_v36  ;;  %v2905_v36 = vld [vmem:[%s3849_s1 + $0x3d4] ss:$8 sps:$4 sm:$0xff]  }
  0xc3   :  { %2061 = vmatmul.mubr.bf16.vlgmr.msra.gmra.mrb[0].mxu0 %v2187_v37  ;;  %1876 = vmatpush1.bf16.msra.mxu1 %v2825_v44  ;;  %v2908_v37 = vld [vmem:[%s3849_s1 + $0x7d4] ss:$8 sps:$4 sm:$0xff]   ;;  %v2914_v44 = vld [vmem:[%s3849_s1 + $0x3e4] ss:$8 sps:$4 sm:$0xff]  }
  0xc4   :  { %2080 = vmatpush1.bf16.msra.mxu0 %v2828_v38  ;;  %1877 = vmatprep.subr.bf16.mxu1 %v2833_v39  ;;  %v2918_v38 = vld [vmem:[%s3849_s1 + $0x7e4] ss:$8 sps:$4 sm:$0xff]   ;;  %v2912_v39 = vld [vmem:[%s3849_s1 + $0x3e0] ss:$8 sps:$4 sm:$0xff]  }
  0xc5   :  { %2081 = vmatprep.subr.bf16.mxu0 %v2836_v42  ;;  %1866 = vmatprep.mubr.bf16.mxu1 %v2196_v43  ;;  %v2916_v42 = vld [vmem:[%s3849_s1 + $0x7e0] ss:$8 sps:$4 sm:$0xff]   ;;  %v2921_v43 = vld [vmem:[%s3849_s1 + $0x3f4] ss:$8 sps:$4 sm:$0xff]  }
  0xc6   :  { %2070 = vmatprep.mubr.bf16.mxu0 %v2204_v45  ;;  %v2924_v45 = vld [vmem:[%s3849_s1 + $0x7f4] ss:$8 sps:$4 sm:$0xff]  }
  0xc7   :  { %1878 = vmatpush1.bf16.msra.mxu1 %v2831_v46  ;;  %v2919_v46 = vld [vmem:[%s3849_s1 + $0x3f0] ss:$8 sps:$4 sm:$0xff]  }
  0xc8   :  { %2082 = vmatpush1.bf16.msra.mxu0 %v2834_v47  ;;  %1879 = vmatprep.subr.bf16.mxu1 %v2839_v48  ;;  %v2922_v47 = vld [vmem:[%s3849_s1 + $0x7f0] ss:$8 sps:$4 sm:$0xff]  }
  0xc9   :  { %2083 = vmatprep.subr.bf16.mxu0 %v2842_v49  ;;  %v33_v48 = vld [vmem:[%s3850_s0 + $0x98] sm:$0xff] }
  0xca   :  { %1867 = vmatmul.mubr.bf16.gmra.mrb[4].mxu1 %v2195_v51  ;;  %v37_v49 = vld [vmem:[%s3850_s0 + $0xb8] sm:$0xff]  ;;  %v2181_v51 = vcombine.low %v3644_v50, %v3649_v53  ;;  %v294_v50 = vld [vmem:[%s3851_s2] sm:$0x3] }
  0xcb   :  { %2071 = vmatmul.mubr.bf16.gmra.mrb[4].mxu0 %v2203_v52  ;;  %1880 = vmatpush1.bf16.msra.mxu1 %v2837_v56  ;;  %v2189_v52 = vcombine.low %v3654_v54, %v3659_v55  ;;  %v2198_v56 = vcombine.high %v33_v48, %v33_v48 }
  0xcc   :  { %2084 = vmatpush1.bf16.msra.mxu0 %v2840_v57  ;;  %1881 = vmatprep.subr.bf16.mxu1 %v2845_v58  ;;  %v2206_v57 = vcombine.high %v37_v49, %v37_v49  ;;  %v2197_v58 = vcombine.low %v33_v48, %v33_v48 }
  0xcd   :  { %2085 = vmatprep.subr.bf16.mxu0 %v2848_v59  ;;  %1907 = vmatprep.mubr.bf16.mxu1 %v2182_v60  ;;  %v2205_v59 = vcombine.low %v37_v49, %v37_v49  ;;  %v296_v60 = vlaneseq }
  0xce   :  { %2111 = vmatprep.mubr.bf16.mxu0 %v2190_v61 }
  0xcf   :  { %1882 = vmatpush1.bf16.msra.mxu1 %v2843_v62  ;;  %v297_v61 = vshrl.u32 %v296_v60, 7 }
  0xd0   :  { %2086 = vmatpush1.bf16.msra.mxu0 %v2846_v63  ;;  %1883 = vmatprep.subr.bf16.mxu1 %v2851_v0 }
  0xd1   :  { %2087 = vmatprep.subr.bf16.mxu0 %v2854_v1  ;;  %v298_v62 = vsub.s32 0, %v297_v61  ;;  %v302_v53 = vsub.s32 1, %v297_v61 }
  0xd3   :  { %1884 = vmatpush1.bf16.msra.mxu1 %v2849_v2  ;;  %v299_v54 = vrot.slane %v294_v50, %v298_v62  ;;  %v303_v55 = vrot.slane %v294_v50, %v302_v53 }
  0xd4   :  { %2088 = vmatpush1.bf16.msra.mxu0 %v2852_v3  ;;  %1885 = vmatprep.subr.bf16.mxu1 %v2857_v4 }
  0xd5   :  { %2089 = vmatprep.subr.bf16.mxu0 %v2860_v5 }
  0xd7   :  { %1886 = vmatpush1.bf16.msra.mxu1 %v2855_v6 }
  0xd8   :  { %2090 = vmatpush1.bf16.msra.mxu0 %v2858_v7  ;;  %1887 = vmatprep.subr.bf16.mxu1 %v2863_v8 }
  0xd9   :  { %2091 = vmatprep.subr.bf16.mxu0 %v2866_v9 }
  0xdb   :  { %1888 = vmatpush1.bf16.msra.mxu1 %v2861_v10 }
  0xdc   :  { %2092 = vmatpush1.bf16.msra.mxu0 %v2864_v11  ;;  %1889 = vmatprep.subr.bf16.mxu1 %v2869_v12 }
  0xdd   :  { %2093 = vmatprep.subr.bf16.mxu0 %v2872_v13 }
  0xdf   :  { %1890 = vmatpush1.bf16.msra.mxu1 %v2867_v14 }
  0xe0   :  { %2094 = vmatpush1.bf16.msra.mxu0 %v2870_v15  ;;  %1891 = vmatprep.subr.bf16.mxu1 %v2875_v16 }
  0xe1   :  { %2095 = vmatprep.subr.bf16.mxu0 %v2878_v17 }
  0xe3   :  { %1892 = vmatpush1.bf16.msra.mxu1 %v2873_v18 }
  0xe4   :  { %2096 = vmatpush1.bf16.msra.mxu0 %v2876_v19  ;;  %1893 = vmatprep.subr.bf16.mxu1 %v2881_v20 }
  0xe5   :  { %2097 = vmatprep.subr.bf16.mxu0 %v2884_v21 }
  0xe7   :  { %1894 = vmatpush1.bf16.msra.mxu1 %v2879_v22 }
  0xe8   :  { %2098 = vmatpush1.bf16.msra.mxu0 %v2882_v23  ;;  %1895 = vmatprep.subr.bf16.mxu1 %v2887_v24 }
  0xe9   :  { %2099 = vmatprep.subr.bf16.mxu0 %v2890_v25 }
  0xeb   :  { %1896 = vmatpush1.bf16.msra.mxu1 %v2885_v26 }
  0xec   :  { %2100 = vmatpush1.bf16.msra.mxu0 %v2888_v27  ;;  %1897 = vmatprep.subr.bf16.mxu1 %v2893_v28 }
  0xed   :  { %2101 = vmatprep.subr.bf16.mxu0 %v2896_v29 }
  0xef   :  { %1898 = vmatpush1.bf16.msra.mxu1 %v2891_v30 }
  0xf0   :  { %2102 = vmatpush1.bf16.msra.mxu0 %v2894_v31  ;;  %1899 = vmatprep.subr.bf16.mxu1 %v2899_v32 }
  0xf1   :  { %2103 = vmatprep.subr.bf16.mxu0 %v2902_v33 }
  0xf3   :  { %1900 = vmatpush1.bf16.msra.mxu1 %v2897_v34 }
  0xf4   :  { %2104 = vmatpush1.bf16.msra.mxu0 %v2900_v35  ;;  %1901 = vmatprep.subr.bf16.mxu1 %v2905_v36 }
  0xf5   :  { %2105 = vmatprep.subr.bf16.mxu0 %v2908_v37 }
  0xf7   :  { %1902 = vmatpush1.bf16.msra.mxu1 %v2903_v40 }
  0xf8   :  { %2106 = vmatpush1.bf16.msra.mxu0 %v2906_v41  ;;  %1903 = vmatprep.subr.bf16.mxu1 %v2914_v44 }
  0xf9   :  { %2107 = vmatprep.subr.bf16.mxu0 %v2918_v38 }
  0xfb   :  { %1904 = vmatpush1.bf16.msra.mxu1 %v2912_v39 }
  0xfc   :  { %2108 = vmatpush1.bf16.msra.mxu0 %v2916_v42  ;;  %1905 = vmatprep.subr.bf16.mxu1 %v2921_v43 }
  0xfd   :  { %2109 = vmatprep.subr.bf16.mxu0 %v2924_v45 }
  0xff   :  { %1906 = vmatpush1.bf16.msra.mxu1 %v2919_v46 }
 0x100   :  { %2110 = vmatpush1.bf16.msra.mxu0 %v2922_v47 }
 0x102   :  { %1908 = vmatmul.mubr.bf16.vlgmr.msra.gmra.mrb[0].mxu1 %v2181_v51 }
 0x103   :  { %2112 = vmatmul.mubr.bf16.vlgmr.msra.gmra.mrb[0].mxu0 %v2189_v52  ;;  %1917 = vmatprep.mubr.bf16.mxu1 %v2198_v56 }
 0x104   :  { %2121 = vmatprep.mubr.bf16.mxu0 %v2206_v57 }
 0x10a   :  { %1918 = vmatmul.mubr.bf16.gmra.mrb[4].mxu1 %v2197_v58 }
 0x10b   :  { %2122 = vmatmul.mubr.bf16.gmra.mrb[4].mxu0 %v2205_v59 }
 0x1d5   :  { %v1909_v63 = vpop.f32.mrb[0].mxu1 }
 0x1d6   :  { %v2113_v0 = vpop.f32.mrb[0].mxu0  ;;  %v2469_v1 = vadd.f32 %v1909_v63, %v299_v54  ;;  %v1911_v2 = vpop.f32.mrb[1].mxu1 }
 0x1d7   :  { %v2115_v3 = vpop.f32.mrb[1].mxu0  ;;  %v2471_v4 = vadd.f32 %v1911_v2, %v303_v55  ;;  %v1913_v5 = vpop.f32.mrb[2].mxu1 }
 0x1d8   :  { %v2117_v6 = vpop.f32.mrb[2].mxu0  ;;  %v2470_v7 = vadd.f32 %v2469_v1, %v2113_v0  ;;  %v2473_v8 = vadd.f32 %v1913_v5, %v299_v54  ;;  %v1915_v9 = vpop.f32.mrb[3].mxu1 }
 0x1d9   :  { %v2119_v10 = vpop.f32.mrb[3].mxu0  ;;  %v2472_v11 = vadd.f32 %v2471_v4, %v2115_v3  ;;  %v2475_v12 = vadd.f32 %v1915_v9, %v303_v55 }
 0x1da   :  { %vm2130_vm0 = vcmp.ge.f32.partialorder %v2470_v7, 0.0  ;;  %v2136_v13 = vmul.f32 0.2, %v2470_v7  ;;  %v2474_v14 = vadd.f32 %v2473_v8, %v2117_v6 }
 0x1db   :  { %vm2131_vm1 = vcmp.ge.f32.partialorder %v2472_v11, 0.0  ;;  %v2137_v15 = vmul.f32 0.2, %v2472_v11  ;;  %v2476_v16 = vadd.f32 %v2475_v12, %v2119_v10 }
 0x1dc   :  { %v2142_v17 = vsel %vm2130_vm0, %v2470_v7, %v2136_v13  ;;  %vm2132_vm2 = vcmp.ge.f32.partialorder %v2474_v14, 0.0  ;;  %v2138_v18 = vmul.f32 0.2, %v2474_v14 }
 0x1dd   :  { %v2143_v19 = vsel %vm2131_vm1, %v2472_v11, %v2137_v15  ;;  %vm2133_vm3 = vcmp.ge.f32.partialorder %v2476_v16, 0.0  ;;  %v2139_v20 = vmul.f32 0.2, %v2476_v16  ;;  %v1919_v21 = vpop.f32.mrb[4].mxu1 }
 0x1de   :  { %v2123_v22 = vpop.f32.mrb[4].mxu0  ;;  %v2466_v23 = vpack.c.bf16 %v2143_v19, %v2142_v17  ;;  %v2144_v24 = vsel %vm2132_vm2, %v2474_v14, %v2138_v18  ;;  %v2477_v25 = vadd.f32 %v1919_v21, %v299_v54  ;;  %v1921_v26 = vpop.f32.mrb[5].mxu1 }
 0x1df   :  { %v2125_v27 = vpop.f32.mrb[5].mxu0  ;;  %v2145_v28 = vsel %vm2133_vm3, %v2476_v16, %v2139_v20  ;;  %v2479_v29 = vadd.f32 %v1921_v26, %v303_v55  ;;  %v1923_v30 = vpop.f32.mrb[6].mxu1 }
 0x1e0   :  { %v2127_v31 = vpop.f32.mrb[6].mxu0  ;;  %2168 = vst [vmem:[%s3852_s3] sm:$0xff] %v2466_v23  ;;  %v2467_v32 = vpack.c.bf16 %v2145_v28, %v2144_v24  ;;  %v2478_v33 = vadd.f32 %v2477_v25, %v2123_v22  ;;  %v1924_v34 = vpop.f32.mrb[7].mxu1 }
 0x1e1   :  { %v2128_v35 = vpop.f32.mrb[7].mxu0  ;;  %v2480_v36 = vadd.f32 %v2479_v29, %v2125_v27 }
 0x1e2   :  { %2169 = vst [vmem:[%s3852_s3 + $0x8] sm:$0xff] %v2467_v32  ;;  %vm2134_vm4 = vcmp.ge.f32.partialorder %v2478_v33, 0.0  ;;  %v2140_v37 = vmul.f32 0.2, %v2478_v33 }
 0x1e3   :  { %vm2135_vm5 = vcmp.ge.f32.partialorder %v2480_v36, 0.0  ;;  %v2141_v40 = vmul.f32 0.2, %v2480_v36 }
 0x1e4   :  { %v2146_v41 = vsel %vm2134_vm4, %v2478_v33, %v2140_v37 }
 0x1e5   :  { %v2147_v44 = vsel %vm2135_vm5, %v2480_v36, %v2141_v40 }
 0x1e6   :  { %v2468_v38 = vpack.c.bf16 %v2147_v44, %v2146_v41 }
 0x1e8   :  { %2170 = vst [vmem:[%s3852_s3 + $0x10] sm:$0xff] %v2468_v38 }

// kernel: dis_forward.9
= control target key start
LH: loop header
LB: loop body
LE: loop exit
PB: predicated region body
PF: predicated region fallthrough
CT: control target
= control target key end

     0   :  { %s9966_s12 = smov 0   ;;  %s9968_s13 = smov 0   ;;  %s11720_s0 = inlined_call_operand.vmem [shape: bf16[8,4096], index: 0, kind: input, shape index: {}]   ;;  %s11721_s1 = inlined_call_operand.vmem [shape: bf16[4096,512], index: 1, kind: input, shape index: {}]   ;;  %s11722_s2 = inlined_call_operand.vmem [shape: f32[1,512], index: 2, kind: input, shape index: {}]   ;;  %s11723_s3 = inlined_call_operand.vmem [shape: bf16[8,512], index: 3, kind: output, shape index: {}]  }
   0x1   :  { %s9970_s14 = smov 0   ;;  %s9972_s15 = smov 0  }
   0x2   :  { %s9974_s16 = smov 0  }
   0x3 LB: > { %s28_s17 = sadd.s32 1, %s9940_s15  ;;  %p76_p1 = scmp.ne.s32.totalorder %s9932_s13, %s9928_s12  ;;  %s9944_s16 = sphi %s9974_s16, %s13_s16   ;;  %s9940_s15 = sphi %s9972_s15, %s11727_s15   ;;  %s9936_s14 = sphi %s9970_s14, %s11726_s14   ;;  %s9932_s13 = sphi %s9968_s13, %s11725_s13   ;;  %s9928_s12 = sphi %s9966_s12, %s11724_s12  }
   0x4   : > { %p30_p0 = scmp.ge.s32.totalorder %s28_s17, 2  ;;  %p77_p2 = scmp.eq.s32.totalorder %s9944_s16, 0 }
   0x5   : > { %s69_s19 = sadd.s32 1, %s9932_s13  ;;  %p8448_p5 = scmp.ge.s32.totalorder %s9944_s16, 2 }
   0x6   : > { %s11729_s17 = smov (%p30_p0, %s28_s17), 0  ;;  %p78_p3 = por %p77_p2, %p76_p1 }
   0x7   : > { %s65_s18 = ssub.s32 %s9940_s15, %s11729_s17  ;;  %169 = sbr.rel (%p8448_p5) target bundleno = 274 (0x112), region = 20 }
   0x8   : > { %p67_p4 = scmp.eq.s32.totalorder %s65_s18, 0 }
   0xa   : > { %s10001_s20 = scalar_select %p67_p4, %s9932_s13, %s69_s19  }
   0xe   : > { %172 = sbr.rel (!%p78_p3) target bundleno = 274 (0x112), region = 24  ;;  %s174_s21 = sand.u32 (%p78_p3), 1, %s9932_s13  }
   0xf   : > { %s9004_s22 = sshll.u32 (%p78_p3), %s9940_s15, 3  ;;  %s8449_s23 = sshll.u32 (%p78_p3), %s174_s21, 12 }
  0x10   : > { %s10009_s26 = scalar_lea.vmem (%p78_p3), %s11721_s1, %s9004_s22  ;;  %s10014_s27 = scalar_lea.vmem (%p78_p3), [#allocation2], %s8449_s23 }
  0x11   : > { %v1235_v0 = vld [vmem:[%s10009_s26] sm:$0xff] (%p78_p3)  ;;  %v1237_v1 = vld [vmem:[%s10009_s26 + $0x10] sm:$0xff] (%p78_p3) }
  0x12   : > { %v1239_v2 = vld [vmem:[%s10009_s26 + $0x20] sm:$0xff] (%p78_p3)  ;;  %1236 = vst [vmem:[%s10014_s27] sm:$0xff] (%p78_p3), %v1235_v0  ;;  %1238 = vst [vmem:[%s10014_s27 + $0x8] sm:$0xff] (%p78_p3), %v1237_v1  ;;  %v1241_v3 = vld [vmem:[%s10009_s26 + $0x30] sm:$0xff] (%p78_p3) }
  0x13   : > { %1240 = vst [vmem:[%s10014_s27 + $0x10] sm:$0xff] (%p78_p3), %v1239_v2  ;;  %v1243_v4 = vld [vmem:[%s10009_s26 + $0x40] sm:$0xff] (%p78_p3)  ;;  %v1245_v5 = vld [vmem:[%s10009_s26 + $0x50] sm:$0xff] (%p78_p3)  ;;  %1242 = vst [vmem:[%s10014_s27 + $0x18] sm:$0xff] (%p78_p3), %v1241_v3 }
  0x14   : > { %1244 = vst [vmem:[%s10014_s27 + $0x20] sm:$0xff] (%p78_p3), %v1243_v4  ;;  %1246 = vst [vmem:[%s10014_s27 + $0x28] sm:$0xff] (%p78_p3), %v1245_v5  ;;  %v1247_v6 = vld [vmem:[%s10009_s26 + $0x60] sm:$0xff] (%p78_p3)  ;;  %v1249_v7 = vld [vmem:[%s10009_s26 + $0x70] sm:$0xff] (%p78_p3) }
  0x15   : > { %v1251_v8 = vld [vmem:[%s10009_s26 + $0x80] sm:$0xff]  ;;  %1248 = vst [vmem:[%s10014_s27 + $0x30] sm:$0xff] %v1247_v6  ;;  %1250 = vst [vmem:[%s10014_s27 + $0x38] sm:$0xff] %v1249_v7  ;;  %v1253_v9 = vld [vmem:[%s10009_s26 + $0x90] sm:$0xff] }
  0x16   : > { %1252 = vst [vmem:[%s10014_s27 + $0x40] sm:$0xff] %v1251_v8  ;;  %v1255_v10 = vld [vmem:[%s10009_s26 + $0xa0] sm:$0xff]  ;;  %v1257_v11 = vld [vmem:[%s10009_s26 + $0xb0] sm:$0xff]  ;;  %1254 = vst [vmem:[%s10014_s27 + $0x48] sm:$0xff] %v1253_v9 }
  0x17   : > { %1256 = vst [vmem:[%s10014_s27 + $0x50] sm:$0xff] %v1255_v10  ;;  %1258 = vst [vmem:[%s10014_s27 + $0x58] sm:$0xff] %v1257_v11  ;;  %v1259_v12 = vld [vmem:[%s10009_s26 + $0xc0] sm:$0xff]  ;;  %v1261_v13 = vld [vmem:[%s10009_s26 + $0xd0] sm:$0xff] }
  0x18   : > { %v1263_v14 = vld [vmem:[%s10009_s26 + $0xe0] sm:$0xff]  ;;  %1260 = vst [vmem:[%s10014_s27 + $0x60] sm:$0xff] %v1259_v12  ;;  %1262 = vst [vmem:[%s10014_s27 + $0x68] sm:$0xff] %v1261_v13  ;;  %v1265_v15 = vld [vmem:[%s10009_s26 + $0xf0] sm:$0xff] }
  0x19   : > { %1264 = vst [vmem:[%s10014_s27 + $0x70] sm:$0xff] %v1263_v14  ;;  %v1267_v16 = vld [vmem:[%s10009_s26 + $0x100] sm:$0xff]  ;;  %v1269_v17 = vld [vmem:[%s10009_s26 + $0x110] sm:$0xff]  ;;  %1266 = vst [vmem:[%s10014_s27 + $0x78] sm:$0xff] %v1265_v15 }
  0x1a   : > { %1268 = vst [vmem:[%s10014_s27 + $0x80] sm:$0xff] %v1267_v16  ;;  %1270 = vst [vmem:[%s10014_s27 + $0x88] sm:$0xff] %v1269_v17  ;;  %v1271_v18 = vld [vmem:[%s10009_s26 + $0x120] sm:$0xff]  ;;  %v1273_v19 = vld [vmem:[%s10009_s26 + $0x130] sm:$0xff] }
  0x1b   : > { %v1275_v20 = vld [vmem:[%s10009_s26 + $0x140] sm:$0xff]  ;;  %1272 = vst [vmem:[%s10014_s27 + $0x90] sm:$0xff] %v1271_v18  ;;  %1274 = vst [vmem:[%s10014_s27 + $0x98] sm:$0xff] %v1273_v19  ;;  %v1277_v21 = vld [vmem:[%s10009_s26 + $0x150] sm:$0xff] }
  0x1c   : > { %1276 = vst [vmem:[%s10014_s27 + $0xa0] sm:$0xff] %v1275_v20  ;;  %v1279_v22 = vld [vmem:[%s10009_s26 + $0x160] sm:$0xff]  ;;  %v1281_v23 = vld [vmem:[%s10009_s26 + $0x170] sm:$0xff]  ;;  %1278 = vst [vmem:[%s10014_s27 + $0xa8] sm:$0xff] %v1277_v21 }
  0x1d   : > { %1280 = vst [vmem:[%s10014_s27 + $0xb0] sm:$0xff] %v1279_v22  ;;  %1282 = vst [vmem:[%s10014_s27 + $0xb8] sm:$0xff] %v1281_v23  ;;  %v1283_v24 = vld [vmem:[%s10009_s26 + $0x180] sm:$0xff]  ;;  %v1285_v25 = vld [vmem:[%s10009_s26 + $0x190] sm:$0xff] }
  0x1e   : > { %v1287_v26 = vld [vmem:[%s10009_s26 + $0x1a0] sm:$0xff]  ;;  %1284 = vst [vmem:[%s10014_s27 + $0xc0] sm:$0xff] %v1283_v24  ;;  %1286 = vst [vmem:[%s10014_s27 + $0xc8] sm:$0xff] %v1285_v25  ;;  %v1289_v27 = vld [vmem:[%s10009_s26 + $0x1b0] sm:$0xff] }
  0x1f   : > { %1288 = vst [vmem:[%s10014_s27 + $0xd0] sm:$0xff] %v1287_v26  ;;  %v1291_v28 = vld [vmem:[%s10009_s26 + $0x1c0] sm:$0xff]  ;;  %v1293_v29 = vld [vmem:[%s10009_s26 + $0x1d0] sm:$0xff]  ;;  %1290 = vst [vmem:[%s10014_s27 + $0xd8] sm:$0xff] %v1289_v27 }
  0x20   : > { %1292 = vst [vmem:[%s10014_s27 + $0xe0] sm:$0xff] %v1291_v28  ;;  %1294 = vst [vmem:[%s10014_s27 + $0xe8] sm:$0xff] %v1293_v29  ;;  %v1295_v30 = vld [vmem:[%s10009_s26 + $0x1e0] sm:$0xff]  ;;  %v1297_v31 = vld [vmem:[%s10009_s26 + $0x1f0] sm:$0xff] }
  0x21   : > { %v1299_v32 = vld [vmem:[%s10009_s26 + $0x200] sm:$0xff]  ;;  %1296 = vst [vmem:[%s10014_s27 + $0xf0] sm:$0xff] %v1295_v30  ;;  %1298 = vst [vmem:[%s10014_s27 + $0xf8] sm:$0xff] %v1297_v31  ;;  %v1301_v33 = vld [vmem:[%s10009_s26 + $0x210] sm:$0xff] }
  0x22   : > { %1300 = vst [vmem:[%s10014_s27 + $0x100] sm:$0xff] %v1299_v32  ;;  %v1303_v34 = vld [vmem:[%s10009_s26 + $0x220] sm:$0xff]  ;;  %v1305_v35 = vld [vmem:[%s10009_s26 + $0x230] sm:$0xff]  ;;  %1302 = vst [vmem:[%s10014_s27 + $0x108] sm:$0xff] %v1301_v33 }
  0x23   : > { %1304 = vst [vmem:[%s10014_s27 + $0x110] sm:$0xff] %v1303_v34  ;;  %1306 = vst [vmem:[%s10014_s27 + $0x118] sm:$0xff] %v1305_v35  ;;  %v1307_v36 = vld [vmem:[%s10009_s26 + $0x240] sm:$0xff]  ;;  %v1309_v37 = vld [vmem:[%s10009_s26 + $0x250] sm:$0xff] }
  0x24   : > { %v1311_v38 = vld [vmem:[%s10009_s26 + $0x260] sm:$0xff]  ;;  %1308 = vst [vmem:[%s10014_s27 + $0x120] sm:$0xff] %v1307_v36  ;;  %1310 = vst [vmem:[%s10014_s27 + $0x128] sm:$0xff] %v1309_v37  ;;  %v1313_v39 = vld [vmem:[%s10009_s26 + $0x270] sm:$0xff] }
  0x25   : > { %1312 = vst [vmem:[%s10014_s27 + $0x130] sm:$0xff] %v1311_v38  ;;  %v1315_v40 = vld [vmem:[%s10009_s26 + $0x280] sm:$0xff]  ;;  %v1317_v41 = vld [vmem:[%s10009_s26 + $0x290] sm:$0xff]  ;;  %1314 = vst [vmem:[%s10014_s27 + $0x138] sm:$0xff] %v1313_v39 }
  0x26   : > { %1316 = vst [vmem:[%s10014_s27 + $0x140] sm:$0xff] %v1315_v40  ;;  %1318 = vst [vmem:[%s10014_s27 + $0x148] sm:$0xff] %v1317_v41  ;;  %v1319_v42 = vld [vmem:[%s10009_s26 + $0x2a0] sm:$0xff]  ;;  %v1321_v43 = vld [vmem:[%s10009_s26 + $0x2b0] sm:$0xff] }
  0x27   : > { %v1323_v44 = vld [vmem:[%s10009_s26 + $0x2c0] sm:$0xff]  ;;  %1320 = vst [vmem:[%s10014_s27 + $0x150] sm:$0xff] %v1319_v42  ;;  %1322 = vst [vmem:[%s10014_s27 + $0x158] sm:$0xff] %v1321_v43  ;;  %v1325_v45 = vld [vmem:[%s10009_s26 + $0x2d0] sm:$0xff] }
  0x28   : > { %1324 = vst [vmem:[%s10014_s27 + $0x160] sm:$0xff] %v1323_v44  ;;  %v1327_v46 = vld [vmem:[%s10009_s26 + $0x2e0] sm:$0xff]  ;;  %v1329_v47 = vld [vmem:[%s10009_s26 + $0x2f0] sm:$0xff]  ;;  %1326 = vst [vmem:[%s10014_s27 + $0x168] sm:$0xff] %v1325_v45 }
  0x29   : > { %1328 = vst [vmem:[%s10014_s27 + $0x170] sm:$0xff] %v1327_v46  ;;  %1330 = vst [vmem:[%s10014_s27 + $0x178] sm:$0xff] %v1329_v47  ;;  %v1331_v48 = vld [vmem:[%s10009_s26 + $0x300] sm:$0xff]  ;;  %v1333_v49 = vld [vmem:[%s10009_s26 + $0x310] sm:$0xff] }
  0x2a   : > { %v1335_v50 = vld [vmem:[%s10009_s26 + $0x320] sm:$0xff]  ;;  %1332 = vst [vmem:[%s10014_s27 + $0x180] sm:$0xff] %v1331_v48  ;;  %1334 = vst [vmem:[%s10014_s27 + $0x188] sm:$0xff] %v1333_v49  ;;  %v1337_v51 = vld [vmem:[%s10009_s26 + $0x330] sm:$0xff] }
  0x2b   : > { %1336 = vst [vmem:[%s10014_s27 + $0x190] sm:$0xff] %v1335_v50  ;;  %v1339_v52 = vld [vmem:[%s10009_s26 + $0x340] sm:$0xff]  ;;  %v1341_v53 = vld [vmem:[%s10009_s26 + $0x350] sm:$0xff]  ;;  %1338 = vst [vmem:[%s10014_s27 + $0x198] sm:$0xff] %v1337_v51 }
  0x2c   : > { %1340 = vst [vmem:[%s10014_s27 + $0x1a0] sm:$0xff] %v1339_v52  ;;  %1342 = vst [vmem:[%s10014_s27 + $0x1a8] sm:$0xff] %v1341_v53  ;;  %v1343_v54 = vld [vmem:[%s10009_s26 + $0x360] sm:$0xff]  ;;  %v1345_v55 = vld [vmem:[%s10009_s26 + $0x370] sm:$0xff] }
  0x2d   : > { %v1347_v56 = vld [vmem:[%s10009_s26 + $0x380] sm:$0xff]  ;;  %1344 = vst [vmem:[%s10014_s27 + $0x1b0] sm:$0xff] %v1343_v54  ;;  %1346 = vst [vmem:[%s10014_s27 + $0x1b8] sm:$0xff] %v1345_v55  ;;  %v1349_v57 = vld [vmem:[%s10009_s26 + $0x390] sm:$0xff] }
  0x2e   : > { %1348 = vst [vmem:[%s10014_s27 + $0x1c0] sm:$0xff] %v1347_v56  ;;  %v1351_v58 = vld [vmem:[%s10009_s26 + $0x3a0] sm:$0xff]  ;;  %v1353_v59 = vld [vmem:[%s10009_s26 + $0x3b0] sm:$0xff]  ;;  %1350 = vst [vmem:[%s10014_s27 + $0x1c8] sm:$0xff] %v1349_v57 }
  0x2f   : > { %1352 = vst [vmem:[%s10014_s27 + $0x1d0] sm:$0xff] %v1351_v58  ;;  %1354 = vst [vmem:[%s10014_s27 + $0x1d8] sm:$0xff] %v1353_v59  ;;  %v1355_v60 = vld [vmem:[%s10009_s26 + $0x3c0] sm:$0xff]  ;;  %v1357_v61 = vld [vmem:[%s10009_s26 + $0x3d0] sm:$0xff] }
  0x30   : > { %v1359_v62 = vld [vmem:[%s10009_s26 + $0x3e0] sm:$0xff]  ;;  %1356 = vst [vmem:[%s10014_s27 + $0x1e0] sm:$0xff] %v1355_v60  ;;  %1358 = vst [vmem:[%s10014_s27 + $0x1e8] sm:$0xff] %v1357_v61  ;;  %v1361_v63 = vld [vmem:[%s10009_s26 + $0x3f0] sm:$0xff] }
  0x31   : > { %1360 = vst [vmem:[%s10014_s27 + $0x1f0] sm:$0xff] %v1359_v62  ;;  %v1363_v0 = vld [vmem:[%s10009_s26 + $0x400] sm:$0xff]  ;;  %v1365_v1 = vld [vmem:[%s10009_s26 + $0x410] sm:$0xff]  ;;  %1362 = vst [vmem:[%s10014_s27 + $0x1f8] sm:$0xff] %v1361_v63 }
  0x32   : > { %1364 = vst [vmem:[%s10014_s27 + $0x200] sm:$0xff] %v1363_v0  ;;  %1366 = vst [vmem:[%s10014_s27 + $0x208] sm:$0xff] %v1365_v1  ;;  %v1367_v2 = vld [vmem:[%s10009_s26 + $0x420] sm:$0xff]  ;;  %v1369_v3 = vld [vmem:[%s10009_s26 + $0x430] sm:$0xff] }
  0x33   : > { %v1371_v4 = vld [vmem:[%s10009_s26 + $0x440] sm:$0xff]  ;;  %1368 = vst [vmem:[%s10014_s27 + $0x210] sm:$0xff] %v1367_v2  ;;  %1370 = vst [vmem:[%s10014_s27 + $0x218] sm:$0xff] %v1369_v3  ;;  %v1373_v5 = vld [vmem:[%s10009_s26 + $0x450] sm:$0xff] }
  0x34   : > { %1372 = vst [vmem:[%s10014_s27 + $0x220] sm:$0xff] %v1371_v4  ;;  %v1375_v6 = vld [vmem:[%s10009_s26 + $0x460] sm:$0xff]  ;;  %v1377_v7 = vld [vmem:[%s10009_s26 + $0x470] sm:$0xff]  ;;  %1374 = vst [vmem:[%s10014_s27 + $0x228] sm:$0xff] %v1373_v5 }
  0x35   : > { %1376 = vst [vmem:[%s10014_s27 + $0x230] sm:$0xff] %v1375_v6  ;;  %1378 = vst [vmem:[%s10014_s27 + $0x238] sm:$0xff] %v1377_v7  ;;  %v1379_v8 = vld [vmem:[%s10009_s26 + $0x480] sm:$0xff]  ;;  %v1381_v9 = vld [vmem:[%s10009_s26 + $0x490] sm:$0xff] }
  0x36   : > { %v1383_v10 = vld [vmem:[%s10009_s26 + $0x4a0] sm:$0xff]  ;;  %1380 = vst [vmem:[%s10014_s27 + $0x240] sm:$0xff] %v1379_v8  ;;  %1382 = vst [vmem:[%s10014_s27 + $0x248] sm:$0xff] %v1381_v9  ;;  %v1385_v11 = vld [vmem:[%s10009_s26 + $0x4b0] sm:$0xff] }
  0x37   : > { %1384 = vst [vmem:[%s10014_s27 + $0x250] sm:$0xff] %v1383_v10  ;;  %v1387_v12 = vld [vmem:[%s10009_s26 + $0x4c0] sm:$0xff]  ;;  %v1389_v13 = vld [vmem:[%s10009_s26 + $0x4d0] sm:$0xff]  ;;  %1386 = vst [vmem:[%s10014_s27 + $0x258] sm:$0xff] %v1385_v11 }
  0x38   : > { %1388 = vst [vmem:[%s10014_s27 + $0x260] sm:$0xff] %v1387_v12  ;;  %1390 = vst [vmem:[%s10014_s27 + $0x268] sm:$0xff] %v1389_v13  ;;  %v1391_v14 = vld [vmem:[%s10009_s26 + $0x4e0] sm:$0xff]  ;;  %v1393_v15 = vld [vmem:[%s10009_s26 + $0x4f0] sm:$0xff] }
  0x39   : > { %v1395_v16 = vld [vmem:[%s10009_s26 + $0x500] sm:$0xff]  ;;  %1392 = vst [vmem:[%s10014_s27 + $0x270] sm:$0xff] %v1391_v14  ;;  %1394 = vst [vmem:[%s10014_s27 + $0x278] sm:$0xff] %v1393_v15  ;;  %v1397_v17 = vld [vmem:[%s10009_s26 + $0x510] sm:$0xff] }
  0x3a   : > { %1396 = vst [vmem:[%s10014_s27 + $0x280] sm:$0xff] %v1395_v16  ;;  %v1399_v18 = vld [vmem:[%s10009_s26 + $0x520] sm:$0xff]  ;;  %v1401_v19 = vld [vmem:[%s10009_s26 + $0x530] sm:$0xff]  ;;  %1398 = vst [vmem:[%s10014_s27 + $0x288] sm:$0xff] %v1397_v17 }
  0x3b   : > { %1400 = vst [vmem:[%s10014_s27 + $0x290] sm:$0xff] %v1399_v18  ;;  %1402 = vst [vmem:[%s10014_s27 + $0x298] sm:$0xff] %v1401_v19  ;;  %v1403_v20 = vld [vmem:[%s10009_s26 + $0x540] sm:$0xff]  ;;  %v1405_v21 = vld [vmem:[%s10009_s26 + $0x550] sm:$0xff] }
  0x3c   : > { %v1407_v22 = vld [vmem:[%s10009_s26 + $0x560] sm:$0xff]  ;;  %1404 = vst [vmem:[%s10014_s27 + $0x2a0] sm:$0xff] %v1403_v20  ;;  %1406 = vst [vmem:[%s10014_s27 + $0x2a8] sm:$0xff] %v1405_v21  ;;  %v1409_v23 = vld [vmem:[%s10009_s26 + $0x570] sm:$0xff] }
  0x3d   : > { %1408 = vst [vmem:[%s10014_s27 + $0x2b0] sm:$0xff] %v1407_v22  ;;  %v1411_v24 = vld [vmem:[%s10009_s26 + $0x580] sm:$0xff]  ;;  %v1413_v25 = vld [vmem:[%s10009_s26 + $0x590] sm:$0xff]  ;;  %1410 = vst [vmem:[%s10014_s27 + $0x2b8] sm:$0xff] %v1409_v23 }
  0x3e   : > { %1412 = vst [vmem:[%s10014_s27 + $0x2c0] sm:$0xff] %v1411_v24  ;;  %1414 = vst [vmem:[%s10014_s27 + $0x2c8] sm:$0xff] %v1413_v25  ;;  %v1415_v26 = vld [vmem:[%s10009_s26 + $0x5a0] sm:$0xff]  ;;  %v1417_v27 = vld [vmem:[%s10009_s26 + $0x5b0] sm:$0xff] }
  0x3f   : > { %v1419_v28 = vld [vmem:[%s10009_s26 + $0x5c0] sm:$0xff]  ;;  %1416 = vst [vmem:[%s10014_s27 + $0x2d0] sm:$0xff] %v1415_v26  ;;  %1418 = vst [vmem:[%s10014_s27 + $0x2d8] sm:$0xff] %v1417_v27  ;;  %v1421_v29 = vld [vmem:[%s10009_s26 + $0x5d0] sm:$0xff] }
  0x40   : > { %1420 = vst [vmem:[%s10014_s27 + $0x2e0] sm:$0xff] %v1419_v28  ;;  %v1423_v30 = vld [vmem:[%s10009_s26 + $0x5e0] sm:$0xff]  ;;  %v1425_v31 = vld [vmem:[%s10009_s26 + $0x5f0] sm:$0xff]  ;;  %1422 = vst [vmem:[%s10014_s27 + $0x2e8] sm:$0xff] %v1421_v29 }
  0x41   : > { %1424 = vst [vmem:[%s10014_s27 + $0x2f0] sm:$0xff] %v1423_v30  ;;  %1426 = vst [vmem:[%s10014_s27 + $0x2f8] sm:$0xff] %v1425_v31  ;;  %v1427_v32 = vld [vmem:[%s10009_s26 + $0x600] sm:$0xff]  ;;  %v1429_v33 = vld [vmem:[%s10009_s26 + $0x610] sm:$0xff] }
  0x42   : > { %v1431_v34 = vld [vmem:[%s10009_s26 + $0x620] sm:$0xff]  ;;  %1428 = vst [vmem:[%s10014_s27 + $0x300] sm:$0xff] %v1427_v32  ;;  %1430 = vst [vmem:[%s10014_s27 + $0x308] sm:$0xff] %v1429_v33  ;;  %v1433_v35 = vld [vmem:[%s10009_s26 + $0x630] sm:$0xff] }
  0x43   : > { %1432 = vst [vmem:[%s10014_s27 + $0x310] sm:$0xff] %v1431_v34  ;;  %v1435_v36 = vld [vmem:[%s10009_s26 + $0x640] sm:$0xff]  ;;  %v1437_v37 = vld [vmem:[%s10009_s26 + $0x650] sm:$0xff]  ;;  %1434 = vst [vmem:[%s10014_s27 + $0x318] sm:$0xff] %v1433_v35 }
  0x44   : > { %1436 = vst [vmem:[%s10014_s27 + $0x320] sm:$0xff] %v1435_v36  ;;  %1438 = vst [vmem:[%s10014_s27 + $0x328] sm:$0xff] %v1437_v37  ;;  %v1439_v38 = vld [vmem:[%s10009_s26 + $0x660] sm:$0xff]  ;;  %v1441_v39 = vld [vmem:[%s10009_s26 + $0x670] sm:$0xff] }
  0x45   : > { %v1443_v40 = vld [vmem:[%s10009_s26 + $0x680] sm:$0xff]  ;;  %1440 = vst [vmem:[%s10014_s27 + $0x330] sm:$0xff] %v1439_v38  ;;  %1442 = vst [vmem:[%s10014_s27 + $0x338] sm:$0xff] %v1441_v39  ;;  %v1445_v41 = vld [vmem:[%s10009_s26 + $0x690] sm:$0xff] }
  0x46   : > { %1444 = vst [vmem:[%s10014_s27 + $0x340] sm:$0xff] %v1443_v40  ;;  %v1447_v42 = vld [vmem:[%s10009_s26 + $0x6a0] sm:$0xff]  ;;  %v1449_v43 = vld [vmem:[%s10009_s26 + $0x6b0] sm:$0xff]  ;;  %1446 = vst [vmem:[%s10014_s27 + $0x348] sm:$0xff] %v1445_v41 }
  0x47   : > { %1448 = vst [vmem:[%s10014_s27 + $0x350] sm:$0xff] %v1447_v42  ;;  %1450 = vst [vmem:[%s10014_s27 + $0x358] sm:$0xff] %v1449_v43  ;;  %v1451_v44 = vld [vmem:[%s10009_s26 + $0x6c0] sm:$0xff]  ;;  %v1453_v45 = vld [vmem:[%s10009_s26 + $0x6d0] sm:$0xff] }
  0x48   : > { %v1455_v46 = vld [vmem:[%s10009_s26 + $0x6e0] sm:$0xff]  ;;  %1452 = vst [vmem:[%s10014_s27 + $0x360] sm:$0xff] %v1451_v44  ;;  %1454 = vst [vmem:[%s10014_s27 + $0x368] sm:$0xff] %v1453_v45  ;;  %v1457_v47 = vld [vmem:[%s10009_s26 + $0x6f0] sm:$0xff] }
  0x49   : > { %1456 = vst [vmem:[%s10014_s27 + $0x370] sm:$0xff] %v1455_v46  ;;  %v1459_v48 = vld [vmem:[%s10009_s26 + $0x700] sm:$0xff]  ;;  %v1461_v49 = vld [vmem:[%s10009_s26 + $0x710] sm:$0xff]  ;;  %1458 = vst [vmem:[%s10014_s27 + $0x378] sm:$0xff] %v1457_v47 }
  0x4a   : > { %1460 = vst [vmem:[%s10014_s27 + $0x380] sm:$0xff] %v1459_v48  ;;  %1462 = vst [vmem:[%s10014_s27 + $0x388] sm:$0xff] %v1461_v49  ;;  %v1463_v50 = vld [vmem:[%s10009_s26 + $0x720] sm:$0xff]  ;;  %v1465_v51 = vld [vmem:[%s10009_s26 + $0x730] sm:$0xff] }
  0x4b   : > { %v1467_v52 = vld [vmem:[%s10009_s26 + $0x740] sm:$0xff]  ;;  %1464 = vst [vmem:[%s10014_s27 + $0x390] sm:$0xff] %v1463_v50  ;;  %1466 = vst [vmem:[%s10014_s27 + $0x398] sm:$0xff] %v1465_v51  ;;  %v1469_v53 = vld [vmem:[%s10009_s26 + $0x750] sm:$0xff] }
  0x4c   : > { %1468 = vst [vmem:[%s10014_s27 + $0x3a0] sm:$0xff] %v1467_v52  ;;  %v1471_v54 = vld [vmem:[%s10009_s26 + $0x760] sm:$0xff]  ;;  %v1473_v55 = vld [vmem:[%s10009_s26 + $0x770] sm:$0xff]  ;;  %1470 = vst [vmem:[%s10014_s27 + $0x3a8] sm:$0xff] %v1469_v53 }
  0x4d   : > { %1472 = vst [vmem:[%s10014_s27 + $0x3b0] sm:$0xff] %v1471_v54  ;;  %1474 = vst [vmem:[%s10014_s27 + $0x3b8] sm:$0xff] %v1473_v55  ;;  %v1475_v56 = vld [vmem:[%s10009_s26 + $0x780] sm:$0xff]  ;;  %v1477_v57 = vld [vmem:[%s10009_s26 + $0x790] sm:$0xff] }
  0x4e   : > { %v1479_v58 = vld [vmem:[%s10009_s26 + $0x7a0] sm:$0xff]  ;;  %1476 = vst [vmem:[%s10014_s27 + $0x3c0] sm:$0xff] %v1475_v56  ;;  %1478 = vst [vmem:[%s10014_s27 + $0x3c8] sm:$0xff] %v1477_v57  ;;  %v1481_v59 = vld [vmem:[%s10009_s26 + $0x7b0] sm:$0xff] }
  0x4f   : > { %1480 = vst [vmem:[%s10014_s27 + $0x3d0] sm:$0xff] %v1479_v58  ;;  %v1483_v60 = vld [vmem:[%s10009_s26 + $0x7c0] sm:$0xff]  ;;  %v1485_v61 = vld [vmem:[%s10009_s26 + $0x7d0] sm:$0xff]  ;;  %1482 = vst [vmem:[%s10014_s27 + $0x3d8] sm:$0xff] %v1481_v59 }
  0x50   : > { %1484 = vst [vmem:[%s10014_s27 + $0x3e0] sm:$0xff] %v1483_v60  ;;  %1486 = vst [vmem:[%s10014_s27 + $0x3e8] sm:$0xff] %v1485_v61  ;;  %v1487_v62 = vld [vmem:[%s10009_s26 + $0x7e0] sm:$0xff]  ;;  %v1489_v63 = vld [vmem:[%s10009_s26 + $0x7f0] sm:$0xff] }
  0x51   : > { %v1491_v0 = vld [vmem:[%s10009_s26 + $0x800] sm:$0xff]  ;;  %1488 = vst [vmem:[%s10014_s27 + $0x3f0] sm:$0xff] %v1487_v62  ;;  %1490 = vst [vmem:[%s10014_s27 + $0x3f8] sm:$0xff] %v1489_v63  ;;  %v1493_v1 = vld [vmem:[%s10009_s26 + $0x810] sm:$0xff] }
  0x52   : > { %1492 = vst [vmem:[%s10014_s27 + $0x400] sm:$0xff] %v1491_v0  ;;  %v1495_v2 = vld [vmem:[%s10009_s26 + $0x820] sm:$0xff]  ;;  %v1497_v3 = vld [vmem:[%s10009_s26 + $0x830] sm:$0xff]  ;;  %1494 = vst [vmem:[%s10014_s27 + $0x408] sm:$0xff] %v1493_v1 }
  0x53   : > { %1496 = vst [vmem:[%s10014_s27 + $0x410] sm:$0xff] %v1495_v2  ;;  %1498 = vst [vmem:[%s10014_s27 + $0x418] sm:$0xff] %v1497_v3  ;;  %v1499_v4 = vld [vmem:[%s10009_s26 + $0x840] sm:$0xff]  ;;  %v1501_v5 = vld [vmem:[%s10009_s26 + $0x850] sm:$0xff] }
  0x54   : > { %v1503_v6 = vld [vmem:[%s10009_s26 + $0x860] sm:$0xff]  ;;  %1500 = vst [vmem:[%s10014_s27 + $0x420] sm:$0xff] %v1499_v4  ;;  %1502 = vst [vmem:[%s10014_s27 + $0x428] sm:$0xff] %v1501_v5  ;;  %v1505_v7 = vld [vmem:[%s10009_s26 + $0x870] sm:$0xff] }
  0x55   : > { %1504 = vst [vmem:[%s10014_s27 + $0x430] sm:$0xff] %v1503_v6  ;;  %v1507_v8 = vld [vmem:[%s10009_s26 + $0x880] sm:$0xff]  ;;  %v1509_v9 = vld [vmem:[%s10009_s26 + $0x890] sm:$0xff]  ;;  %1506 = vst [vmem:[%s10014_s27 + $0x438] sm:$0xff] %v1505_v7 }
  0x56   : > { %1508 = vst [vmem:[%s10014_s27 + $0x440] sm:$0xff] %v1507_v8  ;;  %1510 = vst [vmem:[%s10014_s27 + $0x448] sm:$0xff] %v1509_v9  ;;  %v1511_v10 = vld [vmem:[%s10009_s26 + $0x8a0] sm:$0xff]  ;;  %v1513_v11 = vld [vmem:[%s10009_s26 + $0x8b0] sm:$0xff] }
  0x57   : > { %v1515_v12 = vld [vmem:[%s10009_s26 + $0x8c0] sm:$0xff]  ;;  %1512 = vst [vmem:[%s10014_s27 + $0x450] sm:$0xff] %v1511_v10  ;;  %1514 = vst [vmem:[%s10014_s27 + $0x458] sm:$0xff] %v1513_v11  ;;  %v1517_v13 = vld [vmem:[%s10009_s26 + $0x8d0] sm:$0xff] }
  0x58   : > { %1516 = vst [vmem:[%s10014_s27 + $0x460] sm:$0xff] %v1515_v12  ;;  %v1519_v14 = vld [vmem:[%s10009_s26 + $0x8e0] sm:$0xff]  ;;  %v1521_v15 = vld [vmem:[%s10009_s26 + $0x8f0] sm:$0xff]  ;;  %1518 = vst [vmem:[%s10014_s27 + $0x468] sm:$0xff] %v1517_v13 }
  0x59   : > { %1520 = vst [vmem:[%s10014_s27 + $0x470] sm:$0xff] %v1519_v14  ;;  %1522 = vst [vmem:[%s10014_s27 + $0x478] sm:$0xff] %v1521_v15  ;;  %v1523_v16 = vld [vmem:[%s10009_s26 + $0x900] sm:$0xff]  ;;  %v1525_v17 = vld [vmem:[%s10009_s26 + $0x910] sm:$0xff] }
  0x5a   : > { %v1527_v18 = vld [vmem:[%s10009_s26 + $0x920] sm:$0xff]  ;;  %1524 = vst [vmem:[%s10014_s27 + $0x480] sm:$0xff] %v1523_v16  ;;  %1526 = vst [vmem:[%s10014_s27 + $0x488] sm:$0xff] %v1525_v17  ;;  %v1529_v19 = vld [vmem:[%s10009_s26 + $0x930] sm:$0xff] }
  0x5b   : > { %1528 = vst [vmem:[%s10014_s27 + $0x490] sm:$0xff] %v1527_v18  ;;  %v1531_v20 = vld [vmem:[%s10009_s26 + $0x940] sm:$0xff]  ;;  %v1533_v21 = vld [vmem:[%s10009_s26 + $0x950] sm:$0xff]  ;;  %1530 = vst [vmem:[%s10014_s27 + $0x498] sm:$0xff] %v1529_v19 }
  0x5c   : > { %1532 = vst [vmem:[%s10014_s27 + $0x4a0] sm:$0xff] %v1531_v20  ;;  %1534 = vst [vmem:[%s10014_s27 + $0x4a8] sm:$0xff] %v1533_v21  ;;  %v1535_v22 = vld [vmem:[%s10009_s26 + $0x960] sm:$0xff]  ;;  %v1537_v23 = vld [vmem:[%s10009_s26 + $0x970] sm:$0xff] }
  0x5d   : > { %v1539_v24 = vld [vmem:[%s10009_s26 + $0x980] sm:$0xff]  ;;  %1536 = vst [vmem:[%s10014_s27 + $0x4b0] sm:$0xff] %v1535_v22  ;;  %1538 = vst [vmem:[%s10014_s27 + $0x4b8] sm:$0xff] %v1537_v23  ;;  %v1541_v25 = vld [vmem:[%s10009_s26 + $0x990] sm:$0xff] }
  0x5e   : > { %1540 = vst [vmem:[%s10014_s27 + $0x4c0] sm:$0xff] %v1539_v24  ;;  %v1543_v26 = vld [vmem:[%s10009_s26 + $0x9a0] sm:$0xff]  ;;  %v1545_v27 = vld [vmem:[%s10009_s26 + $0x9b0] sm:$0xff]  ;;  %1542 = vst [vmem:[%s10014_s27 + $0x4c8] sm:$0xff] %v1541_v25 }
  0x5f   : > { %1544 = vst [vmem:[%s10014_s27 + $0x4d0] sm:$0xff] %v1543_v26  ;;  %1546 = vst [vmem:[%s10014_s27 + $0x4d8] sm:$0xff] %v1545_v27  ;;  %v1547_v28 = vld [vmem:[%s10009_s26 + $0x9c0] sm:$0xff]  ;;  %v1549_v29 = vld [vmem:[%s10009_s26 + $0x9d0] sm:$0xff] }
  0x60   : > { %v1551_v30 = vld [vmem:[%s10009_s26 + $0x9e0] sm:$0xff]  ;;  %1548 = vst [vmem:[%s10014_s27 + $0x4e0] sm:$0xff] %v1547_v28  ;;  %1550 = vst [vmem:[%s10014_s27 + $0x4e8] sm:$0xff] %v1549_v29  ;;  %v1553_v31 = vld [vmem:[%s10009_s26 + $0x9f0] sm:$0xff] }
  0x61   : > { %1552 = vst [vmem:[%s10014_s27 + $0x4f0] sm:$0xff] %v1551_v30  ;;  %v1555_v32 = vld [vmem:[%s10009_s26 + $0xa00] sm:$0xff]  ;;  %v1557_v33 = vld [vmem:[%s10009_s26 + $0xa10] sm:$0xff]  ;;  %1554 = vst [vmem:[%s10014_s27 + $0x4f8] sm:$0xff] %v1553_v31 }
  0x62   : > { %1556 = vst [vmem:[%s10014_s27 + $0x500] sm:$0xff] %v1555_v32  ;;  %1558 = vst [vmem:[%s10014_s27 + $0x508] sm:$0xff] %v1557_v33  ;;  %v1559_v34 = vld [vmem:[%s10009_s26 + $0xa20] sm:$0xff]  ;;  %v1561_v35 = vld [vmem:[%s10009_s26 + $0xa30] sm:$0xff] }
  0x63   : > { %v1563_v36 = vld [vmem:[%s10009_s26 + $0xa40] sm:$0xff]  ;;  %1560 = vst [vmem:[%s10014_s27 + $0x510] sm:$0xff] %v1559_v34  ;;  %1562 = vst [vmem:[%s10014_s27 + $0x518] sm:$0xff] %v1561_v35  ;;  %v1565_v37 = vld [vmem:[%s10009_s26 + $0xa50] sm:$0xff] }
  0x64   : > { %1564 = vst [vmem:[%s10014_s27 + $0x520] sm:$0xff] %v1563_v36  ;;  %v1567_v38 = vld [vmem:[%s10009_s26 + $0xa60] sm:$0xff]  ;;  %v1569_v39 = vld [vmem:[%s10009_s26 + $0xa70] sm:$0xff]  ;;  %1566 = vst [vmem:[%s10014_s27 + $0x528] sm:$0xff] %v1565_v37 }
  0x65   : > { %1568 = vst [vmem:[%s10014_s27 + $0x530] sm:$0xff] %v1567_v38  ;;  %1570 = vst [vmem:[%s10014_s27 + $0x538] sm:$0xff] %v1569_v39  ;;  %v1571_v40 = vld [vmem:[%s10009_s26 + $0xa80] sm:$0xff]  ;;  %v1573_v41 = vld [vmem:[%s10009_s26 + $0xa90] sm:$0xff] }
  0x66   : > { %v1575_v42 = vld [vmem:[%s10009_s26 + $0xaa0] sm:$0xff]  ;;  %1572 = vst [vmem:[%s10014_s27 + $0x540] sm:$0xff] %v1571_v40  ;;  %1574 = vst [vmem:[%s10014_s27 + $0x548] sm:$0xff] %v1573_v41  ;;  %v1577_v43 = vld [vmem:[%s10009_s26 + $0xab0] sm:$0xff] }
  0x67   : > { %1576 = vst [vmem:[%s10014_s27 + $0x550] sm:$0xff] %v1575_v42  ;;  %v1579_v44 = vld [vmem:[%s10009_s26 + $0xac0] sm:$0xff]  ;;  %v1581_v45 = vld [vmem:[%s10009_s26 + $0xad0] sm:$0xff]  ;;  %1578 = vst [vmem:[%s10014_s27 + $0x558] sm:$0xff] %v1577_v43 }
  0x68   : > { %1580 = vst [vmem:[%s10014_s27 + $0x560] sm:$0xff] %v1579_v44  ;;  %1582 = vst [vmem:[%s10014_s27 + $0x568] sm:$0xff] %v1581_v45  ;;  %v1583_v46 = vld [vmem:[%s10009_s26 + $0xae0] sm:$0xff]  ;;  %v1585_v47 = vld [vmem:[%s10009_s26 + $0xaf0] sm:$0xff] }
  0x69   : > { %v1587_v48 = vld [vmem:[%s10009_s26 + $0xb00] sm:$0xff]  ;;  %1584 = vst [vmem:[%s10014_s27 + $0x570] sm:$0xff] %v1583_v46  ;;  %1586 = vst [vmem:[%s10014_s27 + $0x578] sm:$0xff] %v1585_v47  ;;  %v1589_v49 = vld [vmem:[%s10009_s26 + $0xb10] sm:$0xff] }
  0x6a   : > { %1588 = vst [vmem:[%s10014_s27 + $0x580] sm:$0xff] %v1587_v48  ;;  %v1591_v50 = vld [vmem:[%s10009_s26 + $0xb20] sm:$0xff]  ;;  %v1593_v51 = vld [vmem:[%s10009_s26 + $0xb30] sm:$0xff]  ;;  %1590 = vst [vmem:[%s10014_s27 + $0x588] sm:$0xff] %v1589_v49 }
  0x6b   : > { %1592 = vst [vmem:[%s10014_s27 + $0x590] sm:$0xff] %v1591_v50  ;;  %1594 = vst [vmem:[%s10014_s27 + $0x598] sm:$0xff] %v1593_v51  ;;  %v1595_v52 = vld [vmem:[%s10009_s26 + $0xb40] sm:$0xff]  ;;  %v1597_v53 = vld [vmem:[%s10009_s26 + $0xb50] sm:$0xff] }
  0x6c   : > { %v1599_v54 = vld [vmem:[%s10009_s26 + $0xb60] sm:$0xff]  ;;  %1596 = vst [vmem:[%s10014_s27 + $0x5a0] sm:$0xff] %v1595_v52  ;;  %1598 = vst [vmem:[%s10014_s27 + $0x5a8] sm:$0xff] %v1597_v53  ;;  %v1601_v55 = vld [vmem:[%s10009_s26 + $0xb70] sm:$0xff] }
  0x6d   : > { %1600 = vst [vmem:[%s10014_s27 + $0x5b0] sm:$0xff] %v1599_v54  ;;  %v1603_v56 = vld [vmem:[%s10009_s26 + $0xb80] sm:$0xff]  ;;  %v1605_v57 = vld [vmem:[%s10009_s26 + $0xb90] sm:$0xff]  ;;  %1602 = vst [vmem:[%s10014_s27 + $0x5b8] sm:$0xff] %v1601_v55 }
  0x6e   : > { %1604 = vst [vmem:[%s10014_s27 + $0x5c0] sm:$0xff] %v1603_v56  ;;  %1606 = vst [vmem:[%s10014_s27 + $0x5c8] sm:$0xff] %v1605_v57  ;;  %v1607_v58 = vld [vmem:[%s10009_s26 + $0xba0] sm:$0xff]  ;;  %v1609_v59 = vld [vmem:[%s10009_s26 + $0xbb0] sm:$0xff] }
  0x6f   : > { %v1611_v60 = vld [vmem:[%s10009_s26 + $0xbc0] sm:$0xff]  ;;  %1608 = vst [vmem:[%s10014_s27 + $0x5d0] sm:$0xff] %v1607_v58  ;;  %1610 = vst [vmem:[%s10014_s27 + $0x5d8] sm:$0xff] %v1609_v59  ;;  %v1613_v61 = vld [vmem:[%s10009_s26 + $0xbd0] sm:$0xff] }
  0x70   : > { %1612 = vst [vmem:[%s10014_s27 + $0x5e0] sm:$0xff] %v1611_v60  ;;  %v1615_v62 = vld [vmem:[%s10009_s26 + $0xbe0] sm:$0xff]  ;;  %v1617_v63 = vld [vmem:[%s10009_s26 + $0xbf0] sm:$0xff]  ;;  %1614 = vst [vmem:[%s10014_s27 + $0x5e8] sm:$0xff] %v1613_v61 }
  0x71   : > { %1616 = vst [vmem:[%s10014_s27 + $0x5f0] sm:$0xff] %v1615_v62  ;;  %1618 = vst [vmem:[%s10014_s27 + $0x5f8] sm:$0xff] %v1617_v63  ;;  %v1619_v0 = vld [vmem:[%s10009_s26 + $0xc00] sm:$0xff]  ;;  %v1621_v1 = vld [vmem:[%s10009_s26 + $0xc10] sm:$0xff] }
  0x72   : > { %v1623_v2 = vld [vmem:[%s10009_s26 + $0xc20] sm:$0xff]  ;;  %1620 = vst [vmem:[%s10014_s27 + $0x600] sm:$0xff] %v1619_v0  ;;  %1622 = vst [vmem:[%s10014_s27 + $0x608] sm:$0xff] %v1621_v1  ;;  %v1625_v3 = vld [vmem:[%s10009_s26 + $0xc30] sm:$0xff] }
  0x73   : > { %1624 = vst [vmem:[%s10014_s27 + $0x610] sm:$0xff] %v1623_v2  ;;  %v1627_v4 = vld [vmem:[%s10009_s26 + $0xc40] sm:$0xff]  ;;  %v1629_v5 = vld [vmem:[%s10009_s26 + $0xc50] sm:$0xff]  ;;  %1626 = vst [vmem:[%s10014_s27 + $0x618] sm:$0xff] %v1625_v3 }
  0x74   : > { %1628 = vst [vmem:[%s10014_s27 + $0x620] sm:$0xff] %v1627_v4  ;;  %1630 = vst [vmem:[%s10014_s27 + $0x628] sm:$0xff] %v1629_v5  ;;  %v1631_v6 = vld [vmem:[%s10009_s26 + $0xc60] sm:$0xff]  ;;  %v1633_v7 = vld [vmem:[%s10009_s26 + $0xc70] sm:$0xff] }
  0x75   : > { %v1635_v8 = vld [vmem:[%s10009_s26 + $0xc80] sm:$0xff]  ;;  %1632 = vst [vmem:[%s10014_s27 + $0x630] sm:$0xff] %v1631_v6  ;;  %1634 = vst [vmem:[%s10014_s27 + $0x638] sm:$0xff] %v1633_v7  ;;  %v1637_v9 = vld [vmem:[%s10009_s26 + $0xc90] sm:$0xff] }
  0x76   : > { %1636 = vst [vmem:[%s10014_s27 + $0x640] sm:$0xff] %v1635_v8  ;;  %v1639_v10 = vld [vmem:[%s10009_s26 + $0xca0] sm:$0xff]  ;;  %v1641_v11 = vld [vmem:[%s10009_s26 + $0xcb0] sm:$0xff]  ;;  %1638 = vst [vmem:[%s10014_s27 + $0x648] sm:$0xff] %v1637_v9 }
  0x77   : > { %1640 = vst [vmem:[%s10014_s27 + $0x650] sm:$0xff] %v1639_v10  ;;  %1642 = vst [vmem:[%s10014_s27 + $0x658] sm:$0xff] %v1641_v11  ;;  %v1643_v12 = vld [vmem:[%s10009_s26 + $0xcc0] sm:$0xff]  ;;  %v1645_v13 = vld [vmem:[%s10009_s26 + $0xcd0] sm:$0xff] }
  0x78   : > { %v1647_v14 = vld [vmem:[%s10009_s26 + $0xce0] sm:$0xff]  ;;  %1644 = vst [vmem:[%s10014_s27 + $0x660] sm:$0xff] %v1643_v12  ;;  %1646 = vst [vmem:[%s10014_s27 + $0x668] sm:$0xff] %v1645_v13  ;;  %v1649_v15 = vld [vmem:[%s10009_s26 + $0xcf0] sm:$0xff] }
  0x79   : > { %1648 = vst [vmem:[%s10014_s27 + $0x670] sm:$0xff] %v1647_v14  ;;  %v1651_v16 = vld [vmem:[%s10009_s26 + $0xd00] sm:$0xff]  ;;  %v1653_v17 = vld [vmem:[%s10009_s26 + $0xd10] sm:$0xff]  ;;  %1650 = vst [vmem:[%s10014_s27 + $0x678] sm:$0xff] %v1649_v15 }
  0x7a   : > { %1652 = vst [vmem:[%s10014_s27 + $0x680] sm:$0xff] %v1651_v16  ;;  %1654 = vst [vmem:[%s10014_s27 + $0x688] sm:$0xff] %v1653_v17  ;;  %v1655_v18 = vld [vmem:[%s10009_s26 + $0xd20] sm:$0xff]  ;;  %v1657_v19 = vld [vmem:[%s10009_s26 + $0xd30] sm:$0xff] }
  0x7b   : > { %v1659_v20 = vld [vmem:[%s10009_s26 + $0xd40] sm:$0xff]  ;;  %1656 = vst [vmem:[%s10014_s27 + $0x690] sm:$0xff] %v1655_v18  ;;  %1658 = vst [vmem:[%s10014_s27 + $0x698] sm:$0xff] %v1657_v19  ;;  %v1661_v21 = vld [vmem:[%s10009_s26 + $0xd50] sm:$0xff] }
  0x7c   : > { %1660 = vst [vmem:[%s10014_s27 + $0x6a0] sm:$0xff] %v1659_v20  ;;  %v1663_v22 = vld [vmem:[%s10009_s26 + $0xd60] sm:$0xff]  ;;  %v1665_v23 = vld [vmem:[%s10009_s26 + $0xd70] sm:$0xff]  ;;  %1662 = vst [vmem:[%s10014_s27 + $0x6a8] sm:$0xff] %v1661_v21 }
  0x7d   : > { %1664 = vst [vmem:[%s10014_s27 + $0x6b0] sm:$0xff] %v1663_v22  ;;  %1666 = vst [vmem:[%s10014_s27 + $0x6b8] sm:$0xff] %v1665_v23  ;;  %v1667_v24 = vld [vmem:[%s10009_s26 + $0xd80] sm:$0xff]  ;;  %v1669_v25 = vld [vmem:[%s10009_s26 + $0xd90] sm:$0xff] }
  0x7e   : > { %v1671_v26 = vld [vmem:[%s10009_s26 + $0xda0] sm:$0xff]  ;;  %1668 = vst [vmem:[%s10014_s27 + $0x6c0] sm:$0xff] %v1667_v24  ;;  %1670 = vst [vmem:[%s10014_s27 + $0x6c8] sm:$0xff] %v1669_v25  ;;  %v1673_v27 = vld [vmem:[%s10009_s26 + $0xdb0] sm:$0xff] }
  0x7f   : > { %1672 = vst [vmem:[%s10014_s27 + $0x6d0] sm:$0xff] %v1671_v26  ;;  %v1675_v28 = vld [vmem:[%s10009_s26 + $0xdc0] sm:$0xff]  ;;  %v1677_v29 = vld [vmem:[%s10009_s26 + $0xdd0] sm:$0xff]  ;;  %1674 = vst [vmem:[%s10014_s27 + $0x6d8] sm:$0xff] %v1673_v27 }
  0x80   : > { %1676 = vst [vmem:[%s10014_s27 + $0x6e0] sm:$0xff] %v1675_v28  ;;  %1678 = vst [vmem:[%s10014_s27 + $0x6e8] sm:$0xff] %v1677_v29  ;;  %v1679_v30 = vld [vmem:[%s10009_s26 + $0xde0] sm:$0xff]  ;;  %v1681_v31 = vld [vmem:[%s10009_s26 + $0xdf0] sm:$0xff] }
  0x81   : > { %v1683_v32 = vld [vmem:[%s10009_s26 + $0xe00] sm:$0xff]  ;;  %1680 = vst [vmem:[%s10014_s27 + $0x6f0] sm:$0xff] %v1679_v30  ;;  %1682 = vst [vmem:[%s10014_s27 + $0x6f8] sm:$0xff] %v1681_v31  ;;  %v1685_v33 = vld [vmem:[%s10009_s26 + $0xe10] sm:$0xff] }
  0x82   : > { %1684 = vst [vmem:[%s10014_s27 + $0x700] sm:$0xff] %v1683_v32  ;;  %v1687_v34 = vld [vmem:[%s10009_s26 + $0xe20] sm:$0xff]  ;;  %v1689_v35 = vld [vmem:[%s10009_s26 + $0xe30] sm:$0xff]  ;;  %1686 = vst [vmem:[%s10014_s27 + $0x708] sm:$0xff] %v1685_v33 }
  0x83   : > { %1688 = vst [vmem:[%s10014_s27 + $0x710] sm:$0xff] %v1687_v34  ;;  %1690 = vst [vmem:[%s10014_s27 + $0x718] sm:$0xff] %v1689_v35  ;;  %v1691_v36 = vld [vmem:[%s10009_s26 + $0xe40] sm:$0xff]  ;;  %v1693_v37 = vld [vmem:[%s10009_s26 + $0xe50] sm:$0xff] }
  0x84   : > { %v1695_v38 = vld [vmem:[%s10009_s26 + $0xe60] sm:$0xff]  ;;  %1692 = vst [vmem:[%s10014_s27 + $0x720] sm:$0xff] %v1691_v36  ;;  %1694 = vst [vmem:[%s10014_s27 + $0x728] sm:$0xff] %v1693_v37  ;;  %v1697_v39 = vld [vmem:[%s10009_s26 + $0xe70] sm:$0xff] }
  0x85   : > { %1696 = vst [vmem:[%s10014_s27 + $0x730] sm:$0xff] %v1695_v38  ;;  %v1699_v40 = vld [vmem:[%s10009_s26 + $0xe80] sm:$0xff]  ;;  %v1701_v41 = vld [vmem:[%s10009_s26 + $0xe90] sm:$0xff]  ;;  %1698 = vst [vmem:[%s10014_s27 + $0x738] sm:$0xff] %v1697_v39 }
  0x86   : > { %1700 = vst [vmem:[%s10014_s27 + $0x740] sm:$0xff] %v1699_v40  ;;  %1702 = vst [vmem:[%s10014_s27 + $0x748] sm:$0xff] %v1701_v41  ;;  %v1703_v42 = vld [vmem:[%s10009_s26 + $0xea0] sm:$0xff]  ;;  %v1705_v43 = vld [vmem:[%s10009_s26 + $0xeb0] sm:$0xff] }
  0x87   : > { %v1707_v44 = vld [vmem:[%s10009_s26 + $0xec0] sm:$0xff]  ;;  %1704 = vst [vmem:[%s10014_s27 + $0x750] sm:$0xff] %v1703_v42  ;;  %1706 = vst [vmem:[%s10014_s27 + $0x758] sm:$0xff] %v1705_v43  ;;  %v1709_v45 = vld [vmem:[%s10009_s26 + $0xed0] sm:$0xff] }
  0x88   : > { %1708 = vst [vmem:[%s10014_s27 + $0x760] sm:$0xff] %v1707_v44  ;;  %v1711_v46 = vld [vmem:[%s10009_s26 + $0xee0] sm:$0xff]  ;;  %v1713_v47 = vld [vmem:[%s10009_s26 + $0xef0] sm:$0xff]  ;;  %1710 = vst [vmem:[%s10014_s27 + $0x768] sm:$0xff] %v1709_v45 }
  0x89   : > { %1712 = vst [vmem:[%s10014_s27 + $0x770] sm:$0xff] %v1711_v46  ;;  %1714 = vst [vmem:[%s10014_s27 + $0x778] sm:$0xff] %v1713_v47  ;;  %v1715_v48 = vld [vmem:[%s10009_s26 + $0xf00] sm:$0xff]  ;;  %v1717_v49 = vld [vmem:[%s10009_s26 + $0xf10] sm:$0xff] }
  0x8a   : > { %v1719_v50 = vld [vmem:[%s10009_s26 + $0xf20] sm:$0xff]  ;;  %1716 = vst [vmem:[%s10014_s27 + $0x780] sm:$0xff] %v1715_v48  ;;  %1718 = vst [vmem:[%s10014_s27 + $0x788] sm:$0xff] %v1717_v49  ;;  %v1721_v51 = vld [vmem:[%s10009_s26 + $0xf30] sm:$0xff] }
  0x8b   : > { %1720 = vst [vmem:[%s10014_s27 + $0x790] sm:$0xff] %v1719_v50  ;;  %v1723_v52 = vld [vmem:[%s10009_s26 + $0xf40] sm:$0xff]  ;;  %v1725_v53 = vld [vmem:[%s10009_s26 + $0xf50] sm:$0xff]  ;;  %1722 = vst [vmem:[%s10014_s27 + $0x798] sm:$0xff] %v1721_v51 }
  0x8c   : > { %1724 = vst [vmem:[%s10014_s27 + $0x7a0] sm:$0xff] %v1723_v52  ;;  %1726 = vst [vmem:[%s10014_s27 + $0x7a8] sm:$0xff] %v1725_v53  ;;  %v1727_v54 = vld [vmem:[%s10009_s26 + $0xf60] sm:$0xff]  ;;  %v1729_v55 = vld [vmem:[%s10009_s26 + $0xf70] sm:$0xff] }
  0x8d   : > { %v1731_v56 = vld [vmem:[%s10009_s26 + $0xf80] sm:$0xff]  ;;  %1728 = vst [vmem:[%s10014_s27 + $0x7b0] sm:$0xff] %v1727_v54  ;;  %1730 = vst [vmem:[%s10014_s27 + $0x7b8] sm:$0xff] %v1729_v55  ;;  %v1733_v57 = vld [vmem:[%s10009_s26 + $0xf90] sm:$0xff] }
  0x8e   : > { %1732 = vst [vmem:[%s10014_s27 + $0x7c0] sm:$0xff] %v1731_v56  ;;  %v1735_v58 = vld [vmem:[%s10009_s26 + $0xfa0] sm:$0xff]  ;;  %v1737_v59 = vld [vmem:[%s10009_s26 + $0xfb0] sm:$0xff]  ;;  %1734 = vst [vmem:[%s10014_s27 + $0x7c8] sm:$0xff] %v1733_v57 }
  0x8f   : > { %1736 = vst [vmem:[%s10014_s27 + $0x7d0] sm:$0xff] %v1735_v58  ;;  %1738 = vst [vmem:[%s10014_s27 + $0x7d8] sm:$0xff] %v1737_v59  ;;  %v1739_v60 = vld [vmem:[%s10009_s26 + $0xfc0] sm:$0xff]  ;;  %v1741_v61 = vld [vmem:[%s10009_s26 + $0xfd0] sm:$0xff] }
  0x90   : > { %v1743_v62 = vld [vmem:[%s10009_s26 + $0xfe0] sm:$0xff]  ;;  %1740 = vst [vmem:[%s10014_s27 + $0x7e0] sm:$0xff] %v1739_v60  ;;  %1742 = vst [vmem:[%s10014_s27 + $0x7e8] sm:$0xff] %v1741_v61  ;;  %v1745_v63 = vld [vmem:[%s10009_s26 + $0xff0] sm:$0xff] }
  0x91   : > { %1744 = vst [vmem:[%s10014_s27 + $0x7f0] sm:$0xff] %v1743_v62  ;;  %v1747_v0 = vld [vmem:[%s10009_s26 + $0x1000] sm:$0xff]  ;;  %v1749_v1 = vld [vmem:[%s10009_s26 + $0x1010] sm:$0xff]  ;;  %1746 = vst [vmem:[%s10014_s27 + $0x7f8] sm:$0xff] %v1745_v63 }
  0x92   : > { %1748 = vst [vmem:[%s10014_s27 + $0x800] sm:$0xff] %v1747_v0  ;;  %1750 = vst [vmem:[%s10014_s27 + $0x808] sm:$0xff] %v1749_v1  ;;  %v1751_v2 = vld [vmem:[%s10009_s26 + $0x1020] sm:$0xff]  ;;  %v1753_v3 = vld [vmem:[%s10009_s26 + $0x1030] sm:$0xff] }
  0x93   : > { %v1755_v4 = vld [vmem:[%s10009_s26 + $0x1040] sm:$0xff]  ;;  %1752 = vst [vmem:[%s10014_s27 + $0x810] sm:$0xff] %v1751_v2  ;;  %1754 = vst [vmem:[%s10014_s27 + $0x818] sm:$0xff] %v1753_v3  ;;  %v1757_v5 = vld [vmem:[%s10009_s26 + $0x1050] sm:$0xff] }
  0x94   : > { %1756 = vst [vmem:[%s10014_s27 + $0x820] sm:$0xff] %v1755_v4  ;;  %v1759_v6 = vld [vmem:[%s10009_s26 + $0x1060] sm:$0xff]  ;;  %v1761_v7 = vld [vmem:[%s10009_s26 + $0x1070] sm:$0xff]  ;;  %1758 = vst [vmem:[%s10014_s27 + $0x828] sm:$0xff] %v1757_v5 }
  0x95   : > { %1760 = vst [vmem:[%s10014_s27 + $0x830] sm:$0xff] %v1759_v6  ;;  %1762 = vst [vmem:[%s10014_s27 + $0x838] sm:$0xff] %v1761_v7  ;;  %v1763_v8 = vld [vmem:[%s10009_s26 + $0x1080] sm:$0xff]  ;;  %v1765_v9 = vld [vmem:[%s10009_s26 + $0x1090] sm:$0xff] }
  0x96   : > { %v1767_v10 = vld [vmem:[%s10009_s26 + $0x10a0] sm:$0xff]  ;;  %1764 = vst [vmem:[%s10014_s27 + $0x840] sm:$0xff] %v1763_v8  ;;  %1766 = vst [vmem:[%s10014_s27 + $0x848] sm:$0xff] %v1765_v9  ;;  %v1769_v11 = vld [vmem:[%s10009_s26 + $0x10b0] sm:$0xff] }
  0x97   : > { %1768 = vst [vmem:[%s10014_s27 + $0x850] sm:$0xff] %v1767_v10  ;;  %v1771_v12 = vld [vmem:[%s10009_s26 + $0x10c0] sm:$0xff]  ;;  %v1773_v13 = vld [vmem:[%s10009_s26 + $0x10d0] sm:$0xff]  ;;  %1770 = vst [vmem:[%s10014_s27 + $0x858] sm:$0xff] %v1769_v11 }
  0x98   : > { %1772 = vst [vmem:[%s10014_s27 + $0x860] sm:$0xff] %v1771_v12  ;;  %1774 = vst [vmem:[%s10014_s27 + $0x868] sm:$0xff] %v1773_v13  ;;  %v1775_v14 = vld [vmem:[%s10009_s26 + $0x10e0] sm:$0xff]  ;;  %v1777_v15 = vld [vmem:[%s10009_s26 + $0x10f0] sm:$0xff] }
  0x99   : > { %v1779_v16 = vld [vmem:[%s10009_s26 + $0x1100] sm:$0xff]  ;;  %1776 = vst [vmem:[%s10014_s27 + $0x870] sm:$0xff] %v1775_v14  ;;  %1778 = vst [vmem:[%s10014_s27 + $0x878] sm:$0xff] %v1777_v15  ;;  %v1781_v17 = vld [vmem:[%s10009_s26 + $0x1110] sm:$0xff] }
  0x9a   : > { %1780 = vst [vmem:[%s10014_s27 + $0x880] sm:$0xff] %v1779_v16  ;;  %v1783_v18 = vld [vmem:[%s10009_s26 + $0x1120] sm:$0xff]  ;;  %v1785_v19 = vld [vmem:[%s10009_s26 + $0x1130] sm:$0xff]  ;;  %1782 = vst [vmem:[%s10014_s27 + $0x888] sm:$0xff] %v1781_v17 }
  0x9b   : > { %1784 = vst [vmem:[%s10014_s27 + $0x890] sm:$0xff] %v1783_v18  ;;  %1786 = vst [vmem:[%s10014_s27 + $0x898] sm:$0xff] %v1785_v19  ;;  %v1787_v20 = vld [vmem:[%s10009_s26 + $0x1140] sm:$0xff]  ;;  %v1789_v21 = vld [vmem:[%s10009_s26 + $0x1150] sm:$0xff] }
  0x9c   : > { %v1791_v22 = vld [vmem:[%s10009_s26 + $0x1160] sm:$0xff]  ;;  %1788 = vst [vmem:[%s10014_s27 + $0x8a0] sm:$0xff] %v1787_v20  ;;  %1790 = vst [vmem:[%s10014_s27 + $0x8a8] sm:$0xff] %v1789_v21  ;;  %v1793_v23 = vld [vmem:[%s10009_s26 + $0x1170] sm:$0xff] }
  0x9d   : > { %1792 = vst [vmem:[%s10014_s27 + $0x8b0] sm:$0xff] %v1791_v22  ;;  %v1795_v24 = vld [vmem:[%s10009_s26 + $0x1180] sm:$0xff]  ;;  %v1797_v25 = vld [vmem:[%s10009_s26 + $0x1190] sm:$0xff]  ;;  %1794 = vst [vmem:[%s10014_s27 + $0x8b8] sm:$0xff] %v1793_v23 }
  0x9e   : > { %1796 = vst [vmem:[%s10014_s27 + $0x8c0] sm:$0xff] %v1795_v24  ;;  %1798 = vst [vmem:[%s10014_s27 + $0x8c8] sm:$0xff] %v1797_v25  ;;  %v1799_v26 = vld [vmem:[%s10009_s26 + $0x11a0] sm:$0xff]  ;;  %v1801_v27 = vld [vmem:[%s10009_s26 + $0x11b0] sm:$0xff] }
  0x9f   : > { %v1803_v28 = vld [vmem:[%s10009_s26 + $0x11c0] sm:$0xff]  ;;  %1800 = vst [vmem:[%s10014_s27 + $0x8d0] sm:$0xff] %v1799_v26  ;;  %1802 = vst [vmem:[%s10014_s27 + $0x8d8] sm:$0xff] %v1801_v27  ;;  %v1805_v29 = vld [vmem:[%s10009_s26 + $0x11d0] sm:$0xff] }
  0xa0   : > { %1804 = vst [vmem:[%s10014_s27 + $0x8e0] sm:$0xff] %v1803_v28  ;;  %v1807_v30 = vld [vmem:[%s10009_s26 + $0x11e0] sm:$0xff]  ;;  %v1809_v31 = vld [vmem:[%s10009_s26 + $0x11f0] sm:$0xff]  ;;  %1806 = vst [vmem:[%s10014_s27 + $0x8e8] sm:$0xff] %v1805_v29 }
  0xa1   : > { %1808 = vst [vmem:[%s10014_s27 + $0x8f0] sm:$0xff] %v1807_v30  ;;  %1810 = vst [vmem:[%s10014_s27 + $0x8f8] sm:$0xff] %v1809_v31  ;;  %v1811_v32 = vld [vmem:[%s10009_s26 + $0x1200] sm:$0xff]  ;;  %v1813_v33 = vld [vmem:[%s10009_s26 + $0x1210] sm:$0xff] }
  0xa2   : > { %v1815_v34 = vld [vmem:[%s10009_s26 + $0x1220] sm:$0xff]  ;;  %1812 = vst [vmem:[%s10014_s27 + $0x900] sm:$0xff] %v1811_v32  ;;  %1814 = vst [vmem:[%s10014_s27 + $0x908] sm:$0xff] %v1813_v33  ;;  %v1817_v35 = vld [vmem:[%s10009_s26 + $0x1230] sm:$0xff] }
  0xa3   : > { %1816 = vst [vmem:[%s10014_s27 + $0x910] sm:$0xff] %v1815_v34  ;;  %v1819_v36 = vld [vmem:[%s10009_s26 + $0x1240] sm:$0xff]  ;;  %v1821_v37 = vld [vmem:[%s10009_s26 + $0x1250] sm:$0xff]  ;;  %1818 = vst [vmem:[%s10014_s27 + $0x918] sm:$0xff] %v1817_v35 }
  0xa4   : > { %1820 = vst [vmem:[%s10014_s27 + $0x920] sm:$0xff] %v1819_v36  ;;  %1822 = vst [vmem:[%s10014_s27 + $0x928] sm:$0xff] %v1821_v37  ;;  %v1823_v38 = vld [vmem:[%s10009_s26 + $0x1260] sm:$0xff]  ;;  %v1825_v39 = vld [vmem:[%s10009_s26 + $0x1270] sm:$0xff] }
  0xa5   : > { %v1827_v40 = vld [vmem:[%s10009_s26 + $0x1280] sm:$0xff]  ;;  %1824 = vst [vmem:[%s10014_s27 + $0x930] sm:$0xff] %v1823_v38  ;;  %1826 = vst [vmem:[%s10014_s27 + $0x938] sm:$0xff] %v1825_v39  ;;  %v1829_v41 = vld [vmem:[%s10009_s26 + $0x1290] sm:$0xff] }
  0xa6   : > { %1828 = vst [vmem:[%s10014_s27 + $0x940] sm:$0xff] %v1827_v40  ;;  %v1831_v42 = vld [vmem:[%s10009_s26 + $0x12a0] sm:$0xff]  ;;  %v1833_v43 = vld [vmem:[%s10009_s26 + $0x12b0] sm:$0xff]  ;;  %1830 = vst [vmem:[%s10014_s27 + $0x948] sm:$0xff] %v1829_v41 }
  0xa7   : > { %1832 = vst [vmem:[%s10014_s27 + $0x950] sm:$0xff] %v1831_v42  ;;  %1834 = vst [vmem:[%s10014_s27 + $0x958] sm:$0xff] %v1833_v43  ;;  %v1835_v44 = vld [vmem:[%s10009_s26 + $0x12c0] sm:$0xff]  ;;  %v1837_v45 = vld [vmem:[%s10009_s26 + $0x12d0] sm:$0xff] }
  0xa8   : > { %v1839_v46 = vld [vmem:[%s10009_s26 + $0x12e0] sm:$0xff]  ;;  %1836 = vst [vmem:[%s10014_s27 + $0x960] sm:$0xff] %v1835_v44  ;;  %1838 = vst [vmem:[%s10014_s27 + $0x968] sm:$0xff] %v1837_v45  ;;  %v1841_v47 = vld [vmem:[%s10009_s26 + $0x12f0] sm:$0xff] }
  0xa9   : > { %1840 = vst [vmem:[%s10014_s27 + $0x970] sm:$0xff] %v1839_v46  ;;  %v1843_v48 = vld [vmem:[%s10009_s26 + $0x1300] sm:$0xff]  ;;  %v1845_v49 = vld [vmem:[%s10009_s26 + $0x1310] sm:$0xff]  ;;  %1842 = vst [vmem:[%s10014_s27 + $0x978] sm:$0xff] %v1841_v47 }
  0xaa   : > { %1844 = vst [vmem:[%s10014_s27 + $0x980] sm:$0xff] %v1843_v48  ;;  %1846 = vst [vmem:[%s10014_s27 + $0x988] sm:$0xff] %v1845_v49  ;;  %v1847_v50 = vld [vmem:[%s10009_s26 + $0x1320] sm:$0xff]  ;;  %v1849_v51 = vld [vmem:[%s10009_s26 + $0x1330] sm:$0xff] }
  0xab   : > { %v1851_v52 = vld [vmem:[%s10009_s26 + $0x1340] sm:$0xff]  ;;  %1848 = vst [vmem:[%s10014_s27 + $0x990] sm:$0xff] %v1847_v50  ;;  %1850 = vst [vmem:[%s10014_s27 + $0x998] sm:$0xff] %v1849_v51  ;;  %v1853_v53 = vld [vmem:[%s10009_s26 + $0x1350] sm:$0xff] }
  0xac   : > { %1852 = vst [vmem:[%s10014_s27 + $0x9a0] sm:$0xff] %v1851_v52  ;;  %v1855_v54 = vld [vmem:[%s10009_s26 + $0x1360] sm:$0xff]  ;;  %v1857_v55 = vld [vmem:[%s10009_s26 + $0x1370] sm:$0xff]  ;;  %1854 = vst [vmem:[%s10014_s27 + $0x9a8] sm:$0xff] %v1853_v53 }
  0xad   : > { %1856 = vst [vmem:[%s10014_s27 + $0x9b0] sm:$0xff] %v1855_v54  ;;  %1858 = vst [vmem:[%s10014_s27 + $0x9b8] sm:$0xff] %v1857_v55  ;;  %v1859_v56 = vld [vmem:[%s10009_s26 + $0x1380] sm:$0xff]  ;;  %v1861_v57 = vld [vmem:[%s10009_s26 + $0x1390] sm:$0xff] }
  0xae   : > { %v1863_v58 = vld [vmem:[%s10009_s26 + $0x13a0] sm:$0xff]  ;;  %1860 = vst [vmem:[%s10014_s27 + $0x9c0] sm:$0xff] %v1859_v56  ;;  %1862 = vst [vmem:[%s10014_s27 + $0x9c8] sm:$0xff] %v1861_v57  ;;  %v1865_v59 = vld [vmem:[%s10009_s26 + $0x13b0] sm:$0xff] }
  0xaf   : > { %1864 = vst [vmem:[%s10014_s27 + $0x9d0] sm:$0xff] %v1863_v58  ;;  %v1867_v60 = vld [vmem:[%s10009_s26 + $0x13c0] sm:$0xff]  ;;  %v1869_v61 = vld [vmem:[%s10009_s26 + $0x13d0] sm:$0xff]  ;;  %1866 = vst [vmem:[%s10014_s27 + $0x9d8] sm:$0xff] %v1865_v59 }
  0xb0   : > { %1868 = vst [vmem:[%s10014_s27 + $0x9e0] sm:$0xff] %v1867_v60  ;;  %1870 = vst [vmem:[%s10014_s27 + $0x9e8] sm:$0xff] %v1869_v61  ;;  %v1871_v62 = vld [vmem:[%s10009_s26 + $0x13e0] sm:$0xff]  ;;  %v1873_v63 = vld [vmem:[%s10009_s26 + $0x13f0] sm:$0xff] }
  0xb1   : > { %v1875_v0 = vld [vmem:[%s10009_s26 + $0x1400] sm:$0xff]  ;;  %1872 = vst [vmem:[%s10014_s27 + $0x9f0] sm:$0xff] %v1871_v62  ;;  %1874 = vst [vmem:[%s10014_s27 + $0x9f8] sm:$0xff] %v1873_v63  ;;  %v1877_v1 = vld [vmem:[%s10009_s26 + $0x1410] sm:$0xff] }
  0xb2   : > { %1876 = vst [vmem:[%s10014_s27 + $0xa00] sm:$0xff] %v1875_v0  ;;  %v1879_v2 = vld [vmem:[%s10009_s26 + $0x1420] sm:$0xff]  ;;  %v1881_v3 = vld [vmem:[%s10009_s26 + $0x1430] sm:$0xff]  ;;  %1878 = vst [vmem:[%s10014_s27 + $0xa08] sm:$0xff] %v1877_v1 }
  0xb3   : > { %1880 = vst [vmem:[%s10014_s27 + $0xa10] sm:$0xff] %v1879_v2  ;;  %1882 = vst [vmem:[%s10014_s27 + $0xa18] sm:$0xff] %v1881_v3  ;;  %v1883_v4 = vld [vmem:[%s10009_s26 + $0x1440] sm:$0xff]  ;;  %v1885_v5 = vld [vmem:[%s10009_s26 + $0x1450] sm:$0xff] }
  0xb4   : > { %v1887_v6 = vld [vmem:[%s10009_s26 + $0x1460] sm:$0xff]  ;;  %1884 = vst [vmem:[%s10014_s27 + $0xa20] sm:$0xff] %v1883_v4  ;;  %1886 = vst [vmem:[%s10014_s27 + $0xa28] sm:$0xff] %v1885_v5  ;;  %v1889_v7 = vld [vmem:[%s10009_s26 + $0x1470] sm:$0xff] }
  0xb5   : > { %1888 = vst [vmem:[%s10014_s27 + $0xa30] sm:$0xff] %v1887_v6  ;;  %v1891_v8 = vld [vmem:[%s10009_s26 + $0x1480] sm:$0xff]  ;;  %v1893_v9 = vld [vmem:[%s10009_s26 + $0x1490] sm:$0xff]  ;;  %1890 = vst [vmem:[%s10014_s27 + $0xa38] sm:$0xff] %v1889_v7 }
  0xb6   : > { %1892 = vst [vmem:[%s10014_s27 + $0xa40] sm:$0xff] %v1891_v8  ;;  %1894 = vst [vmem:[%s10014_s27 + $0xa48] sm:$0xff] %v1893_v9  ;;  %v1895_v10 = vld [vmem:[%s10009_s26 + $0x14a0] sm:$0xff]  ;;  %v1897_v11 = vld [vmem:[%s10009_s26 + $0x14b0] sm:$0xff] }
  0xb7   : > { %v1899_v12 = vld [vmem:[%s10009_s26 + $0x14c0] sm:$0xff]  ;;  %1896 = vst [vmem:[%s10014_s27 + $0xa50] sm:$0xff] %v1895_v10  ;;  %1898 = vst [vmem:[%s10014_s27 + $0xa58] sm:$0xff] %v1897_v11  ;;  %v1901_v13 = vld [vmem:[%s10009_s26 + $0x14d0] sm:$0xff] }
  0xb8   : > { %1900 = vst [vmem:[%s10014_s27 + $0xa60] sm:$0xff] %v1899_v12  ;;  %v1903_v14 = vld [vmem:[%s10009_s26 + $0x14e0] sm:$0xff]  ;;  %v1905_v15 = vld [vmem:[%s10009_s26 + $0x14f0] sm:$0xff]  ;;  %1902 = vst [vmem:[%s10014_s27 + $0xa68] sm:$0xff] %v1901_v13 }
  0xb9   : > { %1904 = vst [vmem:[%s10014_s27 + $0xa70] sm:$0xff] %v1903_v14  ;;  %1906 = vst [vmem:[%s10014_s27 + $0xa78] sm:$0xff] %v1905_v15  ;;  %v1907_v16 = vld [vmem:[%s10009_s26 + $0x1500] sm:$0xff]  ;;  %v1909_v17 = vld [vmem:[%s10009_s26 + $0x1510] sm:$0xff] }
  0xba   : > { %v1911_v18 = vld [vmem:[%s10009_s26 + $0x1520] sm:$0xff]  ;;  %1908 = vst [vmem:[%s10014_s27 + $0xa80] sm:$0xff] %v1907_v16  ;;  %1910 = vst [vmem:[%s10014_s27 + $0xa88] sm:$0xff] %v1909_v17  ;;  %v1913_v19 = vld [vmem:[%s10009_s26 + $0x1530] sm:$0xff] }
  0xbb   : > { %1912 = vst [vmem:[%s10014_s27 + $0xa90] sm:$0xff] %v1911_v18  ;;  %v1915_v20 = vld [vmem:[%s10009_s26 + $0x1540] sm:$0xff]  ;;  %v1917_v21 = vld [vmem:[%s10009_s26 + $0x1550] sm:$0xff]  ;;  %1914 = vst [vmem:[%s10014_s27 + $0xa98] sm:$0xff] %v1913_v19 }
  0xbc   : > { %1916 = vst [vmem:[%s10014_s27 + $0xaa0] sm:$0xff] %v1915_v20  ;;  %1918 = vst [vmem:[%s10014_s27 + $0xaa8] sm:$0xff] %v1917_v21  ;;  %v1919_v22 = vld [vmem:[%s10009_s26 + $0x1560] sm:$0xff]  ;;  %v1921_v23 = vld [vmem:[%s10009_s26 + $0x1570] sm:$0xff] }
  0xbd   : > { %v1923_v24 = vld [vmem:[%s10009_s26 + $0x1580] sm:$0xff]  ;;  %1920 = vst [vmem:[%s10014_s27 + $0xab0] sm:$0xff] %v1919_v22  ;;  %1922 = vst [vmem:[%s10014_s27 + $0xab8] sm:$0xff] %v1921_v23  ;;  %v1925_v25 = vld [vmem:[%s10009_s26 + $0x1590] sm:$0xff] }
  0xbe   : > { %1924 = vst [vmem:[%s10014_s27 + $0xac0] sm:$0xff] %v1923_v24  ;;  %v1927_v26 = vld [vmem:[%s10009_s26 + $0x15a0] sm:$0xff]  ;;  %v1929_v27 = vld [vmem:[%s10009_s26 + $0x15b0] sm:$0xff]  ;;  %1926 = vst [vmem:[%s10014_s27 + $0xac8] sm:$0xff] %v1925_v25 }
  0xbf   : > { %1928 = vst [vmem:[%s10014_s27 + $0xad0] sm:$0xff] %v1927_v26  ;;  %1930 = vst [vmem:[%s10014_s27 + $0xad8] sm:$0xff] %v1929_v27  ;;  %v1931_v28 = vld [vmem:[%s10009_s26 + $0x15c0] sm:$0xff]  ;;  %v1933_v29 = vld [vmem:[%s10009_s26 + $0x15d0] sm:$0xff] }
  0xc0   : > { %v1935_v30 = vld [vmem:[%s10009_s26 + $0x15e0] sm:$0xff]  ;;  %1932 = vst [vmem:[%s10014_s27 + $0xae0] sm:$0xff] %v1931_v28  ;;  %1934 = vst [vmem:[%s10014_s27 + $0xae8] sm:$0xff] %v1933_v29  ;;  %v1937_v31 = vld [vmem:[%s10009_s26 + $0x15f0] sm:$0xff] }
  0xc1   : > { %1936 = vst [vmem:[%s10014_s27 + $0xaf0] sm:$0xff] %v1935_v30  ;;  %v1939_v32 = vld [vmem:[%s10009_s26 + $0x1600] sm:$0xff]  ;;  %v1941_v33 = vld [vmem:[%s10009_s26 + $0x1610] sm:$0xff]  ;;  %1938 = vst [vmem:[%s10014_s27 + $0xaf8] sm:$0xff] %v1937_v31 }
  0xc2   : > { %1940 = vst [vmem:[%s10014_s27 + $0xb00] sm:$0xff] %v1939_v32  ;;  %1942 = vst [vmem:[%s10014_s27 + $0xb08] sm:$0xff] %v1941_v33  ;;  %v1943_v34 = vld [vmem:[%s10009_s26 + $0x1620] sm:$0xff]  ;;  %v1945_v35 = vld [vmem:[%s10009_s26 + $0x1630] sm:$0xff] }
  0xc3   : > { %v1947_v36 = vld [vmem:[%s10009_s26 + $0x1640] sm:$0xff]  ;;  %1944 = vst [vmem:[%s10014_s27 + $0xb10] sm:$0xff] %v1943_v34  ;;  %1946 = vst [vmem:[%s10014_s27 + $0xb18] sm:$0xff] %v1945_v35  ;;  %v1949_v37 = vld [vmem:[%s10009_s26 + $0x1650] sm:$0xff] }
  0xc4   : > { %1948 = vst [vmem:[%s10014_s27 + $0xb20] sm:$0xff] %v1947_v36  ;;  %v1951_v38 = vld [vmem:[%s10009_s26 + $0x1660] sm:$0xff]  ;;  %v1953_v39 = vld [vmem:[%s10009_s26 + $0x1670] sm:$0xff]  ;;  %1950 = vst [vmem:[%s10014_s27 + $0xb28] sm:$0xff] %v1949_v37 }
  0xc5   : > { %1952 = vst [vmem:[%s10014_s27 + $0xb30] sm:$0xff] %v1951_v38  ;;  %1954 = vst [vmem:[%s10014_s27 + $0xb38] sm:$0xff] %v1953_v39  ;;  %v1955_v40 = vld [vmem:[%s10009_s26 + $0x1680] sm:$0xff]  ;;  %v1957_v41 = vld [vmem:[%s10009_s26 + $0x1690] sm:$0xff] }
  0xc6   : > { %v1959_v42 = vld [vmem:[%s10009_s26 + $0x16a0] sm:$0xff]  ;;  %1956 = vst [vmem:[%s10014_s27 + $0xb40] sm:$0xff] %v1955_v40  ;;  %1958 = vst [vmem:[%s10014_s27 + $0xb48] sm:$0xff] %v1957_v41  ;;  %v1961_v43 = vld [vmem:[%s10009_s26 + $0x16b0] sm:$0xff] }
  0xc7   : > { %1960 = vst [vmem:[%s10014_s27 + $0xb50] sm:$0xff] %v1959_v42  ;;  %v1963_v44 = vld [vmem:[%s10009_s26 + $0x16c0] sm:$0xff]  ;;  %v1965_v45 = vld [vmem:[%s10009_s26 + $0x16d0] sm:$0xff]  ;;  %1962 = vst [vmem:[%s10014_s27 + $0xb58] sm:$0xff] %v1961_v43 }
  0xc8   : > { %1964 = vst [vmem:[%s10014_s27 + $0xb60] sm:$0xff] %v1963_v44  ;;  %1966 = vst [vmem:[%s10014_s27 + $0xb68] sm:$0xff] %v1965_v45  ;;  %v1967_v46 = vld [vmem:[%s10009_s26 + $0x16e0] sm:$0xff]  ;;  %v1969_v47 = vld [vmem:[%s10009_s26 + $0x16f0] sm:$0xff] }
  0xc9   : > { %v1971_v48 = vld [vmem:[%s10009_s26 + $0x1700] sm:$0xff]  ;;  %1968 = vst [vmem:[%s10014_s27 + $0xb70] sm:$0xff] %v1967_v46  ;;  %1970 = vst [vmem:[%s10014_s27 + $0xb78] sm:$0xff] %v1969_v47  ;;  %v1973_v49 = vld [vmem:[%s10009_s26 + $0x1710] sm:$0xff] }
  0xca   : > { %1972 = vst [vmem:[%s10014_s27 + $0xb80] sm:$0xff] %v1971_v48  ;;  %v1975_v50 = vld [vmem:[%s10009_s26 + $0x1720] sm:$0xff]  ;;  %v1977_v51 = vld [vmem:[%s10009_s26 + $0x1730] sm:$0xff]  ;;  %1974 = vst [vmem:[%s10014_s27 + $0xb88] sm:$0xff] %v1973_v49 }
  0xcb   : > { %1976 = vst [vmem:[%s10014_s27 + $0xb90] sm:$0xff] %v1975_v50  ;;  %1978 = vst [vmem:[%s10014_s27 + $0xb98] sm:$0xff] %v1977_v51  ;;  %v1979_v52 = vld [vmem:[%s10009_s26 + $0x1740] sm:$0xff]  ;;  %v1981_v53 = vld [vmem:[%s10009_s26 + $0x1750] sm:$0xff] }
  0xcc   : > { %v1983_v54 = vld [vmem:[%s10009_s26 + $0x1760] sm:$0xff]  ;;  %1980 = vst [vmem:[%s10014_s27 + $0xba0] sm:$0xff] %v1979_v52  ;;  %1982 = vst [vmem:[%s10014_s27 + $0xba8] sm:$0xff] %v1981_v53  ;;  %v1985_v55 = vld [vmem:[%s10009_s26 + $0x1770] sm:$0xff] }
  0xcd   : > { %1984 = vst [vmem:[%s10014_s27 + $0xbb0] sm:$0xff] %v1983_v54  ;;  %v1987_v56 = vld [vmem:[%s10009_s26 + $0x1780] sm:$0xff]  ;;  %v1989_v57 = vld [vmem:[%s10009_s26 + $0x1790] sm:$0xff]  ;;  %1986 = vst [vmem:[%s10014_s27 + $0xbb8] sm:$0xff] %v1985_v55 }
  0xce   : > { %1988 = vst [vmem:[%s10014_s27 + $0xbc0] sm:$0xff] %v1987_v56  ;;  %1990 = vst [vmem:[%s10014_s27 + $0xbc8] sm:$0xff] %v1989_v57  ;;  %v1991_v58 = vld [vmem:[%s10009_s26 + $0x17a0] sm:$0xff]  ;;  %v1993_v59 = vld [vmem:[%s10009_s26 + $0x17b0] sm:$0xff] }
  0xcf   : > { %v1995_v60 = vld [vmem:[%s10009_s26 + $0x17c0] sm:$0xff]  ;;  %1992 = vst [vmem:[%s10014_s27 + $0xbd0] sm:$0xff] %v1991_v58  ;;  %1994 = vst [vmem:[%s10014_s27 + $0xbd8] sm:$0xff] %v1993_v59  ;;  %v1997_v61 = vld [vmem:[%s10009_s26 + $0x17d0] sm:$0xff] }
  0xd0   : > { %1996 = vst [vmem:[%s10014_s27 + $0xbe0] sm:$0xff] %v1995_v60  ;;  %v1999_v62 = vld [vmem:[%s10009_s26 + $0x17e0] sm:$0xff]  ;;  %v2001_v63 = vld [vmem:[%s10009_s26 + $0x17f0] sm:$0xff]  ;;  %1998 = vst [vmem:[%s10014_s27 + $0xbe8] sm:$0xff] %v1997_v61 }
  0xd1   : > { %2000 = vst [vmem:[%s10014_s27 + $0xbf0] sm:$0xff] %v1999_v62  ;;  %2002 = vst [vmem:[%s10014_s27 + $0xbf8] sm:$0xff] %v2001_v63  ;;  %v2003_v0 = vld [vmem:[%s10009_s26 + $0x1800] sm:$0xff]  ;;  %v2005_v1 = vld [vmem:[%s10009_s26 + $0x1810] sm:$0xff] }
  0xd2   : > { %v2007_v2 = vld [vmem:[%s10009_s26 + $0x1820] sm:$0xff]  ;;  %2004 = vst [vmem:[%s10014_s27 + $0xc00] sm:$0xff] %v2003_v0  ;;  %2006 = vst [vmem:[%s10014_s27 + $0xc08] sm:$0xff] %v2005_v1  ;;  %v2009_v3 = vld [vmem:[%s10009_s26 + $0x1830] sm:$0xff] }
  0xd3   : > { %2008 = vst [vmem:[%s10014_s27 + $0xc10] sm:$0xff] %v2007_v2  ;;  %v2011_v4 = vld [vmem:[%s10009_s26 + $0x1840] sm:$0xff]  ;;  %v2013_v5 = vld [vmem:[%s10009_s26 + $0x1850] sm:$0xff]  ;;  %2010 = vst [vmem:[%s10014_s27 + $0xc18] sm:$0xff] %v2009_v3 }
  0xd4   : > { %2012 = vst [vmem:[%s10014_s27 + $0xc20] sm:$0xff] %v2011_v4  ;;  %2014 = vst [vmem:[%s10014_s27 + $0xc28] sm:$0xff] %v2013_v5  ;;  %v2015_v6 = vld [vmem:[%s10009_s26 + $0x1860] sm:$0xff]  ;;  %v2017_v7 = vld [vmem:[%s10009_s26 + $0x1870] sm:$0xff] }
  0xd5   : > { %v2019_v8 = vld [vmem:[%s10009_s26 + $0x1880] sm:$0xff]  ;;  %2016 = vst [vmem:[%s10014_s27 + $0xc30] sm:$0xff] %v2015_v6  ;;  %2018 = vst [vmem:[%s10014_s27 + $0xc38] sm:$0xff] %v2017_v7  ;;  %v2021_v9 = vld [vmem:[%s10009_s26 + $0x1890] sm:$0xff] }
  0xd6   : > { %2020 = vst [vmem:[%s10014_s27 + $0xc40] sm:$0xff] %v2019_v8  ;;  %v2023_v10 = vld [vmem:[%s10009_s26 + $0x18a0] sm:$0xff]  ;;  %v2025_v11 = vld [vmem:[%s10009_s26 + $0x18b0] sm:$0xff]  ;;  %2022 = vst [vmem:[%s10014_s27 + $0xc48] sm:$0xff] %v2021_v9 }
  0xd7   : > { %2024 = vst [vmem:[%s10014_s27 + $0xc50] sm:$0xff] %v2023_v10  ;;  %2026 = vst [vmem:[%s10014_s27 + $0xc58] sm:$0xff] %v2025_v11  ;;  %v2027_v12 = vld [vmem:[%s10009_s26 + $0x18c0] sm:$0xff]  ;;  %v2029_v13 = vld [vmem:[%s10009_s26 + $0x18d0] sm:$0xff] }
  0xd8   : > { %v2031_v14 = vld [vmem:[%s10009_s26 + $0x18e0] sm:$0xff]  ;;  %2028 = vst [vmem:[%s10014_s27 + $0xc60] sm:$0xff] %v2027_v12  ;;  %2030 = vst [vmem:[%s10014_s27 + $0xc68] sm:$0xff] %v2029_v13  ;;  %v2033_v15 = vld [vmem:[%s10009_s26 + $0x18f0] sm:$0xff] }
  0xd9   : > { %2032 = vst [vmem:[%s10014_s27 + $0xc70] sm:$0xff] %v2031_v14  ;;  %v2035_v16 = vld [vmem:[%s10009_s26 + $0x1900] sm:$0xff]  ;;  %v2037_v17 = vld [vmem:[%s10009_s26 + $0x1910] sm:$0xff]  ;;  %2034 = vst [vmem:[%s10014_s27 + $0xc78] sm:$0xff] %v2033_v15 }
  0xda   : > { %2036 = vst [vmem:[%s10014_s27 + $0xc80] sm:$0xff] %v2035_v16  ;;  %2038 = vst [vmem:[%s10014_s27 + $0xc88] sm:$0xff] %v2037_v17  ;;  %v2039_v18 = vld [vmem:[%s10009_s26 + $0x1920] sm:$0xff]  ;;  %v2041_v19 = vld [vmem:[%s10009_s26 + $0x1930] sm:$0xff] }
  0xdb   : > { %v2043_v20 = vld [vmem:[%s10009_s26 + $0x1940] sm:$0xff]  ;;  %2040 = vst [vmem:[%s10014_s27 + $0xc90] sm:$0xff] %v2039_v18  ;;  %2042 = vst [vmem:[%s10014_s27 + $0xc98] sm:$0xff] %v2041_v19  ;;  %v2045_v21 = vld [vmem:[%s10009_s26 + $0x1950] sm:$0xff] }
  0xdc   : > { %2044 = vst [vmem:[%s10014_s27 + $0xca0] sm:$0xff] %v2043_v20  ;;  %v2047_v22 = vld [vmem:[%s10009_s26 + $0x1960] sm:$0xff]  ;;  %v2049_v23 = vld [vmem:[%s10009_s26 + $0x1970] sm:$0xff]  ;;  %2046 = vst [vmem:[%s10014_s27 + $0xca8] sm:$0xff] %v2045_v21 }
  0xdd   : > { %2048 = vst [vmem:[%s10014_s27 + $0xcb0] sm:$0xff] %v2047_v22  ;;  %2050 = vst [vmem:[%s10014_s27 + $0xcb8] sm:$0xff] %v2049_v23  ;;  %v2051_v24 = vld [vmem:[%s10009_s26 + $0x1980] sm:$0xff]  ;;  %v2053_v25 = vld [vmem:[%s10009_s26 + $0x1990] sm:$0xff] }
  0xde   : > { %v2055_v26 = vld [vmem:[%s10009_s26 + $0x19a0] sm:$0xff]  ;;  %2052 = vst [vmem:[%s10014_s27 + $0xcc0] sm:$0xff] %v2051_v24  ;;  %2054 = vst [vmem:[%s10014_s27 + $0xcc8] sm:$0xff] %v2053_v25  ;;  %v2057_v27 = vld [vmem:[%s10009_s26 + $0x19b0] sm:$0xff] }
  0xdf   : > { %2056 = vst [vmem:[%s10014_s27 + $0xcd0] sm:$0xff] %v2055_v26  ;;  %v2059_v28 = vld [vmem:[%s10009_s26 + $0x19c0] sm:$0xff]  ;;  %v2061_v29 = vld [vmem:[%s10009_s26 + $0x19d0] sm:$0xff]  ;;  %2058 = vst [vmem:[%s10014_s27 + $0xcd8] sm:$0xff] %v2057_v27 }
  0xe0   : > { %2060 = vst [vmem:[%s10014_s27 + $0xce0] sm:$0xff] %v2059_v28  ;;  %2062 = vst [vmem:[%s10014_s27 + $0xce8] sm:$0xff] %v2061_v29  ;;  %v2063_v30 = vld [vmem:[%s10009_s26 + $0x19e0] sm:$0xff]  ;;  %v2065_v31 = vld [vmem:[%s10009_s26 + $0x19f0] sm:$0xff] }
  0xe1   : > { %v2067_v32 = vld [vmem:[%s10009_s26 + $0x1a00] sm:$0xff]  ;;  %2064 = vst [vmem:[%s10014_s27 + $0xcf0] sm:$0xff] %v2063_v30  ;;  %2066 = vst [vmem:[%s10014_s27 + $0xcf8] sm:$0xff] %v2065_v31  ;;  %v2069_v33 = vld [vmem:[%s10009_s26 + $0x1a10] sm:$0xff] }
  0xe2   : > { %2068 = vst [vmem:[%s10014_s27 + $0xd00] sm:$0xff] %v2067_v32  ;;  %v2071_v34 = vld [vmem:[%s10009_s26 + $0x1a20] sm:$0xff]  ;;  %v2073_v35 = vld [vmem:[%s10009_s26 + $0x1a30] sm:$0xff]  ;;  %2070 = vst [vmem:[%s10014_s27 + $0xd08] sm:$0xff] %v2069_v33 }
  0xe3   : > { %2072 = vst [vmem:[%s10014_s27 + $0xd10] sm:$0xff] %v2071_v34  ;;  %2074 = vst [vmem:[%s10014_s27 + $0xd18] sm:$0xff] %v2073_v35  ;;  %v2075_v36 = vld [vmem:[%s10009_s26 + $0x1a40] sm:$0xff]  ;;  %v2077_v37 = vld [vmem:[%s10009_s26 + $0x1a50] sm:$0xff] }
  0xe4   : > { %v2079_v38 = vld [vmem:[%s10009_s26 + $0x1a60] sm:$0xff]  ;;  %2076 = vst [vmem:[%s10014_s27 + $0xd20] sm:$0xff] %v2075_v36  ;;  %2078 = vst [vmem:[%s10014_s27 + $0xd28] sm:$0xff] %v2077_v37  ;;  %v2081_v39 = vld [vmem:[%s10009_s26 + $0x1a70] sm:$0xff] }
  0xe5   : > { %2080 = vst [vmem:[%s10014_s27 + $0xd30] sm:$0xff] %v2079_v38  ;;  %v2083_v40 = vld [vmem:[%s10009_s26 + $0x1a80] sm:$0xff]  ;;  %v2085_v41 = vld [vmem:[%s10009_s26 + $0x1a90] sm:$0xff]  ;;  %2082 = vst [vmem:[%s10014_s27 + $0xd38] sm:$0xff] %v2081_v39 }
  0xe6   : > { %2084 = vst [vmem:[%s10014_s27 + $0xd40] sm:$0xff] %v2083_v40  ;;  %2086 = vst [vmem:[%s10014_s27 + $0xd48] sm:$0xff] %v2085_v41  ;;  %v2087_v42 = vld [vmem:[%s10009_s26 + $0x1aa0] sm:$0xff]  ;;  %v2089_v43 = vld [vmem:[%s10009_s26 + $0x1ab0] sm:$0xff] }
  0xe7   : > { %v2091_v44 = vld [vmem:[%s10009_s26 + $0x1ac0] sm:$0xff]  ;;  %2088 = vst [vmem:[%s10014_s27 + $0xd50] sm:$0xff] %v2087_v42  ;;  %2090 = vst [vmem:[%s10014_s27 + $0xd58] sm:$0xff] %v2089_v43  ;;  %v2093_v45 = vld [vmem:[%s10009_s26 + $0x1ad0] sm:$0xff] }
  0xe8   : > { %2092 = vst [vmem:[%s10014_s27 + $0xd60] sm:$0xff] %v2091_v44  ;;  %v2095_v46 = vld [vmem:[%s10009_s26 + $0x1ae0] sm:$0xff]  ;;  %v2097_v47 = vld [vmem:[%s10009_s26 + $0x1af0] sm:$0xff]  ;;  %2094 = vst [vmem:[%s10014_s27 + $0xd68] sm:$0xff] %v2093_v45 }
  0xe9   : > { %2096 = vst [vmem:[%s10014_s27 + $0xd70] sm:$0xff] %v2095_v46  ;;  %2098 = vst [vmem:[%s10014_s27 + $0xd78] sm:$0xff] %v2097_v47  ;;  %v2099_v48 = vld [vmem:[%s10009_s26 + $0x1b00] sm:$0xff]  ;;  %v2101_v49 = vld [vmem:[%s10009_s26 + $0x1b10] sm:$0xff] }
  0xea   : > { %v2103_v50 = vld [vmem:[%s10009_s26 + $0x1b20] sm:$0xff]  ;;  %2100 = vst [vmem:[%s10014_s27 + $0xd80] sm:$0xff] %v2099_v48  ;;  %2102 = vst [vmem:[%s10014_s27 + $0xd88] sm:$0xff] %v2101_v49  ;;  %v2105_v51 = vld [vmem:[%s10009_s26 + $0x1b30] sm:$0xff] }
  0xeb   : > { %2104 = vst [vmem:[%s10014_s27 + $0xd90] sm:$0xff] %v2103_v50  ;;  %v2107_v52 = vld [vmem:[%s10009_s26 + $0x1b40] sm:$0xff]  ;;  %v2109_v53 = vld [vmem:[%s10009_s26 + $0x1b50] sm:$0xff]  ;;  %2106 = vst [vmem:[%s10014_s27 + $0xd98] sm:$0xff] %v2105_v51 }
  0xec   : > { %2108 = vst [vmem:[%s10014_s27 + $0xda0] sm:$0xff] %v2107_v52  ;;  %2110 = vst [vmem:[%s10014_s27 + $0xda8] sm:$0xff] %v2109_v53  ;;  %v2111_v54 = vld [vmem:[%s10009_s26 + $0x1b60] sm:$0xff]  ;;  %v2113_v55 = vld [vmem:[%s10009_s26 + $0x1b70] sm:$0xff] }
  0xed   : > { %v2115_v56 = vld [vmem:[%s10009_s26 + $0x1b80] sm:$0xff]  ;;  %2112 = vst [vmem:[%s10014_s27 + $0xdb0] sm:$0xff] %v2111_v54  ;;  %2114 = vst [vmem:[%s10014_s27 + $0xdb8] sm:$0xff] %v2113_v55  ;;  %v2117_v57 = vld [vmem:[%s10009_s26 + $0x1b90] sm:$0xff] }
  0xee   : > { %2116 = vst [vmem:[%s10014_s27 + $0xdc0] sm:$0xff] %v2115_v56  ;;  %v2119_v58 = vld [vmem:[%s10009_s26 + $0x1ba0] sm:$0xff]  ;;  %v2121_v59 = vld [vmem:[%s10009_s26 + $0x1bb0] sm:$0xff]  ;;  %2118 = vst [vmem:[%s10014_s27 + $0xdc8] sm:$0xff] %v2117_v57 }
  0xef   : > { %2120 = vst [vmem:[%s10014_s27 + $0xdd0] sm:$0xff] %v2119_v58  ;;  %2122 = vst [vmem:[%s10014_s27 + $0xdd8] sm:$0xff] %v2121_v59  ;;  %v2123_v60 = vld [vmem:[%s10009_s26 + $0x1bc0] sm:$0xff]  ;;  %v2125_v61 = vld [vmem:[%s10009_s26 + $0x1bd0] sm:$0xff] }
  0xf0   : > { %v2127_v62 = vld [vmem:[%s10009_s26 + $0x1be0] sm:$0xff]  ;;  %2124 = vst [vmem:[%s10014_s27 + $0xde0] sm:$0xff] %v2123_v60  ;;  %2126 = vst [vmem:[%s10014_s27 + $0xde8] sm:$0xff] %v2125_v61  ;;  %v2129_v63 = vld [vmem:[%s10009_s26 + $0x1bf0] sm:$0xff] }
  0xf1   : > { %2128 = vst [vmem:[%s10014_s27 + $0xdf0] sm:$0xff] %v2127_v62  ;;  %v2131_v0 = vld [vmem:[%s10009_s26 + $0x1c00] sm:$0xff]  ;;  %v2133_v1 = vld [vmem:[%s10009_s26 + $0x1c10] sm:$0xff]  ;;  %2130 = vst [vmem:[%s10014_s27 + $0xdf8] sm:$0xff] %v2129_v63 }
  0xf2   : > { %2132 = vst [vmem:[%s10014_s27 + $0xe00] sm:$0xff] %v2131_v0  ;;  %2134 = vst [vmem:[%s10014_s27 + $0xe08] sm:$0xff] %v2133_v1  ;;  %v2135_v2 = vld [vmem:[%s10009_s26 + $0x1c20] sm:$0xff]  ;;  %v2137_v3 = vld [vmem:[%s10009_s26 + $0x1c30] sm:$0xff] }
  0xf3   : > { %v2139_v4 = vld [vmem:[%s10009_s26 + $0x1c40] sm:$0xff]  ;;  %2136 = vst [vmem:[%s10014_s27 + $0xe10] sm:$0xff] %v2135_v2  ;;  %2138 = vst [vmem:[%s10014_s27 + $0xe18] sm:$0xff] %v2137_v3  ;;  %v2141_v5 = vld [vmem:[%s10009_s26 + $0x1c50] sm:$0xff] }
  0xf4   : > { %2140 = vst [vmem:[%s10014_s27 + $0xe20] sm:$0xff] %v2139_v4  ;;  %v2143_v6 = vld [vmem:[%s10009_s26 + $0x1c60] sm:$0xff]  ;;  %v2145_v7 = vld [vmem:[%s10009_s26 + $0x1c70] sm:$0xff]  ;;  %2142 = vst [vmem:[%s10014_s27 + $0xe28] sm:$0xff] %v2141_v5 }
  0xf5   : > { %2144 = vst [vmem:[%s10014_s27 + $0xe30] sm:$0xff] %v2143_v6  ;;  %2146 = vst [vmem:[%s10014_s27 + $0xe38] sm:$0xff] %v2145_v7  ;;  %v2147_v8 = vld [vmem:[%s10009_s26 + $0x1c80] sm:$0xff]  ;;  %v2149_v9 = vld [vmem:[%s10009_s26 + $0x1c90] sm:$0xff] }
  0xf6   : > { %v2151_v10 = vld [vmem:[%s10009_s26 + $0x1ca0] sm:$0xff]  ;;  %2148 = vst [vmem:[%s10014_s27 + $0xe40] sm:$0xff] %v2147_v8  ;;  %2150 = vst [vmem:[%s10014_s27 + $0xe48] sm:$0xff] %v2149_v9  ;;  %v2153_v11 = vld [vmem:[%s10009_s26 + $0x1cb0] sm:$0xff] }
  0xf7   : > { %2152 = vst [vmem:[%s10014_s27 + $0xe50] sm:$0xff] %v2151_v10  ;;  %v2155_v12 = vld [vmem:[%s10009_s26 + $0x1cc0] sm:$0xff]  ;;  %v2157_v13 = vld [vmem:[%s10009_s26 + $0x1cd0] sm:$0xff]  ;;  %2154 = vst [vmem:[%s10014_s27 + $0xe58] sm:$0xff] %v2153_v11 }
  0xf8   : > { %2156 = vst [vmem:[%s10014_s27 + $0xe60] sm:$0xff] %v2155_v12  ;;  %2158 = vst [vmem:[%s10014_s27 + $0xe68] sm:$0xff] %v2157_v13  ;;  %v2159_v14 = vld [vmem:[%s10009_s26 + $0x1ce0] sm:$0xff]  ;;  %v2161_v15 = vld [vmem:[%s10009_s26 + $0x1cf0] sm:$0xff] }
  0xf9   : > { %v2163_v16 = vld [vmem:[%s10009_s26 + $0x1d00] sm:$0xff]  ;;  %2160 = vst [vmem:[%s10014_s27 + $0xe70] sm:$0xff] %v2159_v14  ;;  %2162 = vst [vmem:[%s10014_s27 + $0xe78] sm:$0xff] %v2161_v15  ;;  %v2165_v17 = vld [vmem:[%s10009_s26 + $0x1d10] sm:$0xff] }
  0xfa   : > { %2164 = vst [vmem:[%s10014_s27 + $0xe80] sm:$0xff] %v2163_v16  ;;  %v2167_v18 = vld [vmem:[%s10009_s26 + $0x1d20] sm:$0xff]  ;;  %v2169_v19 = vld [vmem:[%s10009_s26 + $0x1d30] sm:$0xff]  ;;  %2166 = vst [vmem:[%s10014_s27 + $0xe88] sm:$0xff] %v2165_v17 }
  0xfb   : > { %2168 = vst [vmem:[%s10014_s27 + $0xe90] sm:$0xff] %v2167_v18  ;;  %2170 = vst [vmem:[%s10014_s27 + $0xe98] sm:$0xff] %v2169_v19  ;;  %v2171_v20 = vld [vmem:[%s10009_s26 + $0x1d40] sm:$0xff]  ;;  %v2173_v21 = vld [vmem:[%s10009_s26 + $0x1d50] sm:$0xff] }
  0xfc   : > { %v2175_v22 = vld [vmem:[%s10009_s26 + $0x1d60] sm:$0xff]  ;;  %2172 = vst [vmem:[%s10014_s27 + $0xea0] sm:$0xff] %v2171_v20  ;;  %2174 = vst [vmem:[%s10014_s27 + $0xea8] sm:$0xff] %v2173_v21  ;;  %v2177_v23 = vld [vmem:[%s10009_s26 + $0x1d70] sm:$0xff] }
  0xfd   : > { %2176 = vst [vmem:[%s10014_s27 + $0xeb0] sm:$0xff] %v2175_v22  ;;  %v2179_v24 = vld [vmem:[%s10009_s26 + $0x1d80] sm:$0xff]  ;;  %v2181_v25 = vld [vmem:[%s10009_s26 + $0x1d90] sm:$0xff]  ;;  %2178 = vst [vmem:[%s10014_s27 + $0xeb8] sm:$0xff] %v2177_v23 }
  0xfe   : > { %2180 = vst [vmem:[%s10014_s27 + $0xec0] sm:$0xff] %v2179_v24  ;;  %2182 = vst [vmem:[%s10014_s27 + $0xec8] sm:$0xff] %v2181_v25  ;;  %v2183_v26 = vld [vmem:[%s10009_s26 + $0x1da0] sm:$0xff]  ;;  %v2185_v27 = vld [vmem:[%s10009_s26 + $0x1db0] sm:$0xff] }
  0xff   : > { %v2187_v28 = vld [vmem:[%s10009_s26 + $0x1dc0] sm:$0xff]  ;;  %2184 = vst [vmem:[%s10014_s27 + $0xed0] sm:$0xff] %v2183_v26  ;;  %2186 = vst [vmem:[%s10014_s27 + $0xed8] sm:$0xff] %v2185_v27  ;;  %v2189_v29 = vld [vmem:[%s10009_s26 + $0x1dd0] sm:$0xff] }
 0x100   : > { %2188 = vst [vmem:[%s10014_s27 + $0xee0] sm:$0xff] %v2187_v28  ;;  %v2191_v30 = vld [vmem:[%s10009_s26 + $0x1de0] sm:$0xff]  ;;  %v2193_v31 = vld [vmem:[%s10009_s26 + $0x1df0] sm:$0xff]  ;;  %2190 = vst [vmem:[%s10014_s27 + $0xee8] sm:$0xff] %v2189_v29 }
 0x101   : > { %2192 = vst [vmem:[%s10014_s27 + $0xef0] sm:$0xff] %v2191_v30  ;;  %2194 = vst [vmem:[%s10014_s27 + $0xef8] sm:$0xff] %v2193_v31  ;;  %v2195_v32 = vld [vmem:[%s10009_s26 + $0x1e00] sm:$0xff]  ;;  %v2197_v33 = vld [vmem:[%s10009_s26 + $0x1e10] sm:$0xff] }
 0x102   : > { %v2199_v34 = vld [vmem:[%s10009_s26 + $0x1e20] sm:$0xff]  ;;  %2196 = vst [vmem:[%s10014_s27 + $0xf00] sm:$0xff] %v2195_v32  ;;  %2198 = vst [vmem:[%s10014_s27 + $0xf08] sm:$0xff] %v2197_v33  ;;  %v2201_v35 = vld [vmem:[%s10009_s26 + $0x1e30] sm:$0xff] }
 0x103   : > { %2200 = vst [vmem:[%s10014_s27 + $0xf10] sm:$0xff] %v2199_v34  ;;  %v2203_v36 = vld [vmem:[%s10009_s26 + $0x1e40] sm:$0xff]  ;;  %v2205_v37 = vld [vmem:[%s10009_s26 + $0x1e50] sm:$0xff]  ;;  %2202 = vst [vmem:[%s10014_s27 + $0xf18] sm:$0xff] %v2201_v35 }
 0x104   : > { %2204 = vst [vmem:[%s10014_s27 + $0xf20] sm:$0xff] %v2203_v36  ;;  %2206 = vst [vmem:[%s10014_s27 + $0xf28] sm:$0xff] %v2205_v37  ;;  %v2207_v38 = vld [vmem:[%s10009_s26 + $0x1e60] sm:$0xff]  ;;  %v2209_v39 = vld [vmem:[%s10009_s26 + $0x1e70] sm:$0xff] }
 0x105   : > { %v2211_v40 = vld [vmem:[%s10009_s26 + $0x1e80] sm:$0xff]  ;;  %2208 = vst [vmem:[%s10014_s27 + $0xf30] sm:$0xff] %v2207_v38  ;;  %2210 = vst [vmem:[%s10014_s27 + $0xf38] sm:$0xff] %v2209_v39  ;;  %v2213_v41 = vld [vmem:[%s10009_s26 + $0x1e90] sm:$0xff] }
 0x106   : > { %2212 = vst [vmem:[%s10014_s27 + $0xf40] sm:$0xff] %v2211_v40  ;;  %v2215_v42 = vld [vmem:[%s10009_s26 + $0x1ea0] sm:$0xff]  ;;  %v2217_v43 = vld [vmem:[%s10009_s26 + $0x1eb0] sm:$0xff]  ;;  %2214 = vst [vmem:[%s10014_s27 + $0xf48] sm:$0xff] %v2213_v41 }
 0x107   : > { %2216 = vst [vmem:[%s10014_s27 + $0xf50] sm:$0xff] %v2215_v42  ;;  %2218 = vst [vmem:[%s10014_s27 + $0xf58] sm:$0xff] %v2217_v43  ;;  %v2219_v44 = vld [vmem:[%s10009_s26 + $0x1ec0] sm:$0xff]  ;;  %v2221_v45 = vld [vmem:[%s10009_s26 + $0x1ed0] sm:$0xff] }
 0x108   : > { %v2223_v46 = vld [vmem:[%s10009_s26 + $0x1ee0] sm:$0xff]  ;;  %2220 = vst [vmem:[%s10014_s27 + $0xf60] sm:$0xff] %v2219_v44  ;;  %2222 = vst [vmem:[%s10014_s27 + $0xf68] sm:$0xff] %v2221_v45  ;;  %v2225_v47 = vld [vmem:[%s10009_s26 + $0x1ef0] sm:$0xff] }
 0x109   : > { %2224 = vst [vmem:[%s10014_s27 + $0xf70] sm:$0xff] %v2223_v46  ;;  %v2227_v48 = vld [vmem:[%s10009_s26 + $0x1f00] sm:$0xff]  ;;  %v2229_v49 = vld [vmem:[%s10009_s26 + $0x1f10] sm:$0xff]  ;;  %2226 = vst [vmem:[%s10014_s27 + $0xf78] sm:$0xff] %v2225_v47 }
 0x10a   : > { %2228 = vst [vmem:[%s10014_s27 + $0xf80] sm:$0xff] %v2227_v48  ;;  %2230 = vst [vmem:[%s10014_s27 + $0xf88] sm:$0xff] %v2229_v49  ;;  %v2231_v50 = vld [vmem:[%s10009_s26 + $0x1f20] sm:$0xff]  ;;  %v2233_v51 = vld [vmem:[%s10009_s26 + $0x1f30] sm:$0xff] }
 0x10b   : > { %v2235_v52 = vld [vmem:[%s10009_s26 + $0x1f40] sm:$0xff]  ;;  %2232 = vst [vmem:[%s10014_s27 + $0xf90] sm:$0xff] %v2231_v50  ;;  %2234 = vst [vmem:[%s10014_s27 + $0xf98] sm:$0xff] %v2233_v51  ;;  %v2237_v53 = vld [vmem:[%s10009_s26 + $0x1f50] sm:$0xff] }
 0x10c   : > { %2236 = vst [vmem:[%s10014_s27 + $0xfa0] sm:$0xff] %v2235_v52  ;;  %v2239_v54 = vld [vmem:[%s10009_s26 + $0x1f60] sm:$0xff]  ;;  %v2241_v55 = vld [vmem:[%s10009_s26 + $0x1f70] sm:$0xff]  ;;  %2238 = vst [vmem:[%s10014_s27 + $0xfa8] sm:$0xff] %v2237_v53 }
 0x10d   : > { %2240 = vst [vmem:[%s10014_s27 + $0xfb0] sm:$0xff] %v2239_v54  ;;  %2242 = vst [vmem:[%s10014_s27 + $0xfb8] sm:$0xff] %v2241_v55  ;;  %v2243_v56 = vld [vmem:[%s10009_s26 + $0x1f80] sm:$0xff]  ;;  %v2245_v57 = vld [vmem:[%s10009_s26 + $0x1f90] sm:$0xff] }
 0x10e   : > { %v2247_v58 = vld [vmem:[%s10009_s26 + $0x1fa0] sm:$0xff]  ;;  %2244 = vst [vmem:[%s10014_s27 + $0xfc0] sm:$0xff] %v2243_v56  ;;  %2246 = vst [vmem:[%s10014_s27 + $0xfc8] sm:$0xff] %v2245_v57  ;;  %v2249_v59 = vld [vmem:[%s10009_s26 + $0x1fb0] sm:$0xff] }
 0x10f   : > { %2248 = vst [vmem:[%s10014_s27 + $0xfd0] sm:$0xff] %v2247_v58  ;;  %v2251_v60 = vld [vmem:[%s10009_s26 + $0x1fc0] sm:$0xff]  ;;  %v2253_v61 = vld [vmem:[%s10009_s26 + $0x1fd0] sm:$0xff]  ;;  %2250 = vst [vmem:[%s10014_s27 + $0xfd8] sm:$0xff] %v2249_v59 }
 0x110   : > { %2252 = vst [vmem:[%s10014_s27 + $0xfe0] sm:$0xff] %v2251_v60  ;;  %2254 = vst [vmem:[%s10014_s27 + $0xfe8] sm:$0xff] %v2253_v61  ;;  %v2255_v62 = vld [vmem:[%s10009_s26 + $0x1fe0] sm:$0xff]  ;;  %v2257_v63 = vld [vmem:[%s10009_s26 + $0x1ff0] sm:$0xff] }
 0x111   : > { %2256 = vst [vmem:[%s10014_s27 + $0xff0] sm:$0xff] %v2255_v62  ;;  %2258 = vst [vmem:[%s10014_s27 + $0xff8] sm:$0xff] %v2257_v63 }
 0x112 PF: > { %p8452_p6 = scmp.ge.s32.totalorder %s9944_s16, 1  ;;  %p4355_p7 = scmp.lt.s32.totalorder %s9944_s16, 3 }
 0x114   : > { %p4356_p8 = pnand %p8452_p6, %p4355_p7 }
 0x115   : > { %s4362_s28 = sand.u32 (!%p4356_p8), 1, %s9928_s12   ;;  %v11043_v0 = vld [vmem:[%s11720_s0] sm:$0xff] (!%p4356_p8)  ;;  %s8454_s22 = sshll.u32 (!%p4356_p8), %s9936_s14, 1 }
 0x116   : > { %4359 = sbr.rel (%p4356_p8) target bundleno = 1016 (0x3f8), region = 80  ;;  %v11048_v1 = vld [vmem:[%s11720_s0 + $0x40] sm:$0xff] (!%p4356_p8)  ;;  %s8453_s6 = sshll.u32 (!%p4356_p8), %s4362_s28, 12  ;;  %v8458_v2 = vcombine.high (!%p4356_p8), %v11043_v0, %v11043_v0 }
 0x117   : > { %v8474_v3 = vcombine.high (!%p4356_p8), %v11048_v1, %v11048_v1  ;;  %s11054_s7 = scalar_lea.vmem (!%p4356_p8), [#allocation2], %s8453_s6  ;;  %p4415_p9 = scmp.lt.s32.totalorder (!%p4356_p8), %s8454_s22, 3 }
 0x118   : > { %v9106_v4 = vld [vmem:[%s11054_s7 + $0x4] ss:$8 sps:$4 sm:$0xff] (!%p4356_p8)   ;;  %7673 = vmatprep.mubr.bf16.mxu1 (!%p4356_p8), %v8458_v2  ;;  %v9110_v6 = vld [vmem:[%s11054_s7] ss:$8 sps:$4 sm:$0xff] (!%p4356_p8)   ;;  %v9112_v8 = vld [vmem:[%s11054_s7 + $0x14] ss:$8 sps:$4 sm:$0xff] (!%p4356_p8)  }
 0x119   : > { %8001 = vmatprep.mubr.bf16.mxu0 (!%p4356_p8), %v8474_v3  ;;  %v9108_v5 = vld [vmem:[%s11054_s7 + $0x804] ss:$8 sps:$4 sm:$0xff] (!%p4356_p8)   ;;  %7641 = vmatprep.subr.bf16.mxu1 (!%p4356_p8), %v9106_v4  ;;  %v9111_v7 = vld [vmem:[%s11054_s7 + $0x800] ss:$8 sps:$4 sm:$0xff] (!%p4356_p8)   ;;  %v9114_v9 = vld [vmem:[%s11054_s7 + $0x814] ss:$8 sps:$4 sm:$0xff] (!%p4356_p8)  }
 0x11a   : > { %7969 = vmatprep.subr.bf16.mxu0 (!%p4356_p8), %v9108_v5  ;;  %7642 = vmatpush1.bf16.msra.mxu1 (!%p4356_p8), %v9110_v6  ;;  %v9116_v10 = vld [vmem:[%s11054_s7 + $0x10] ss:$8 sps:$4 sm:$0xff] (!%p4356_p8)   ;;  %v9118_v12 = vld [vmem:[%s11054_s7 + $0x24] ss:$8 sps:$4 sm:$0xff] (!%p4356_p8)   ;;  %v9122_v14 = vld [vmem:[%s11054_s7 + $0x20] ss:$8 sps:$4 sm:$0xff] (!%p4356_p8)  }
 0x11b   : > { %7970 = vmatpush1.bf16.msra.mxu0 (!%p4356_p8), %v9111_v7  ;;  %7643 = vmatprep.subr.bf16.mxu1 (!%p4356_p8), %v9112_v8  ;;  %v9117_v11 = vld [vmem:[%s11054_s7 + $0x810] ss:$8 sps:$4 sm:$0xff] (!%p4356_p8)   ;;  %v9120_v13 = vld [vmem:[%s11054_s7 + $0x824] ss:$8 sps:$4 sm:$0xff] (!%p4356_p8)   ;;  %v9123_v15 = vld [vmem:[%s11054_s7 + $0x820] ss:$8 sps:$4 sm:$0xff] (!%p4356_p8)   ;;  %v8457_v8 = vcombine.low (!%p4356_p8), %v11043_v0, %v11043_v0 }
 0x11c   : > { %7971 = vmatprep.subr.bf16.mxu0 (!%p4356_p8), %v9114_v9  ;;  %v9124_v16 = vld [vmem:[%s11054_s7 + $0x34] ss:$8 sps:$4 sm:$0xff] (!%p4356_p8)   ;;  %v9128_v18 = vld [vmem:[%s11054_s7 + $0x30] ss:$8 sps:$4 sm:$0xff] (!%p4356_p8)   ;;  %v9130_v20 = vld [vmem:[%s11054_s7 + $0x44] ss:$8 sps:$4 sm:$0xff] (!%p4356_p8)  }
 0x11d   : > { %v9126_v17 = vld [vmem:[%s11054_s7 + $0x834] ss:$8 sps:$4 sm:$0xff]   ;;  %v9129_v19 = vld [vmem:[%s11054_s7 + $0x830] ss:$8 sps:$4 sm:$0xff]   ;;  %v9132_v21 = vld [vmem:[%s11054_s7 + $0x844] ss:$8 sps:$4 sm:$0xff]  }
 0x11e   : > { %7644 = vmatpush1.bf16.msra.mxu1 %v9116_v10  ;;  %v9134_v22 = vld [vmem:[%s11054_s7 + $0x40] ss:$8 sps:$4 sm:$0xff]   ;;  %v9136_v24 = vld [vmem:[%s11054_s7 + $0x54] ss:$8 sps:$4 sm:$0xff]   ;;  %v9140_v26 = vld [vmem:[%s11054_s7 + $0x50] ss:$8 sps:$4 sm:$0xff]   ;;  %v8473_v10 = vcombine.low %v11048_v1, %v11048_v1 }
 0x11f   : > { %7972 = vmatpush1.bf16.msra.mxu0 %v9117_v11  ;;  %7645 = vmatprep.subr.bf16.mxu1 %v9118_v12  ;;  %v9135_v23 = vld [vmem:[%s11054_s7 + $0x840] ss:$8 sps:$4 sm:$0xff]   ;;  %v9138_v25 = vld [vmem:[%s11054_s7 + $0x854] ss:$8 sps:$4 sm:$0xff]   ;;  %v9141_v27 = vld [vmem:[%s11054_s7 + $0x850] ss:$8 sps:$4 sm:$0xff]  }
 0x120   : > { %7973 = vmatprep.subr.bf16.mxu0 %v9120_v13  ;;  %v9142_v28 = vld [vmem:[%s11054_s7 + $0x64] ss:$8 sps:$4 sm:$0xff]   ;;  %v9146_v30 = vld [vmem:[%s11054_s7 + $0x60] ss:$8 sps:$4 sm:$0xff]   ;;  %v9148_v32 = vld [vmem:[%s11054_s7 + $0x74] ss:$8 sps:$4 sm:$0xff]  }
 0x121   : > { %v9144_v29 = vld [vmem:[%s11054_s7 + $0x864] ss:$8 sps:$4 sm:$0xff]   ;;  %v9147_v31 = vld [vmem:[%s11054_s7 + $0x860] ss:$8 sps:$4 sm:$0xff]   ;;  %v9150_v33 = vld [vmem:[%s11054_s7 + $0x874] ss:$8 sps:$4 sm:$0xff]  }
 0x122   : > { %7646 = vmatpush1.bf16.msra.mxu1 %v9122_v14  ;;  %v9152_v34 = vld [vmem:[%s11054_s7 + $0x70] ss:$8 sps:$4 sm:$0xff]   ;;  %v9154_v36 = vld [vmem:[%s11054_s7 + $0x84] ss:$8 sps:$4 sm:$0xff]   ;;  %v9158_v38 = vld [vmem:[%s11054_s7 + $0x80] ss:$8 sps:$4 sm:$0xff]  }
 0x123   : > { %7974 = vmatpush1.bf16.msra.mxu0 %v9123_v15  ;;  %7647 = vmatprep.subr.bf16.mxu1 %v9124_v16  ;;  %v9153_v35 = vld [vmem:[%s11054_s7 + $0x870] ss:$8 sps:$4 sm:$0xff]   ;;  %v9156_v37 = vld [vmem:[%s11054_s7 + $0x884] ss:$8 sps:$4 sm:$0xff]   ;;  %v9159_v39 = vld [vmem:[%s11054_s7 + $0x880] ss:$8 sps:$4 sm:$0xff]  }
 0x124   : > { %7975 = vmatprep.subr.bf16.mxu0 %v9126_v17  ;;  %v9160_v40 = vld [vmem:[%s11054_s7 + $0x94] ss:$8 sps:$4 sm:$0xff]   ;;  %v9164_v42 = vld [vmem:[%s11054_s7 + $0x90] ss:$8 sps:$4 sm:$0xff]   ;;  %v9166_v44 = vld [vmem:[%s11054_s7 + $0xa4] ss:$8 sps:$4 sm:$0xff]  }
 0x125   : > { %v9162_v41 = vld [vmem:[%s11054_s7 + $0x894] ss:$8 sps:$4 sm:$0xff]   ;;  %v9165_v43 = vld [vmem:[%s11054_s7 + $0x890] ss:$8 sps:$4 sm:$0xff]   ;;  %v9168_v45 = vld [vmem:[%s11054_s7 + $0x8a4] ss:$8 sps:$4 sm:$0xff]  }
 0x126   : > { %7648 = vmatpush1.bf16.msra.mxu1 %v9128_v18  ;;  %v9170_v46 = vld [vmem:[%s11054_s7 + $0xa0] ss:$8 sps:$4 sm:$0xff]   ;;  %v9172_v48 = vld [vmem:[%s11054_s7 + $0xb4] ss:$8 sps:$4 sm:$0xff]   ;;  %v9176_v50 = vld [vmem:[%s11054_s7 + $0xb0] ss:$8 sps:$4 sm:$0xff]  }
 0x127   : > { %7976 = vmatpush1.bf16.msra.mxu0 %v9129_v19  ;;  %7649 = vmatprep.subr.bf16.mxu1 %v9130_v20  ;;  %v9171_v47 = vld [vmem:[%s11054_s7 + $0x8a0] ss:$8 sps:$4 sm:$0xff]   ;;  %v9174_v49 = vld [vmem:[%s11054_s7 + $0x8b4] ss:$8 sps:$4 sm:$0xff]   ;;  %v9177_v51 = vld [vmem:[%s11054_s7 + $0x8b0] ss:$8 sps:$4 sm:$0xff]  }
 0x128   : > { %7977 = vmatprep.subr.bf16.mxu0 %v9132_v21  ;;  %v9178_v52 = vld [vmem:[%s11054_s7 + $0xc4] ss:$8 sps:$4 sm:$0xff]   ;;  %v9182_v54 = vld [vmem:[%s11054_s7 + $0xc0] ss:$8 sps:$4 sm:$0xff]   ;;  %v9184_v56 = vld [vmem:[%s11054_s7 + $0xd4] ss:$8 sps:$4 sm:$0xff]  }
 0x129   : > { %v9180_v53 = vld [vmem:[%s11054_s7 + $0x8c4] ss:$8 sps:$4 sm:$0xff]   ;;  %v9183_v55 = vld [vmem:[%s11054_s7 + $0x8c0] ss:$8 sps:$4 sm:$0xff]   ;;  %v9186_v57 = vld [vmem:[%s11054_s7 + $0x8d4] ss:$8 sps:$4 sm:$0xff]  }
 0x12a   : > { %7650 = vmatpush1.bf16.msra.mxu1 %v9134_v22  ;;  %v9188_v58 = vld [vmem:[%s11054_s7 + $0xd0] ss:$8 sps:$4 sm:$0xff]   ;;  %v9190_v60 = vld [vmem:[%s11054_s7 + $0xe4] ss:$8 sps:$4 sm:$0xff]   ;;  %v9194_v62 = vld [vmem:[%s11054_s7 + $0xe0] ss:$8 sps:$4 sm:$0xff]  }
 0x12b   : > { %7978 = vmatpush1.bf16.msra.mxu0 %v9135_v23  ;;  %7651 = vmatprep.subr.bf16.mxu1 %v9136_v24  ;;  %v9189_v59 = vld [vmem:[%s11054_s7 + $0x8d0] ss:$8 sps:$4 sm:$0xff]   ;;  %v9192_v61 = vld [vmem:[%s11054_s7 + $0x8e4] ss:$8 sps:$4 sm:$0xff]   ;;  %v9195_v63 = vld [vmem:[%s11054_s7 + $0x8e0] ss:$8 sps:$4 sm:$0xff]  }
 0x12c   : > { %7979 = vmatprep.subr.bf16.mxu0 %v9138_v25  ;;  %v9196_v2 = vld [vmem:[%s11054_s7 + $0xf4] ss:$8 sps:$4 sm:$0xff]   ;;  %v9200_v4 = vld [vmem:[%s11054_s7 + $0xf0] ss:$8 sps:$4 sm:$0xff]   ;;  %v9206_v6 = vld [vmem:[%s11054_s7 + $0x104] ss:$8 sps:$4 sm:$0xff]  }
 0x12d   : > { %v9198_v3 = vld [vmem:[%s11054_s7 + $0x8f4] ss:$8 sps:$4 sm:$0xff]   ;;  %v9201_v5 = vld [vmem:[%s11054_s7 + $0x8f0] ss:$8 sps:$4 sm:$0xff]   ;;  %v9211_v7 = vld [vmem:[%s11054_s7 + $0x904] ss:$8 sps:$4 sm:$0xff]  }
 0x12e   : > { %7652 = vmatpush1.bf16.msra.mxu1 %v9140_v26  ;;  %v9204_v9 = vld [vmem:[%s11054_s7 + $0x100] ss:$8 sps:$4 sm:$0xff]   ;;  %v9214_v12 = vld [vmem:[%s11054_s7 + $0x114] ss:$8 sps:$4 sm:$0xff]   ;;  %v9212_v0 = vld [vmem:[%s11054_s7 + $0x110] ss:$8 sps:$4 sm:$0xff]  }
 0x12f   : > { %7980 = vmatpush1.bf16.msra.mxu0 %v9141_v27  ;;  %7653 = vmatprep.subr.bf16.mxu1 %v9142_v28  ;;  %v9209_v11 = vld [vmem:[%s11054_s7 + $0x900] ss:$8 sps:$4 sm:$0xff]   ;;  %v9217_v13 = vld [vmem:[%s11054_s7 + $0x914] ss:$8 sps:$4 sm:$0xff]   ;;  %v9215_v14 = vld [vmem:[%s11054_s7 + $0x910] ss:$8 sps:$4 sm:$0xff]  }
 0x130   : > { %7981 = vmatprep.subr.bf16.mxu0 %v9144_v29  ;;  %v9220_v1 = vld [vmem:[%s11054_s7 + $0x124] ss:$8 sps:$4 sm:$0xff]   ;;  %v9218_v16 = vld [vmem:[%s11054_s7 + $0x120] ss:$8 sps:$4 sm:$0xff]   ;;  %v9226_v18 = vld [vmem:[%s11054_s7 + $0x134] ss:$8 sps:$4 sm:$0xff]  }
 0x131   : > { %v9223_v15 = vld [vmem:[%s11054_s7 + $0x924] ss:$8 sps:$4 sm:$0xff]   ;;  %v9221_v17 = vld [vmem:[%s11054_s7 + $0x920] ss:$8 sps:$4 sm:$0xff]   ;;  %v9229_v19 = vld [vmem:[%s11054_s7 + $0x934] ss:$8 sps:$4 sm:$0xff]  }
 0x132   : > { %7654 = vmatpush1.bf16.msra.mxu1 %v9146_v30  ;;  %v9224_v20 = vld [vmem:[%s11054_s7 + $0x130] ss:$8 sps:$4 sm:$0xff]   ;;  %v9232_v22 = vld [vmem:[%s11054_s7 + $0x144] ss:$8 sps:$4 sm:$0xff]   ;;  %v9230_v24 = vld [vmem:[%s11054_s7 + $0x140] ss:$8 sps:$4 sm:$0xff]  }
 0x133   : > { %7982 = vmatpush1.bf16.msra.mxu0 %v9147_v31  ;;  %7655 = vmatprep.subr.bf16.mxu1 %v9148_v32  ;;  %v9227_v21 = vld [vmem:[%s11054_s7 + $0x930] ss:$8 sps:$4 sm:$0xff]   ;;  %v9235_v23 = vld [vmem:[%s11054_s7 + $0x944] ss:$8 sps:$4 sm:$0xff]   ;;  %v9233_v25 = vld [vmem:[%s11054_s7 + $0x940] ss:$8 sps:$4 sm:$0xff]  }
 0x134   : > { %7983 = vmatprep.subr.bf16.mxu0 %v9150_v33  ;;  %v9238_v26 = vld [vmem:[%s11054_s7 + $0x154] ss:$8 sps:$4 sm:$0xff]   ;;  %v9236_v28 = vld [vmem:[%s11054_s7 + $0x150] ss:$8 sps:$4 sm:$0xff]   ;;  %v9244_v30 = vld [vmem:[%s11054_s7 + $0x164] ss:$8 sps:$4 sm:$0xff]  }
 0x135   : > { %v9241_v27 = vld [vmem:[%s11054_s7 + $0x954] ss:$8 sps:$4 sm:$0xff]   ;;  %v9239_v29 = vld [vmem:[%s11054_s7 + $0x950] ss:$8 sps:$4 sm:$0xff]   ;;  %v9247_v31 = vld [vmem:[%s11054_s7 + $0x964] ss:$8 sps:$4 sm:$0xff]  }
 0x136   : > { %7656 = vmatpush1.bf16.msra.mxu1 %v9152_v34  ;;  %v11153_v32 = vld [vmem:[%s11720_s0 + $0x8] sm:$0xff]  ;;  %s11731_s22 = smov (!%p4415_p9, %s8454_s22), 3 }
 0x137   : > { %7984 = vmatpush1.bf16.msra.mxu0 %v9153_v35  ;;  %7657 = vmatprep.subr.bf16.mxu1 %v9154_v36  ;;  %v8460_v33 = vcombine.high %v11153_v32, %v11153_v32  ;;  %v11160_v34 = vld [vmem:[%s11720_s0 + $0x48] sm:$0xff]  ;;  %s8456_s14 = sshll.u32 %s11731_s22, 2 }
 0x138   : > { %7985 = vmatprep.subr.bf16.mxu0 %v9156_v37  ;;  %v9242_v35 = vld [vmem:[%s11054_s7 + $0x160] ss:$8 sps:$4 sm:$0xff]   ;;  %v8476_v37 = vcombine.high %v11160_v34, %v11160_v34  ;;  %s4427_s27 = scalar_lea.vmem %s11723_s3, %s8456_s14 }
 0x139   : > { %v9245_v36 = vld [vmem:[%s11054_s7 + $0x960] ss:$8 sps:$4 sm:$0xff]  }
 0x13a   : > { %7658 = vmatpush1.bf16.msra.mxu1 %v9158_v38  ;;  %v9250_v38 = vld [vmem:[%s11054_s7 + $0x174] ss:$8 sps:$4 sm:$0xff]  }
 0x13b   : > { %7986 = vmatpush1.bf16.msra.mxu0 %v9159_v39  ;;  %7659 = vmatprep.subr.bf16.mxu1 %v9160_v40  ;;  %v9253_v39 = vld [vmem:[%s11054_s7 + $0x974] ss:$8 sps:$4 sm:$0xff]   ;;  %v9248_v40 = vld [vmem:[%s11054_s7 + $0x170] ss:$8 sps:$4 sm:$0xff]  }
 0x13c   : > { %7987 = vmatprep.subr.bf16.mxu0 %v9162_v41  ;;  %v9251_v41 = vld [vmem:[%s11054_s7 + $0x970] ss:$8 sps:$4 sm:$0xff]  }
 0x13e   : > { %7660 = vmatpush1.bf16.msra.mxu1 %v9164_v42  ;;  %v9256_v42 = vld [vmem:[%s11054_s7 + $0x184] ss:$8 sps:$4 sm:$0xff]  }
 0x13f   : > { %7988 = vmatpush1.bf16.msra.mxu0 %v9165_v43  ;;  %7661 = vmatprep.subr.bf16.mxu1 %v9166_v44  ;;  %v9259_v43 = vld [vmem:[%s11054_s7 + $0x984] ss:$8 sps:$4 sm:$0xff]   ;;  %v9254_v44 = vld [vmem:[%s11054_s7 + $0x180] ss:$8 sps:$4 sm:$0xff]  }
 0x140   : > { %7989 = vmatprep.subr.bf16.mxu0 %v9168_v45  ;;  %v9257_v45 = vld [vmem:[%s11054_s7 + $0x980] ss:$8 sps:$4 sm:$0xff]  }
 0x142   : > { %7662 = vmatpush1.bf16.msra.mxu1 %v9170_v46  ;;  %v9262_v46 = vld [vmem:[%s11054_s7 + $0x194] ss:$8 sps:$4 sm:$0xff]  }
 0x143   : > { %7990 = vmatpush1.bf16.msra.mxu0 %v9171_v47  ;;  %7663 = vmatprep.subr.bf16.mxu1 %v9172_v48  ;;  %v9265_v47 = vld [vmem:[%s11054_s7 + $0x994] ss:$8 sps:$4 sm:$0xff]   ;;  %v9260_v48 = vld [vmem:[%s11054_s7 + $0x190] ss:$8 sps:$4 sm:$0xff]  }
 0x144   : > { %7991 = vmatprep.subr.bf16.mxu0 %v9174_v49  ;;  %v9263_v49 = vld [vmem:[%s11054_s7 + $0x990] ss:$8 sps:$4 sm:$0xff]  }
 0x146   : > { %7664 = vmatpush1.bf16.msra.mxu1 %v9176_v50  ;;  %v9268_v50 = vld [vmem:[%s11054_s7 + $0x1a4] ss:$8 sps:$4 sm:$0xff]  }
 0x147   : > { %7992 = vmatpush1.bf16.msra.mxu0 %v9177_v51  ;;  %7665 = vmatprep.subr.bf16.mxu1 %v9178_v52  ;;  %v9271_v51 = vld [vmem:[%s11054_s7 + $0x9a4] ss:$8 sps:$4 sm:$0xff]   ;;  %v9266_v52 = vld [vmem:[%s11054_s7 + $0x1a0] ss:$8 sps:$4 sm:$0xff]  }
 0x148   : > { %7993 = vmatprep.subr.bf16.mxu0 %v9180_v53  ;;  %v9269_v53 = vld [vmem:[%s11054_s7 + $0x9a0] ss:$8 sps:$4 sm:$0xff]  }
 0x14a   : > { %7666 = vmatpush1.bf16.msra.mxu1 %v9182_v54  ;;  %v9274_v54 = vld [vmem:[%s11054_s7 + $0x1b4] ss:$8 sps:$4 sm:$0xff]  }
 0x14b   : > { %7994 = vmatpush1.bf16.msra.mxu0 %v9183_v55  ;;  %7667 = vmatprep.subr.bf16.mxu1 %v9184_v56  ;;  %v9277_v55 = vld [vmem:[%s11054_s7 + $0x9b4] ss:$8 sps:$4 sm:$0xff]   ;;  %v9272_v56 = vld [vmem:[%s11054_s7 + $0x1b0] ss:$8 sps:$4 sm:$0xff]  }
 0x14c   : > { %7995 = vmatprep.subr.bf16.mxu0 %v9186_v57  ;;  %v9275_v57 = vld [vmem:[%s11054_s7 + $0x9b0] ss:$8 sps:$4 sm:$0xff]  }
 0x14e   : > { %7668 = vmatpush1.bf16.msra.mxu1 %v9188_v58  ;;  %v9280_v58 = vld [vmem:[%s11054_s7 + $0x1c4] ss:$8 sps:$4 sm:$0xff]  }
 0x14f   : > { %7996 = vmatpush1.bf16.msra.mxu0 %v9189_v59  ;;  %7669 = vmatprep.subr.bf16.mxu1 %v9190_v60  ;;  %v9283_v59 = vld [vmem:[%s11054_s7 + $0x9c4] ss:$8 sps:$4 sm:$0xff]   ;;  %v9278_v60 = vld [vmem:[%s11054_s7 + $0x1c0] ss:$8 sps:$4 sm:$0xff]  }
 0x150   : > { %7997 = vmatprep.subr.bf16.mxu0 %v9192_v61  ;;  %v9281_v61 = vld [vmem:[%s11054_s7 + $0x9c0] ss:$8 sps:$4 sm:$0xff]  }
 0x152   : > { %7670 = vmatpush1.bf16.msra.mxu1 %v9194_v62  ;;  %v9286_v62 = vld [vmem:[%s11054_s7 + $0x1d4] ss:$8 sps:$4 sm:$0xff]  }
 0x153   : > { %7998 = vmatpush1.bf16.msra.mxu0 %v9195_v63  ;;  %7671 = vmatprep.subr.bf16.mxu1 %v9196_v2  ;;  %v9289_v63 = vld [vmem:[%s11054_s7 + $0x9d4] ss:$8 sps:$4 sm:$0xff]   ;;  %v9284_v2 = vld [vmem:[%s11054_s7 + $0x1d0] ss:$8 sps:$4 sm:$0xff]  }
 0x154   : > { %7999 = vmatprep.subr.bf16.mxu0 %v9198_v3  ;;  %v9287_v3 = vld [vmem:[%s11054_s7 + $0x9d0] ss:$8 sps:$4 sm:$0xff]  }
 0x156   : > { %7672 = vmatpush1.bf16.msra.mxu1 %v9200_v4  ;;  %v9292_v4 = vld [vmem:[%s11054_s7 + $0x1e4] ss:$8 sps:$4 sm:$0xff]  }
 0x157   : > { %8000 = vmatpush1.bf16.msra.mxu0 %v9201_v5  ;;  %7682 = vmatprep.subr.bf16.mxu1 %v9206_v6  ;;  %v9295_v5 = vld [vmem:[%s11054_s7 + $0x9e4] ss:$8 sps:$4 sm:$0xff]   ;;  %v9290_v6 = vld [vmem:[%s11054_s7 + $0x1e0] ss:$8 sps:$4 sm:$0xff]  }
 0x158   : > { %8010 = vmatprep.subr.bf16.mxu0 %v9211_v7  ;;  %v9293_v7 = vld [vmem:[%s11054_s7 + $0x9e0] ss:$8 sps:$4 sm:$0xff]  }
 0x159   : > { %7674 = vmatmul.mubr.bf16.vlgmr.msra.gmra.mrb[0].mxu1 %v8457_v8  ;;  %v9298_v8 = vld [vmem:[%s11054_s7 + $0x1f4] ss:$8 sps:$4 sm:$0xff]  }
 0x15a   : > { %8002 = vmatmul.mubr.bf16.vlgmr.msra.gmra.mrb[0].mxu0 %v8473_v10  ;;  %7683 = vmatpush1.bf16.msra.mxu1 %v9204_v9  ;;  %v9301_v9 = vld [vmem:[%s11054_s7 + $0x9f4] ss:$8 sps:$4 sm:$0xff]   ;;  %v9296_v10 = vld [vmem:[%s11054_s7 + $0x1f0] ss:$8 sps:$4 sm:$0xff]  }
 0x15b   : > { %8011 = vmatpush1.bf16.msra.mxu0 %v9209_v11  ;;  %7684 = vmatprep.subr.bf16.mxu1 %v9214_v12  ;;  %v9299_v11 = vld [vmem:[%s11054_s7 + $0x9f0] ss:$8 sps:$4 sm:$0xff]   ;;  %v9306_v12 = vld [vmem:[%s11054_s7 + $0x204] ss:$8 sps:$4 sm:$0xff]  }
 0x15c   : > { %8012 = vmatprep.subr.bf16.mxu0 %v9217_v13  ;;  %7714 = vmatprep.mubr.bf16.mxu1 %v8460_v33  ;;  %v9311_v13 = vld [vmem:[%s11054_s7 + $0xa04] ss:$8 sps:$4 sm:$0xff]  }
 0x15d   : > { %8042 = vmatprep.mubr.bf16.mxu0 %v8476_v37  ;;  %v9335_v33 = vld [vmem:[%s11054_s7 + $0xa44] ss:$8 sps:$4 sm:$0xff]   ;;  %v9341_v37 = vld [vmem:[%s11054_s7 + $0xa54] ss:$8 sps:$4 sm:$0xff]  }
 0x15e   : > { %7685 = vmatpush1.bf16.msra.mxu1 %v9212_v0  ;;  %v8459_v0 = vcombine.low %v11153_v32, %v11153_v32  ;;  %v9332_v32 = vld [vmem:[%s11054_s7 + $0x244] ss:$8 sps:$4 sm:$0xff]  }
 0x15f   : > { %8013 = vmatpush1.bf16.msra.mxu0 %v9215_v14  ;;  %7686 = vmatprep.subr.bf16.mxu1 %v9220_v1  ;;  %v9304_v14 = vld [vmem:[%s11054_s7 + $0x200] ss:$8 sps:$4 sm:$0xff]   ;;  %v8475_v1 = vcombine.low %v11160_v34, %v11160_v34 }
 0x160   : > { %8014 = vmatprep.subr.bf16.mxu0 %v9223_v15  ;;  %v9309_v15 = vld [vmem:[%s11054_s7 + $0xa00] ss:$8 sps:$4 sm:$0xff]  }
 0x161   : > { %v9330_v34 = vld [vmem:[%s11054_s7 + $0x240] ss:$8 sps:$4 sm:$0xff]  }
 0x162   : > { %7687 = vmatpush1.bf16.msra.mxu1 %v9218_v16  ;;  %v9314_v16 = vld [vmem:[%s11054_s7 + $0x214] ss:$8 sps:$4 sm:$0xff]  }
 0x163   : > { %8015 = vmatpush1.bf16.msra.mxu0 %v9221_v17  ;;  %7688 = vmatprep.subr.bf16.mxu1 %v9226_v18  ;;  %v11214_v17 = vld [vmem:[%s11720_s0 + $0x10] sm:$0xff] }
 0x164   : > { %8016 = vmatprep.subr.bf16.mxu0 %v9229_v19  ;;  %v9317_v18 = vld [vmem:[%s11054_s7 + $0xa14] ss:$8 sps:$4 sm:$0xff]   ;;  %v8462_v19 = vcombine.high %v11214_v17, %v11214_v17 }
 0x166   : > { %7689 = vmatpush1.bf16.msra.mxu1 %v9224_v20  ;;  %v11222_v20 = vld [vmem:[%s11720_s0 + $0x50] sm:$0xff] }
 0x167   : > { %8017 = vmatpush1.bf16.msra.mxu0 %v9227_v21  ;;  %7690 = vmatprep.subr.bf16.mxu1 %v9232_v22  ;;  %v9312_v21 = vld [vmem:[%s11054_s7 + $0x210] ss:$8 sps:$4 sm:$0xff]  }
 0x168   : > { %8018 = vmatprep.subr.bf16.mxu0 %v9235_v23  ;;  %v9315_v22 = vld [vmem:[%s11054_s7 + $0xa10] ss:$8 sps:$4 sm:$0xff]   ;;  %v8478_v23 = vcombine.high %v11222_v20, %v11222_v20 }
 0x16a   : > { %7691 = vmatpush1.bf16.msra.mxu1 %v9230_v24  ;;  %v9320_v24 = vld [vmem:[%s11054_s7 + $0x224] ss:$8 sps:$4 sm:$0xff]  }
 0x16b   : > { %8019 = vmatpush1.bf16.msra.mxu0 %v9233_v25  ;;  %7692 = vmatprep.subr.bf16.mxu1 %v9238_v26  ;;  %v9323_v25 = vld [vmem:[%s11054_s7 + $0xa24] ss:$8 sps:$4 sm:$0xff]   ;;  %v9318_v26 = vld [vmem:[%s11054_s7 + $0x220] ss:$8 sps:$4 sm:$0xff]  }
 0x16c   : > { %8020 = vmatprep.subr.bf16.mxu0 %v9241_v27  ;;  %v9321_v27 = vld [vmem:[%s11054_s7 + $0xa20] ss:$8 sps:$4 sm:$0xff]  }
 0x16e   : > { %7693 = vmatpush1.bf16.msra.mxu1 %v9236_v28  ;;  %v9326_v28 = vld [vmem:[%s11054_s7 + $0x234] ss:$8 sps:$4 sm:$0xff]  }
 0x16f   : > { %8021 = vmatpush1.bf16.msra.mxu0 %v9239_v29  ;;  %7694 = vmatprep.subr.bf16.mxu1 %v9244_v30  ;;  %v9329_v29 = vld [vmem:[%s11054_s7 + $0xa34] ss:$8 sps:$4 sm:$0xff]   ;;  %v9324_v30 = vld [vmem:[%s11054_s7 + $0x230] ss:$8 sps:$4 sm:$0xff]  }
 0x170   : > { %8022 = vmatprep.subr.bf16.mxu0 %v9247_v31  ;;  %v9327_v31 = vld [vmem:[%s11054_s7 + $0xa30] ss:$8 sps:$4 sm:$0xff]  }
 0x172   : > { %7695 = vmatpush1.bf16.msra.mxu1 %v9242_v35  ;;  %v9333_v35 = vld [vmem:[%s11054_s7 + $0xa40] ss:$8 sps:$4 sm:$0xff]  }
 0x173   : > { %8023 = vmatpush1.bf16.msra.mxu0 %v9245_v36  ;;  %7696 = vmatprep.subr.bf16.mxu1 %v9250_v38  ;;  %v9338_v36 = vld [vmem:[%s11054_s7 + $0x254] ss:$8 sps:$4 sm:$0xff]   ;;  %v9336_v38 = vld [vmem:[%s11054_s7 + $0x250] ss:$8 sps:$4 sm:$0xff]  }
 0x174   : > { %8024 = vmatprep.subr.bf16.mxu0 %v9253_v39  ;;  %v9339_v39 = vld [vmem:[%s11054_s7 + $0xa50] ss:$8 sps:$4 sm:$0xff]  }
 0x176   : > { %7697 = vmatpush1.bf16.msra.mxu1 %v9248_v40  ;;  %v9344_v40 = vld [vmem:[%s11054_s7 + $0x264] ss:$8 sps:$4 sm:$0xff]  }
 0x177   : > { %8025 = vmatpush1.bf16.msra.mxu0 %v9251_v41  ;;  %7698 = vmatprep.subr.bf16.mxu1 %v9256_v42  ;;  %v9347_v41 = vld [vmem:[%s11054_s7 + $0xa64] ss:$8 sps:$4 sm:$0xff]   ;;  %v9342_v42 = vld [vmem:[%s11054_s7 + $0x260] ss:$8 sps:$4 sm:$0xff]  }
 0x178   : > { %8026 = vmatprep.subr.bf16.mxu0 %v9259_v43  ;;  %v9345_v43 = vld [vmem:[%s11054_s7 + $0xa60] ss:$8 sps:$4 sm:$0xff]  }
 0x17a   : > { %7699 = vmatpush1.bf16.msra.mxu1 %v9254_v44  ;;  %v9350_v44 = vld [vmem:[%s11054_s7 + $0x274] ss:$8 sps:$4 sm:$0xff]  }
 0x17b   : > { %8027 = vmatpush1.bf16.msra.mxu0 %v9257_v45  ;;  %7700 = vmatprep.subr.bf16.mxu1 %v9262_v46  ;;  %v9353_v45 = vld [vmem:[%s11054_s7 + $0xa74] ss:$8 sps:$4 sm:$0xff]   ;;  %v9348_v46 = vld [vmem:[%s11054_s7 + $0x270] ss:$8 sps:$4 sm:$0xff]  }
 0x17c   : > { %8028 = vmatprep.subr.bf16.mxu0 %v9265_v47  ;;  %v9351_v47 = vld [vmem:[%s11054_s7 + $0xa70] ss:$8 sps:$4 sm:$0xff]  }
 0x17e   : > { %7701 = vmatpush1.bf16.msra.mxu1 %v9260_v48  ;;  %v9356_v48 = vld [vmem:[%s11054_s7 + $0x284] ss:$8 sps:$4 sm:$0xff]  }
 0x17f   : > { %8029 = vmatpush1.bf16.msra.mxu0 %v9263_v49  ;;  %7702 = vmatprep.subr.bf16.mxu1 %v9268_v50  ;;  %v9359_v49 = vld [vmem:[%s11054_s7 + $0xa84] ss:$8 sps:$4 sm:$0xff]   ;;  %v9354_v50 = vld [vmem:[%s11054_s7 + $0x280] ss:$8 sps:$4 sm:$0xff]  }
 0x180   : > { %8030 = vmatprep.subr.bf16.mxu0 %v9271_v51  ;;  %v9357_v51 = vld [vmem:[%s11054_s7 + $0xa80] ss:$8 sps:$4 sm:$0xff]  }
 0x182   : > { %7703 = vmatpush1.bf16.msra.mxu1 %v9266_v52  ;;  %v9362_v52 = vld [vmem:[%s11054_s7 + $0x294] ss:$8 sps:$4 sm:$0xff]  }
 0x183   : > { %8031 = vmatpush1.bf16.msra.mxu0 %v9269_v53  ;;  %7704 = vmatprep.subr.bf16.mxu1 %v9274_v54  ;;  %v9365_v53 = vld [vmem:[%s11054_s7 + $0xa94] ss:$8 sps:$4 sm:$0xff]   ;;  %v9360_v54 = vld [vmem:[%s11054_s7 + $0x290] ss:$8 sps:$4 sm:$0xff]  }
 0x184   : > { %8032 = vmatprep.subr.bf16.mxu0 %v9277_v55  ;;  %v9363_v55 = vld [vmem:[%s11054_s7 + $0xa90] ss:$8 sps:$4 sm:$0xff]  }
 0x186   : > { %7705 = vmatpush1.bf16.msra.mxu1 %v9272_v56  ;;  %v9368_v56 = vld [vmem:[%s11054_s7 + $0x2a4] ss:$8 sps:$4 sm:$0xff]  }
 0x187   : > { %8033 = vmatpush1.bf16.msra.mxu0 %v9275_v57  ;;  %7706 = vmatprep.subr.bf16.mxu1 %v9280_v58  ;;  %v9371_v57 = vld [vmem:[%s11054_s7 + $0xaa4] ss:$8 sps:$4 sm:$0xff]   ;;  %v9366_v58 = vld [vmem:[%s11054_s7 + $0x2a0] ss:$8 sps:$4 sm:$0xff]  }
 0x188   : > { %8034 = vmatprep.subr.bf16.mxu0 %v9283_v59  ;;  %v9369_v59 = vld [vmem:[%s11054_s7 + $0xaa0] ss:$8 sps:$4 sm:$0xff]  }
 0x18a   : > { %7707 = vmatpush1.bf16.msra.mxu1 %v9278_v60  ;;  %v9374_v60 = vld [vmem:[%s11054_s7 + $0x2b4] ss:$8 sps:$4 sm:$0xff]  }
 0x18b   : > { %8035 = vmatpush1.bf16.msra.mxu0 %v9281_v61  ;;  %7708 = vmatprep.subr.bf16.mxu1 %v9286_v62  ;;  %v9377_v61 = vld [vmem:[%s11054_s7 + $0xab4] ss:$8 sps:$4 sm:$0xff]   ;;  %v9372_v62 = vld [vmem:[%s11054_s7 + $0x2b0] ss:$8 sps:$4 sm:$0xff]  }
 0x18c   : > { %8036 = vmatprep.subr.bf16.mxu0 %v9289_v63  ;;  %v9375_v63 = vld [vmem:[%s11054_s7 + $0xab0] ss:$8 sps:$4 sm:$0xff]  }
 0x18e   : > { %7709 = vmatpush1.bf16.msra.mxu1 %v9284_v2  ;;  %v9380_v2 = vld [vmem:[%s11054_s7 + $0x2c4] ss:$8 sps:$4 sm:$0xff]  }
 0x18f   : > { %8037 = vmatpush1.bf16.msra.mxu0 %v9287_v3  ;;  %7710 = vmatprep.subr.bf16.mxu1 %v9292_v4  ;;  %v9383_v3 = vld [vmem:[%s11054_s7 + $0xac4] ss:$8 sps:$4 sm:$0xff]   ;;  %v9378_v4 = vld [vmem:[%s11054_s7 + $0x2c0] ss:$8 sps:$4 sm:$0xff]  }
 0x190   : > { %8038 = vmatprep.subr.bf16.mxu0 %v9295_v5  ;;  %v9381_v5 = vld [vmem:[%s11054_s7 + $0xac0] ss:$8 sps:$4 sm:$0xff]  }
 0x192   : > { %7711 = vmatpush1.bf16.msra.mxu1 %v9290_v6  ;;  %v9386_v6 = vld [vmem:[%s11054_s7 + $0x2d4] ss:$8 sps:$4 sm:$0xff]  }
 0x193   : > { %8039 = vmatpush1.bf16.msra.mxu0 %v9293_v7  ;;  %7712 = vmatprep.subr.bf16.mxu1 %v9298_v8  ;;  %v9389_v7 = vld [vmem:[%s11054_s7 + $0xad4] ss:$8 sps:$4 sm:$0xff]   ;;  %v9384_v8 = vld [vmem:[%s11054_s7 + $0x2d0] ss:$8 sps:$4 sm:$0xff]  }
 0x194   : > { %8040 = vmatprep.subr.bf16.mxu0 %v9301_v9  ;;  %v9387_v9 = vld [vmem:[%s11054_s7 + $0xad0] ss:$8 sps:$4 sm:$0xff]  }
 0x196   : > { %7713 = vmatpush1.bf16.msra.mxu1 %v9296_v10  ;;  %v9392_v10 = vld [vmem:[%s11054_s7 + $0x2e4] ss:$8 sps:$4 sm:$0xff]  }
 0x197   : > { %8041 = vmatpush1.bf16.msra.mxu0 %v9299_v11  ;;  %7723 = vmatprep.subr.bf16.mxu1 %v9306_v12  ;;  %v9395_v11 = vld [vmem:[%s11054_s7 + $0xae4] ss:$8 sps:$4 sm:$0xff]   ;;  %v9390_v12 = vld [vmem:[%s11054_s7 + $0x2e0] ss:$8 sps:$4 sm:$0xff]  }
 0x198   : > { %8051 = vmatprep.subr.bf16.mxu0 %v9311_v13  ;;  %v9393_v13 = vld [vmem:[%s11054_s7 + $0xae0] ss:$8 sps:$4 sm:$0xff]  }
 0x199   : > { %7715 = vmatmul.mubr.bf16.vlgmr.msra.gmra.mrb[0].mxu1 %v8459_v0  ;;  %v9398_v0 = vld [vmem:[%s11054_s7 + $0x2f4] ss:$8 sps:$4 sm:$0xff]  }
 0x19a   : > { %8043 = vmatmul.mubr.bf16.vlgmr.msra.gmra.mrb[0].mxu0 %v8475_v1  ;;  %7724 = vmatpush1.bf16.msra.mxu1 %v9304_v14  ;;  %v9401_v14 = vld [vmem:[%s11054_s7 + $0xaf4] ss:$8 sps:$4 sm:$0xff]   ;;  %v9396_v1 = vld [vmem:[%s11054_s7 + $0x2f0] ss:$8 sps:$4 sm:$0xff]  }
 0x19b   : > { %8052 = vmatpush1.bf16.msra.mxu0 %v9309_v15  ;;  %7725 = vmatprep.subr.bf16.mxu1 %v9314_v16  ;;  %v9399_v15 = vld [vmem:[%s11054_s7 + $0xaf0] ss:$8 sps:$4 sm:$0xff]   ;;  %v9406_v16 = vld [vmem:[%s11054_s7 + $0x304] ss:$8 sps:$4 sm:$0xff]  }
 0x19c   : > { %8053 = vmatprep.subr.bf16.mxu0 %v9317_v18  ;;  %7755 = vmatprep.mubr.bf16.mxu1 %v8462_v19  ;;  %v9411_v18 = vld [vmem:[%s11054_s7 + $0xb04] ss:$8 sps:$4 sm:$0xff]   ;;  %v11289_v19 = vld [vmem:[%s11720_s0 + $0x18] sm:$0xff] }
 0x19d   : > { %8083 = vmatprep.mubr.bf16.mxu0 %v8478_v23  ;;  %v11298_v23 = vld [vmem:[%s11720_s0 + $0x58] sm:$0xff] }
 0x19e   : > { %7726 = vmatpush1.bf16.msra.mxu1 %v9312_v21  ;;  %v8461_v21 = vcombine.low %v11214_v17, %v11214_v17  ;;  %v9417_v17 = vld [vmem:[%s11054_s7 + $0xb14] ss:$8 sps:$4 sm:$0xff]  }
 0x19f   : > { %8054 = vmatpush1.bf16.msra.mxu0 %v9315_v22  ;;  %7727 = vmatprep.subr.bf16.mxu1 %v9320_v24  ;;  %v8477_v22 = vcombine.low %v11222_v20, %v11222_v20  ;;  %v9404_v24 = vld [vmem:[%s11054_s7 + $0x300] ss:$8 sps:$4 sm:$0xff]   ;;  %v8464_v20 = vcombine.high %v11289_v19, %v11289_v19 }
 0x1a0   : > { %8055 = vmatprep.subr.bf16.mxu0 %v9323_v25  ;;  %v9409_v25 = vld [vmem:[%s11054_s7 + $0xb00] ss:$8 sps:$4 sm:$0xff]  }
 0x1a2   : > { %7728 = vmatpush1.bf16.msra.mxu1 %v9318_v26  ;;  %v9414_v26 = vld [vmem:[%s11054_s7 + $0x314] ss:$8 sps:$4 sm:$0xff]  }
 0x1a3   : > { %8056 = vmatpush1.bf16.msra.mxu0 %v9321_v27  ;;  %7729 = vmatprep.subr.bf16.mxu1 %v9326_v28  ;;  %v8480_v27 = vcombine.high %v11298_v23, %v11298_v23  ;;  %v9412_v28 = vld [vmem:[%s11054_s7 + $0x310] ss:$8 sps:$4 sm:$0xff]  }
 0x1a4   : > { %8057 = vmatprep.subr.bf16.mxu0 %v9329_v29  ;;  %v9415_v29 = vld [vmem:[%s11054_s7 + $0xb10] ss:$8 sps:$4 sm:$0xff]  }
 0x1a6   : > { %7730 = vmatpush1.bf16.msra.mxu1 %v9324_v30  ;;  %v9420_v30 = vld [vmem:[%s11054_s7 + $0x324] ss:$8 sps:$4 sm:$0xff]  }
 0x1a7   : > { %8058 = vmatpush1.bf16.msra.mxu0 %v9327_v31  ;;  %7731 = vmatprep.subr.bf16.mxu1 %v9332_v32  ;;  %v9423_v31 = vld [vmem:[%s11054_s7 + $0xb24] ss:$8 sps:$4 sm:$0xff]   ;;  %v9418_v32 = vld [vmem:[%s11054_s7 + $0x320] ss:$8 sps:$4 sm:$0xff]  }
 0x1a8   : > { %8059 = vmatprep.subr.bf16.mxu0 %v9335_v33  ;;  %v9421_v33 = vld [vmem:[%s11054_s7 + $0xb20] ss:$8 sps:$4 sm:$0xff]  }
 0x1aa   : > { %7732 = vmatpush1.bf16.msra.mxu1 %v9330_v34  ;;  %v9426_v34 = vld [vmem:[%s11054_s7 + $0x334] ss:$8 sps:$4 sm:$0xff]  }
 0x1ab   : > { %8060 = vmatpush1.bf16.msra.mxu0 %v9333_v35  ;;  %7733 = vmatprep.subr.bf16.mxu1 %v9338_v36  ;;  %v9429_v35 = vld [vmem:[%s11054_s7 + $0xb34] ss:$8 sps:$4 sm:$0xff]   ;;  %v9424_v36 = vld [vmem:[%s11054_s7 + $0x330] ss:$8 sps:$4 sm:$0xff]  }
 0x1ac   : > { %8061 = vmatprep.subr.bf16.mxu0 %v9341_v37  ;;  %v9427_v37 = vld [vmem:[%s11054_s7 + $0xb30] ss:$8 sps:$4 sm:$0xff]  }
 0x1ae   : > { %7734 = vmatpush1.bf16.msra.mxu1 %v9336_v38  ;;  %v9432_v38 = vld [vmem:[%s11054_s7 + $0x344] ss:$8 sps:$4 sm:$0xff]  }
 0x1af   : > { %8062 = vmatpush1.bf16.msra.mxu0 %v9339_v39  ;;  %7735 = vmatprep.subr.bf16.mxu1 %v9344_v40  ;;  %v9435_v39 = vld [vmem:[%s11054_s7 + $0xb44] ss:$8 sps:$4 sm:$0xff]   ;;  %v9430_v40 = vld [vmem:[%s11054_s7 + $0x340] ss:$8 sps:$4 sm:$0xff]  }
 0x1b0   : > { %8063 = vmatprep.subr.bf16.mxu0 %v9347_v41  ;;  %v9433_v41 = vld [vmem:[%s11054_s7 + $0xb40] ss:$8 sps:$4 sm:$0xff]  }
 0x1b2   : > { %7736 = vmatpush1.bf16.msra.mxu1 %v9342_v42  ;;  %v9438_v42 = vld [vmem:[%s11054_s7 + $0x354] ss:$8 sps:$4 sm:$0xff]  }
 0x1b3   : > { %8064 = vmatpush1.bf16.msra.mxu0 %v9345_v43  ;;  %7737 = vmatprep.subr.bf16.mxu1 %v9350_v44  ;;  %v9441_v43 = vld [vmem:[%s11054_s7 + $0xb54] ss:$8 sps:$4 sm:$0xff]   ;;  %v9436_v44 = vld [vmem:[%s11054_s7 + $0x350] ss:$8 sps:$4 sm:$0xff]  }
 0x1b4   : > { %8065 = vmatprep.subr.bf16.mxu0 %v9353_v45  ;;  %v9439_v45 = vld [vmem:[%s11054_s7 + $0xb50] ss:$8 sps:$4 sm:$0xff]  }
 0x1b6   : > { %7738 = vmatpush1.bf16.msra.mxu1 %v9348_v46  ;;  %v9444_v46 = vld [vmem:[%s11054_s7 + $0x364] ss:$8 sps:$4 sm:$0xff]  }
 0x1b7   : > { %8066 = vmatpush1.bf16.msra.mxu0 %v9351_v47  ;;  %7739 = vmatprep.subr.bf16.mxu1 %v9356_v48  ;;  %v9447_v47 = vld [vmem:[%s11054_s7 + $0xb64] ss:$8 sps:$4 sm:$0xff]   ;;  %v9442_v48 = vld [vmem:[%s11054_s7 + $0x360] ss:$8 sps:$4 sm:$0xff]  }
 0x1b8   : > { %8067 = vmatprep.subr.bf16.mxu0 %v9359_v49  ;;  %v9445_v49 = vld [vmem:[%s11054_s7 + $0xb60] ss:$8 sps:$4 sm:$0xff]  }
 0x1ba   : > { %7740 = vmatpush1.bf16.msra.mxu1 %v9354_v50  ;;  %v9450_v50 = vld [vmem:[%s11054_s7 + $0x374] ss:$8 sps:$4 sm:$0xff]  }
 0x1bb   : > { %8068 = vmatpush1.bf16.msra.mxu0 %v9357_v51  ;;  %7741 = vmatprep.subr.bf16.mxu1 %v9362_v52  ;;  %v9453_v51 = vld [vmem:[%s11054_s7 + $0xb74] ss:$8 sps:$4 sm:$0xff]   ;;  %v9448_v52 = vld [vmem:[%s11054_s7 + $0x370] ss:$8 sps:$4 sm:$0xff]  }
 0x1bc   : > { %8069 = vmatprep.subr.bf16.mxu0 %v9365_v53  ;;  %v9451_v53 = vld [vmem:[%s11054_s7 + $0xb70] ss:$8 sps:$4 sm:$0xff]  }
 0x1be   : > { %7742 = vmatpush1.bf16.msra.mxu1 %v9360_v54  ;;  %v9456_v54 = vld [vmem:[%s11054_s7 + $0x384] ss:$8 sps:$4 sm:$0xff]  }
 0x1bf   : > { %8070 = vmatpush1.bf16.msra.mxu0 %v9363_v55  ;;  %7743 = vmatprep.subr.bf16.mxu1 %v9368_v56  ;;  %v9459_v55 = vld [vmem:[%s11054_s7 + $0xb84] ss:$8 sps:$4 sm:$0xff]   ;;  %v9454_v56 = vld [vmem:[%s11054_s7 + $0x380] ss:$8 sps:$4 sm:$0xff]  }
 0x1c0   : > { %8071 = vmatprep.subr.bf16.mxu0 %v9371_v57  ;;  %v9457_v57 = vld [vmem:[%s11054_s7 + $0xb80] ss:$8 sps:$4 sm:$0xff]  }
 0x1c2   : > { %7744 = vmatpush1.bf16.msra.mxu1 %v9366_v58  ;;  %v9462_v58 = vld [vmem:[%s11054_s7 + $0x394] ss:$8 sps:$4 sm:$0xff]  }
 0x1c3   : > { %8072 = vmatpush1.bf16.msra.mxu0 %v9369_v59  ;;  %7745 = vmatprep.subr.bf16.mxu1 %v9374_v60  ;;  %v9465_v59 = vld [vmem:[%s11054_s7 + $0xb94] ss:$8 sps:$4 sm:$0xff]   ;;  %v9460_v60 = vld [vmem:[%s11054_s7 + $0x390] ss:$8 sps:$4 sm:$0xff]  }
 0x1c4   : > { %8073 = vmatprep.subr.bf16.mxu0 %v9377_v61  ;;  %v9463_v61 = vld [vmem:[%s11054_s7 + $0xb90] ss:$8 sps:$4 sm:$0xff]  }
 0x1c6   : > { %7746 = vmatpush1.bf16.msra.mxu1 %v9372_v62  ;;  %v9468_v62 = vld [vmem:[%s11054_s7 + $0x3a4] ss:$8 sps:$4 sm:$0xff]  }
 0x1c7   : > { %8074 = vmatpush1.bf16.msra.mxu0 %v9375_v63  ;;  %7747 = vmatprep.subr.bf16.mxu1 %v9380_v2  ;;  %v9471_v63 = vld [vmem:[%s11054_s7 + $0xba4] ss:$8 sps:$4 sm:$0xff]   ;;  %v9466_v2 = vld [vmem:[%s11054_s7 + $0x3a0] ss:$8 sps:$4 sm:$0xff]  }
 0x1c8   : > { %8075 = vmatprep.subr.bf16.mxu0 %v9383_v3  ;;  %v9469_v3 = vld [vmem:[%s11054_s7 + $0xba0] ss:$8 sps:$4 sm:$0xff]  }
 0x1ca   : > { %7748 = vmatpush1.bf16.msra.mxu1 %v9378_v4  ;;  %v9474_v4 = vld [vmem:[%s11054_s7 + $0x3b4] ss:$8 sps:$4 sm:$0xff]  }
 0x1cb   : > { %8076 = vmatpush1.bf16.msra.mxu0 %v9381_v5  ;;  %7749 = vmatprep.subr.bf16.mxu1 %v9386_v6  ;;  %v9477_v5 = vld [vmem:[%s11054_s7 + $0xbb4] ss:$8 sps:$4 sm:$0xff]   ;;  %v9472_v6 = vld [vmem:[%s11054_s7 + $0x3b0] ss:$8 sps:$4 sm:$0xff]  }
 0x1cc   : > { %8077 = vmatprep.subr.bf16.mxu0 %v9389_v7  ;;  %v9475_v7 = vld [vmem:[%s11054_s7 + $0xbb0] ss:$8 sps:$4 sm:$0xff]  }
 0x1ce   : > { %7750 = vmatpush1.bf16.msra.mxu1 %v9384_v8  ;;  %v9480_v8 = vld [vmem:[%s11054_s7 + $0x3c4] ss:$8 sps:$4 sm:$0xff]  }
 0x1cf   : > { %8078 = vmatpush1.bf16.msra.mxu0 %v9387_v9  ;;  %7751 = vmatprep.subr.bf16.mxu1 %v9392_v10  ;;  %v9483_v9 = vld [vmem:[%s11054_s7 + $0xbc4] ss:$8 sps:$4 sm:$0xff]   ;;  %v9478_v10 = vld [vmem:[%s11054_s7 + $0x3c0] ss:$8 sps:$4 sm:$0xff]  }
 0x1d0   : > { %8079 = vmatprep.subr.bf16.mxu0 %v9395_v11  ;;  %v9481_v11 = vld [vmem:[%s11054_s7 + $0xbc0] ss:$8 sps:$4 sm:$0xff]  }
 0x1d2   : > { %7752 = vmatpush1.bf16.msra.mxu1 %v9390_v12  ;;  %v9486_v12 = vld [vmem:[%s11054_s7 + $0x3d4] ss:$8 sps:$4 sm:$0xff]  }
 0x1d3   : > { %8080 = vmatpush1.bf16.msra.mxu0 %v9393_v13  ;;  %7753 = vmatprep.subr.bf16.mxu1 %v9398_v0  ;;  %v9489_v13 = vld [vmem:[%s11054_s7 + $0xbd4] ss:$8 sps:$4 sm:$0xff]   ;;  %v9484_v0 = vld [vmem:[%s11054_s7 + $0x3d0] ss:$8 sps:$4 sm:$0xff]  }
 0x1d4   : > { %8081 = vmatprep.subr.bf16.mxu0 %v9401_v14  ;;  %v9487_v14 = vld [vmem:[%s11054_s7 + $0xbd0] ss:$8 sps:$4 sm:$0xff]  }
 0x1d6   : > { %7754 = vmatpush1.bf16.msra.mxu1 %v9396_v1  ;;  %v9492_v1 = vld [vmem:[%s11054_s7 + $0x3e4] ss:$8 sps:$4 sm:$0xff]  }
 0x1d7   : > { %8082 = vmatpush1.bf16.msra.mxu0 %v9399_v15  ;;  %7764 = vmatprep.subr.bf16.mxu1 %v9406_v16  ;;  %v9495_v15 = vld [vmem:[%s11054_s7 + $0xbe4] ss:$8 sps:$4 sm:$0xff]   ;;  %v9490_v16 = vld [vmem:[%s11054_s7 + $0x3e0] ss:$8 sps:$4 sm:$0xff]  }
 0x1d8   : > { %8092 = vmatprep.subr.bf16.mxu0 %v9411_v18  ;;  %v9493_v18 = vld [vmem:[%s11054_s7 + $0xbe0] ss:$8 sps:$4 sm:$0xff]  }
 0x1d9   : > { %7756 = vmatmul.mubr.bf16.vlgmr.msra.gmra.mrb[0].mxu1 %v8461_v21  ;;  %v9498_v21 = vld [vmem:[%s11054_s7 + $0x3f4] ss:$8 sps:$4 sm:$0xff]  }
 0x1da   : > { %8084 = vmatmul.mubr.bf16.vlgmr.msra.gmra.mrb[0].mxu0 %v8477_v22  ;;  %7765 = vmatpush1.bf16.msra.mxu1 %v9404_v24  ;;  %v9501_v22 = vld [vmem:[%s11054_s7 + $0xbf4] ss:$8 sps:$4 sm:$0xff]   ;;  %v9496_v24 = vld [vmem:[%s11054_s7 + $0x3f0] ss:$8 sps:$4 sm:$0xff]  }
 0x1db   : > { %8093 = vmatpush1.bf16.msra.mxu0 %v9409_v25  ;;  %7766 = vmatprep.subr.bf16.mxu1 %v9414_v26  ;;  %v9499_v25 = vld [vmem:[%s11054_s7 + $0xbf0] ss:$8 sps:$4 sm:$0xff]   ;;  %v9506_v26 = vld [vmem:[%s11054_s7 + $0x404] ss:$8 sps:$4 sm:$0xff]  }
 0x1dc   : > { %8094 = vmatprep.subr.bf16.mxu0 %v9417_v17  ;;  %7796 = vmatprep.mubr.bf16.mxu1 %v8464_v20  ;;  %v9511_v17 = vld [vmem:[%s11054_s7 + $0xc04] ss:$8 sps:$4 sm:$0xff]   ;;  %v9504_v20 = vld [vmem:[%s11054_s7 + $0x400] ss:$8 sps:$4 sm:$0xff]  }
 0x1dd   : > { %8124 = vmatprep.mubr.bf16.mxu0 %v8480_v27  ;;  %v9509_v27 = vld [vmem:[%s11054_s7 + $0xc00] ss:$8 sps:$4 sm:$0xff]  }
 0x1de   : > { %7767 = vmatpush1.bf16.msra.mxu1 %v9412_v28  ;;  %v8463_v28 = vcombine.low %v11289_v19, %v11289_v19  ;;  %v9514_v19 = vld [vmem:[%s11054_s7 + $0x414] ss:$8 sps:$4 sm:$0xff]  }
 0x1df   : > { %8095 = vmatpush1.bf16.msra.mxu0 %v9415_v29  ;;  %7768 = vmatprep.subr.bf16.mxu1 %v9420_v30  ;;  %v8479_v29 = vcombine.low %v11298_v23, %v11298_v23  ;;  %v11377_v30 = vld [vmem:[%s11720_s0 + $0x20] sm:$0xff] }
 0x1e0   : > { %8096 = vmatprep.subr.bf16.mxu0 %v9423_v31  ;;  %v11382_v31 = vld [vmem:[%s11720_s0 + $0x60] sm:$0xff]  ;;  %v8466_v23 = vcombine.high %v11377_v30, %v11377_v30 }
 0x1e2   : > { %7769 = vmatpush1.bf16.msra.mxu1 %v9418_v32  ;;  %v9517_v32 = vld [vmem:[%s11054_s7 + $0xc14] ss:$8 sps:$4 sm:$0xff]  }
 0x1e3   : > { %8097 = vmatpush1.bf16.msra.mxu0 %v9421_v33  ;;  %7770 = vmatprep.subr.bf16.mxu1 %v9426_v34  ;;  %v8482_v33 = vcombine.high %v11382_v31, %v11382_v31  ;;  %v9512_v34 = vld [vmem:[%s11054_s7 + $0x410] ss:$8 sps:$4 sm:$0xff]  }
 0x1e4   : > { %8098 = vmatprep.subr.bf16.mxu0 %v9429_v35  ;;  %v9515_v35 = vld [vmem:[%s11054_s7 + $0xc10] ss:$8 sps:$4 sm:$0xff]  }
 0x1e6   : > { %7771 = vmatpush1.bf16.msra.mxu1 %v9424_v36  ;;  %v9520_v36 = vld [vmem:[%s11054_s7 + $0x424] ss:$8 sps:$4 sm:$0xff]  }
 0x1e7   : > { %8099 = vmatpush1.bf16.msra.mxu0 %v9427_v37  ;;  %7772 = vmatprep.subr.bf16.mxu1 %v9432_v38  ;;  %v9523_v37 = vld [vmem:[%s11054_s7 + $0xc24] ss:$8 sps:$4 sm:$0xff]   ;;  %v9518_v38 = vld [vmem:[%s11054_s7 + $0x420] ss:$8 sps:$4 sm:$0xff]  }
 0x1e8   : > { %8100 = vmatprep.subr.bf16.mxu0 %v9435_v39  ;;  %v9521_v39 = vld [vmem:[%s11054_s7 + $0xc20] ss:$8 sps:$4 sm:$0xff]  }
 0x1ea   : > { %7773 = vmatpush1.bf16.msra.mxu1 %v9430_v40  ;;  %v9526_v40 = vld [vmem:[%s11054_s7 + $0x434] ss:$8 sps:$4 sm:$0xff]  }
 0x1eb   : > { %8101 = vmatpush1.bf16.msra.mxu0 %v9433_v41  ;;  %7774 = vmatprep.subr.bf16.mxu1 %v9438_v42  ;;  %v9529_v41 = vld [vmem:[%s11054_s7 + $0xc34] ss:$8 sps:$4 sm:$0xff]   ;;  %v9524_v42 = vld [vmem:[%s11054_s7 + $0x430] ss:$8 sps:$4 sm:$0xff]  }
 0x1ec   : > { %8102 = vmatprep.subr.bf16.mxu0 %v9441_v43  ;;  %v9527_v43 = vld [vmem:[%s11054_s7 + $0xc30] ss:$8 sps:$4 sm:$0xff]  }
 0x1ee   : > { %7775 = vmatpush1.bf16.msra.mxu1 %v9436_v44  ;;  %v9532_v44 = vld [vmem:[%s11054_s7 + $0x444] ss:$8 sps:$4 sm:$0xff]  }
 0x1ef   : > { %8103 = vmatpush1.bf16.msra.mxu0 %v9439_v45  ;;  %7776 = vmatprep.subr.bf16.mxu1 %v9444_v46  ;;  %v9535_v45 = vld [vmem:[%s11054_s7 + $0xc44] ss:$8 sps:$4 sm:$0xff]   ;;  %v9530_v46 = vld [vmem:[%s11054_s7 + $0x440] ss:$8 sps:$4 sm:$0xff]  }
 0x1f0   : > { %8104 = vmatprep.subr.bf16.mxu0 %v9447_v47  ;;  %v9533_v47 = vld [vmem:[%s11054_s7 + $0xc40] ss:$8 sps:$4 sm:$0xff]  }
 0x1f2   : > { %7777 = vmatpush1.bf16.msra.mxu1 %v9442_v48  ;;  %v9538_v48 = vld [vmem:[%s11054_s7 + $0x454] ss:$8 sps:$4 sm:$0xff]  }
 0x1f3   : > { %8105 = vmatpush1.bf16.msra.mxu0 %v9445_v49  ;;  %7778 = vmatprep.subr.bf16.mxu1 %v9450_v50  ;;  %v9541_v49 = vld [vmem:[%s11054_s7 + $0xc54] ss:$8 sps:$4 sm:$0xff]   ;;  %v9536_v50 = vld [vmem:[%s11054_s7 + $0x450] ss:$8 sps:$4 sm:$0xff]  }
 0x1f4   : > { %8106 = vmatprep.subr.bf16.mxu0 %v9453_v51  ;;  %v9539_v51 = vld [vmem:[%s11054_s7 + $0xc50] ss:$8 sps:$4 sm:$0xff]  }
 0x1f6   : > { %7779 = vmatpush1.bf16.msra.mxu1 %v9448_v52  ;;  %v9544_v52 = vld [vmem:[%s11054_s7 + $0x464] ss:$8 sps:$4 sm:$0xff]  }
 0x1f7   : > { %8107 = vmatpush1.bf16.msra.mxu0 %v9451_v53  ;;  %7780 = vmatprep.subr.bf16.mxu1 %v9456_v54  ;;  %v9547_v53 = vld [vmem:[%s11054_s7 + $0xc64] ss:$8 sps:$4 sm:$0xff]   ;;  %v9542_v54 = vld [vmem:[%s11054_s7 + $0x460] ss:$8 sps:$4 sm:$0xff]  }
 0x1f8   : > { %8108 = vmatprep.subr.bf16.mxu0 %v9459_v55  ;;  %v9545_v55 = vld [vmem:[%s11054_s7 + $0xc60] ss:$8 sps:$4 sm:$0xff]  }
 0x1fa   : > { %7781 = vmatpush1.bf16.msra.mxu1 %v9454_v56  ;;  %v9550_v56 = vld [vmem:[%s11054_s7 + $0x474] ss:$8 sps:$4 sm:$0xff]  }
 0x1fb   : > { %8109 = vmatpush1.bf16.msra.mxu0 %v9457_v57  ;;  %7782 = vmatprep.subr.bf16.mxu1 %v9462_v58  ;;  %v9553_v57 = vld [vmem:[%s11054_s7 + $0xc74] ss:$8 sps:$4 sm:$0xff]   ;;  %v9548_v58 = vld [vmem:[%s11054_s7 + $0x470] ss:$8 sps:$4 sm:$0xff]  }
 0x1fc   : > { %8110 = vmatprep.subr.bf16.mxu0 %v9465_v59  ;;  %v9551_v59 = vld [vmem:[%s11054_s7 + $0xc70] ss:$8 sps:$4 sm:$0xff]  }
 0x1fe   : > { %7783 = vmatpush1.bf16.msra.mxu1 %v9460_v60  ;;  %v9556_v60 = vld [vmem:[%s11054_s7 + $0x484] ss:$8 sps:$4 sm:$0xff]  }
 0x1ff   : > { %8111 = vmatpush1.bf16.msra.mxu0 %v9463_v61  ;;  %7784 = vmatprep.subr.bf16.mxu1 %v9468_v62  ;;  %v9559_v61 = vld [vmem:[%s11054_s7 + $0xc84] ss:$8 sps:$4 sm:$0xff]   ;;  %v9554_v62 = vld [vmem:[%s11054_s7 + $0x480] ss:$8 sps:$4 sm:$0xff]  }
 0x200   : > { %8112 = vmatprep.subr.bf16.mxu0 %v9471_v63  ;;  %v9557_v63 = vld [vmem:[%s11054_s7 + $0xc80] ss:$8 sps:$4 sm:$0xff]  }
 0x202   : > { %7785 = vmatpush1.bf16.msra.mxu1 %v9466_v2  ;;  %v9562_v2 = vld [vmem:[%s11054_s7 + $0x494] ss:$8 sps:$4 sm:$0xff]  }
 0x203   : > { %8113 = vmatpush1.bf16.msra.mxu0 %v9469_v3  ;;  %7786 = vmatprep.subr.bf16.mxu1 %v9474_v4  ;;  %v9565_v3 = vld [vmem:[%s11054_s7 + $0xc94] ss:$8 sps:$4 sm:$0xff]   ;;  %v9560_v4 = vld [vmem:[%s11054_s7 + $0x490] ss:$8 sps:$4 sm:$0xff]  }
 0x204   : > { %8114 = vmatprep.subr.bf16.mxu0 %v9477_v5  ;;  %v9563_v5 = vld [vmem:[%s11054_s7 + $0xc90] ss:$8 sps:$4 sm:$0xff]  }
 0x206   : > { %7787 = vmatpush1.bf16.msra.mxu1 %v9472_v6  ;;  %v9568_v6 = vld [vmem:[%s11054_s7 + $0x4a4] ss:$8 sps:$4 sm:$0xff]  }
 0x207   : > { %8115 = vmatpush1.bf16.msra.mxu0 %v9475_v7  ;;  %7788 = vmatprep.subr.bf16.mxu1 %v9480_v8  ;;  %v9571_v7 = vld [vmem:[%s11054_s7 + $0xca4] ss:$8 sps:$4 sm:$0xff]   ;;  %v9566_v8 = vld [vmem:[%s11054_s7 + $0x4a0] ss:$8 sps:$4 sm:$0xff]  }
 0x208   : > { %8116 = vmatprep.subr.bf16.mxu0 %v9483_v9  ;;  %v9569_v9 = vld [vmem:[%s11054_s7 + $0xca0] ss:$8 sps:$4 sm:$0xff]  }
 0x20a   : > { %7789 = vmatpush1.bf16.msra.mxu1 %v9478_v10  ;;  %v9574_v10 = vld [vmem:[%s11054_s7 + $0x4b4] ss:$8 sps:$4 sm:$0xff]  }
 0x20b   : > { %8117 = vmatpush1.bf16.msra.mxu0 %v9481_v11  ;;  %7790 = vmatprep.subr.bf16.mxu1 %v9486_v12  ;;  %v9577_v11 = vld [vmem:[%s11054_s7 + $0xcb4] ss:$8 sps:$4 sm:$0xff]   ;;  %v9572_v12 = vld [vmem:[%s11054_s7 + $0x4b0] ss:$8 sps:$4 sm:$0xff]  }
 0x20c   : > { %8118 = vmatprep.subr.bf16.mxu0 %v9489_v13  ;;  %v9575_v13 = vld [vmem:[%s11054_s7 + $0xcb0] ss:$8 sps:$4 sm:$0xff]  }
 0x20e   : > { %7791 = vmatpush1.bf16.msra.mxu1 %v9484_v0  ;;  %v9580_v0 = vld [vmem:[%s11054_s7 + $0x4c4] ss:$8 sps:$4 sm:$0xff]  }
 0x20f   : > { %8119 = vmatpush1.bf16.msra.mxu0 %v9487_v14  ;;  %7792 = vmatprep.subr.bf16.mxu1 %v9492_v1  ;;  %v9583_v14 = vld [vmem:[%s11054_s7 + $0xcc4] ss:$8 sps:$4 sm:$0xff]   ;;  %v9578_v1 = vld [vmem:[%s11054_s7 + $0x4c0] ss:$8 sps:$4 sm:$0xff]  }
 0x210   : > { %8120 = vmatprep.subr.bf16.mxu0 %v9495_v15  ;;  %v9581_v15 = vld [vmem:[%s11054_s7 + $0xcc0] ss:$8 sps:$4 sm:$0xff]  }
 0x212   : > { %7793 = vmatpush1.bf16.msra.mxu1 %v9490_v16  ;;  %v9586_v16 = vld [vmem:[%s11054_s7 + $0x4d4] ss:$8 sps:$4 sm:$0xff]  }
 0x213   : > { %8121 = vmatpush1.bf16.msra.mxu0 %v9493_v18  ;;  %7794 = vmatprep.subr.bf16.mxu1 %v9498_v21  ;;  %v9589_v18 = vld [vmem:[%s11054_s7 + $0xcd4] ss:$8 sps:$4 sm:$0xff]   ;;  %v9584_v21 = vld [vmem:[%s11054_s7 + $0x4d0] ss:$8 sps:$4 sm:$0xff]  }
 0x214   : > { %8122 = vmatprep.subr.bf16.mxu0 %v9501_v22  ;;  %v9587_v22 = vld [vmem:[%s11054_s7 + $0xcd0] ss:$8 sps:$4 sm:$0xff]  }
 0x216   : > { %7795 = vmatpush1.bf16.msra.mxu1 %v9496_v24  ;;  %v9592_v24 = vld [vmem:[%s11054_s7 + $0x4e4] ss:$8 sps:$4 sm:$0xff]  }
 0x217   : > { %8123 = vmatpush1.bf16.msra.mxu0 %v9499_v25  ;;  %7805 = vmatprep.subr.bf16.mxu1 %v9506_v26  ;;  %v9595_v25 = vld [vmem:[%s11054_s7 + $0xce4] ss:$8 sps:$4 sm:$0xff]   ;;  %v9590_v26 = vld [vmem:[%s11054_s7 + $0x4e0] ss:$8 sps:$4 sm:$0xff]  }
 0x218   : > { %8133 = vmatprep.subr.bf16.mxu0 %v9511_v17  ;;  %v9593_v17 = vld [vmem:[%s11054_s7 + $0xce0] ss:$8 sps:$4 sm:$0xff]  }
 0x219   : > { %7797 = vmatmul.mubr.bf16.vlgmr.msra.gmra.mrb[0].mxu1 %v8463_v28  ;;  %v9596_v28 = vld [vmem:[%s11054_s7 + $0x4f0] ss:$8 sps:$4 sm:$0xff]  }
 0x21a   : > { %8125 = vmatmul.mubr.bf16.vlgmr.msra.gmra.mrb[0].mxu0 %v8479_v29  ;;  %7806 = vmatpush1.bf16.msra.mxu1 %v9504_v20  ;;  %v9598_v20 = vld [vmem:[%s11054_s7 + $0x4f4] ss:$8 sps:$4 sm:$0xff]   ;;  %v9599_v29 = vld [vmem:[%s11054_s7 + $0xcf0] ss:$8 sps:$4 sm:$0xff]  }
 0x21b   : > { %8134 = vmatpush1.bf16.msra.mxu0 %v9509_v27  ;;  %7807 = vmatprep.subr.bf16.mxu1 %v9514_v19  ;;  %v9601_v27 = vld [vmem:[%s11054_s7 + $0xcf4] ss:$8 sps:$4 sm:$0xff]   ;;  %v9606_v19 = vld [vmem:[%s11054_s7 + $0x504] ss:$8 sps:$4 sm:$0xff]  }
 0x21c   : > { %8135 = vmatprep.subr.bf16.mxu0 %v9517_v32  ;;  %7837 = vmatprep.mubr.bf16.mxu1 %v8466_v23  ;;  %v9611_v32 = vld [vmem:[%s11054_s7 + $0xd04] ss:$8 sps:$4 sm:$0xff]  }
 0x21d   : > { %8165 = vmatprep.mubr.bf16.mxu0 %v8482_v33  ;;  %v11453_v23 = vld [vmem:[%s11720_s0 + $0x28] sm:$0xff] }
 0x21e   : > { %7808 = vmatpush1.bf16.msra.mxu1 %v9512_v34  ;;  %v11458_v33 = vld [vmem:[%s11720_s0 + $0x68] sm:$0xff]  ;;  %v8465_v34 = vcombine.low %v11377_v30, %v11377_v30 }
 0x21f   : > { %8136 = vmatpush1.bf16.msra.mxu0 %v9515_v35  ;;  %7809 = vmatprep.subr.bf16.mxu1 %v9520_v36  ;;  %v8481_v35 = vcombine.low %v11382_v31, %v11382_v31  ;;  %v9604_v36 = vld [vmem:[%s11054_s7 + $0x500] ss:$8 sps:$4 sm:$0xff]   ;;  %v8484_v30 = vcombine.high %v11458_v33, %v11458_v33  ;;  %v9612_v31 = vld [vmem:[%s11054_s7 + $0x510] ss:$8 sps:$4 sm:$0xff]  }
 0x220   : > { %8137 = vmatprep.subr.bf16.mxu0 %v9523_v37  ;;  %v9609_v37 = vld [vmem:[%s11054_s7 + $0xd00] ss:$8 sps:$4 sm:$0xff]  }
 0x222   : > { %7810 = vmatpush1.bf16.msra.mxu1 %v9518_v38  ;;  %v9614_v38 = vld [vmem:[%s11054_s7 + $0x514] ss:$8 sps:$4 sm:$0xff]  }
 0x223   : > { %8138 = vmatpush1.bf16.msra.mxu0 %v9521_v39  ;;  %7811 = vmatprep.subr.bf16.mxu1 %v9526_v40  ;;  %v9617_v39 = vld [vmem:[%s11054_s7 + $0xd14] ss:$8 sps:$4 sm:$0xff]   ;;  %v8468_v40 = vcombine.high %v11453_v23, %v11453_v23 }
 0x224   : > { %8139 = vmatprep.subr.bf16.mxu0 %v9529_v41  ;;  %v9615_v41 = vld [vmem:[%s11054_s7 + $0xd10] ss:$8 sps:$4 sm:$0xff]  }
 0x226   : > { %7812 = vmatpush1.bf16.msra.mxu1 %v9524_v42  ;;  %v9620_v42 = vld [vmem:[%s11054_s7 + $0x524] ss:$8 sps:$4 sm:$0xff]  }
 0x227   : > { %8140 = vmatpush1.bf16.msra.mxu0 %v9527_v43  ;;  %7813 = vmatprep.subr.bf16.mxu1 %v9532_v44  ;;  %v9623_v43 = vld [vmem:[%s11054_s7 + $0xd24] ss:$8 sps:$4 sm:$0xff]   ;;  %v9618_v44 = vld [vmem:[%s11054_s7 + $0x520] ss:$8 sps:$4 sm:$0xff]  }
 0x228   : > { %8141 = vmatprep.subr.bf16.mxu0 %v9535_v45  ;;  %v9621_v45 = vld [vmem:[%s11054_s7 + $0xd20] ss:$8 sps:$4 sm:$0xff]  }
 0x22a   : > { %7814 = vmatpush1.bf16.msra.mxu1 %v9530_v46  ;;  %v9626_v46 = vld [vmem:[%s11054_s7 + $0x534] ss:$8 sps:$4 sm:$0xff]  }
 0x22b   : > { %8142 = vmatpush1.bf16.msra.mxu0 %v9533_v47  ;;  %7815 = vmatprep.subr.bf16.mxu1 %v9538_v48  ;;  %v9629_v47 = vld [vmem:[%s11054_s7 + $0xd34] ss:$8 sps:$4 sm:$0xff]   ;;  %v9624_v48 = vld [vmem:[%s11054_s7 + $0x530] ss:$8 sps:$4 sm:$0xff]  }
 0x22c   : > { %8143 = vmatprep.subr.bf16.mxu0 %v9541_v49  ;;  %v9627_v49 = vld [vmem:[%s11054_s7 + $0xd30] ss:$8 sps:$4 sm:$0xff]  }
 0x22e   : > { %7816 = vmatpush1.bf16.msra.mxu1 %v9536_v50  ;;  %v9632_v50 = vld [vmem:[%s11054_s7 + $0x544] ss:$8 sps:$4 sm:$0xff]  }
 0x22f   : > { %8144 = vmatpush1.bf16.msra.mxu0 %v9539_v51  ;;  %7817 = vmatprep.subr.bf16.mxu1 %v9544_v52  ;;  %v9635_v51 = vld [vmem:[%s11054_s7 + $0xd44] ss:$8 sps:$4 sm:$0xff]   ;;  %v9630_v52 = vld [vmem:[%s11054_s7 + $0x540] ss:$8 sps:$4 sm:$0xff]  }
 0x230   : > { %8145 = vmatprep.subr.bf16.mxu0 %v9547_v53  ;;  %v9633_v53 = vld [vmem:[%s11054_s7 + $0xd40] ss:$8 sps:$4 sm:$0xff]  }
 0x232   : > { %7818 = vmatpush1.bf16.msra.mxu1 %v9542_v54  ;;  %v9638_v54 = vld [vmem:[%s11054_s7 + $0x554] ss:$8 sps:$4 sm:$0xff]  }
 0x233   : > { %8146 = vmatpush1.bf16.msra.mxu0 %v9545_v55  ;;  %7819 = vmatprep.subr.bf16.mxu1 %v9550_v56  ;;  %v9641_v55 = vld [vmem:[%s11054_s7 + $0xd54] ss:$8 sps:$4 sm:$0xff]   ;;  %v9636_v56 = vld [vmem:[%s11054_s7 + $0x550] ss:$8 sps:$4 sm:$0xff]  }
 0x234   : > { %8147 = vmatprep.subr.bf16.mxu0 %v9553_v57  ;;  %v9639_v57 = vld [vmem:[%s11054_s7 + $0xd50] ss:$8 sps:$4 sm:$0xff]  }
 0x236   : > { %7820 = vmatpush1.bf16.msra.mxu1 %v9548_v58  ;;  %v9644_v58 = vld [vmem:[%s11054_s7 + $0x564] ss:$8 sps:$4 sm:$0xff]  }
 0x237   : > { %8148 = vmatpush1.bf16.msra.mxu0 %v9551_v59  ;;  %7821 = vmatprep.subr.bf16.mxu1 %v9556_v60  ;;  %v9647_v59 = vld [vmem:[%s11054_s7 + $0xd64] ss:$8 sps:$4 sm:$0xff]   ;;  %v9642_v60 = vld [vmem:[%s11054_s7 + $0x560] ss:$8 sps:$4 sm:$0xff]  }
 0x238   : > { %8149 = vmatprep.subr.bf16.mxu0 %v9559_v61  ;;  %v9645_v61 = vld [vmem:[%s11054_s7 + $0xd60] ss:$8 sps:$4 sm:$0xff]  }
 0x23a   : > { %7822 = vmatpush1.bf16.msra.mxu1 %v9554_v62  ;;  %v9650_v62 = vld [vmem:[%s11054_s7 + $0x574] ss:$8 sps:$4 sm:$0xff]  }
 0x23b   : > { %8150 = vmatpush1.bf16.msra.mxu0 %v9557_v63  ;;  %7823 = vmatprep.subr.bf16.mxu1 %v9562_v2  ;;  %v9653_v63 = vld [vmem:[%s11054_s7 + $0xd74] ss:$8 sps:$4 sm:$0xff]   ;;  %v9648_v2 = vld [vmem:[%s11054_s7 + $0x570] ss:$8 sps:$4 sm:$0xff]  }
 0x23c   : > { %8151 = vmatprep.subr.bf16.mxu0 %v9565_v3  ;;  %v9651_v3 = vld [vmem:[%s11054_s7 + $0xd70] ss:$8 sps:$4 sm:$0xff]  }
 0x23e   : > { %7824 = vmatpush1.bf16.msra.mxu1 %v9560_v4  ;;  %v9656_v4 = vld [vmem:[%s11054_s7 + $0x584] ss:$8 sps:$4 sm:$0xff]  }
 0x23f   : > { %8152 = vmatpush1.bf16.msra.mxu0 %v9563_v5  ;;  %7825 = vmatprep.subr.bf16.mxu1 %v9568_v6  ;;  %v9659_v5 = vld [vmem:[%s11054_s7 + $0xd84] ss:$8 sps:$4 sm:$0xff]   ;;  %v9654_v6 = vld [vmem:[%s11054_s7 + $0x580] ss:$8 sps:$4 sm:$0xff]  }
 0x240   : > { %8153 = vmatprep.subr.bf16.mxu0 %v9571_v7  ;;  %v9657_v7 = vld [vmem:[%s11054_s7 + $0xd80] ss:$8 sps:$4 sm:$0xff]  }
 0x242   : > { %7826 = vmatpush1.bf16.msra.mxu1 %v9566_v8  ;;  %v9662_v8 = vld [vmem:[%s11054_s7 + $0x594] ss:$8 sps:$4 sm:$0xff]  }
 0x243   : > { %8154 = vmatpush1.bf16.msra.mxu0 %v9569_v9  ;;  %7827 = vmatprep.subr.bf16.mxu1 %v9574_v10  ;;  %v9665_v9 = vld [vmem:[%s11054_s7 + $0xd94] ss:$8 sps:$4 sm:$0xff]   ;;  %v9660_v10 = vld [vmem:[%s11054_s7 + $0x590] ss:$8 sps:$4 sm:$0xff]  }
 0x244   : > { %8155 = vmatprep.subr.bf16.mxu0 %v9577_v11  ;;  %v9663_v11 = vld [vmem:[%s11054_s7 + $0xd90] ss:$8 sps:$4 sm:$0xff]  }
 0x246   : > { %7828 = vmatpush1.bf16.msra.mxu1 %v9572_v12  ;;  %v9668_v12 = vld [vmem:[%s11054_s7 + $0x5a4] ss:$8 sps:$4 sm:$0xff]  }
 0x247   : > { %8156 = vmatpush1.bf16.msra.mxu0 %v9575_v13  ;;  %7829 = vmatprep.subr.bf16.mxu1 %v9580_v0  ;;  %v9671_v13 = vld [vmem:[%s11054_s7 + $0xda4] ss:$8 sps:$4 sm:$0xff]   ;;  %v9666_v0 = vld [vmem:[%s11054_s7 + $0x5a0] ss:$8 sps:$4 sm:$0xff]  }
 0x248   : > { %8157 = vmatprep.subr.bf16.mxu0 %v9583_v14  ;;  %v9669_v14 = vld [vmem:[%s11054_s7 + $0xda0] ss:$8 sps:$4 sm:$0xff]  }
 0x24a   : > { %7830 = vmatpush1.bf16.msra.mxu1 %v9578_v1  ;;  %v9674_v1 = vld [vmem:[%s11054_s7 + $0x5b4] ss:$8 sps:$4 sm:$0xff]  }
 0x24b   : > { %8158 = vmatpush1.bf16.msra.mxu0 %v9581_v15  ;;  %7831 = vmatprep.subr.bf16.mxu1 %v9586_v16  ;;  %v9677_v15 = vld [vmem:[%s11054_s7 + $0xdb4] ss:$8 sps:$4 sm:$0xff]   ;;  %v9672_v16 = vld [vmem:[%s11054_s7 + $0x5b0] ss:$8 sps:$4 sm:$0xff]  }
 0x24c   : > { %8159 = vmatprep.subr.bf16.mxu0 %v9589_v18  ;;  %v9675_v18 = vld [vmem:[%s11054_s7 + $0xdb0] ss:$8 sps:$4 sm:$0xff]  }
 0x24e   : > { %7832 = vmatpush1.bf16.msra.mxu1 %v9584_v21  ;;  %v9680_v21 = vld [vmem:[%s11054_s7 + $0x5c4] ss:$8 sps:$4 sm:$0xff]  }
 0x24f   : > { %8160 = vmatpush1.bf16.msra.mxu0 %v9587_v22  ;;  %7833 = vmatprep.subr.bf16.mxu1 %v9592_v24  ;;  %v9683_v22 = vld [vmem:[%s11054_s7 + $0xdc4] ss:$8 sps:$4 sm:$0xff]   ;;  %v9678_v24 = vld [vmem:[%s11054_s7 + $0x5c0] ss:$8 sps:$4 sm:$0xff]  }
 0x250   : > { %8161 = vmatprep.subr.bf16.mxu0 %v9595_v25  ;;  %v9681_v25 = vld [vmem:[%s11054_s7 + $0xdc0] ss:$8 sps:$4 sm:$0xff]  }
 0x252   : > { %7834 = vmatpush1.bf16.msra.mxu1 %v9590_v26  ;;  %v9686_v26 = vld [vmem:[%s11054_s7 + $0x5d4] ss:$8 sps:$4 sm:$0xff]  }
 0x253   : > { %8162 = vmatpush1.bf16.msra.mxu0 %v9593_v17  ;;  %7835 = vmatprep.subr.bf16.mxu1 %v9598_v20  ;;  %v9689_v17 = vld [vmem:[%s11054_s7 + $0xdd4] ss:$8 sps:$4 sm:$0xff]   ;;  %v9684_v20 = vld [vmem:[%s11054_s7 + $0x5d0] ss:$8 sps:$4 sm:$0xff]  }
 0x254   : > { %8163 = vmatprep.subr.bf16.mxu0 %v9601_v27  ;;  %v9687_v27 = vld [vmem:[%s11054_s7 + $0xdd0] ss:$8 sps:$4 sm:$0xff]  }
 0x256   : > { %7836 = vmatpush1.bf16.msra.mxu1 %v9596_v28  ;;  %v9692_v28 = vld [vmem:[%s11054_s7 + $0x5e4] ss:$8 sps:$4 sm:$0xff]  }
 0x257   : > { %8164 = vmatpush1.bf16.msra.mxu0 %v9599_v29  ;;  %7846 = vmatprep.subr.bf16.mxu1 %v9606_v19  ;;  %v9695_v29 = vld [vmem:[%s11054_s7 + $0xde4] ss:$8 sps:$4 sm:$0xff]   ;;  %v9690_v19 = vld [vmem:[%s11054_s7 + $0x5e0] ss:$8 sps:$4 sm:$0xff]  }
 0x258   : > { %8174 = vmatprep.subr.bf16.mxu0 %v9611_v32  ;;  %v9693_v32 = vld [vmem:[%s11054_s7 + $0xde0] ss:$8 sps:$4 sm:$0xff]  }
 0x259   : > { %7838 = vmatmul.mubr.bf16.vlgmr.msra.gmra.mrb[0].mxu1 %v8465_v34  ;;  %v9698_v34 = vld [vmem:[%s11054_s7 + $0x5f4] ss:$8 sps:$4 sm:$0xff]  }
 0x25a   : > { %8166 = vmatmul.mubr.bf16.vlgmr.msra.gmra.mrb[0].mxu0 %v8481_v35  ;;  %7847 = vmatpush1.bf16.msra.mxu1 %v9604_v36  ;;  %v9701_v35 = vld [vmem:[%s11054_s7 + $0xdf4] ss:$8 sps:$4 sm:$0xff]   ;;  %v9696_v36 = vld [vmem:[%s11054_s7 + $0x5f0] ss:$8 sps:$4 sm:$0xff]  }
 0x25b   : > { %8175 = vmatpush1.bf16.msra.mxu0 %v9609_v37  ;;  %7848 = vmatprep.subr.bf16.mxu1 %v9614_v38  ;;  %v9699_v37 = vld [vmem:[%s11054_s7 + $0xdf0] ss:$8 sps:$4 sm:$0xff]   ;;  %v9706_v38 = vld [vmem:[%s11054_s7 + $0x604] ss:$8 sps:$4 sm:$0xff]  }
 0x25c   : > { %8176 = vmatprep.subr.bf16.mxu0 %v9617_v39  ;;  %7878 = vmatprep.mubr.bf16.mxu1 %v8468_v40  ;;  %v9711_v39 = vld [vmem:[%s11054_s7 + $0xe04] ss:$8 sps:$4 sm:$0xff]   ;;  %v8467_v40 = vcombine.low %v11453_v23, %v11453_v23  ;;  %v9709_v23 = vld [vmem:[%s11054_s7 + $0xe00] ss:$8 sps:$4 sm:$0xff]  }
 0x25d   : > { %8206 = vmatprep.mubr.bf16.mxu0 %v8484_v30  ;;  %v8483_v30 = vcombine.low %v11458_v33, %v11458_v33  ;;  %v9714_v33 = vld [vmem:[%s11054_s7 + $0x614] ss:$8 sps:$4 sm:$0xff]  }
 0x25e   : > { %7849 = vmatpush1.bf16.msra.mxu1 %v9612_v31  ;;  %v11539_v31 = vld [vmem:[%s11720_s0 + $0x30] sm:$0xff] }
 0x25f   : > { %8177 = vmatpush1.bf16.msra.mxu0 %v9615_v41  ;;  %7850 = vmatprep.subr.bf16.mxu1 %v9620_v42  ;;  %v11544_v41 = vld [vmem:[%s11720_s0 + $0x70] sm:$0xff]  ;;  %v9704_v42 = vld [vmem:[%s11054_s7 + $0x600] ss:$8 sps:$4 sm:$0xff]  }
 0x260   : > { %8178 = vmatprep.subr.bf16.mxu0 %v9623_v43  ;;  %v9717_v43 = vld [vmem:[%s11054_s7 + $0xe14] ss:$8 sps:$4 sm:$0xff]  }
 0x262   : > { %7851 = vmatpush1.bf16.msra.mxu1 %v9618_v44  ;;  %v8470_v44 = vcombine.high %v11539_v31, %v11539_v31 }
 0x263   : > { %8179 = vmatpush1.bf16.msra.mxu0 %v9621_v45  ;;  %7852 = vmatprep.subr.bf16.mxu1 %v9626_v46  ;;  %v8486_v45 = vcombine.high %v11544_v41, %v11544_v41  ;;  %v9712_v46 = vld [vmem:[%s11054_s7 + $0x610] ss:$8 sps:$4 sm:$0xff]  }
 0x264   : > { %8180 = vmatprep.subr.bf16.mxu0 %v9629_v47  ;;  %v9715_v47 = vld [vmem:[%s11054_s7 + $0xe10] ss:$8 sps:$4 sm:$0xff]  }
 0x266   : > { %7853 = vmatpush1.bf16.msra.mxu1 %v9624_v48  ;;  %v9720_v48 = vld [vmem:[%s11054_s7 + $0x624] ss:$8 sps:$4 sm:$0xff]  }
 0x267   : > { %8181 = vmatpush1.bf16.msra.mxu0 %v9627_v49  ;;  %7854 = vmatprep.subr.bf16.mxu1 %v9632_v50  ;;  %v9723_v49 = vld [vmem:[%s11054_s7 + $0xe24] ss:$8 sps:$4 sm:$0xff]   ;;  %v9718_v50 = vld [vmem:[%s11054_s7 + $0x620] ss:$8 sps:$4 sm:$0xff]  }
 0x268   : > { %8182 = vmatprep.subr.bf16.mxu0 %v9635_v51  ;;  %v9721_v51 = vld [vmem:[%s11054_s7 + $0xe20] ss:$8 sps:$4 sm:$0xff]  }
 0x26a   : > { %7855 = vmatpush1.bf16.msra.mxu1 %v9630_v52  ;;  %v9726_v52 = vld [vmem:[%s11054_s7 + $0x634] ss:$8 sps:$4 sm:$0xff]  }
 0x26b   : > { %8183 = vmatpush1.bf16.msra.mxu0 %v9633_v53  ;;  %7856 = vmatprep.subr.bf16.mxu1 %v9638_v54  ;;  %v9729_v53 = vld [vmem:[%s11054_s7 + $0xe34] ss:$8 sps:$4 sm:$0xff]   ;;  %v9724_v54 = vld [vmem:[%s11054_s7 + $0x630] ss:$8 sps:$4 sm:$0xff]  }
 0x26c   : > { %8184 = vmatprep.subr.bf16.mxu0 %v9641_v55  ;;  %v9727_v55 = vld [vmem:[%s11054_s7 + $0xe30] ss:$8 sps:$4 sm:$0xff]  }
 0x26e   : > { %7857 = vmatpush1.bf16.msra.mxu1 %v9636_v56  ;;  %v9732_v56 = vld [vmem:[%s11054_s7 + $0x644] ss:$8 sps:$4 sm:$0xff]  }
 0x26f   : > { %8185 = vmatpush1.bf16.msra.mxu0 %v9639_v57  ;;  %7858 = vmatprep.subr.bf16.mxu1 %v9644_v58  ;;  %v9735_v57 = vld [vmem:[%s11054_s7 + $0xe44] ss:$8 sps:$4 sm:$0xff]   ;;  %v9730_v58 = vld [vmem:[%s11054_s7 + $0x640] ss:$8 sps:$4 sm:$0xff]  }
 0x270   : > { %8186 = vmatprep.subr.bf16.mxu0 %v9647_v59  ;;  %v9733_v59 = vld [vmem:[%s11054_s7 + $0xe40] ss:$8 sps:$4 sm:$0xff]  }
 0x272   : > { %7859 = vmatpush1.bf16.msra.mxu1 %v9642_v60  ;;  %v9738_v60 = vld [vmem:[%s11054_s7 + $0x654] ss:$8 sps:$4 sm:$0xff]  }
 0x273   : > { %8187 = vmatpush1.bf16.msra.mxu0 %v9645_v61  ;;  %7860 = vmatprep.subr.bf16.mxu1 %v9650_v62  ;;  %v9741_v61 = vld [vmem:[%s11054_s7 + $0xe54] ss:$8 sps:$4 sm:$0xff]   ;;  %v9736_v62 = vld [vmem:[%s11054_s7 + $0x650] ss:$8 sps:$4 sm:$0xff]  }
 0x274   : > { %8188 = vmatprep.subr.bf16.mxu0 %v9653_v63  ;;  %v9739_v63 = vld [vmem:[%s11054_s7 + $0xe50] ss:$8 sps:$4 sm:$0xff]  }
 0x276   : > { %7861 = vmatpush1.bf16.msra.mxu1 %v9648_v2  ;;  %v9744_v2 = vld [vmem:[%s11054_s7 + $0x664] ss:$8 sps:$4 sm:$0xff]  }
 0x277   : > { %8189 = vmatpush1.bf16.msra.mxu0 %v9651_v3  ;;  %7862 = vmatprep.subr.bf16.mxu1 %v9656_v4  ;;  %v9747_v3 = vld [vmem:[%s11054_s7 + $0xe64] ss:$8 sps:$4 sm:$0xff]   ;;  %v9742_v4 = vld [vmem:[%s11054_s7 + $0x660] ss:$8 sps:$4 sm:$0xff]  }
 0x278   : > { %8190 = vmatprep.subr.bf16.mxu0 %v9659_v5  ;;  %v9745_v5 = vld [vmem:[%s11054_s7 + $0xe60] ss:$8 sps:$4 sm:$0xff]  }
 0x27a   : > { %7863 = vmatpush1.bf16.msra.mxu1 %v9654_v6  ;;  %v9750_v6 = vld [vmem:[%s11054_s7 + $0x674] ss:$8 sps:$4 sm:$0xff]  }
 0x27b   : > { %8191 = vmatpush1.bf16.msra.mxu0 %v9657_v7  ;;  %7864 = vmatprep.subr.bf16.mxu1 %v9662_v8  ;;  %v9753_v7 = vld [vmem:[%s11054_s7 + $0xe74] ss:$8 sps:$4 sm:$0xff]   ;;  %v9748_v8 = vld [vmem:[%s11054_s7 + $0x670] ss:$8 sps:$4 sm:$0xff]  }
 0x27c   : > { %8192 = vmatprep.subr.bf16.mxu0 %v9665_v9  ;;  %v9751_v9 = vld [vmem:[%s11054_s7 + $0xe70] ss:$8 sps:$4 sm:$0xff]  }
 0x27e   : > { %7865 = vmatpush1.bf16.msra.mxu1 %v9660_v10  ;;  %v9756_v10 = vld [vmem:[%s11054_s7 + $0x684] ss:$8 sps:$4 sm:$0xff]  }
 0x27f   : > { %8193 = vmatpush1.bf16.msra.mxu0 %v9663_v11  ;;  %7866 = vmatprep.subr.bf16.mxu1 %v9668_v12  ;;  %v9759_v11 = vld [vmem:[%s11054_s7 + $0xe84] ss:$8 sps:$4 sm:$0xff]   ;;  %v9754_v12 = vld [vmem:[%s11054_s7 + $0x680] ss:$8 sps:$4 sm:$0xff]  }
 0x280   : > { %8194 = vmatprep.subr.bf16.mxu0 %v9671_v13  ;;  %v9757_v13 = vld [vmem:[%s11054_s7 + $0xe80] ss:$8 sps:$4 sm:$0xff]  }
 0x282   : > { %7867 = vmatpush1.bf16.msra.mxu1 %v9666_v0  ;;  %v9762_v0 = vld [vmem:[%s11054_s7 + $0x694] ss:$8 sps:$4 sm:$0xff]  }
 0x283   : > { %8195 = vmatpush1.bf16.msra.mxu0 %v9669_v14  ;;  %7868 = vmatprep.subr.bf16.mxu1 %v9674_v1  ;;  %v9765_v14 = vld [vmem:[%s11054_s7 + $0xe94] ss:$8 sps:$4 sm:$0xff]   ;;  %v9760_v1 = vld [vmem:[%s11054_s7 + $0x690] ss:$8 sps:$4 sm:$0xff]  }
 0x284   : > { %8196 = vmatprep.subr.bf16.mxu0 %v9677_v15  ;;  %v9763_v15 = vld [vmem:[%s11054_s7 + $0xe90] ss:$8 sps:$4 sm:$0xff]  }
 0x286   : > { %7869 = vmatpush1.bf16.msra.mxu1 %v9672_v16  ;;  %v9768_v16 = vld [vmem:[%s11054_s7 + $0x6a4] ss:$8 sps:$4 sm:$0xff]  }
 0x287   : > { %8197 = vmatpush1.bf16.msra.mxu0 %v9675_v18  ;;  %7870 = vmatprep.subr.bf16.mxu1 %v9680_v21  ;;  %v9771_v18 = vld [vmem:[%s11054_s7 + $0xea4] ss:$8 sps:$4 sm:$0xff]   ;;  %v9766_v21 = vld [vmem:[%s11054_s7 + $0x6a0] ss:$8 sps:$4 sm:$0xff]  }
 0x288   : > { %8198 = vmatprep.subr.bf16.mxu0 %v9683_v22  ;;  %v9769_v22 = vld [vmem:[%s11054_s7 + $0xea0] ss:$8 sps:$4 sm:$0xff]  }
 0x28a   : > { %7871 = vmatpush1.bf16.msra.mxu1 %v9678_v24  ;;  %v9774_v24 = vld [vmem:[%s11054_s7 + $0x6b4] ss:$8 sps:$4 sm:$0xff]  }
 0x28b   : > { %8199 = vmatpush1.bf16.msra.mxu0 %v9681_v25  ;;  %7872 = vmatprep.subr.bf16.mxu1 %v9686_v26  ;;  %v9777_v25 = vld [vmem:[%s11054_s7 + $0xeb4] ss:$8 sps:$4 sm:$0xff]   ;;  %v9772_v26 = vld [vmem:[%s11054_s7 + $0x6b0] ss:$8 sps:$4 sm:$0xff]  }
 0x28c   : > { %8200 = vmatprep.subr.bf16.mxu0 %v9689_v17  ;;  %v9775_v17 = vld [vmem:[%s11054_s7 + $0xeb0] ss:$8 sps:$4 sm:$0xff]  }
 0x28e   : > { %7873 = vmatpush1.bf16.msra.mxu1 %v9684_v20  ;;  %v9780_v20 = vld [vmem:[%s11054_s7 + $0x6c4] ss:$8 sps:$4 sm:$0xff]  }
 0x28f   : > { %8201 = vmatpush1.bf16.msra.mxu0 %v9687_v27  ;;  %7874 = vmatprep.subr.bf16.mxu1 %v9692_v28  ;;  %v9783_v27 = vld [vmem:[%s11054_s7 + $0xec4] ss:$8 sps:$4 sm:$0xff]   ;;  %v9778_v28 = vld [vmem:[%s11054_s7 + $0x6c0] ss:$8 sps:$4 sm:$0xff]  }
 0x290   : > { %8202 = vmatprep.subr.bf16.mxu0 %v9695_v29  ;;  %v9781_v29 = vld [vmem:[%s11054_s7 + $0xec0] ss:$8 sps:$4 sm:$0xff]  }
 0x292   : > { %7875 = vmatpush1.bf16.msra.mxu1 %v9690_v19  ;;  %v9786_v19 = vld [vmem:[%s11054_s7 + $0x6d4] ss:$8 sps:$4 sm:$0xff]  }
 0x293   : > { %8203 = vmatpush1.bf16.msra.mxu0 %v9693_v32  ;;  %7876 = vmatprep.subr.bf16.mxu1 %v9698_v34  ;;  %v9789_v32 = vld [vmem:[%s11054_s7 + $0xed4] ss:$8 sps:$4 sm:$0xff]   ;;  %v9784_v34 = vld [vmem:[%s11054_s7 + $0x6d0] ss:$8 sps:$4 sm:$0xff]  }
 0x294   : > { %8204 = vmatprep.subr.bf16.mxu0 %v9701_v35  ;;  %v9787_v35 = vld [vmem:[%s11054_s7 + $0xed0] ss:$8 sps:$4 sm:$0xff]  }
 0x296   : > { %7877 = vmatpush1.bf16.msra.mxu1 %v9696_v36  ;;  %v9792_v36 = vld [vmem:[%s11054_s7 + $0x6e4] ss:$8 sps:$4 sm:$0xff]  }
 0x297   : > { %8205 = vmatpush1.bf16.msra.mxu0 %v9699_v37  ;;  %7887 = vmatprep.subr.bf16.mxu1 %v9706_v38  ;;  %v9795_v37 = vld [vmem:[%s11054_s7 + $0xee4] ss:$8 sps:$4 sm:$0xff]   ;;  %v9790_v38 = vld [vmem:[%s11054_s7 + $0x6e0] ss:$8 sps:$4 sm:$0xff]  }
 0x298   : > { %8215 = vmatprep.subr.bf16.mxu0 %v9711_v39  ;;  %v9793_v39 = vld [vmem:[%s11054_s7 + $0xee0] ss:$8 sps:$4 sm:$0xff]  }
 0x299   : > { %7879 = vmatmul.mubr.bf16.vlgmr.msra.gmra.mrb[0].mxu1 %v8467_v40  ;;  %v9798_v40 = vld [vmem:[%s11054_s7 + $0x6f4] ss:$8 sps:$4 sm:$0xff]  }
 0x29a   : > { %8207 = vmatmul.mubr.bf16.vlgmr.msra.gmra.mrb[0].mxu0 %v8483_v30  ;;  %7888 = vmatpush1.bf16.msra.mxu1 %v9704_v42  ;;  %v9801_v30 = vld [vmem:[%s11054_s7 + $0xef4] ss:$8 sps:$4 sm:$0xff]   ;;  %v9796_v42 = vld [vmem:[%s11054_s7 + $0x6f0] ss:$8 sps:$4 sm:$0xff]  }
 0x29b   : > { %8216 = vmatpush1.bf16.msra.mxu0 %v9709_v23  ;;  %7889 = vmatprep.subr.bf16.mxu1 %v9714_v33  ;;  %v9799_v23 = vld [vmem:[%s11054_s7 + $0xef0] ss:$8 sps:$4 sm:$0xff]   ;;  %v9806_v33 = vld [vmem:[%s11054_s7 + $0x704] ss:$8 sps:$4 sm:$0xff]  }
 0x29c   : > { %8217 = vmatprep.subr.bf16.mxu0 %v9717_v43  ;;  %7919 = vmatprep.mubr.bf16.mxu1 %v8470_v44  ;;  %v9811_v43 = vld [vmem:[%s11054_s7 + $0xf04] ss:$8 sps:$4 sm:$0xff]   ;;  %v8469_v44 = vcombine.low %v11539_v31, %v11539_v31  ;;  %v9809_v31 = vld [vmem:[%s11054_s7 + $0xf00] ss:$8 sps:$4 sm:$0xff]  }
 0x29d   : > { %8247 = vmatprep.mubr.bf16.mxu0 %v8486_v45  ;;  %v8485_v45 = vcombine.low %v11544_v41, %v11544_v41  ;;  %v9814_v41 = vld [vmem:[%s11054_s7 + $0x714] ss:$8 sps:$4 sm:$0xff]  }
 0x29e   : > { %7890 = vmatpush1.bf16.msra.mxu1 %v9712_v46  ;;  %v11621_v46 = vld [vmem:[%s11720_s0 + $0x38] sm:$0xff] }
 0x29f   : > { %8218 = vmatpush1.bf16.msra.mxu0 %v9715_v47  ;;  %7891 = vmatprep.subr.bf16.mxu1 %v9720_v48  ;;  %v11626_v47 = vld [vmem:[%s11720_s0 + $0x78] sm:$0xff]  ;;  %v9804_v48 = vld [vmem:[%s11054_s7 + $0x700] ss:$8 sps:$4 sm:$0xff]  }
 0x2a0   : > { %8219 = vmatprep.subr.bf16.mxu0 %v9723_v49  ;;  %v9817_v49 = vld [vmem:[%s11054_s7 + $0xf14] ss:$8 sps:$4 sm:$0xff]  }
 0x2a2   : > { %7892 = vmatpush1.bf16.msra.mxu1 %v9718_v50  ;;  %v8472_v50 = vcombine.high %v11621_v46, %v11621_v46 }
 0x2a3   : > { %8220 = vmatpush1.bf16.msra.mxu0 %v9721_v51  ;;  %7893 = vmatprep.subr.bf16.mxu1 %v9726_v52  ;;  %v8488_v51 = vcombine.high %v11626_v47, %v11626_v47  ;;  %v9812_v52 = vld [vmem:[%s11054_s7 + $0x710] ss:$8 sps:$4 sm:$0xff]  }
 0x2a4   : > { %8221 = vmatprep.subr.bf16.mxu0 %v9729_v53  ;;  %v9815_v53 = vld [vmem:[%s11054_s7 + $0xf10] ss:$8 sps:$4 sm:$0xff]  }
 0x2a6   : > { %7894 = vmatpush1.bf16.msra.mxu1 %v9724_v54  ;;  %v9820_v54 = vld [vmem:[%s11054_s7 + $0x724] ss:$8 sps:$4 sm:$0xff]  }
 0x2a7   : > { %8222 = vmatpush1.bf16.msra.mxu0 %v9727_v55  ;;  %7895 = vmatprep.subr.bf16.mxu1 %v9732_v56  ;;  %v9823_v55 = vld [vmem:[%s11054_s7 + $0xf24] ss:$8 sps:$4 sm:$0xff]   ;;  %v9818_v56 = vld [vmem:[%s11054_s7 + $0x720] ss:$8 sps:$4 sm:$0xff]  }
 0x2a8   : > { %8223 = vmatprep.subr.bf16.mxu0 %v9735_v57  ;;  %v9821_v57 = vld [vmem:[%s11054_s7 + $0xf20] ss:$8 sps:$4 sm:$0xff]  }
 0x2aa   : > { %7896 = vmatpush1.bf16.msra.mxu1 %v9730_v58  ;;  %v9826_v58 = vld [vmem:[%s11054_s7 + $0x734] ss:$8 sps:$4 sm:$0xff]  }
 0x2ab   : > { %8224 = vmatpush1.bf16.msra.mxu0 %v9733_v59  ;;  %7897 = vmatprep.subr.bf16.mxu1 %v9738_v60  ;;  %v9829_v59 = vld [vmem:[%s11054_s7 + $0xf34] ss:$8 sps:$4 sm:$0xff]   ;;  %v9824_v60 = vld [vmem:[%s11054_s7 + $0x730] ss:$8 sps:$4 sm:$0xff]  }
 0x2ac   : > { %8225 = vmatprep.subr.bf16.mxu0 %v9741_v61  ;;  %v9827_v61 = vld [vmem:[%s11054_s7 + $0xf30] ss:$8 sps:$4 sm:$0xff]  }
 0x2ae   : > { %7898 = vmatpush1.bf16.msra.mxu1 %v9736_v62  ;;  %v9832_v62 = vld [vmem:[%s11054_s7 + $0x744] ss:$8 sps:$4 sm:$0xff]  }
 0x2af   : > { %8226 = vmatpush1.bf16.msra.mxu0 %v9739_v63  ;;  %7899 = vmatprep.subr.bf16.mxu1 %v9744_v2  ;;  %v9835_v63 = vld [vmem:[%s11054_s7 + $0xf44] ss:$8 sps:$4 sm:$0xff]   ;;  %v9830_v2 = vld [vmem:[%s11054_s7 + $0x740] ss:$8 sps:$4 sm:$0xff]  }
 0x2b0   : > { %8227 = vmatprep.subr.bf16.mxu0 %v9747_v3  ;;  %v9833_v3 = vld [vmem:[%s11054_s7 + $0xf40] ss:$8 sps:$4 sm:$0xff]  }
 0x2b2   : > { %7900 = vmatpush1.bf16.msra.mxu1 %v9742_v4  ;;  %v9838_v4 = vld [vmem:[%s11054_s7 + $0x754] ss:$8 sps:$4 sm:$0xff]  }
 0x2b3   : > { %8228 = vmatpush1.bf16.msra.mxu0 %v9745_v5  ;;  %7901 = vmatprep.subr.bf16.mxu1 %v9750_v6  ;;  %v9841_v5 = vld [vmem:[%s11054_s7 + $0xf54] ss:$8 sps:$4 sm:$0xff]   ;;  %v9836_v6 = vld [vmem:[%s11054_s7 + $0x750] ss:$8 sps:$4 sm:$0xff]  }
 0x2b4   : > { %8229 = vmatprep.subr.bf16.mxu0 %v9753_v7  ;;  %v9839_v7 = vld [vmem:[%s11054_s7 + $0xf50] ss:$8 sps:$4 sm:$0xff]  }
 0x2b6   : > { %7902 = vmatpush1.bf16.msra.mxu1 %v9748_v8  ;;  %v9844_v8 = vld [vmem:[%s11054_s7 + $0x764] ss:$8 sps:$4 sm:$0xff]  }
 0x2b7   : > { %8230 = vmatpush1.bf16.msra.mxu0 %v9751_v9  ;;  %7903 = vmatprep.subr.bf16.mxu1 %v9756_v10  ;;  %v9847_v9 = vld [vmem:[%s11054_s7 + $0xf64] ss:$8 sps:$4 sm:$0xff]   ;;  %v9842_v10 = vld [vmem:[%s11054_s7 + $0x760] ss:$8 sps:$4 sm:$0xff]  }
 0x2b8   : > { %8231 = vmatprep.subr.bf16.mxu0 %v9759_v11  ;;  %v9845_v11 = vld [vmem:[%s11054_s7 + $0xf60] ss:$8 sps:$4 sm:$0xff]  }
 0x2ba   : > { %7904 = vmatpush1.bf16.msra.mxu1 %v9754_v12  ;;  %v9850_v12 = vld [vmem:[%s11054_s7 + $0x774] ss:$8 sps:$4 sm:$0xff]  }
 0x2bb   : > { %8232 = vmatpush1.bf16.msra.mxu0 %v9757_v13  ;;  %7905 = vmatprep.subr.bf16.mxu1 %v9762_v0  ;;  %v9853_v13 = vld [vmem:[%s11054_s7 + $0xf74] ss:$8 sps:$4 sm:$0xff]   ;;  %v9848_v0 = vld [vmem:[%s11054_s7 + $0x770] ss:$8 sps:$4 sm:$0xff]  }
 0x2bc   : > { %8233 = vmatprep.subr.bf16.mxu0 %v9765_v14  ;;  %v9851_v14 = vld [vmem:[%s11054_s7 + $0xf70] ss:$8 sps:$4 sm:$0xff]  }
 0x2be   : > { %7906 = vmatpush1.bf16.msra.mxu1 %v9760_v1  ;;  %v9856_v1 = vld [vmem:[%s11054_s7 + $0x784] ss:$8 sps:$4 sm:$0xff]  }
 0x2bf   : > { %8234 = vmatpush1.bf16.msra.mxu0 %v9763_v15  ;;  %7907 = vmatprep.subr.bf16.mxu1 %v9768_v16  ;;  %v9859_v15 = vld [vmem:[%s11054_s7 + $0xf84] ss:$8 sps:$4 sm:$0xff]   ;;  %v9854_v16 = vld [vmem:[%s11054_s7 + $0x780] ss:$8 sps:$4 sm:$0xff]  }
 0x2c0   : > { %8235 = vmatprep.subr.bf16.mxu0 %v9771_v18  ;;  %v9857_v18 = vld [vmem:[%s11054_s7 + $0xf80] ss:$8 sps:$4 sm:$0xff]  }
 0x2c2   : > { %7908 = vmatpush1.bf16.msra.mxu1 %v9766_v21  ;;  %v9862_v21 = vld [vmem:[%s11054_s7 + $0x794] ss:$8 sps:$4 sm:$0xff]  }
 0x2c3   : > { %8236 = vmatpush1.bf16.msra.mxu0 %v9769_v22  ;;  %7909 = vmatprep.subr.bf16.mxu1 %v9774_v24  ;;  %v9865_v22 = vld [vmem:[%s11054_s7 + $0xf94] ss:$8 sps:$4 sm:$0xff]   ;;  %v9860_v24 = vld [vmem:[%s11054_s7 + $0x790] ss:$8 sps:$4 sm:$0xff]  }
 0x2c4   : > { %8237 = vmatprep.subr.bf16.mxu0 %v9777_v25  ;;  %v9863_v25 = vld [vmem:[%s11054_s7 + $0xf90] ss:$8 sps:$4 sm:$0xff]  }
 0x2c6   : > { %7910 = vmatpush1.bf16.msra.mxu1 %v9772_v26  ;;  %v9868_v26 = vld [vmem:[%s11054_s7 + $0x7a4] ss:$8 sps:$4 sm:$0xff]  }
 0x2c7   : > { %8238 = vmatpush1.bf16.msra.mxu0 %v9775_v17  ;;  %7911 = vmatprep.subr.bf16.mxu1 %v9780_v20  ;;  %v9871_v17 = vld [vmem:[%s11054_s7 + $0xfa4] ss:$8 sps:$4 sm:$0xff]   ;;  %v9866_v20 = vld [vmem:[%s11054_s7 + $0x7a0] ss:$8 sps:$4 sm:$0xff]  }
 0x2c8   : > { %8239 = vmatprep.subr.bf16.mxu0 %v9783_v27  ;;  %v9869_v27 = vld [vmem:[%s11054_s7 + $0xfa0] ss:$8 sps:$4 sm:$0xff]  }
 0x2ca   : > { %7912 = vmatpush1.bf16.msra.mxu1 %v9778_v28  ;;  %v9874_v28 = vld [vmem:[%s11054_s7 + $0x7b4] ss:$8 sps:$4 sm:$0xff]  }
 0x2cb   : > { %8240 = vmatpush1.bf16.msra.mxu0 %v9781_v29  ;;  %7913 = vmatprep.subr.bf16.mxu1 %v9786_v19  ;;  %v9877_v29 = vld [vmem:[%s11054_s7 + $0xfb4] ss:$8 sps:$4 sm:$0xff]   ;;  %v9872_v19 = vld [vmem:[%s11054_s7 + $0x7b0] ss:$8 sps:$4 sm:$0xff]  }
 0x2cc   : > { %8241 = vmatprep.subr.bf16.mxu0 %v9789_v32  ;;  %v9875_v32 = vld [vmem:[%s11054_s7 + $0xfb0] ss:$8 sps:$4 sm:$0xff]  }
 0x2ce   : > { %7914 = vmatpush1.bf16.msra.mxu1 %v9784_v34  ;;  %v9880_v34 = vld [vmem:[%s11054_s7 + $0x7c4] ss:$8 sps:$4 sm:$0xff]  }
 0x2cf   : > { %8242 = vmatpush1.bf16.msra.mxu0 %v9787_v35  ;;  %7915 = vmatprep.subr.bf16.mxu1 %v9792_v36  ;;  %v9883_v35 = vld [vmem:[%s11054_s7 + $0xfc4] ss:$8 sps:$4 sm:$0xff]   ;;  %v9878_v36 = vld [vmem:[%s11054_s7 + $0x7c0] ss:$8 sps:$4 sm:$0xff]  }
 0x2d0   : > { %8243 = vmatprep.subr.bf16.mxu0 %v9795_v37  ;;  %v9881_v37 = vld [vmem:[%s11054_s7 + $0xfc0] ss:$8 sps:$4 sm:$0xff]  }
 0x2d2   : > { %7916 = vmatpush1.bf16.msra.mxu1 %v9790_v38  ;;  %v9886_v38 = vld [vmem:[%s11054_s7 + $0x7d4] ss:$8 sps:$4 sm:$0xff]  }
 0x2d3   : > { %8244 = vmatpush1.bf16.msra.mxu0 %v9793_v39  ;;  %7917 = vmatprep.subr.bf16.mxu1 %v9798_v40  ;;  %v9889_v39 = vld [vmem:[%s11054_s7 + $0xfd4] ss:$8 sps:$4 sm:$0xff]   ;;  %v9884_v40 = vld [vmem:[%s11054_s7 + $0x7d0] ss:$8 sps:$4 sm:$0xff]  }
 0x2d4   : > { %8245 = vmatprep.subr.bf16.mxu0 %v9801_v30  ;;  %v9887_v30 = vld [vmem:[%s11054_s7 + $0xfd0] ss:$8 sps:$4 sm:$0xff]  }
 0x2d6   : > { %7918 = vmatpush1.bf16.msra.mxu1 %v9796_v42  ;;  %v9892_v42 = vld [vmem:[%s11054_s7 + $0x7e4] ss:$8 sps:$4 sm:$0xff]  }
 0x2d7   : > { %8246 = vmatpush1.bf16.msra.mxu0 %v9799_v23  ;;  %7928 = vmatprep.subr.bf16.mxu1 %v9806_v33  ;;  %v9895_v23 = vld [vmem:[%s11054_s7 + $0xfe4] ss:$8 sps:$4 sm:$0xff]   ;;  %v9890_v33 = vld [vmem:[%s11054_s7 + $0x7e0] ss:$8 sps:$4 sm:$0xff]  }
 0x2d8   : > { %8256 = vmatprep.subr.bf16.mxu0 %v9811_v43  ;;  %v9893_v43 = vld [vmem:[%s11054_s7 + $0xfe0] ss:$8 sps:$4 sm:$0xff]  }
 0x2d9   : > { %7920 = vmatmul.mubr.bf16.vlgmr.msra.gmra.mrb[0].mxu1 %v8469_v44  ;;  %v9898_v44 = vld [vmem:[%s11054_s7 + $0x7f4] ss:$8 sps:$4 sm:$0xff]  }
 0x2da   : > { %8248 = vmatmul.mubr.bf16.vlgmr.msra.gmra.mrb[0].mxu0 %v8485_v45  ;;  %7929 = vmatpush1.bf16.msra.mxu1 %v9804_v48  ;;  %v9901_v45 = vld [vmem:[%s11054_s7 + $0xff4] ss:$8 sps:$4 sm:$0xff]   ;;  %v9896_v48 = vld [vmem:[%s11054_s7 + $0x7f0] ss:$8 sps:$4 sm:$0xff]  }
 0x2db   : > { %8257 = vmatpush1.bf16.msra.mxu0 %v9809_v31  ;;  %7930 = vmatprep.subr.bf16.mxu1 %v9814_v41  ;;  %v9899_v31 = vld [vmem:[%s11054_s7 + $0xff0] ss:$8 sps:$4 sm:$0xff]   ;;  %v8471_v41 = vcombine.low %v11621_v46, %v11621_v46  ;;  %s4417_s7 = scalar_lea.vmem %s11722_s2, %s11731_s22 }
 0x2dc   : > { %8258 = vmatprep.subr.bf16.mxu0 %v9817_v49  ;;  %7960 = vmatprep.mubr.bf16.mxu1 %v8472_v50  ;;  %v8487_v49 = vcombine.low %v11626_v47, %v11626_v47  ;;  %v4959_v50 = vlaneseq }
 0x2dd   : > { %8288 = vmatprep.mubr.bf16.mxu0 %v8488_v51 }
 0x2de   : > { %7931 = vmatpush1.bf16.msra.mxu1 %v9812_v52  ;;  %v4960_v51 = vshrl.u32 %v4959_v50, 7 }
 0x2df   : > { %8259 = vmatpush1.bf16.msra.mxu0 %v9815_v53  ;;  %7932 = vmatprep.subr.bf16.mxu1 %v9820_v54  ;;  %v4957_v53 = vld [vmem:[%s4417_s7] sm:$0x3] }
 0x2e0   : > { %8260 = vmatprep.subr.bf16.mxu0 %v9823_v55  ;;  %v4961_v52 = vsub.s32 0, %v4960_v51  ;;  %v4965_v54 = vsub.s32 1, %v4960_v51 }
 0x2e2   : > { %7933 = vmatpush1.bf16.msra.mxu1 %v9818_v56  ;;  %v4962_v46 = vrot.slane %v4957_v53, %v4961_v52  ;;  %v4966_v55 = vrot.slane %v4957_v53, %v4965_v54 }
 0x2e3   : > { %8261 = vmatpush1.bf16.msra.mxu0 %v9821_v57  ;;  %7934 = vmatprep.subr.bf16.mxu1 %v9826_v58 }
 0x2e4   : > { %8262 = vmatprep.subr.bf16.mxu0 %v9829_v59 }
 0x2e6   : > { %7935 = vmatpush1.bf16.msra.mxu1 %v9824_v60 }
 0x2e7   : > { %8263 = vmatpush1.bf16.msra.mxu0 %v9827_v61  ;;  %7936 = vmatprep.subr.bf16.mxu1 %v9832_v62 }
 0x2e8   : > { %8264 = vmatprep.subr.bf16.mxu0 %v9835_v63 }
 0x2ea   : > { %7937 = vmatpush1.bf16.msra.mxu1 %v9830_v2 }
 0x2eb   : > { %8265 = vmatpush1.bf16.msra.mxu0 %v9833_v3  ;;  %7938 = vmatprep.subr.bf16.mxu1 %v9838_v4 }
 0x2ec   : > { %8266 = vmatprep.subr.bf16.mxu0 %v9841_v5 }
 0x2ee   : > { %7939 = vmatpush1.bf16.msra.mxu1 %v9836_v6 }
 0x2ef   : > { %8267 = vmatpush1.bf16.msra.mxu0 %v9839_v7  ;;  %7940 = vmatprep.subr.bf16.mxu1 %v9844_v8 }
 0x2f0   : > { %8268 = vmatprep.subr.bf16.mxu0 %v9847_v9 }
 0x2f2   : > { %7941 = vmatpush1.bf16.msra.mxu1 %v9842_v10 }
 0x2f3   : > { %8269 = vmatpush1.bf16.msra.mxu0 %v9845_v11  ;;  %7942 = vmatprep.subr.bf16.mxu1 %v9850_v12 }
 0x2f4   : > { %8270 = vmatprep.subr.bf16.mxu0 %v9853_v13 }
 0x2f6   : > { %7943 = vmatpush1.bf16.msra.mxu1 %v9848_v0 }
 0x2f7   : > { %8271 = vmatpush1.bf16.msra.mxu0 %v9851_v14  ;;  %7944 = vmatprep.subr.bf16.mxu1 %v9856_v1 }
 0x2f8   : > { %8272 = vmatprep.subr.bf16.mxu0 %v9859_v15 }
 0x2fa   : > { %7945 = vmatpush1.bf16.msra.mxu1 %v9854_v16 }
 0x2fb   : > { %8273 = vmatpush1.bf16.msra.mxu0 %v9857_v18  ;;  %7946 = vmatprep.subr.bf16.mxu1 %v9862_v21 }
 0x2fc   : > { %8274 = vmatprep.subr.bf16.mxu0 %v9865_v22 }
 0x2fe   : > { %7947 = vmatpush1.bf16.msra.mxu1 %v9860_v24 }
 0x2ff   : > { %8275 = vmatpush1.bf16.msra.mxu0 %v9863_v25  ;;  %7948 = vmatprep.subr.bf16.mxu1 %v9868_v26 }
 0x300   : > { %8276 = vmatprep.subr.bf16.mxu0 %v9871_v17 }
 0x302   : > { %7949 = vmatpush1.bf16.msra.mxu1 %v9866_v20 }
 0x303   : > { %8277 = vmatpush1.bf16.msra.mxu0 %v9869_v27  ;;  %7950 = vmatprep.subr.bf16.mxu1 %v9874_v28 }
 0x304   : > { %8278 = vmatprep.subr.bf16.mxu0 %v9877_v29 }
 0x306   : > { %7951 = vmatpush1.bf16.msra.mxu1 %v9872_v19 }
 0x307   : > { %8279 = vmatpush1.bf16.msra.mxu0 %v9875_v32  ;;  %7952 = vmatprep.subr.bf16.mxu1 %v9880_v34 }
 0x308   : > { %8280 = vmatprep.subr.bf16.mxu0 %v9883_v35 }
 0x30a   : > { %7953 = vmatpush1.bf16.msra.mxu1 %v9878_v36 }
 0x30b   : > { %8281 = vmatpush1.bf16.msra.mxu0 %v9881_v37  ;;  %7954 = vmatprep.subr.bf16.mxu1 %v9886_v38 }
 0x30c   : > { %8282 = vmatprep.subr.bf16.mxu0 %v9889_v39 }
 0x30e   : > { %7955 = vmatpush1.bf16.msra.mxu1 %v9884_v40 }
 0x30f   : > { %8283 = vmatpush1.bf16.msra.mxu0 %v9887_v30  ;;  %7956 = vmatprep.subr.bf16.mxu1 %v9892_v42 }
 0x310   : > { %8284 = vmatprep.subr.bf16.mxu0 %v9895_v23 }
 0x312   : > { %7957 = vmatpush1.bf16.msra.mxu1 %v9890_v33 }
 0x313   : > { %8285 = vmatpush1.bf16.msra.mxu0 %v9893_v43  ;;  %7958 = vmatprep.subr.bf16.mxu1 %v9898_v44 }
 0x314   : > { %8286 = vmatprep.subr.bf16.mxu0 %v9901_v45 }
 0x316   : > { %7959 = vmatpush1.bf16.msra.mxu1 %v9896_v48 }
 0x317   : > { %8287 = vmatpush1.bf16.msra.mxu0 %v9899_v31 }
 0x319   : > { %7961 = vmatmul.mubr.bf16.vlgmr.msra.gmra.mrb[0].mxu1 %v8471_v41 }
 0x31a   : > { %8289 = vmatmul.mubr.bf16.vlgmr.msra.gmra.mrb[0].mxu0 %v8487_v49 }
 0x3ec   : > { %v7962_v56 = vpop.f32.mrb[0].mxu1 }
 0x3ed   : > { %v8290_v47 = vpop.f32.mrb[0].mxu0  ;;  %v9006_v57 = vadd.f32 %v7962_v56, %v4962_v46  ;;  %v7964_v58 = vpop.f32.mrb[1].mxu1 }
 0x3ee   : > { %v8292_v59 = vpop.f32.mrb[1].mxu0  ;;  %v9008_v60 = vadd.f32 %v7964_v58, %v4966_v55  ;;  %v7966_v61 = vpop.f32.mrb[2].mxu1 }
 0x3ef   : > { %v8294_v62 = vpop.f32.mrb[2].mxu0  ;;  %v9007_v63 = vadd.f32 %v9006_v57, %v8290_v47  ;;  %v7967_v2 = vpop.f32.mrb[3].mxu1 }
 0x3f0   : > { %v8295_v3 = vpop.f32.mrb[3].mxu0  ;;  %v9009_v4 = vadd.f32 %v9008_v60, %v8292_v59 }
 0x3f1   : > { %vm8297_vm0 = vcmp.ge.f32.partialorder %v9007_v63, 0.0  ;;  %v8299_v5 = vmul.f32 0.2, %v9007_v63 }
 0x3f2   : > { %vm8298_vm1 = vcmp.ge.f32.partialorder %v9009_v4, 0.0  ;;  %v8300_v6 = vmul.f32 0.2, %v9009_v4 }
 0x3f3   : > { %v8301_v7 = vsel %vm8297_vm0, %v9007_v63, %v8299_v5 }
 0x3f4   : > { %v8302_v8 = vsel %vm8298_vm1, %v9009_v4, %v8300_v6 }
 0x3f5   : > { %v9005_v9 = vpack.c.bf16 %v8302_v8, %v8301_v7 }
 0x3f7   : > { %8311 = vst [vmem:[%s4427_s27] sm:$0xff] %v9005_v9 }
 0x3f8 PF: > { %s13_s16 = sadd.s32 1, %s9944_s16   ;;  %s11724_s12 = smov %s9932_s13 }
 0x3f9   : > { %p10_p10 = scmp.ge.s32.totalorder %s13_s16, 4   ;;  %s11725_s13 = smov %s10001_s20 }
 0x3fa   : > { %s11726_s14 = smov %s9940_s15  ;;  %s11727_s15 = smov %s11729_s17 }
 0x3fb   :  { %12 = sbr.rel (!%p10_p10) target bundleno = 3 (0x3), region = 131 }

// kernel: dis_forward.11
= control target key start
LH: loop header
LB: loop body
LE: loop exit
PB: predicated region body
PF: predicated region fallthrough
CT: control target
= control target key end

     0   :  { %s545_s12 = smov 0   ;;  %s547_s13 = smov 0   ;;  %s581_s0 = inlined_call_operand.vmem [shape: f32[8,4], index: 0, kind: input, shape index: {}]   ;;  %s582_s1 = inlined_call_operand.vmem [shape: f32[4,1152], index: 1, kind: input, shape index: {}]   ;;  %s583_s2 = inlined_call_operand.vmem [shape: f32[1,1152], index: 2, kind: input, shape index: {}]   ;;  %s584_s3 = inlined_call_operand.vmem [shape: f32[8,1152], index: 3, kind: output, shape index: {}]  }
   0x1   :  { %s549_s14 = smov 0  }
   0x2 LB: > { %s28_s15 = sadd.s32 1, %s517_s13  ;;  %p458_p0 = scmp.ge.s32.totalorder %s521_s14, 1  ;;  %s521_s14 = sphi %s549_s14, %s13_s14   ;;  %s517_s13 = sphi %s547_s13, %s586_s13   ;;  %s513_s12 = sphi %s545_s12, %s585_s12  }
   0x3   : > { %p30_p1 = scmp.ge.s32.totalorder %s28_s15, 9  ;;  %p185_p2 = scmp.lt.s32.totalorder %s521_s14, 10 }
   0x5   : > { %s588_s15 = smov (%p30_p1, %s28_s15), 0  ;;  %p186_p3 = pnand %p458_p0, %p185_p2 }
   0x6   : > { %p234_p4 = scmp.lt.s32.totalorder (!%p186_p3), %s513_s12, 8  ;;  %v523_v0 = vmov (!%p186_p3), 0.0   ;;  %vm524_vm0 = vmmov (!%p186_p3), 0   ;;  %vm264_vm1 = vcmask (!%p186_p3), 1043456   ;;  %v251_v1 = vld [vmem:[%s581_s0] sm:$0xff] (!%p186_p3)  ;;  %vm260_vm2 = vcmask (!%p186_p3), 31744  }
   0x7   : > { %189 = sbr.rel (%p186_p3) target bundleno = 234 (0xea), region = 32  ;;  %468 = vmatprep.subr.mxu0 (!%p186_p3), %v523_v0  ;;  %470 = vmatprep.mubr.msk.f32.mxu0 (!%p186_p3), %vm524_vm0, %v523_v0 }
   0xe   : > { %s590_s12 = smov (!%p234_p4, %s513_s12), 8 }
   0xf   : > { %s459_s16 = sshll.u32 %s590_s12, 2  ;;  %s242_s24 = scalar_lea.vmem %s583_s2, %s590_s12 }
  0x10   : > { %s239_s19 = scalar_lea.vmem %s582_s1, %s459_s16  ;;  %s460_s25 = sshll.u32 %s590_s12, 3  ;;  %v461_v3 = vld [vmem:[%s242_s24] ss:$0 sm:$0xff] }
  0x11   : > { %v252_v2 = vld [vmem:[%s239_s19] sm:$0xf]  ;;  %s250_s28 = scalar_lea.vmem %s584_s3, %s460_s25 }
  0x12   : > { %469 = vmatpush3.msk.msra.mxu0 %vm264_vm1, %v252_v2 }
  0x13   : > { %471 = vmatmul.mubr.msk.f32.vlgmr.msra.gmra.mrb[0].mxu0 %vm260_vm2, %v251_v1 }
  0xe6   : > { %v334_v4 = vpop.f32.mrb[0].mxu0 }
  0xe7   : > { %v335_v5 = vadd.f32 %v461_v3, %v334_v4  ;;  %v472_v6 = vpop.f32.mrb[1].mxu0 }
  0xe9   : > { %338 = vst [vmem:[%s250_s28] sm:$0xff] %v335_v5 }
  0xea PF: > { %s13_s14 = sadd.s32 1, %s521_s14   ;;  %s585_s12 = smov %s517_s13 }
  0xeb   : > { %p10_p5 = scmp.ge.s32.totalorder %s13_s14, 11   ;;  %s586_s13 = smov %s588_s15 }
  0xed   :  { %12 = sbr.rel (!%p10_p5) target bundleno = 2 (0x2), region = 68 }

// kernel: dis_forward.10
= control target key start
LH: loop header
LB: loop body
LE: loop exit
PB: predicated region body
PF: predicated region fallthrough
CT: control target
= control target key end

     0   :  { %s9198_s1 = inlined_call_operand.vmem [shape: bf16[8192,128], index: 1, kind: input, shape index: {}]   ;;  %s9199_s0 = inlined_call_operand.vmem [shape: bf16[8,8192], index: 0, kind: input, shape index: {}]   ;;  %s9200_s2 = inlined_call_operand.vmem [shape: f32[1,128], index: 2, kind: input, shape index: {}]   ;;  %s9201_s3 = inlined_call_operand.vmem [shape: f32[8,128], index: 3, kind: output, shape index: {}]  }
   0x1   :  { %v6940_v0 = vld [vmem:[%s9198_s1 + $0x40] sm:$0xff]   ;;  %v6944_v4 = vld [vmem:[%s9198_s1 + $0x48] sm:$0xff]   ;;  %v6948_v8 = vld [vmem:[%s9198_s1 + $0x50] sm:$0xff]  }
   0x2   :  { %v6941_v1 = vld [vmem:[%s9198_s1 + $0xc0] sm:$0xff]   ;;  %6236 = vmatprep.subr.bf16.mxu0 %v6940_v0  ;;  %v6945_v5 = vld [vmem:[%s9198_s1 + $0xc8] sm:$0xff]   ;;  %v6949_v9 = vld [vmem:[%s9198_s1 + $0xd0] sm:$0xff]  }
   0x3   :  { %v6942_v2 = vld [vmem:[%s9198_s1] sm:$0xff]   ;;  %6258 = vmatprep.subr.bf16.mxu1 %v6941_v1  ;;  %v6946_v6 = vld [vmem:[%s9198_s1 + $0x8] sm:$0xff]   ;;  %v6950_v10 = vld [vmem:[%s9198_s1 + $0x10] sm:$0xff]  }
   0x4   :  { %v6943_v3 = vld [vmem:[%s9198_s1 + $0x80] sm:$0xff]   ;;  %6237 = vmatpush3.bf16.msra.mxu0 %v6942_v2  ;;  %v6947_v7 = vld [vmem:[%s9198_s1 + $0x88] sm:$0xff]   ;;  %v6951_v11 = vld [vmem:[%s9198_s1 + $0x90] sm:$0xff]  }
   0x5   :  { %6259 = vmatpush3.bf16.msra.mxu1 %v6943_v3  ;;  %6238 = vmatprep.subr.bf16.mxu0 %v6944_v4  ;;  %v6952_v12 = vld [vmem:[%s9198_s1 + $0x58] sm:$0xff]   ;;  %v6956_v16 = vld [vmem:[%s9198_s1 + $0x60] sm:$0xff]   ;;  %v6960_v20 = vld [vmem:[%s9198_s1 + $0x68] sm:$0xff]  }
   0x6   :  { %6260 = vmatprep.subr.bf16.mxu1 %v6945_v5  ;;  %v6953_v13 = vld [vmem:[%s9198_s1 + $0xd8] sm:$0xff]   ;;  %v6957_v17 = vld [vmem:[%s9198_s1 + $0xe0] sm:$0xff]   ;;  %v6961_v21 = vld [vmem:[%s9198_s1 + $0xe8] sm:$0xff]  }
   0x7   :  { %v6954_v14 = vld [vmem:[%s9198_s1 + $0x18] sm:$0xff]   ;;  %v6958_v18 = vld [vmem:[%s9198_s1 + $0x20] sm:$0xff]   ;;  %v6962_v22 = vld [vmem:[%s9198_s1 + $0x28] sm:$0xff]  }
   0x8   :  { %6239 = vmatpush3.bf16.msra.mxu0 %v6946_v6  ;;  %v6955_v15 = vld [vmem:[%s9198_s1 + $0x98] sm:$0xff]   ;;  %v6959_v19 = vld [vmem:[%s9198_s1 + $0xa0] sm:$0xff]   ;;  %v6963_v23 = vld [vmem:[%s9198_s1 + $0xa8] sm:$0xff]  }
   0x9   :  { %6261 = vmatpush3.bf16.msra.mxu1 %v6947_v7  ;;  %6240 = vmatprep.subr.bf16.mxu0 %v6948_v8  ;;  %v6964_v24 = vld [vmem:[%s9198_s1 + $0x70] sm:$0xff]   ;;  %v6968_v28 = vld [vmem:[%s9198_s1 + $0x78] sm:$0xff]   ;;  %v15_v32 = vld [vmem:[%s9199_s0] sm:$0xff] }
   0xa   :  { %6262 = vmatprep.subr.bf16.mxu1 %v6949_v9  ;;  %v6965_v25 = vld [vmem:[%s9198_s1 + $0xf0] sm:$0xff]   ;;  %v6969_v29 = vld [vmem:[%s9198_s1 + $0xf8] sm:$0xff]   ;;  %v16_v33 = vld [vmem:[%s9199_s0 + $0x8] sm:$0xff]  ;;  %v5660_v34 = vcombine.low %v15_v32, %v15_v32  ;;  %v5661_v35 = vcombine.high %v15_v32, %v15_v32 }
   0xb   :  { %v6966_v26 = vld [vmem:[%s9198_s1 + $0x30] sm:$0xff]   ;;  %v6970_v30 = vld [vmem:[%s9198_s1 + $0x38] sm:$0xff]   ;;  %v5662_v36 = vcombine.low %v16_v33, %v16_v33  ;;  %v5663_v37 = vcombine.high %v16_v33, %v16_v33  ;;  %v6976_v38 = vld [vmem:[%s9198_s1 + $0x140] sm:$0xff]  }
   0xc   :  { %6241 = vmatpush3.bf16.msra.mxu0 %v6950_v10  ;;  %v6967_v27 = vld [vmem:[%s9198_s1 + $0xb0] sm:$0xff]   ;;  %v6971_v31 = vld [vmem:[%s9198_s1 + $0xb8] sm:$0xff]   ;;  %v6977_v39 = vld [vmem:[%s9198_s1 + $0x1c0] sm:$0xff]   ;;  %4406 = vmatprep.mubr.bf16.mxu0 %v5661_v35 }
   0xd   :  { %6263 = vmatpush3.bf16.msra.mxu1 %v6951_v11  ;;  %6242 = vmatprep.subr.bf16.mxu0 %v6952_v12  ;;  %v6978_v40 = vld [vmem:[%s9198_s1 + $0x100] sm:$0xff]   ;;  %v6980_v42 = vld [vmem:[%s9198_s1 + $0x148] sm:$0xff]   ;;  %v6984_v46 = vld [vmem:[%s9198_s1 + $0x150] sm:$0xff]  }
   0xe   :  { %6264 = vmatprep.subr.bf16.mxu1 %v6953_v13  ;;  %4446 = vmatprep.mubr.bf16.mxu1 %v5663_v37  ;;  %v6979_v41 = vld [vmem:[%s9198_s1 + $0x180] sm:$0xff]   ;;  %v6981_v43 = vld [vmem:[%s9198_s1 + $0x1c8] sm:$0xff]   ;;  %v6985_v47 = vld [vmem:[%s9198_s1 + $0x1d0] sm:$0xff]  }
   0xf   :  { %v6982_v44 = vld [vmem:[%s9198_s1 + $0x108] sm:$0xff]   ;;  %v6986_v48 = vld [vmem:[%s9198_s1 + $0x110] sm:$0xff]   ;;  %v6988_v50 = vld [vmem:[%s9198_s1 + $0x158] sm:$0xff]  }
  0x10   :  { %6243 = vmatpush3.bf16.msra.mxu0 %v6954_v14  ;;  %v6983_v45 = vld [vmem:[%s9198_s1 + $0x188] sm:$0xff]   ;;  %v6987_v49 = vld [vmem:[%s9198_s1 + $0x190] sm:$0xff]   ;;  %v6989_v51 = vld [vmem:[%s9198_s1 + $0x1d8] sm:$0xff]  }
  0x11   :  { %6265 = vmatpush3.bf16.msra.mxu1 %v6955_v15  ;;  %6244 = vmatprep.subr.bf16.mxu0 %v6956_v16  ;;  %v6990_v52 = vld [vmem:[%s9198_s1 + $0x118] sm:$0xff]   ;;  %v6992_v54 = vld [vmem:[%s9198_s1 + $0x160] sm:$0xff]   ;;  %v6996_v58 = vld [vmem:[%s9198_s1 + $0x168] sm:$0xff]  }
  0x12   :  { %6266 = vmatprep.subr.bf16.mxu1 %v6957_v17  ;;  %v6991_v53 = vld [vmem:[%s9198_s1 + $0x198] sm:$0xff]   ;;  %v6993_v55 = vld [vmem:[%s9198_s1 + $0x1e0] sm:$0xff]   ;;  %v6997_v59 = vld [vmem:[%s9198_s1 + $0x1e8] sm:$0xff]  }
  0x13   :  { %v6994_v56 = vld [vmem:[%s9198_s1 + $0x120] sm:$0xff]   ;;  %v6998_v60 = vld [vmem:[%s9198_s1 + $0x128] sm:$0xff]   ;;  %v7000_v62 = vld [vmem:[%s9198_s1 + $0x170] sm:$0xff]  }
  0x14   :  { %6245 = vmatpush3.bf16.msra.mxu0 %v6958_v18  ;;  %v6995_v57 = vld [vmem:[%s9198_s1 + $0x1a0] sm:$0xff]   ;;  %v6999_v61 = vld [vmem:[%s9198_s1 + $0x1a8] sm:$0xff]   ;;  %v7001_v63 = vld [vmem:[%s9198_s1 + $0x1f0] sm:$0xff]  }
  0x15   :  { %6267 = vmatpush3.bf16.msra.mxu1 %v6959_v19  ;;  %6246 = vmatprep.subr.bf16.mxu0 %v6960_v20  ;;  %v7002_v0 = vld [vmem:[%s9198_s1 + $0x130] sm:$0xff]   ;;  %v7004_v2 = vld [vmem:[%s9198_s1 + $0x178] sm:$0xff]   ;;  %v7012_v12 = vld [vmem:[%s9198_s1 + $0x240] sm:$0xff]  }
  0x16   :  { %6268 = vmatprep.subr.bf16.mxu1 %v6961_v21  ;;  %v7003_v1 = vld [vmem:[%s9198_s1 + $0x1b0] sm:$0xff]   ;;  %v7005_v3 = vld [vmem:[%s9198_s1 + $0x1f8] sm:$0xff]   ;;  %v7013_v13 = vld [vmem:[%s9198_s1 + $0x2c0] sm:$0xff]  }
  0x17   :  { %v7006_v4 = vld [vmem:[%s9198_s1 + $0x138] sm:$0xff]   ;;  %v17_v6 = vld [vmem:[%s9199_s0 + $0x10] sm:$0xff]  ;;  %v7014_v14 = vld [vmem:[%s9198_s1 + $0x200] sm:$0xff]  }
  0x18   :  { %6247 = vmatpush3.bf16.msra.mxu0 %v6962_v22  ;;  %v7007_v5 = vld [vmem:[%s9198_s1 + $0x1b8] sm:$0xff]   ;;  %v5664_v7 = vcombine.low %v17_v6, %v17_v6  ;;  %v5665_v8 = vcombine.high %v17_v6, %v17_v6  ;;  %v7015_v15 = vld [vmem:[%s9198_s1 + $0x280] sm:$0xff]   ;;  %v7016_v16 = vld [vmem:[%s9198_s1 + $0x248] sm:$0xff]  }
  0x19   :  { %6269 = vmatpush3.bf16.msra.mxu1 %v6963_v23  ;;  %6248 = vmatprep.subr.bf16.mxu0 %v6964_v24  ;;  %v18_v9 = vld [vmem:[%s9199_s0 + $0x18] sm:$0xff]  ;;  %v7017_v17 = vld [vmem:[%s9198_s1 + $0x2c8] sm:$0xff]   ;;  %v7020_v20 = vld [vmem:[%s9198_s1 + $0x250] sm:$0xff]  }
  0x1a   :  { %6270 = vmatprep.subr.bf16.mxu1 %v6965_v25  ;;  %v5666_v10 = vcombine.low %v18_v9, %v18_v9  ;;  %v5667_v11 = vcombine.high %v18_v9, %v18_v9  ;;  %v7018_v18 = vld [vmem:[%s9198_s1 + $0x208] sm:$0xff]   ;;  %v7021_v21 = vld [vmem:[%s9198_s1 + $0x2d0] sm:$0xff]   ;;  %v7024_v24 = vld [vmem:[%s9198_s1 + $0x258] sm:$0xff]  }
  0x1b   :  { %v7019_v19 = vld [vmem:[%s9198_s1 + $0x288] sm:$0xff]   ;;  %v7022_v22 = vld [vmem:[%s9198_s1 + $0x210] sm:$0xff]   ;;  %v7025_v25 = vld [vmem:[%s9198_s1 + $0x2d8] sm:$0xff]  }
  0x1c   :  { %6249 = vmatpush3.bf16.msra.mxu0 %v6966_v26  ;;  %v7023_v23 = vld [vmem:[%s9198_s1 + $0x290] sm:$0xff]   ;;  %v7026_v26 = vld [vmem:[%s9198_s1 + $0x218] sm:$0xff]   ;;  %v7032_v32 = vld [vmem:[%s9198_s1 + $0x268] sm:$0xff]  }
  0x1d   :  { %6271 = vmatpush3.bf16.msra.mxu1 %v6967_v27  ;;  %6250 = vmatprep.subr.bf16.mxu0 %v6968_v28  ;;  %v7027_v27 = vld [vmem:[%s9198_s1 + $0x298] sm:$0xff]   ;;  %v7028_v28 = vld [vmem:[%s9198_s1 + $0x260] sm:$0xff]   ;;  %v7033_v33 = vld [vmem:[%s9198_s1 + $0x2e8] sm:$0xff]  }
  0x1e   :  { %6272 = vmatprep.subr.bf16.mxu1 %v6969_v29  ;;  %v7029_v29 = vld [vmem:[%s9198_s1 + $0x2e0] sm:$0xff]   ;;  %v7035_v35 = vld [vmem:[%s9198_s1 + $0x2a8] sm:$0xff]   ;;  %v7037_v37 = vld [vmem:[%s9198_s1 + $0x2f0] sm:$0xff]  }
  0x1f   :  { %v7068_v6 = vld [vmem:[%s9198_s1 + $0x368] sm:$0xff]  }
  0x20   :  { %6251 = vmatpush3.bf16.msra.mxu0 %v6970_v30  ;;  %v7030_v30 = vld [vmem:[%s9198_s1 + $0x220] sm:$0xff]   ;;  %v7071_v9 = vld [vmem:[%s9198_s1 + $0x3a8] sm:$0xff]  }
  0x21   :  { %6273 = vmatpush3.bf16.msra.mxu1 %v6971_v31  ;;  %6280 = vmatprep.subr.bf16.mxu0 %v6976_v38  ;;  %v7031_v31 = vld [vmem:[%s9198_s1 + $0x2a0] sm:$0xff]   ;;  %v7038_v38 = vld [vmem:[%s9198_s1 + $0x230] sm:$0xff]  }
  0x22   :  { %6302 = vmatprep.subr.bf16.mxu1 %v6977_v39  ;;  %v7039_v39 = vld [vmem:[%s9198_s1 + $0x2b0] sm:$0xff]  }
  0x23   :  { %4407 = vmatmul.mubr.bf16.vlgmr.msra.gmra.mrb[0].mxu0 %v5660_v34  ;;  %v7034_v34 = vld [vmem:[%s9198_s1 + $0x228] sm:$0xff]  }
  0x24   :  { %4447 = vmatmul.mubr.bf16.vlgmr.msra.gmra.mrb[0].mxu1 %v5662_v36  ;;  %6281 = vmatpush3.bf16.msra.mxu0 %v6978_v40  ;;  %v7036_v36 = vld [vmem:[%s9198_s1 + $0x270] sm:$0xff]   ;;  %v7040_v40 = vld [vmem:[%s9198_s1 + $0x278] sm:$0xff]  }
  0x25   :  { %6303 = vmatpush3.bf16.msra.mxu1 %v6979_v41  ;;  %6282 = vmatprep.subr.bf16.mxu0 %v6980_v42  ;;  %v7041_v41 = vld [vmem:[%s9198_s1 + $0x2f8] sm:$0xff]  }
  0x26   :  { %6304 = vmatprep.subr.bf16.mxu1 %v6981_v43  ;;  %4486 = vmatprep.mubr.bf16.mxu0 %v5665_v8  ;;  %v7042_v42 = vld [vmem:[%s9198_s1 + $0x238] sm:$0xff]   ;;  %v7070_v8 = vld [vmem:[%s9198_s1 + $0x328] sm:$0xff]  }
  0x27   :  { %4526 = vmatprep.mubr.bf16.mxu1 %v5667_v11  ;;  %v7043_v43 = vld [vmem:[%s9198_s1 + $0x2b8] sm:$0xff]   ;;  %v7073_v11 = vld [vmem:[%s9198_s1 + $0x3f0] sm:$0xff]  }
  0x28   :  { %6283 = vmatpush3.bf16.msra.mxu0 %v6982_v44  ;;  %v19_v44 = vld [vmem:[%s9199_s0 + $0x20] sm:$0xff] }
  0x29   :  { %6305 = vmatpush3.bf16.msra.mxu1 %v6983_v45  ;;  %6284 = vmatprep.subr.bf16.mxu0 %v6984_v46  ;;  %v20_v45 = vld [vmem:[%s9199_s0 + $0x28] sm:$0xff]  ;;  %v5668_v46 = vcombine.low %v19_v44, %v19_v44 }
  0x2a   :  { %6306 = vmatprep.subr.bf16.mxu1 %v6985_v47  ;;  %v5669_v47 = vcombine.high %v19_v44, %v19_v44  ;;  %v7104_v44 = vld [vmem:[%s9198_s1 + $0x468] sm:$0xff]  }
  0x2c   :  { %6285 = vmatpush3.bf16.msra.mxu0 %v6986_v48  ;;  %v5670_v48 = vcombine.low %v20_v45, %v20_v45 }
  0x2d   :  { %6307 = vmatpush3.bf16.msra.mxu1 %v6987_v49  ;;  %6286 = vmatprep.subr.bf16.mxu0 %v6988_v50  ;;  %v5671_v49 = vcombine.high %v20_v45, %v20_v45  ;;  %v7048_v50 = vld [vmem:[%s9198_s1 + $0x340] sm:$0xff]   ;;  %v7105_v45 = vld [vmem:[%s9198_s1 + $0x4e8] sm:$0xff]  }
  0x2e   :  { %6308 = vmatprep.subr.bf16.mxu1 %v6989_v51  ;;  %v7049_v51 = vld [vmem:[%s9198_s1 + $0x3c0] sm:$0xff]  }
  0x30   :  { %6287 = vmatpush3.bf16.msra.mxu0 %v6990_v52  ;;  %v7050_v52 = vld [vmem:[%s9198_s1 + $0x300] sm:$0xff]  }
  0x31   :  { %6309 = vmatpush3.bf16.msra.mxu1 %v6991_v53  ;;  %6288 = vmatprep.subr.bf16.mxu0 %v6992_v54  ;;  %v7051_v53 = vld [vmem:[%s9198_s1 + $0x380] sm:$0xff]   ;;  %v7052_v54 = vld [vmem:[%s9198_s1 + $0x348] sm:$0xff]  }
  0x32   :  { %6310 = vmatprep.subr.bf16.mxu1 %v6993_v55  ;;  %v7053_v55 = vld [vmem:[%s9198_s1 + $0x3c8] sm:$0xff]  }
  0x34   :  { %6289 = vmatpush3.bf16.msra.mxu0 %v6994_v56  ;;  %v7054_v56 = vld [vmem:[%s9198_s1 + $0x308] sm:$0xff]  }
  0x35   :  { %6311 = vmatpush3.bf16.msra.mxu1 %v6995_v57  ;;  %6290 = vmatprep.subr.bf16.mxu0 %v6996_v58  ;;  %v7055_v57 = vld [vmem:[%s9198_s1 + $0x388] sm:$0xff]   ;;  %v7056_v58 = vld [vmem:[%s9198_s1 + $0x350] sm:$0xff]  }
  0x36   :  { %6312 = vmatprep.subr.bf16.mxu1 %v6997_v59  ;;  %v7057_v59 = vld [vmem:[%s9198_s1 + $0x3d0] sm:$0xff]  }
  0x38   :  { %6291 = vmatpush3.bf16.msra.mxu0 %v6998_v60  ;;  %v7058_v60 = vld [vmem:[%s9198_s1 + $0x310] sm:$0xff]  }
  0x39   :  { %6313 = vmatpush3.bf16.msra.mxu1 %v6999_v61  ;;  %6292 = vmatprep.subr.bf16.mxu0 %v7000_v62  ;;  %v7059_v61 = vld [vmem:[%s9198_s1 + $0x390] sm:$0xff]   ;;  %v7060_v62 = vld [vmem:[%s9198_s1 + $0x358] sm:$0xff]  }
  0x3a   :  { %6314 = vmatprep.subr.bf16.mxu1 %v7001_v63  ;;  %v7061_v63 = vld [vmem:[%s9198_s1 + $0x3d8] sm:$0xff]  }
  0x3c   :  { %6293 = vmatpush3.bf16.msra.mxu0 %v7002_v0  ;;  %v7062_v0 = vld [vmem:[%s9198_s1 + $0x318] sm:$0xff]  }
  0x3d   :  { %6315 = vmatpush3.bf16.msra.mxu1 %v7003_v1  ;;  %6294 = vmatprep.subr.bf16.mxu0 %v7004_v2  ;;  %v7063_v1 = vld [vmem:[%s9198_s1 + $0x398] sm:$0xff]   ;;  %v7064_v2 = vld [vmem:[%s9198_s1 + $0x360] sm:$0xff]  }
  0x3e   :  { %6316 = vmatprep.subr.bf16.mxu1 %v7005_v3  ;;  %v7065_v3 = vld [vmem:[%s9198_s1 + $0x3e0] sm:$0xff]  }
  0x40   :  { %6295 = vmatpush3.bf16.msra.mxu0 %v7006_v4  ;;  %v7066_v4 = vld [vmem:[%s9198_s1 + $0x320] sm:$0xff]  }
  0x41   :  { %6317 = vmatpush3.bf16.msra.mxu1 %v7007_v5  ;;  %6324 = vmatprep.subr.bf16.mxu0 %v7012_v12  ;;  %v7067_v5 = vld [vmem:[%s9198_s1 + $0x3a0] sm:$0xff]   ;;  %v7074_v12 = vld [vmem:[%s9198_s1 + $0x330] sm:$0xff]  }
  0x42   :  { %6346 = vmatprep.subr.bf16.mxu1 %v7013_v13  ;;  %v7075_v13 = vld [vmem:[%s9198_s1 + $0x3b0] sm:$0xff]  }
  0x43   :  { %4487 = vmatmul.mubr.bf16.vlgmr.msra.gmra.mrb[4].mxu0 %v5664_v7  ;;  %v7069_v7 = vld [vmem:[%s9198_s1 + $0x3e8] sm:$0xff]  }
  0x44   :  { %4527 = vmatmul.mubr.bf16.vlgmr.msra.gmra.mrb[4].mxu1 %v5666_v10  ;;  %6325 = vmatpush3.bf16.msra.mxu0 %v7014_v14  ;;  %v7072_v10 = vld [vmem:[%s9198_s1 + $0x370] sm:$0xff]   ;;  %v7076_v14 = vld [vmem:[%s9198_s1 + $0x378] sm:$0xff]  }
  0x45   :  { %6347 = vmatpush3.bf16.msra.mxu1 %v7015_v15  ;;  %6326 = vmatprep.subr.bf16.mxu0 %v7016_v16  ;;  %v7077_v15 = vld [vmem:[%s9198_s1 + $0x3f8] sm:$0xff]  }
  0x46   :  { %6348 = vmatprep.subr.bf16.mxu1 %v7017_v17  ;;  %4566 = vmatprep.mubr.bf16.mxu0 %v5669_v47  ;;  %v7078_v16 = vld [vmem:[%s9198_s1 + $0x338] sm:$0xff]   ;;  %v7107_v47 = vld [vmem:[%s9198_s1 + $0x4a8] sm:$0xff]  }
  0x47   :  { %4606 = vmatprep.mubr.bf16.mxu1 %v5671_v49  ;;  %v7079_v17 = vld [vmem:[%s9198_s1 + $0x3b8] sm:$0xff]   ;;  %v7109_v49 = vld [vmem:[%s9198_s1 + $0x4f0] sm:$0xff]  }
  0x48   :  { %6327 = vmatpush3.bf16.msra.mxu0 %v7018_v18  ;;  %v21_v18 = vld [vmem:[%s9199_s0 + $0x30] sm:$0xff] }
  0x49   :  { %6349 = vmatpush3.bf16.msra.mxu1 %v7019_v19  ;;  %6328 = vmatprep.subr.bf16.mxu0 %v7020_v20  ;;  %v22_v19 = vld [vmem:[%s9199_s0 + $0x38] sm:$0xff]  ;;  %v5672_v20 = vcombine.low %v21_v18, %v21_v18 }
  0x4a   :  { %6350 = vmatprep.subr.bf16.mxu1 %v7021_v21  ;;  %v5673_v21 = vcombine.high %v21_v18, %v21_v18  ;;  %v7140_v18 = vld [vmem:[%s9198_s1 + $0x568] sm:$0xff]  }
  0x4c   :  { %6329 = vmatpush3.bf16.msra.mxu0 %v7022_v22  ;;  %v5674_v22 = vcombine.low %v22_v19, %v22_v19 }
  0x4d   :  { %6351 = vmatpush3.bf16.msra.mxu1 %v7023_v23  ;;  %6330 = vmatprep.subr.bf16.mxu0 %v7024_v24  ;;  %v7084_v23 = vld [vmem:[%s9198_s1 + $0x440] sm:$0xff]   ;;  %v5675_v24 = vcombine.high %v22_v19, %v22_v19  ;;  %v7141_v19 = vld [vmem:[%s9198_s1 + $0x5e8] sm:$0xff]  }
  0x4e   :  { %6352 = vmatprep.subr.bf16.mxu1 %v7025_v25  ;;  %v7085_v25 = vld [vmem:[%s9198_s1 + $0x4c0] sm:$0xff]  }
  0x50   :  { %6331 = vmatpush3.bf16.msra.mxu0 %v7026_v26  ;;  %v7086_v26 = vld [vmem:[%s9198_s1 + $0x400] sm:$0xff]  }
  0x51   :  { %6353 = vmatpush3.bf16.msra.mxu1 %v7027_v27  ;;  %6332 = vmatprep.subr.bf16.mxu0 %v7028_v28  ;;  %v7087_v27 = vld [vmem:[%s9198_s1 + $0x480] sm:$0xff]   ;;  %v7088_v28 = vld [vmem:[%s9198_s1 + $0x448] sm:$0xff]  }
  0x52   :  { %6354 = vmatprep.subr.bf16.mxu1 %v7029_v29  ;;  %v7089_v29 = vld [vmem:[%s9198_s1 + $0x4c8] sm:$0xff]  }
  0x54   :  { %6333 = vmatpush3.bf16.msra.mxu0 %v7030_v30  ;;  %v7090_v30 = vld [vmem:[%s9198_s1 + $0x408] sm:$0xff]  }
  0x55   :  { %6355 = vmatpush3.bf16.msra.mxu1 %v7031_v31  ;;  %6334 = vmatprep.subr.bf16.mxu0 %v7032_v32  ;;  %v7091_v31 = vld [vmem:[%s9198_s1 + $0x488] sm:$0xff]   ;;  %v7092_v32 = vld [vmem:[%s9198_s1 + $0x450] sm:$0xff]  }
  0x56   :  { %6356 = vmatprep.subr.bf16.mxu1 %v7033_v33  ;;  %v7093_v33 = vld [vmem:[%s9198_s1 + $0x4d0] sm:$0xff]  }
  0x58   :  { %6335 = vmatpush3.bf16.msra.mxu0 %v7034_v34  ;;  %v7094_v34 = vld [vmem:[%s9198_s1 + $0x410] sm:$0xff]  }
  0x59   :  { %6357 = vmatpush3.bf16.msra.mxu1 %v7035_v35  ;;  %6336 = vmatprep.subr.bf16.mxu0 %v7036_v36  ;;  %v7095_v35 = vld [vmem:[%s9198_s1 + $0x490] sm:$0xff]   ;;  %v7096_v36 = vld [vmem:[%s9198_s1 + $0x458] sm:$0xff]  }
  0x5a   :  { %6358 = vmatprep.subr.bf16.mxu1 %v7037_v37  ;;  %v7097_v37 = vld [vmem:[%s9198_s1 + $0x4d8] sm:$0xff]  }
  0x5c   :  { %6337 = vmatpush3.bf16.msra.mxu0 %v7038_v38  ;;  %v7098_v38 = vld [vmem:[%s9198_s1 + $0x418] sm:$0xff]  }
  0x5d   :  { %6359 = vmatpush3.bf16.msra.mxu1 %v7039_v39  ;;  %6338 = vmatprep.subr.bf16.mxu0 %v7040_v40  ;;  %v7099_v39 = vld [vmem:[%s9198_s1 + $0x498] sm:$0xff]   ;;  %v7100_v40 = vld [vmem:[%s9198_s1 + $0x460] sm:$0xff]  }
  0x5e   :  { %6360 = vmatprep.subr.bf16.mxu1 %v7041_v41  ;;  %v7101_v41 = vld [vmem:[%s9198_s1 + $0x4e0] sm:$0xff]  }
  0x60   :  { %6339 = vmatpush3.bf16.msra.mxu0 %v7042_v42  ;;  %v7102_v42 = vld [vmem:[%s9198_s1 + $0x420] sm:$0xff]  }
  0x61   :  { %6361 = vmatpush3.bf16.msra.mxu1 %v7043_v43  ;;  %6368 = vmatprep.subr.bf16.mxu0 %v7048_v50  ;;  %v7103_v43 = vld [vmem:[%s9198_s1 + $0x4a0] sm:$0xff]   ;;  %v7110_v50 = vld [vmem:[%s9198_s1 + $0x430] sm:$0xff]  }
  0x62   :  { %6390 = vmatprep.subr.bf16.mxu1 %v7049_v51  ;;  %v7111_v51 = vld [vmem:[%s9198_s1 + $0x4b0] sm:$0xff]  }
  0x63   :  { %4567 = vmatmul.mubr.bf16.vlgmr.msra.gmra.mrb[8].mxu0 %v5668_v46  ;;  %v7106_v46 = vld [vmem:[%s9198_s1 + $0x428] sm:$0xff]  }
  0x64   :  { %4607 = vmatmul.mubr.bf16.vlgmr.msra.gmra.mrb[8].mxu1 %v5670_v48  ;;  %6369 = vmatpush3.bf16.msra.mxu0 %v7050_v52  ;;  %v7108_v48 = vld [vmem:[%s9198_s1 + $0x470] sm:$0xff]   ;;  %v7112_v52 = vld [vmem:[%s9198_s1 + $0x478] sm:$0xff]  }
  0x65   :  { %6391 = vmatpush3.bf16.msra.mxu1 %v7051_v53  ;;  %6370 = vmatprep.subr.bf16.mxu0 %v7052_v54  ;;  %v7113_v53 = vld [vmem:[%s9198_s1 + $0x4f8] sm:$0xff]  }
  0x66   :  { %6392 = vmatprep.subr.bf16.mxu1 %v7053_v55  ;;  %4646 = vmatprep.mubr.bf16.mxu0 %v5673_v21  ;;  %v7114_v54 = vld [vmem:[%s9198_s1 + $0x438] sm:$0xff]   ;;  %v7143_v21 = vld [vmem:[%s9198_s1 + $0x5a8] sm:$0xff]  }
  0x67   :  { %4686 = vmatprep.mubr.bf16.mxu1 %v5675_v24  ;;  %v7115_v55 = vld [vmem:[%s9198_s1 + $0x4b8] sm:$0xff]   ;;  %v7146_v24 = vld [vmem:[%s9198_s1 + $0x530] sm:$0xff]  }
  0x68   :  { %6371 = vmatpush3.bf16.msra.mxu0 %v7054_v56  ;;  %v23_v56 = vld [vmem:[%s9199_s0 + $0x40] sm:$0xff] }
  0x69   :  { %6393 = vmatpush3.bf16.msra.mxu1 %v7055_v57  ;;  %6372 = vmatprep.subr.bf16.mxu0 %v7056_v58  ;;  %v5676_v57 = vcombine.low %v23_v56, %v23_v56  ;;  %v5677_v58 = vcombine.high %v23_v56, %v23_v56  ;;  %v7176_v56 = vld [vmem:[%s9198_s1 + $0x668] sm:$0xff]  }
  0x6a   :  { %6394 = vmatprep.subr.bf16.mxu1 %v7057_v59  ;;  %v24_v59 = vld [vmem:[%s9199_s0 + $0x48] sm:$0xff] }
  0x6c   :  { %6373 = vmatpush3.bf16.msra.mxu0 %v7058_v60  ;;  %v5678_v60 = vcombine.low %v24_v59, %v24_v59 }
  0x6d   :  { %6395 = vmatpush3.bf16.msra.mxu1 %v7059_v61  ;;  %6374 = vmatprep.subr.bf16.mxu0 %v7060_v62  ;;  %v5679_v61 = vcombine.high %v24_v59, %v24_v59  ;;  %v7120_v62 = vld [vmem:[%s9198_s1 + $0x540] sm:$0xff]   ;;  %v7179_v59 = vld [vmem:[%s9198_s1 + $0x6a8] sm:$0xff]  }
  0x6e   :  { %6396 = vmatprep.subr.bf16.mxu1 %v7061_v63  ;;  %v7121_v63 = vld [vmem:[%s9198_s1 + $0x5c0] sm:$0xff]  }
  0x70   :  { %6375 = vmatpush3.bf16.msra.mxu0 %v7062_v0  ;;  %v7122_v0 = vld [vmem:[%s9198_s1 + $0x500] sm:$0xff]  }
  0x71   :  { %6397 = vmatpush3.bf16.msra.mxu1 %v7063_v1  ;;  %6376 = vmatprep.subr.bf16.mxu0 %v7064_v2  ;;  %v7123_v1 = vld [vmem:[%s9198_s1 + $0x580] sm:$0xff]   ;;  %v7124_v2 = vld [vmem:[%s9198_s1 + $0x548] sm:$0xff]  }
  0x72   :  { %6398 = vmatprep.subr.bf16.mxu1 %v7065_v3  ;;  %v7125_v3 = vld [vmem:[%s9198_s1 + $0x5c8] sm:$0xff]  }
  0x74   :  { %6377 = vmatpush3.bf16.msra.mxu0 %v7066_v4  ;;  %v7126_v4 = vld [vmem:[%s9198_s1 + $0x508] sm:$0xff]  }
  0x75   :  { %6399 = vmatpush3.bf16.msra.mxu1 %v7067_v5  ;;  %6378 = vmatprep.subr.bf16.mxu0 %v7068_v6  ;;  %v7127_v5 = vld [vmem:[%s9198_s1 + $0x588] sm:$0xff]   ;;  %v7128_v6 = vld [vmem:[%s9198_s1 + $0x550] sm:$0xff]  }
  0x76   :  { %6400 = vmatprep.subr.bf16.mxu1 %v7069_v7  ;;  %v7129_v7 = vld [vmem:[%s9198_s1 + $0x5d0] sm:$0xff]  }
  0x78   :  { %6379 = vmatpush3.bf16.msra.mxu0 %v7070_v8  ;;  %v7130_v8 = vld [vmem:[%s9198_s1 + $0x510] sm:$0xff]  }
  0x79   :  { %6401 = vmatpush3.bf16.msra.mxu1 %v7071_v9  ;;  %6380 = vmatprep.subr.bf16.mxu0 %v7072_v10  ;;  %v7131_v9 = vld [vmem:[%s9198_s1 + $0x590] sm:$0xff]   ;;  %v7132_v10 = vld [vmem:[%s9198_s1 + $0x558] sm:$0xff]  }
  0x7a   :  { %6402 = vmatprep.subr.bf16.mxu1 %v7073_v11  ;;  %v7133_v11 = vld [vmem:[%s9198_s1 + $0x5d8] sm:$0xff]  }
  0x7c   :  { %6381 = vmatpush3.bf16.msra.mxu0 %v7074_v12  ;;  %v7134_v12 = vld [vmem:[%s9198_s1 + $0x518] sm:$0xff]  }
  0x7d   :  { %6403 = vmatpush3.bf16.msra.mxu1 %v7075_v13  ;;  %6382 = vmatprep.subr.bf16.mxu0 %v7076_v14  ;;  %v7135_v13 = vld [vmem:[%s9198_s1 + $0x598] sm:$0xff]   ;;  %v7136_v14 = vld [vmem:[%s9198_s1 + $0x560] sm:$0xff]  }
  0x7e   :  { %6404 = vmatprep.subr.bf16.mxu1 %v7077_v15  ;;  %v7137_v15 = vld [vmem:[%s9198_s1 + $0x5e0] sm:$0xff]  }
  0x80   :  { %6383 = vmatpush3.bf16.msra.mxu0 %v7078_v16  ;;  %v7138_v16 = vld [vmem:[%s9198_s1 + $0x520] sm:$0xff]  }
  0x81   :  { %6405 = vmatpush3.bf16.msra.mxu1 %v7079_v17  ;;  %6412 = vmatprep.subr.bf16.mxu0 %v7084_v23  ;;  %v7139_v17 = vld [vmem:[%s9198_s1 + $0x5a0] sm:$0xff]   ;;  %v7145_v23 = vld [vmem:[%s9198_s1 + $0x5f0] sm:$0xff]  }
  0x82   :  { %6434 = vmatprep.subr.bf16.mxu1 %v7085_v25  ;;  %v7147_v25 = vld [vmem:[%s9198_s1 + $0x5b0] sm:$0xff]  }
  0x83   :  { %4647 = vmatmul.mubr.bf16.vlgmr.msra.gmra.mrb[12].mxu0 %v5672_v20  ;;  %v7142_v20 = vld [vmem:[%s9198_s1 + $0x528] sm:$0xff]  }
  0x84   :  { %4687 = vmatmul.mubr.bf16.vlgmr.msra.gmra.mrb[12].mxu1 %v5674_v22  ;;  %6413 = vmatpush3.bf16.msra.mxu0 %v7086_v26  ;;  %v7144_v22 = vld [vmem:[%s9198_s1 + $0x570] sm:$0xff]   ;;  %v7148_v26 = vld [vmem:[%s9198_s1 + $0x578] sm:$0xff]  }
  0x85   :  { %6435 = vmatpush3.bf16.msra.mxu1 %v7087_v27  ;;  %6414 = vmatprep.subr.bf16.mxu0 %v7088_v28  ;;  %v7149_v27 = vld [vmem:[%s9198_s1 + $0x5f8] sm:$0xff]  }
  0x86   :  { %6436 = vmatprep.subr.bf16.mxu1 %v7089_v29  ;;  %4726 = vmatprep.mubr.bf16.mxu0 %v5677_v58  ;;  %v7150_v28 = vld [vmem:[%s9198_s1 + $0x538] sm:$0xff]   ;;  %v7178_v58 = vld [vmem:[%s9198_s1 + $0x628] sm:$0xff]  }
  0x87   :  { %4766 = vmatprep.mubr.bf16.mxu1 %v5679_v61  ;;  %v7151_v29 = vld [vmem:[%s9198_s1 + $0x5b8] sm:$0xff]   ;;  %v7181_v61 = vld [vmem:[%s9198_s1 + $0x6f0] sm:$0xff]  }
  0x88   :  { %6415 = vmatpush3.bf16.msra.mxu0 %v7090_v30  ;;  %v25_v30 = vld [vmem:[%s9199_s0 + $0x50] sm:$0xff] }
  0x89   :  { %6437 = vmatpush3.bf16.msra.mxu1 %v7091_v31  ;;  %6416 = vmatprep.subr.bf16.mxu0 %v7092_v32  ;;  %v26_v31 = vld [vmem:[%s9199_s0 + $0x58] sm:$0xff]  ;;  %v5680_v32 = vcombine.low %v25_v30, %v25_v30 }
  0x8a   :  { %6438 = vmatprep.subr.bf16.mxu1 %v7093_v33  ;;  %v5681_v33 = vcombine.high %v25_v30, %v25_v30  ;;  %v7211_v30 = vld [vmem:[%s9198_s1 + $0x7a0] sm:$0xff]  }
  0x8c   :  { %6417 = vmatpush3.bf16.msra.mxu0 %v7094_v34  ;;  %v5682_v34 = vcombine.low %v26_v31, %v26_v31 }
  0x8d   :  { %6439 = vmatpush3.bf16.msra.mxu1 %v7095_v35  ;;  %6418 = vmatprep.subr.bf16.mxu0 %v7096_v36  ;;  %v5683_v35 = vcombine.high %v26_v31, %v26_v31  ;;  %v7156_v36 = vld [vmem:[%s9198_s1 + $0x640] sm:$0xff]  }
  0x8e   :  { %6440 = vmatprep.subr.bf16.mxu1 %v7097_v37  ;;  %v7157_v37 = vld [vmem:[%s9198_s1 + $0x6c0] sm:$0xff]  }
  0x90   :  { %6419 = vmatpush3.bf16.msra.mxu0 %v7098_v38  ;;  %v7158_v38 = vld [vmem:[%s9198_s1 + $0x600] sm:$0xff]  }
  0x91   :  { %6441 = vmatpush3.bf16.msra.mxu1 %v7099_v39  ;;  %6420 = vmatprep.subr.bf16.mxu0 %v7100_v40  ;;  %v7159_v39 = vld [vmem:[%s9198_s1 + $0x680] sm:$0xff]   ;;  %v7160_v40 = vld [vmem:[%s9198_s1 + $0x648] sm:$0xff]  }
  0x92   :  { %6442 = vmatprep.subr.bf16.mxu1 %v7101_v41  ;;  %v7161_v41 = vld [vmem:[%s9198_s1 + $0x6c8] sm:$0xff]  }
  0x94   :  { %6421 = vmatpush3.bf16.msra.mxu0 %v7102_v42  ;;  %v7162_v42 = vld [vmem:[%s9198_s1 + $0x608] sm:$0xff]  }
  0x95   :  { %6443 = vmatpush3.bf16.msra.mxu1 %v7103_v43  ;;  %6422 = vmatprep.subr.bf16.mxu0 %v7104_v44  ;;  %v7163_v43 = vld [vmem:[%s9198_s1 + $0x688] sm:$0xff]   ;;  %v7164_v44 = vld [vmem:[%s9198_s1 + $0x650] sm:$0xff]  }
  0x96   :  { %6444 = vmatprep.subr.bf16.mxu1 %v7105_v45  ;;  %v7165_v45 = vld [vmem:[%s9198_s1 + $0x6d0] sm:$0xff]  }
  0x98   :  { %6423 = vmatpush3.bf16.msra.mxu0 %v7106_v46  ;;  %v7166_v46 = vld [vmem:[%s9198_s1 + $0x610] sm:$0xff]  }
  0x99   :  { %6445 = vmatpush3.bf16.msra.mxu1 %v7107_v47  ;;  %6424 = vmatprep.subr.bf16.mxu0 %v7108_v48  ;;  %v7167_v47 = vld [vmem:[%s9198_s1 + $0x690] sm:$0xff]   ;;  %v7168_v48 = vld [vmem:[%s9198_s1 + $0x658] sm:$0xff]  }
  0x9a   :  { %6446 = vmatprep.subr.bf16.mxu1 %v7109_v49  ;;  %v7169_v49 = vld [vmem:[%s9198_s1 + $0x6d8] sm:$0xff]  }
  0x9c   :  { %6425 = vmatpush3.bf16.msra.mxu0 %v7110_v50  ;;  %v7170_v50 = vld [vmem:[%s9198_s1 + $0x618] sm:$0xff]  }
  0x9d   :  { %6447 = vmatpush3.bf16.msra.mxu1 %v7111_v51  ;;  %6426 = vmatprep.subr.bf16.mxu0 %v7112_v52  ;;  %v7171_v51 = vld [vmem:[%s9198_s1 + $0x698] sm:$0xff]   ;;  %v7172_v52 = vld [vmem:[%s9198_s1 + $0x660] sm:$0xff]  }
  0x9e   :  { %6448 = vmatprep.subr.bf16.mxu1 %v7113_v53  ;;  %v7173_v53 = vld [vmem:[%s9198_s1 + $0x6e0] sm:$0xff]  }
  0xa0   :  { %6427 = vmatpush3.bf16.msra.mxu0 %v7114_v54  ;;  %v7174_v54 = vld [vmem:[%s9198_s1 + $0x620] sm:$0xff]  }
  0xa1   :  { %6449 = vmatpush3.bf16.msra.mxu1 %v7115_v55  ;;  %6456 = vmatprep.subr.bf16.mxu0 %v7120_v62  ;;  %v7175_v55 = vld [vmem:[%s9198_s1 + $0x6a0] sm:$0xff]   ;;  %v7182_v62 = vld [vmem:[%s9198_s1 + $0x630] sm:$0xff]  }
  0xa2   :  { %6478 = vmatprep.subr.bf16.mxu1 %v7121_v63  ;;  %v7183_v63 = vld [vmem:[%s9198_s1 + $0x6b0] sm:$0xff]  }
  0xa3   :  { %4727 = vmatmul.mubr.bf16.vlgmr.msra.gmra.mrb[16].mxu0 %v5676_v57  ;;  %v7177_v57 = vld [vmem:[%s9198_s1 + $0x6e8] sm:$0xff]  }
  0xa4   :  { %4767 = vmatmul.mubr.bf16.vlgmr.msra.gmra.mrb[16].mxu1 %v5678_v60  ;;  %6457 = vmatpush3.bf16.msra.mxu0 %v7122_v0  ;;  %v7180_v60 = vld [vmem:[%s9198_s1 + $0x670] sm:$0xff]   ;;  %v7184_v0 = vld [vmem:[%s9198_s1 + $0x678] sm:$0xff]  }
  0xa5   :  { %6479 = vmatpush3.bf16.msra.mxu1 %v7123_v1  ;;  %6458 = vmatprep.subr.bf16.mxu0 %v7124_v2  ;;  %v7185_v1 = vld [vmem:[%s9198_s1 + $0x6f8] sm:$0xff]  }
  0xa6   :  { %6480 = vmatprep.subr.bf16.mxu1 %v7125_v3  ;;  %4806 = vmatprep.mubr.bf16.mxu0 %v5681_v33  ;;  %v7186_v2 = vld [vmem:[%s9198_s1 + $0x638] sm:$0xff]  }
  0xa7   :  { %4846 = vmatprep.mubr.bf16.mxu1 %v5683_v35  ;;  %v7187_v3 = vld [vmem:[%s9198_s1 + $0x6b8] sm:$0xff]  }
  0xa8   :  { %6459 = vmatpush3.bf16.msra.mxu0 %v7126_v4  ;;  %v27_v4 = vld [vmem:[%s9199_s0 + $0x60] sm:$0xff] }
  0xa9   :  { %6481 = vmatpush3.bf16.msra.mxu1 %v7127_v5  ;;  %6460 = vmatprep.subr.bf16.mxu0 %v7128_v6  ;;  %v28_v5 = vld [vmem:[%s9199_s0 + $0x68] sm:$0xff]  ;;  %v5684_v6 = vcombine.low %v27_v4, %v27_v4 }
  0xaa   :  { %6482 = vmatprep.subr.bf16.mxu1 %v7129_v7  ;;  %v5685_v7 = vcombine.high %v27_v4, %v27_v4  ;;  %v7235_v4 = vld [vmem:[%s9198_s1 + $0x888] sm:$0xff]  }
  0xac   :  { %6461 = vmatpush3.bf16.msra.mxu0 %v7130_v8  ;;  %v5686_v8 = vcombine.low %v28_v5, %v28_v5 }
  0xad   :  { %6483 = vmatpush3.bf16.msra.mxu1 %v7131_v9  ;;  %6462 = vmatprep.subr.bf16.mxu0 %v7132_v10  ;;  %v7192_v9 = vld [vmem:[%s9198_s1 + $0x740] sm:$0xff]   ;;  %v5687_v10 = vcombine.high %v28_v5, %v28_v5  ;;  %v7236_v5 = vld [vmem:[%s9198_s1 + $0x850] sm:$0xff]  }
  0xae   :  { %6484 = vmatprep.subr.bf16.mxu1 %v7133_v11  ;;  %v7193_v11 = vld [vmem:[%s9198_s1 + $0x7c0] sm:$0xff]  }
  0xb0   :  { %6463 = vmatpush3.bf16.msra.mxu0 %v7134_v12  ;;  %v7194_v12 = vld [vmem:[%s9198_s1 + $0x700] sm:$0xff]  }
  0xb1   :  { %6485 = vmatpush3.bf16.msra.mxu1 %v7135_v13  ;;  %6464 = vmatprep.subr.bf16.mxu0 %v7136_v14  ;;  %v7195_v13 = vld [vmem:[%s9198_s1 + $0x780] sm:$0xff]   ;;  %v7196_v14 = vld [vmem:[%s9198_s1 + $0x748] sm:$0xff]  }
  0xb2   :  { %6486 = vmatprep.subr.bf16.mxu1 %v7137_v15  ;;  %v7197_v15 = vld [vmem:[%s9198_s1 + $0x7c8] sm:$0xff]  }
  0xb4   :  { %6465 = vmatpush3.bf16.msra.mxu0 %v7138_v16  ;;  %v7198_v16 = vld [vmem:[%s9198_s1 + $0x708] sm:$0xff]  }
  0xb5   :  { %6487 = vmatpush3.bf16.msra.mxu1 %v7139_v17  ;;  %6466 = vmatprep.subr.bf16.mxu0 %v7140_v18  ;;  %v7199_v17 = vld [vmem:[%s9198_s1 + $0x788] sm:$0xff]   ;;  %v7200_v18 = vld [vmem:[%s9198_s1 + $0x750] sm:$0xff]  }
  0xb6   :  { %6488 = vmatprep.subr.bf16.mxu1 %v7141_v19  ;;  %v7201_v19 = vld [vmem:[%s9198_s1 + $0x7d0] sm:$0xff]  }
  0xb8   :  { %6467 = vmatpush3.bf16.msra.mxu0 %v7142_v20  ;;  %v7202_v20 = vld [vmem:[%s9198_s1 + $0x710] sm:$0xff]  }
  0xb9   :  { %6489 = vmatpush3.bf16.msra.mxu1 %v7143_v21  ;;  %6468 = vmatprep.subr.bf16.mxu0 %v7144_v22  ;;  %v7203_v21 = vld [vmem:[%s9198_s1 + $0x790] sm:$0xff]   ;;  %v7204_v22 = vld [vmem:[%s9198_s1 + $0x758] sm:$0xff]  }
  0xba   :  { %6490 = vmatprep.subr.bf16.mxu1 %v7145_v23  ;;  %v7205_v23 = vld [vmem:[%s9198_s1 + $0x7d8] sm:$0xff]  }
  0xbc   :  { %6469 = vmatpush3.bf16.msra.mxu0 %v7146_v24  ;;  %v7206_v24 = vld [vmem:[%s9198_s1 + $0x718] sm:$0xff]  }
  0xbd   :  { %6491 = vmatpush3.bf16.msra.mxu1 %v7147_v25  ;;  %6470 = vmatprep.subr.bf16.mxu0 %v7148_v26  ;;  %v7207_v25 = vld [vmem:[%s9198_s1 + $0x798] sm:$0xff]   ;;  %v7208_v26 = vld [vmem:[%s9198_s1 + $0x760] sm:$0xff]  }
  0xbe   :  { %6492 = vmatprep.subr.bf16.mxu1 %v7149_v27  ;;  %v7209_v27 = vld [vmem:[%s9198_s1 + $0x7e0] sm:$0xff]  }
  0xc0   :  { %6471 = vmatpush3.bf16.msra.mxu0 %v7150_v28  ;;  %v7210_v28 = vld [vmem:[%s9198_s1 + $0x720] sm:$0xff]  }
  0xc1   :  { %6493 = vmatpush3.bf16.msra.mxu1 %v7151_v29  ;;  %6500 = vmatprep.subr.bf16.mxu0 %v7156_v36 }
  0xc2   :  { %6522 = vmatprep.subr.bf16.mxu1 %v7157_v37  ;;  %v7212_v37 = vld [vmem:[%s9198_s1 + $0x768] sm:$0xff]  }
  0xc3   :  { %4807 = vmatmul.mubr.bf16.vlgmr.msra.gmra.mrb[20].mxu0 %v5680_v32  ;;  %v5659_v32 = vld [vmem:[%s9200_s2] ss:$0 sm:$0xff] }
  0xc4   :  { %4847 = vmatmul.mubr.bf16.vlgmr.msra.gmra.mrb[20].mxu1 %v5682_v34  ;;  %6501 = vmatpush3.bf16.msra.mxu0 %v7158_v38 }
  0xc5   :  { %6523 = vmatpush3.bf16.msra.mxu1 %v7159_v39  ;;  %6502 = vmatprep.subr.bf16.mxu0 %v7160_v40  ;;  %v7213_v39 = vld [vmem:[%s9198_s1 + $0x7e8] sm:$0xff]  }
  0xc6   :  { %6524 = vmatprep.subr.bf16.mxu1 %v7161_v41  ;;  %4886 = vmatprep.mubr.bf16.mxu0 %v5685_v7  ;;  %v7238_v7 = vld [vmem:[%s9198_s1 + $0x810] sm:$0xff]  }
  0xc7   :  { %4926 = vmatprep.mubr.bf16.mxu1 %v5687_v10  ;;  %v7241_v10 = vld [vmem:[%s9198_s1 + $0x8d8] sm:$0xff]  }
  0xc8   :  { %6503 = vmatpush3.bf16.msra.mxu0 %v7162_v42  ;;  %v7214_v42 = vld [vmem:[%s9198_s1 + $0x728] sm:$0xff]  }
  0xc9   :  { %6525 = vmatpush3.bf16.msra.mxu1 %v7163_v43  ;;  %6504 = vmatprep.subr.bf16.mxu0 %v7164_v44  ;;  %v7215_v44 = vld [vmem:[%s9198_s1 + $0x7a8] sm:$0xff]  }
  0xca   :  { %6526 = vmatprep.subr.bf16.mxu1 %v7165_v45 }
  0xcc   :  { %6505 = vmatpush3.bf16.msra.mxu0 %v7166_v46 }
  0xcd   :  { %6527 = vmatpush3.bf16.msra.mxu1 %v7167_v47  ;;  %6506 = vmatprep.subr.bf16.mxu0 %v7168_v48  ;;  %v7216_v47 = vld [vmem:[%s9198_s1 + $0x770] sm:$0xff]  }
  0xce   :  { %6528 = vmatprep.subr.bf16.mxu1 %v7169_v49  ;;  %v7217_v48 = vld [vmem:[%s9198_s1 + $0x7f0] sm:$0xff]  }
  0xcf   :  { %v7218_v49 = vld [vmem:[%s9198_s1 + $0x730] sm:$0xff]  }
  0xd0   :  { %6507 = vmatpush3.bf16.msra.mxu0 %v7170_v50  ;;  %v7219_v50 = vld [vmem:[%s9198_s1 + $0x7b0] sm:$0xff]  }
  0xd1   :  { %6529 = vmatpush3.bf16.msra.mxu1 %v7171_v51  ;;  %6508 = vmatprep.subr.bf16.mxu0 %v7172_v52  ;;  %v7220_v51 = vld [vmem:[%s9198_s1 + $0x778] sm:$0xff]  }
  0xd2   :  { %6530 = vmatprep.subr.bf16.mxu1 %v7173_v53  ;;  %v7221_v52 = vld [vmem:[%s9198_s1 + $0x7f8] sm:$0xff]  }
  0xd3   :  { %v7222_v53 = vld [vmem:[%s9198_s1 + $0x738] sm:$0xff]  }
  0xd4   :  { %6509 = vmatpush3.bf16.msra.mxu0 %v7174_v54  ;;  %v7223_v54 = vld [vmem:[%s9198_s1 + $0x7b8] sm:$0xff]  }
  0xd5   :  { %6531 = vmatpush3.bf16.msra.mxu1 %v7175_v55  ;;  %6510 = vmatprep.subr.bf16.mxu0 %v7176_v56  ;;  %v29_v55 = vld [vmem:[%s9199_s0 + $0x70] sm:$0xff]  ;;  %v30_v56 = vld [vmem:[%s9199_s0 + $0x78] sm:$0xff] }
  0xd6   :  { %6532 = vmatprep.subr.bf16.mxu1 %v7177_v57  ;;  %v5688_v57 = vcombine.low %v29_v55, %v29_v55 }
  0xd8   :  { %6511 = vmatpush3.bf16.msra.mxu0 %v7178_v58  ;;  %v5689_v58 = vcombine.high %v29_v55, %v29_v55  ;;  %v7272_v55 = vld [vmem:[%s9198_s1 + $0x950] sm:$0xff]  }
  0xd9   :  { %6533 = vmatpush3.bf16.msra.mxu1 %v7179_v59  ;;  %6512 = vmatprep.subr.bf16.mxu0 %v7180_v60  ;;  %v5690_v59 = vcombine.low %v30_v56, %v30_v56  ;;  %v5691_v60 = vcombine.high %v30_v56, %v30_v56  ;;  %v7273_v56 = vld [vmem:[%s9198_s1 + $0x9d0] sm:$0xff]  }
  0xda   :  { %6534 = vmatprep.subr.bf16.mxu1 %v7181_v61  ;;  %v7228_v61 = vld [vmem:[%s9198_s1 + $0x840] sm:$0xff]  }
  0xdc   :  { %6513 = vmatpush3.bf16.msra.mxu0 %v7182_v62  ;;  %v7229_v62 = vld [vmem:[%s9198_s1 + $0x8c0] sm:$0xff]  }
  0xdd   :  { %6535 = vmatpush3.bf16.msra.mxu1 %v7183_v63  ;;  %6514 = vmatprep.subr.bf16.mxu0 %v7184_v0  ;;  %v7230_v63 = vld [vmem:[%s9198_s1 + $0x800] sm:$0xff]  }
  0xde   :  { %6536 = vmatprep.subr.bf16.mxu1 %v7185_v1  ;;  %v7231_v0 = vld [vmem:[%s9198_s1 + $0x880] sm:$0xff]   ;;  %v7232_v1 = vld [vmem:[%s9198_s1 + $0x848] sm:$0xff]  }
  0xe0   :  { %6515 = vmatpush3.bf16.msra.mxu0 %v7186_v2  ;;  %v7233_v2 = vld [vmem:[%s9198_s1 + $0x8c8] sm:$0xff]  }
  0xe1   :  { %6537 = vmatpush3.bf16.msra.mxu1 %v7187_v3  ;;  %6544 = vmatprep.subr.bf16.mxu0 %v7192_v9  ;;  %v7234_v3 = vld [vmem:[%s9198_s1 + $0x808] sm:$0xff]   ;;  %v7240_v9 = vld [vmem:[%s9198_s1 + $0x858] sm:$0xff]  }
  0xe2   :  { %6566 = vmatprep.subr.bf16.mxu1 %v7193_v11  ;;  %v7242_v11 = vld [vmem:[%s9198_s1 + $0x818] sm:$0xff]  }
  0xe3   :  { %4887 = vmatmul.mubr.bf16.vlgmr.msra.gmra.mrb[24].mxu0 %v5684_v6  ;;  %v7237_v6 = vld [vmem:[%s9198_s1 + $0x8d0] sm:$0xff]  }
  0xe4   :  { %4927 = vmatmul.mubr.bf16.vlgmr.msra.gmra.mrb[24].mxu1 %v5686_v8  ;;  %6545 = vmatpush3.bf16.msra.mxu0 %v7194_v12  ;;  %v7239_v8 = vld [vmem:[%s9198_s1 + $0x890] sm:$0xff]   ;;  %v7243_v12 = vld [vmem:[%s9198_s1 + $0x898] sm:$0xff]  }
  0xe5   :  { %6567 = vmatpush3.bf16.msra.mxu1 %v7195_v13  ;;  %6546 = vmatprep.subr.bf16.mxu0 %v7196_v14  ;;  %v7244_v13 = vld [vmem:[%s9198_s1 + $0x860] sm:$0xff]  }
  0xe6   :  { %6568 = vmatprep.subr.bf16.mxu1 %v7197_v15  ;;  %4966 = vmatprep.mubr.bf16.mxu0 %v5689_v58  ;;  %v7245_v14 = vld [vmem:[%s9198_s1 + $0x8e0] sm:$0xff]   ;;  %v7275_v58 = vld [vmem:[%s9198_s1 + $0x990] sm:$0xff]  }
  0xe7   :  { %5006 = vmatprep.mubr.bf16.mxu1 %v5691_v60  ;;  %v7246_v15 = vld [vmem:[%s9198_s1 + $0x820] sm:$0xff]   ;;  %v7277_v60 = vld [vmem:[%s9198_s1 + $0x9d8] sm:$0xff]  }
  0xe8   :  { %6547 = vmatpush3.bf16.msra.mxu0 %v7198_v16 }
  0xe9   :  { %6569 = vmatpush3.bf16.msra.mxu1 %v7199_v17  ;;  %6548 = vmatprep.subr.bf16.mxu0 %v7200_v18  ;;  %v7247_v17 = vld [vmem:[%s9198_s1 + $0x8a0] sm:$0xff]  }
  0xea   :  { %6570 = vmatprep.subr.bf16.mxu1 %v7201_v19 }
  0xec   :  { %6549 = vmatpush3.bf16.msra.mxu0 %v7202_v20 }
  0xed   :  { %6571 = vmatpush3.bf16.msra.mxu1 %v7203_v21  ;;  %6550 = vmatprep.subr.bf16.mxu0 %v7204_v22 }
  0xee   :  { %6572 = vmatprep.subr.bf16.mxu1 %v7205_v23  ;;  %v7248_v23 = vld [vmem:[%s9198_s1 + $0x868] sm:$0xff]  }
  0xf0   :  { %6551 = vmatpush3.bf16.msra.mxu0 %v7206_v24 }
  0xf1   :  { %6573 = vmatpush3.bf16.msra.mxu1 %v7207_v25  ;;  %6552 = vmatprep.subr.bf16.mxu0 %v7208_v26  ;;  %v7249_v25 = vld [vmem:[%s9198_s1 + $0x8e8] sm:$0xff]  }
  0xf2   :  { %6574 = vmatprep.subr.bf16.mxu1 %v7209_v27 }
  0xf4   :  { %6553 = vmatpush3.bf16.msra.mxu0 %v7210_v28  ;;  %v7250_v28 = vld [vmem:[%s9198_s1 + $0x828] sm:$0xff]  }
  0xf5   :  { %6575 = vmatpush3.bf16.msra.mxu1 %v7211_v30  ;;  %6554 = vmatprep.subr.bf16.mxu0 %v7212_v37  ;;  %v7251_v30 = vld [vmem:[%s9198_s1 + $0x8a8] sm:$0xff]   ;;  %v7256_v37 = vld [vmem:[%s9198_s1 + $0x878] sm:$0xff]  }
  0xf6   :  { %v6252_v29 = vpop.f32.mrb[0].mxu0  ;;  %6576 = vmatprep.subr.bf16.mxu1 %v7213_v39  ;;  %v7258_v39 = vld [vmem:[%s9198_s1 + $0x838] sm:$0xff]  }
  0xf7   :  { %v6274_v31 = vpop.f32.mrb[0].mxu1  ;;  %v6253_v33 = vpop.f32.mrb[1].mxu0 }
  0xf8   :  { %v6275_v34 = vpop.f32.mrb[1].mxu1  ;;  %v6254_v35 = vadd.f32 %v6253_v33, %v6252_v29  ;;  %v6255_v38 = vpop.f32.mrb[2].mxu0  ;;  %6555 = vmatpush3.bf16.msra.mxu0 %v7214_v42  ;;  %v7252_v33 = vld [vmem:[%s9198_s1 + $0x870] sm:$0xff]   ;;  %v32_v42 = vld [vmem:[%s9199_s0 + $0x88] sm:$0xff] }
  0xf9   :  { %v6276_v36 = vadd.f32 %v6275_v34, %v6274_v31  ;;  %v6277_v40 = vpop.f32.mrb[2].mxu1  ;;  %v6256_v43 = vpop.f32.mrb[3].mxu0  ;;  %6577 = vmatpush3.bf16.msra.mxu1 %v7215_v44  ;;  %6556 = vmatprep.subr.bf16.mxu0 %v7216_v47  ;;  %v7253_v34 = vld [vmem:[%s9198_s1 + $0x8f0] sm:$0xff]   ;;  %v7257_v38 = vld [vmem:[%s9198_s1 + $0x8f8] sm:$0xff]   ;;  %v7264_v47 = vld [vmem:[%s9198_s1 + $0x940] sm:$0xff]  }
  0xfa   :  { %v4409_v41 = vadd.f32 %v6254_v35, %v5659_v32  ;;  %v6278_v45 = vpop.f32.mrb[3].mxu1  ;;  %6578 = vmatprep.subr.bf16.mxu1 %v7217_v48  ;;  %v7254_v35 = vld [vmem:[%s9198_s1 + $0x830] sm:$0xff]   ;;  %v7259_v40 = vld [vmem:[%s9198_s1 + $0x8b8] sm:$0xff]   ;;  %v7265_v48 = vld [vmem:[%s9198_s1 + $0x9c0] sm:$0xff]  }
  0xfb   :  { %v5694_v45 = vcombine.low %v32_v42, %v32_v42 }
  0xfc   :  { %v8325_v46 = vadd.f32 %v6276_v36, %v4409_v41  ;;  %6557 = vmatpush3.bf16.msra.mxu0 %v7218_v49  ;;  %v7255_v36 = vld [vmem:[%s9198_s1 + $0x8b0] sm:$0xff]   ;;  %v31_v41 = vld [vmem:[%s9199_s0 + $0x80] sm:$0xff] }
  0xfd   :  { %6579 = vmatpush3.bf16.msra.mxu1 %v7219_v50  ;;  %6558 = vmatprep.subr.bf16.mxu0 %v7220_v51  ;;  %v5692_v43 = vcombine.low %v31_v41, %v31_v41  ;;  %v5693_v44 = vcombine.high %v31_v41, %v31_v41  ;;  %v7266_v49 = vld [vmem:[%s9198_s1 + $0x900] sm:$0xff]   ;;  %v7268_v51 = vld [vmem:[%s9198_s1 + $0x948] sm:$0xff]   ;;  %v7308_v41 = vld [vmem:[%s9198_s1 + $0xa50] sm:$0xff]  }
  0xfe   :  { %6580 = vmatprep.subr.bf16.mxu1 %v7221_v52  ;;  %v7267_v50 = vld [vmem:[%s9198_s1 + $0x980] sm:$0xff]   ;;  %v7269_v52 = vld [vmem:[%s9198_s1 + $0x9c8] sm:$0xff]  }
 0x100   :  { %6559 = vmatpush3.bf16.msra.mxu0 %v7222_v53  ;;  %v7270_v53 = vld [vmem:[%s9198_s1 + $0x908] sm:$0xff]  }
 0x101   :  { %6581 = vmatpush3.bf16.msra.mxu1 %v7223_v54  ;;  %6588 = vmatprep.subr.bf16.mxu0 %v7228_v61  ;;  %v7271_v54 = vld [vmem:[%s9198_s1 + $0x988] sm:$0xff]   ;;  %v7278_v61 = vld [vmem:[%s9198_s1 + $0x918] sm:$0xff]  }
 0x102   :  { %6610 = vmatprep.subr.bf16.mxu1 %v7229_v62  ;;  %v7279_v62 = vld [vmem:[%s9198_s1 + $0x998] sm:$0xff]  }
 0x103   :  { %4967 = vmatmul.mubr.bf16.vlgmr.msra.gmra.mrb[28].mxu0 %v5688_v57  ;;  %v7274_v57 = vld [vmem:[%s9198_s1 + $0x910] sm:$0xff]  }
 0x104   :  { %5007 = vmatmul.mubr.bf16.vlgmr.msra.gmra.mrb[28].mxu1 %v5690_v59  ;;  %6589 = vmatpush3.bf16.msra.mxu0 %v7230_v63  ;;  %v7276_v59 = vld [vmem:[%s9198_s1 + $0x958] sm:$0xff]   ;;  %v7280_v63 = vld [vmem:[%s9198_s1 + $0x960] sm:$0xff]  }
 0x105   :  { %6611 = vmatpush3.bf16.msra.mxu1 %v7231_v0  ;;  %6590 = vmatprep.subr.bf16.mxu0 %v7232_v1  ;;  %v7281_v0 = vld [vmem:[%s9198_s1 + $0x9e0] sm:$0xff]  }
 0x106   :  { %6612 = vmatprep.subr.bf16.mxu1 %v7233_v2  ;;  %5046 = vmatprep.mubr.bf16.mxu0 %v5693_v44  ;;  %v7282_v2 = vld [vmem:[%s9198_s1 + $0x920] sm:$0xff]   ;;  %v7311_v44 = vld [vmem:[%s9198_s1 + $0xa90] sm:$0xff]  }
 0x108   :  { %6591 = vmatpush3.bf16.msra.mxu0 %v7234_v3 }
 0x109   :  { %6613 = vmatpush3.bf16.msra.mxu1 %v7235_v4  ;;  %6592 = vmatprep.subr.bf16.mxu0 %v7236_v5  ;;  %v7283_v4 = vld [vmem:[%s9198_s1 + $0x9a0] sm:$0xff]  }
 0x10a   :  { %6614 = vmatprep.subr.bf16.mxu1 %v7237_v6 }
 0x10c   :  { %6593 = vmatpush3.bf16.msra.mxu0 %v7238_v7 }
 0x10d   :  { %6615 = vmatpush3.bf16.msra.mxu1 %v7239_v8  ;;  %6594 = vmatprep.subr.bf16.mxu0 %v7240_v9  ;;  %v7284_v8 = vld [vmem:[%s9198_s1 + $0x968] sm:$0xff]  }
 0x10e   :  { %6616 = vmatprep.subr.bf16.mxu1 %v7241_v10  ;;  %v7285_v10 = vld [vmem:[%s9198_s1 + $0x9e8] sm:$0xff]  }
 0x110   :  { %6595 = vmatpush3.bf16.msra.mxu0 %v7242_v11 }
 0x111   :  { %6617 = vmatpush3.bf16.msra.mxu1 %v7243_v12  ;;  %6596 = vmatprep.subr.bf16.mxu0 %v7244_v13 }
 0x112   :  { %6618 = vmatprep.subr.bf16.mxu1 %v7245_v14  ;;  %v7286_v14 = vld [vmem:[%s9198_s1 + $0x928] sm:$0xff]  }
 0x114   :  { %6597 = vmatpush3.bf16.msra.mxu0 %v7246_v15  ;;  %v7287_v15 = vld [vmem:[%s9198_s1 + $0x9a8] sm:$0xff]  }
 0x115   :  { %6619 = vmatpush3.bf16.msra.mxu1 %v7247_v17  ;;  %6598 = vmatprep.subr.bf16.mxu0 %v7248_v23  ;;  %v7292_v23 = vld [vmem:[%s9198_s1 + $0x978] sm:$0xff]  }
 0x116   :  { %v6296_v16 = vpop.f32.mrb[4].mxu0  ;;  %6620 = vmatprep.subr.bf16.mxu1 %v7249_v25  ;;  %v7294_v25 = vld [vmem:[%s9198_s1 + $0x938] sm:$0xff]  }
 0x117   :  { %v6318_v18 = vpop.f32.mrb[4].mxu1  ;;  %v6297_v19 = vpop.f32.mrb[5].mxu0 }
 0x118   :  { %v6319_v20 = vpop.f32.mrb[5].mxu1  ;;  %v6298_v21 = vadd.f32 %v6297_v19, %v6296_v16  ;;  %v6299_v24 = vpop.f32.mrb[6].mxu0  ;;  %6599 = vmatpush3.bf16.msra.mxu0 %v7250_v28  ;;  %v7288_v19 = vld [vmem:[%s9198_s1 + $0x970] sm:$0xff]   ;;  %v34_v28 = vld [vmem:[%s9199_s0 + $0x98] sm:$0xff] }
 0x119   :  { %v6320_v22 = vadd.f32 %v6319_v20, %v6318_v18  ;;  %v6321_v26 = vpop.f32.mrb[6].mxu1  ;;  %v6300_v29 = vpop.f32.mrb[7].mxu0  ;;  %6621 = vmatpush3.bf16.msra.mxu1 %v7251_v30  ;;  %6600 = vmatprep.subr.bf16.mxu0 %v7252_v33  ;;  %v7289_v20 = vld [vmem:[%s9198_s1 + $0x9f0] sm:$0xff]   ;;  %v7293_v24 = vld [vmem:[%s9198_s1 + $0x9f8] sm:$0xff]   ;;  %v5699_v33 = vcombine.high %v34_v28, %v34_v28 }
 0x11a   :  { %v4489_v27 = vadd.f32 %v6298_v21, %v8325_v46  ;;  %v6322_v31 = vpop.f32.mrb[7].mxu1  ;;  %6622 = vmatprep.subr.bf16.mxu1 %v7253_v34  ;;  %v5695_v46 = vcombine.high %v32_v42, %v32_v42  ;;  %v7290_v21 = vld [vmem:[%s9198_s1 + $0x930] sm:$0xff]   ;;  %v7295_v26 = vld [vmem:[%s9198_s1 + $0x9b8] sm:$0xff]   ;;  %v7301_v34 = vld [vmem:[%s9198_s1 + $0xac0] sm:$0xff]  }
 0x11b   :  { %v5698_v31 = vcombine.low %v34_v28, %v34_v28  ;;  %v7309_v42 = vld [vmem:[%s9198_s1 + $0xad0] sm:$0xff]  }
 0x11c   :  { %v8430_v32 = vadd.f32 %v6320_v22, %v4489_v27  ;;  %6601 = vmatpush3.bf16.msra.mxu0 %v7254_v35  ;;  %5086 = vmatprep.mubr.bf16.mxu1 %v5695_v46  ;;  %v7291_v22 = vld [vmem:[%s9198_s1 + $0x9b0] sm:$0xff]   ;;  %v7302_v35 = vld [vmem:[%s9198_s1 + $0xa00] sm:$0xff]   ;;  %v7313_v46 = vld [vmem:[%s9198_s1 + $0xad8] sm:$0xff]  }
 0x11d   :  { %6623 = vmatpush3.bf16.msra.mxu1 %v7255_v36  ;;  %6602 = vmatprep.subr.bf16.mxu0 %v7256_v37  ;;  %v33_v27 = vld [vmem:[%s9199_s0 + $0x90] sm:$0xff]  ;;  %v7303_v36 = vld [vmem:[%s9198_s1 + $0xa80] sm:$0xff]   ;;  %v7304_v37 = vld [vmem:[%s9198_s1 + $0xa48] sm:$0xff]  }
 0x11e   :  { %6624 = vmatprep.subr.bf16.mxu1 %v7257_v38  ;;  %v5696_v29 = vcombine.low %v33_v27, %v33_v27  ;;  %v5697_v30 = vcombine.high %v33_v27, %v33_v27  ;;  %v7305_v38 = vld [vmem:[%s9198_s1 + $0xac8] sm:$0xff]   ;;  %v7344_v27 = vld [vmem:[%s9198_s1 + $0xb50] sm:$0xff]  }
 0x11f   :  { %v7345_v28 = vld [vmem:[%s9198_s1 + $0xbd0] sm:$0xff]  }
 0x120   :  { %6603 = vmatpush3.bf16.msra.mxu0 %v7258_v39  ;;  %v7306_v39 = vld [vmem:[%s9198_s1 + $0xa08] sm:$0xff]  }
 0x121   :  { %6625 = vmatpush3.bf16.msra.mxu1 %v7259_v40  ;;  %6632 = vmatprep.subr.bf16.mxu0 %v7264_v47  ;;  %v7307_v40 = vld [vmem:[%s9198_s1 + $0xa88] sm:$0xff]   ;;  %v7314_v47 = vld [vmem:[%s9198_s1 + $0xa18] sm:$0xff]  }
 0x122   :  { %6654 = vmatprep.subr.bf16.mxu1 %v7265_v48  ;;  %v7315_v48 = vld [vmem:[%s9198_s1 + $0xa98] sm:$0xff]  }
 0x123   :  { %5047 = vmatmul.mubr.bf16.vlgmr.msra.gmra.mrb[32].mxu0 %v5692_v43  ;;  %v7310_v43 = vld [vmem:[%s9198_s1 + $0xa10] sm:$0xff]  }
 0x124   :  { %5087 = vmatmul.mubr.bf16.vlgmr.msra.gmra.mrb[32].mxu1 %v5694_v45  ;;  %6633 = vmatpush3.bf16.msra.mxu0 %v7266_v49  ;;  %v7312_v45 = vld [vmem:[%s9198_s1 + $0xa58] sm:$0xff]   ;;  %v7316_v49 = vld [vmem:[%s9198_s1 + $0xa60] sm:$0xff]  }
 0x125   :  { %6655 = vmatpush3.bf16.msra.mxu1 %v7267_v50  ;;  %6634 = vmatprep.subr.bf16.mxu0 %v7268_v51  ;;  %v7317_v50 = vld [vmem:[%s9198_s1 + $0xae0] sm:$0xff]  }
 0x126   :  { %6656 = vmatprep.subr.bf16.mxu1 %v7269_v52  ;;  %5126 = vmatprep.mubr.bf16.mxu0 %v5697_v30  ;;  %v7318_v52 = vld [vmem:[%s9198_s1 + $0xa20] sm:$0xff]   ;;  %v7347_v30 = vld [vmem:[%s9198_s1 + $0xb90] sm:$0xff]  }
 0x127   :  { %5166 = vmatprep.mubr.bf16.mxu1 %v5699_v33  ;;  %v7350_v33 = vld [vmem:[%s9198_s1 + $0xb18] sm:$0xff]  }
 0x128   :  { %6635 = vmatpush3.bf16.msra.mxu0 %v7270_v53 }
 0x129   :  { %6657 = vmatpush3.bf16.msra.mxu1 %v7271_v54  ;;  %6636 = vmatprep.subr.bf16.mxu0 %v7272_v55  ;;  %v7319_v54 = vld [vmem:[%s9198_s1 + $0xaa0] sm:$0xff]  }
 0x12a   :  { %6658 = vmatprep.subr.bf16.mxu1 %v7273_v56 }
 0x12c   :  { %6637 = vmatpush3.bf16.msra.mxu0 %v7274_v57  ;;  %v7320_v57 = vld [vmem:[%s9198_s1 + $0xa68] sm:$0xff]  }
 0x12d   :  { %6659 = vmatpush3.bf16.msra.mxu1 %v7275_v58  ;;  %6638 = vmatprep.subr.bf16.mxu0 %v7276_v59 }
 0x12e   :  { %6660 = vmatprep.subr.bf16.mxu1 %v7277_v60  ;;  %v7321_v60 = vld [vmem:[%s9198_s1 + $0xae8] sm:$0xff]  }
 0x130   :  { %6639 = vmatpush3.bf16.msra.mxu0 %v7278_v61 }
 0x131   :  { %6661 = vmatpush3.bf16.msra.mxu1 %v7279_v62  ;;  %6640 = vmatprep.subr.bf16.mxu0 %v7280_v63  ;;  %v7322_v63 = vld [vmem:[%s9198_s1 + $0xa28] sm:$0xff]  }
 0x132   :  { %6662 = vmatprep.subr.bf16.mxu1 %v7281_v0 }
 0x134   :  { %6641 = vmatpush3.bf16.msra.mxu0 %v7282_v2 }
 0x135   :  { %6663 = vmatpush3.bf16.msra.mxu1 %v7283_v4  ;;  %6642 = vmatprep.subr.bf16.mxu0 %v7284_v8  ;;  %v7324_v4 = vld [vmem:[%s9198_s1 + $0xa70] sm:$0xff]  }
 0x136   :  { %v6340_v1 = vpop.f32.mrb[8].mxu0  ;;  %6664 = vmatprep.subr.bf16.mxu1 %v7285_v10  ;;  %v7327_v8 = vld [vmem:[%s9198_s1 + $0xab0] sm:$0xff]   ;;  %v7329_v10 = vld [vmem:[%s9198_s1 + $0xaf8] sm:$0xff]  }
 0x137   :  { %v6362_v3 = vpop.f32.mrb[8].mxu1  ;;  %v6341_v5 = vpop.f32.mrb[9].mxu0 }
 0x138   :  { %v6342_v6 = vadd.f32 %v6341_v5, %v6340_v1  ;;  %v6363_v7 = vpop.f32.mrb[9].mxu1  ;;  %v6343_v11 = vpop.f32.mrb[10].mxu0  ;;  %6643 = vmatpush3.bf16.msra.mxu0 %v7286_v14  ;;  %v7323_v1 = vld [vmem:[%s9198_s1 + $0xaa8] sm:$0xff]  }
 0x139   :  { %v6364_v9 = vadd.f32 %v6363_v7, %v6362_v3  ;;  %v6365_v13 = vpop.f32.mrb[10].mxu1  ;;  %v6344_v16 = vpop.f32.mrb[11].mxu0  ;;  %6665 = vmatpush3.bf16.msra.mxu1 %v7287_v15  ;;  %6644 = vmatprep.subr.bf16.mxu0 %v7288_v19  ;;  %v7326_v7 = vld [vmem:[%s9198_s1 + $0xa30] sm:$0xff]   ;;  %v7330_v11 = vld [vmem:[%s9198_s1 + $0xa38] sm:$0xff]   ;;  %v7336_v19 = vld [vmem:[%s9198_s1 + $0xb40] sm:$0xff]  }
 0x13a   :  { %v4569_v12 = vadd.f32 %v6342_v6, %v8430_v32  ;;  %v6366_v18 = vpop.f32.mrb[11].mxu1  ;;  %6666 = vmatprep.subr.bf16.mxu1 %v7289_v20  ;;  %v7300_v32 = vld [vmem:[%s9198_s1 + $0xa40] sm:$0xff]   ;;  %v7325_v6 = vld [vmem:[%s9198_s1 + $0xaf0] sm:$0xff]   ;;  %v36_v16 = vld [vmem:[%s9199_s0 + $0xa8] sm:$0xff] }
 0x13b   :  { %v35_v13 = vld [vmem:[%s9199_s0 + $0xa0] sm:$0xff]  ;;  %v5703_v18 = vcombine.high %v36_v16, %v36_v16 }
 0x13c   :  { %v8535_v17 = vadd.f32 %v6364_v9, %v4569_v12  ;;  %6645 = vmatpush3.bf16.msra.mxu0 %v7290_v21  ;;  %v7328_v9 = vld [vmem:[%s9198_s1 + $0xa78] sm:$0xff]   ;;  %v5700_v14 = vcombine.low %v35_v13, %v35_v13  ;;  %v5701_v15 = vcombine.high %v35_v13, %v35_v13  ;;  %v7337_v20 = vld [vmem:[%s9198_s1 + $0xbc0] sm:$0xff]   ;;  %v7380_v13 = vld [vmem:[%s9198_s1 + $0xc50] sm:$0xff]  }
 0x13d   :  { %6667 = vmatpush3.bf16.msra.mxu1 %v7291_v22  ;;  %6646 = vmatprep.subr.bf16.mxu0 %v7292_v23  ;;  %v7331_v12 = vld [vmem:[%s9198_s1 + $0xab8] sm:$0xff]   ;;  %v7338_v21 = vld [vmem:[%s9198_s1 + $0xb00] sm:$0xff]   ;;  %v7340_v23 = vld [vmem:[%s9198_s1 + $0xb48] sm:$0xff]  }
 0x13e   :  { %6668 = vmatprep.subr.bf16.mxu1 %v7293_v24  ;;  %v7339_v22 = vld [vmem:[%s9198_s1 + $0xb80] sm:$0xff]   ;;  %v7341_v24 = vld [vmem:[%s9198_s1 + $0xbc8] sm:$0xff]  }
 0x140   :  { %6647 = vmatpush3.bf16.msra.mxu0 %v7294_v25  ;;  %v7342_v25 = vld [vmem:[%s9198_s1 + $0xb08] sm:$0xff]  }
 0x141   :  { %6669 = vmatpush3.bf16.msra.mxu1 %v7295_v26  ;;  %6676 = vmatprep.subr.bf16.mxu0 %v7300_v32  ;;  %v7343_v26 = vld [vmem:[%s9198_s1 + $0xb88] sm:$0xff]   ;;  %v7349_v32 = vld [vmem:[%s9198_s1 + $0xbd8] sm:$0xff]  }
 0x142   :  { %6698 = vmatprep.subr.bf16.mxu1 %v7301_v34  ;;  %v7351_v34 = vld [vmem:[%s9198_s1 + $0xb98] sm:$0xff]  }
 0x143   :  { %5127 = vmatmul.mubr.bf16.vlgmr.msra.gmra.mrb[36].mxu0 %v5696_v29  ;;  %v7346_v29 = vld [vmem:[%s9198_s1 + $0xb10] sm:$0xff]  }
 0x144   :  { %5167 = vmatmul.mubr.bf16.vlgmr.msra.gmra.mrb[36].mxu1 %v5698_v31  ;;  %6677 = vmatpush3.bf16.msra.mxu0 %v7302_v35  ;;  %v7348_v31 = vld [vmem:[%s9198_s1 + $0xb58] sm:$0xff]   ;;  %v7352_v35 = vld [vmem:[%s9198_s1 + $0xb60] sm:$0xff]  }
 0x145   :  { %6699 = vmatpush3.bf16.msra.mxu1 %v7303_v36  ;;  %6678 = vmatprep.subr.bf16.mxu0 %v7304_v37  ;;  %v7353_v36 = vld [vmem:[%s9198_s1 + $0xbe0] sm:$0xff]  }
 0x146   :  { %6700 = vmatprep.subr.bf16.mxu1 %v7305_v38  ;;  %5206 = vmatprep.mubr.bf16.mxu0 %v5701_v15  ;;  %v7354_v38 = vld [vmem:[%s9198_s1 + $0xb20] sm:$0xff]   ;;  %v7382_v15 = vld [vmem:[%s9198_s1 + $0xc10] sm:$0xff]  }
 0x147   :  { %5246 = vmatprep.mubr.bf16.mxu1 %v5703_v18  ;;  %v7385_v18 = vld [vmem:[%s9198_s1 + $0xcd8] sm:$0xff]  }
 0x148   :  { %6679 = vmatpush3.bf16.msra.mxu0 %v7306_v39 }
 0x149   :  { %6701 = vmatpush3.bf16.msra.mxu1 %v7307_v40  ;;  %6680 = vmatprep.subr.bf16.mxu0 %v7308_v41  ;;  %v7355_v40 = vld [vmem:[%s9198_s1 + $0xba0] sm:$0xff]  }
 0x14a   :  { %6702 = vmatprep.subr.bf16.mxu1 %v7309_v42 }
 0x14c   :  { %6681 = vmatpush3.bf16.msra.mxu0 %v7310_v43  ;;  %v7356_v43 = vld [vmem:[%s9198_s1 + $0xb68] sm:$0xff]  }
 0x14d   :  { %6703 = vmatpush3.bf16.msra.mxu1 %v7311_v44  ;;  %6682 = vmatprep.subr.bf16.mxu0 %v7312_v45 }
 0x14e   :  { %6704 = vmatprep.subr.bf16.mxu1 %v7313_v46  ;;  %v7357_v46 = vld [vmem:[%s9198_s1 + $0xbe8] sm:$0xff]  }
 0x150   :  { %6683 = vmatpush3.bf16.msra.mxu0 %v7314_v47 }
 0x151   :  { %6705 = vmatpush3.bf16.msra.mxu1 %v7315_v48  ;;  %6684 = vmatprep.subr.bf16.mxu0 %v7316_v49  ;;  %v7358_v49 = vld [vmem:[%s9198_s1 + $0xb28] sm:$0xff]  }
 0x152   :  { %6706 = vmatprep.subr.bf16.mxu1 %v7317_v50 }
 0x154   :  { %6685 = vmatpush3.bf16.msra.mxu0 %v7318_v52 }
 0x155   :  { %6707 = vmatpush3.bf16.msra.mxu1 %v7319_v54  ;;  %6686 = vmatprep.subr.bf16.mxu0 %v7320_v57  ;;  %v7360_v54 = vld [vmem:[%s9198_s1 + $0xb70] sm:$0xff]  }
 0x156   :  { %v6384_v51 = vpop.f32.mrb[12].mxu0  ;;  %6708 = vmatprep.subr.bf16.mxu1 %v7321_v60  ;;  %v7362_v57 = vld [vmem:[%s9198_s1 + $0xb30] sm:$0xff]   ;;  %v7365_v60 = vld [vmem:[%s9198_s1 + $0xbf8] sm:$0xff]  }
 0x157   :  { %v6406_v53 = vpop.f32.mrb[12].mxu1  ;;  %v6385_v55 = vpop.f32.mrb[13].mxu0 }
 0x158   :  { %v6407_v56 = vpop.f32.mrb[13].mxu1  ;;  %v6386_v58 = vadd.f32 %v6385_v55, %v6384_v51  ;;  %v6387_v61 = vpop.f32.mrb[14].mxu0  ;;  %6687 = vmatpush3.bf16.msra.mxu0 %v7322_v63  ;;  %v7359_v51 = vld [vmem:[%s9198_s1 + $0xba8] sm:$0xff]   ;;  %v37_v63 = vld [vmem:[%s9199_s0 + $0xb0] sm:$0xff] }
 0x159   :  { %v6408_v59 = vadd.f32 %v6407_v56, %v6406_v53  ;;  %v6409_v62 = vpop.f32.mrb[14].mxu1  ;;  %v6388_v2 = vpop.f32.mrb[15].mxu0  ;;  %6709 = vmatpush3.bf16.msra.mxu1 %v7323_v1  ;;  %6688 = vmatprep.subr.bf16.mxu0 %v7324_v4  ;;  %v7361_v56 = vld [vmem:[%s9198_s1 + $0xbf0] sm:$0xff]   ;;  %v7366_v61 = vld [vmem:[%s9198_s1 + $0xb38] sm:$0xff]   ;;  %v5704_v1 = vcombine.low %v37_v63, %v37_v63 }
 0x15a   :  { %v4649_v0 = vadd.f32 %v6386_v58, %v8535_v17  ;;  %v6410_v3 = vpop.f32.mrb[15].mxu1  ;;  %6710 = vmatprep.subr.bf16.mxu1 %v7325_v6  ;;  %v5702_v17 = vcombine.low %v36_v16, %v36_v16  ;;  %v7363_v58 = vld [vmem:[%s9198_s1 + $0xbb0] sm:$0xff]   ;;  %v7367_v62 = vld [vmem:[%s9198_s1 + $0xbb8] sm:$0xff]   ;;  %v5705_v2 = vcombine.high %v37_v63, %v37_v63  ;;  %v7373_v6 = vld [vmem:[%s9198_s1 + $0xcc0] sm:$0xff]  }
 0x15b   :  { %v7383_v16 = vld [vmem:[%s9198_s1 + $0xc90] sm:$0xff]  }
 0x15c   :  { %v8643_v5 = vadd.f32 %v6408_v59, %v4649_v0  ;;  %6689 = vmatpush3.bf16.msra.mxu0 %v7326_v7  ;;  %v7364_v59 = vld [vmem:[%s9198_s1 + $0xb78] sm:$0xff]   ;;  %v7374_v7 = vld [vmem:[%s9198_s1 + $0xc00] sm:$0xff]   ;;  %v7416_v63 = vld [vmem:[%s9198_s1 + $0xd50] sm:$0xff]  }
 0x15d   :  { %6711 = vmatpush3.bf16.msra.mxu1 %v7327_v8  ;;  %6690 = vmatprep.subr.bf16.mxu0 %v7328_v9  ;;  %v38_v0 = vld [vmem:[%s9199_s0 + $0xb8] sm:$0xff]  ;;  %v7375_v8 = vld [vmem:[%s9198_s1 + $0xc80] sm:$0xff]   ;;  %v7376_v9 = vld [vmem:[%s9198_s1 + $0xc48] sm:$0xff]  }
 0x15e   :  { %6712 = vmatprep.subr.bf16.mxu1 %v7329_v10  ;;  %v5706_v3 = vcombine.low %v38_v0, %v38_v0  ;;  %v5707_v4 = vcombine.high %v38_v0, %v38_v0  ;;  %v7377_v10 = vld [vmem:[%s9198_s1 + $0xcc8] sm:$0xff]   ;;  %v7417_v0 = vld [vmem:[%s9198_s1 + $0xdd0] sm:$0xff]  }
 0x160   :  { %6691 = vmatpush3.bf16.msra.mxu0 %v7330_v11  ;;  %v7378_v11 = vld [vmem:[%s9198_s1 + $0xc08] sm:$0xff]  }
 0x161   :  { %6713 = vmatpush3.bf16.msra.mxu1 %v7331_v12  ;;  %6720 = vmatprep.subr.bf16.mxu0 %v7336_v19  ;;  %v7379_v12 = vld [vmem:[%s9198_s1 + $0xc88] sm:$0xff]   ;;  %v7386_v19 = vld [vmem:[%s9198_s1 + $0xc18] sm:$0xff]  }
 0x162   :  { %6742 = vmatprep.subr.bf16.mxu1 %v7337_v20  ;;  %v7387_v20 = vld [vmem:[%s9198_s1 + $0xc98] sm:$0xff]  }
 0x163   :  { %5207 = vmatmul.mubr.bf16.vlgmr.msra.gmra.mrb[40].mxu0 %v5700_v14  ;;  %v7381_v14 = vld [vmem:[%s9198_s1 + $0xcd0] sm:$0xff]  }
 0x164   :  { %5247 = vmatmul.mubr.bf16.vlgmr.msra.gmra.mrb[40].mxu1 %v5702_v17  ;;  %6721 = vmatpush3.bf16.msra.mxu0 %v7338_v21  ;;  %v7384_v17 = vld [vmem:[%s9198_s1 + $0xc58] sm:$0xff]   ;;  %v7388_v21 = vld [vmem:[%s9198_s1 + $0xc60] sm:$0xff]  }
 0x165   :  { %6743 = vmatpush3.bf16.msra.mxu1 %v7339_v22  ;;  %6722 = vmatprep.subr.bf16.mxu0 %v7340_v23  ;;  %v7389_v22 = vld [vmem:[%s9198_s1 + $0xce0] sm:$0xff]  }
 0x166   :  { %6744 = vmatprep.subr.bf16.mxu1 %v7341_v24  ;;  %5286 = vmatprep.mubr.bf16.mxu0 %v5705_v2  ;;  %v7390_v24 = vld [vmem:[%s9198_s1 + $0xc20] sm:$0xff]   ;;  %v7419_v2 = vld [vmem:[%s9198_s1 + $0xd90] sm:$0xff]  }
 0x167   :  { %5326 = vmatprep.mubr.bf16.mxu1 %v5707_v4  ;;  %v7421_v4 = vld [vmem:[%s9198_s1 + $0xdd8] sm:$0xff]  }
 0x168   :  { %6723 = vmatpush3.bf16.msra.mxu0 %v7342_v25 }
 0x169   :  { %6745 = vmatpush3.bf16.msra.mxu1 %v7343_v26  ;;  %6724 = vmatprep.subr.bf16.mxu0 %v7344_v27  ;;  %v7391_v26 = vld [vmem:[%s9198_s1 + $0xca0] sm:$0xff]  }
 0x16a   :  { %6746 = vmatprep.subr.bf16.mxu1 %v7345_v28 }
 0x16c   :  { %6725 = vmatpush3.bf16.msra.mxu0 %v7346_v29 }
 0x16d   :  { %6747 = vmatpush3.bf16.msra.mxu1 %v7347_v30  ;;  %6726 = vmatprep.subr.bf16.mxu0 %v7348_v31  ;;  %v7392_v30 = vld [vmem:[%s9198_s1 + $0xc68] sm:$0xff]  }
 0x16e   :  { %6748 = vmatprep.subr.bf16.mxu1 %v7349_v32  ;;  %v7393_v32 = vld [vmem:[%s9198_s1 + $0xce8] sm:$0xff]  }
 0x170   :  { %6727 = vmatpush3.bf16.msra.mxu0 %v7350_v33 }
 0x171   :  { %6749 = vmatpush3.bf16.msra.mxu1 %v7351_v34  ;;  %6728 = vmatprep.subr.bf16.mxu0 %v7352_v35 }
 0x172   :  { %6750 = vmatprep.subr.bf16.mxu1 %v7353_v36  ;;  %v7394_v36 = vld [vmem:[%s9198_s1 + $0xc28] sm:$0xff]  }
 0x174   :  { %6729 = vmatpush3.bf16.msra.mxu0 %v7354_v38 }
 0x175   :  { %6751 = vmatpush3.bf16.msra.mxu1 %v7355_v40  ;;  %6730 = vmatprep.subr.bf16.mxu0 %v7356_v43  ;;  %v7398_v43 = vld [vmem:[%s9198_s1 + $0xc30] sm:$0xff]  }
 0x176   :  { %v6428_v37 = vpop.f32.mrb[16].mxu0  ;;  %6752 = vmatprep.subr.bf16.mxu1 %v7357_v46  ;;  %v7401_v46 = vld [vmem:[%s9198_s1 + $0xcf8] sm:$0xff]  }
 0x177   :  { %v6450_v39 = vpop.f32.mrb[16].mxu1  ;;  %v6429_v41 = vpop.f32.mrb[17].mxu0 }
 0x178   :  { %v6451_v42 = vpop.f32.mrb[17].mxu1  ;;  %v6430_v44 = vadd.f32 %v6429_v41, %v6428_v37  ;;  %v6431_v47 = vpop.f32.mrb[18].mxu0  ;;  %6731 = vmatpush3.bf16.msra.mxu0 %v7358_v49  ;;  %v7395_v37 = vld [vmem:[%s9198_s1 + $0xca8] sm:$0xff]   ;;  %v7396_v41 = vld [vmem:[%s9198_s1 + $0xc70] sm:$0xff]   ;;  %v39_v49 = vld [vmem:[%s9199_s0 + $0xc0] sm:$0xff] }
 0x179   :  { %v6452_v45 = vadd.f32 %v6451_v42, %v6450_v39  ;;  %v6453_v48 = vpop.f32.mrb[18].mxu1  ;;  %v6432_v52 = vpop.f32.mrb[19].mxu0  ;;  %6753 = vmatpush3.bf16.msra.mxu1 %v7359_v51  ;;  %6732 = vmatprep.subr.bf16.mxu0 %v7360_v54  ;;  %v7397_v42 = vld [vmem:[%s9198_s1 + $0xcf0] sm:$0xff]   ;;  %v7402_v47 = vld [vmem:[%s9198_s1 + $0xc38] sm:$0xff]   ;;  %v5708_v51 = vcombine.low %v39_v49, %v39_v49  ;;  %v7408_v54 = vld [vmem:[%s9198_s1 + $0xd40] sm:$0xff]  }
 0x17a   :  { %v4729_v50 = vadd.f32 %v6430_v44, %v8643_v5  ;;  %v6454_v53 = vpop.f32.mrb[19].mxu1  ;;  %6754 = vmatprep.subr.bf16.mxu1 %v7361_v56  ;;  %v7372_v5 = vld [vmem:[%s9198_s1 + $0xc40] sm:$0xff]   ;;  %v7399_v44 = vld [vmem:[%s9198_s1 + $0xcb0] sm:$0xff]   ;;  %v7403_v48 = vld [vmem:[%s9198_s1 + $0xcb8] sm:$0xff]   ;;  %v5709_v52 = vcombine.high %v39_v49, %v39_v49 }
 0x17b   :  { %v7409_v56 = vld [vmem:[%s9198_s1 + $0xdc0] sm:$0xff]   ;;  %v7452_v49 = vld [vmem:[%s9198_s1 + $0xe50] sm:$0xff]  }
 0x17c   :  { %v8748_v55 = vadd.f32 %v6452_v45, %v4729_v50  ;;  %6733 = vmatpush3.bf16.msra.mxu0 %v7362_v57  ;;  %v7400_v45 = vld [vmem:[%s9198_s1 + $0xc78] sm:$0xff]   ;;  %v40_v50 = vld [vmem:[%s9199_s0 + $0xc8] sm:$0xff]  ;;  %v7410_v57 = vld [vmem:[%s9198_s1 + $0xd00] sm:$0xff]  }
 0x17d   :  { %6755 = vmatpush3.bf16.msra.mxu1 %v7363_v58  ;;  %6734 = vmatprep.subr.bf16.mxu0 %v7364_v59  ;;  %v5710_v53 = vcombine.low %v40_v50, %v40_v50  ;;  %v7411_v58 = vld [vmem:[%s9198_s1 + $0xd80] sm:$0xff]   ;;  %v7412_v59 = vld [vmem:[%s9198_s1 + $0xd48] sm:$0xff]  }
 0x17e   :  { %6756 = vmatprep.subr.bf16.mxu1 %v7365_v60  ;;  %v7413_v60 = vld [vmem:[%s9198_s1 + $0xdc8] sm:$0xff]  }
 0x180   :  { %6735 = vmatpush3.bf16.msra.mxu0 %v7366_v61  ;;  %v7414_v61 = vld [vmem:[%s9198_s1 + $0xd08] sm:$0xff]  }
 0x181   :  { %6757 = vmatpush3.bf16.msra.mxu1 %v7367_v62  ;;  %6764 = vmatprep.subr.bf16.mxu0 %v7372_v5  ;;  %v7415_v62 = vld [vmem:[%s9198_s1 + $0xd88] sm:$0xff]   ;;  %v7422_v5 = vld [vmem:[%s9198_s1 + $0xd18] sm:$0xff]  }
 0x182   :  { %6786 = vmatprep.subr.bf16.mxu1 %v7373_v6  ;;  %v7423_v6 = vld [vmem:[%s9198_s1 + $0xd98] sm:$0xff]  }
 0x183   :  { %5287 = vmatmul.mubr.bf16.vlgmr.msra.gmra.mrb[44].mxu0 %v5704_v1  ;;  %v7418_v1 = vld [vmem:[%s9198_s1 + $0xd10] sm:$0xff]  }
 0x184   :  { %5327 = vmatmul.mubr.bf16.vlgmr.msra.gmra.mrb[44].mxu1 %v5706_v3  ;;  %6765 = vmatpush3.bf16.msra.mxu0 %v7374_v7  ;;  %v7420_v3 = vld [vmem:[%s9198_s1 + $0xd58] sm:$0xff]   ;;  %v7424_v7 = vld [vmem:[%s9198_s1 + $0xd60] sm:$0xff]  }
 0x185   :  { %6787 = vmatpush3.bf16.msra.mxu1 %v7375_v8  ;;  %6766 = vmatprep.subr.bf16.mxu0 %v7376_v9  ;;  %v7425_v8 = vld [vmem:[%s9198_s1 + $0xde0] sm:$0xff]  }
 0x186   :  { %6788 = vmatprep.subr.bf16.mxu1 %v7377_v10  ;;  %5366 = vmatprep.mubr.bf16.mxu0 %v5709_v52  ;;  %v7426_v10 = vld [vmem:[%s9198_s1 + $0xd20] sm:$0xff]   ;;  %v7455_v52 = vld [vmem:[%s9198_s1 + $0xe90] sm:$0xff]  }
 0x188   :  { %6767 = vmatpush3.bf16.msra.mxu0 %v7378_v11 }
 0x189   :  { %6789 = vmatpush3.bf16.msra.mxu1 %v7379_v12  ;;  %6768 = vmatprep.subr.bf16.mxu0 %v7380_v13  ;;  %v7427_v12 = vld [vmem:[%s9198_s1 + $0xda0] sm:$0xff]  }
 0x18a   :  { %6790 = vmatprep.subr.bf16.mxu1 %v7381_v14 }
 0x18c   :  { %6769 = vmatpush3.bf16.msra.mxu0 %v7382_v15  ;;  %v7428_v15 = vld [vmem:[%s9198_s1 + $0xd68] sm:$0xff]  }
 0x18d   :  { %6791 = vmatpush3.bf16.msra.mxu1 %v7383_v16  ;;  %6770 = vmatprep.subr.bf16.mxu0 %v7384_v17 }
 0x18e   :  { %6792 = vmatprep.subr.bf16.mxu1 %v7385_v18  ;;  %v7429_v18 = vld [vmem:[%s9198_s1 + $0xde8] sm:$0xff]  }
 0x190   :  { %6771 = vmatpush3.bf16.msra.mxu0 %v7386_v19 }
 0x191   :  { %6793 = vmatpush3.bf16.msra.mxu1 %v7387_v20  ;;  %6772 = vmatprep.subr.bf16.mxu0 %v7388_v21  ;;  %v7430_v21 = vld [vmem:[%s9198_s1 + $0xd28] sm:$0xff]  }
 0x192   :  { %6794 = vmatprep.subr.bf16.mxu1 %v7389_v22 }
 0x194   :  { %6773 = vmatpush3.bf16.msra.mxu0 %v7390_v24 }
 0x195   :  { %6795 = vmatpush3.bf16.msra.mxu1 %v7391_v26  ;;  %6774 = vmatprep.subr.bf16.mxu0 %v7392_v30  ;;  %v7432_v26 = vld [vmem:[%s9198_s1 + $0xd70] sm:$0xff]  }
 0x196   :  { %v6472_v23 = vpop.f32.mrb[20].mxu0  ;;  %6796 = vmatprep.subr.bf16.mxu1 %v7393_v32  ;;  %v7435_v30 = vld [vmem:[%s9198_s1 + $0xdb0] sm:$0xff]   ;;  %v7437_v32 = vld [vmem:[%s9198_s1 + $0xdf8] sm:$0xff]  }
 0x197   :  { %v6494_v25 = vpop.f32.mrb[20].mxu1  ;;  %v6473_v27 = vpop.f32.mrb[21].mxu0 }
 0x198   :  { %v6474_v28 = vadd.f32 %v6473_v27, %v6472_v23  ;;  %v6495_v29 = vpop.f32.mrb[21].mxu1  ;;  %v6475_v33 = vpop.f32.mrb[22].mxu0  ;;  %6775 = vmatpush3.bf16.msra.mxu0 %v7394_v36  ;;  %v7431_v23 = vld [vmem:[%s9198_s1 + $0xda8] sm:$0xff]  }
 0x199   :  { %v6496_v31 = vadd.f32 %v6495_v29, %v6494_v25  ;;  %v6497_v35 = vpop.f32.mrb[22].mxu1  ;;  %v6476_v38 = vpop.f32.mrb[23].mxu0  ;;  %6797 = vmatpush3.bf16.msra.mxu1 %v7395_v37  ;;  %6776 = vmatprep.subr.bf16.mxu0 %v7396_v41  ;;  %v7434_v29 = vld [vmem:[%s9198_s1 + $0xd30] sm:$0xff]   ;;  %v7438_v33 = vld [vmem:[%s9198_s1 + $0xd38] sm:$0xff]   ;;  %v7444_v41 = vld [vmem:[%s9198_s1 + $0xe40] sm:$0xff]  }
 0x19a   :  { %v4809_v34 = vadd.f32 %v6474_v28, %v8748_v55  ;;  %v6498_v40 = vpop.f32.mrb[23].mxu1  ;;  %6798 = vmatprep.subr.bf16.mxu1 %v7397_v42  ;;  %v5711_v55 = vcombine.high %v40_v50, %v40_v50  ;;  %v7433_v28 = vld [vmem:[%s9198_s1 + $0xdf0] sm:$0xff]   ;;  %v42_v38 = vld [vmem:[%s9199_s0 + $0xd8] sm:$0xff]  ;;  %v7445_v42 = vld [vmem:[%s9198_s1 + $0xec0] sm:$0xff]  }
 0x19b   :  { %v41_v35 = vld [vmem:[%s9199_s0 + $0xd0] sm:$0xff]  ;;  %v5715_v40 = vcombine.high %v42_v38, %v42_v38 }
 0x19c   :  { %v8850_v39 = vadd.f32 %v6496_v31, %v4809_v34  ;;  %6777 = vmatpush3.bf16.msra.mxu0 %v7398_v43  ;;  %5406 = vmatprep.mubr.bf16.mxu1 %v5711_v55  ;;  %v7436_v31 = vld [vmem:[%s9198_s1 + $0xd78] sm:$0xff]   ;;  %v5712_v36 = vcombine.low %v41_v35, %v41_v35  ;;  %v5713_v37 = vcombine.high %v41_v35, %v41_v35  ;;  %v7446_v43 = vld [vmem:[%s9198_s1 + $0xe00] sm:$0xff]   ;;  %v7453_v50 = vld [vmem:[%s9198_s1 + $0xed0] sm:$0xff]  }
 0x19d   :  { %6799 = vmatpush3.bf16.msra.mxu1 %v7399_v44  ;;  %6778 = vmatprep.subr.bf16.mxu0 %v7400_v45  ;;  %v7439_v34 = vld [vmem:[%s9198_s1 + $0xdb8] sm:$0xff]   ;;  %v7447_v44 = vld [vmem:[%s9198_s1 + $0xe80] sm:$0xff]   ;;  %v7448_v45 = vld [vmem:[%s9198_s1 + $0xe48] sm:$0xff]  }
 0x19e   :  { %6800 = vmatprep.subr.bf16.mxu1 %v7401_v46  ;;  %v7449_v46 = vld [vmem:[%s9198_s1 + $0xec8] sm:$0xff]   ;;  %v7458_v55 = vld [vmem:[%s9198_s1 + $0xe18] sm:$0xff]   ;;  %v7488_v35 = vld [vmem:[%s9198_s1 + $0xf50] sm:$0xff]  }
 0x1a0   :  { %6779 = vmatpush3.bf16.msra.mxu0 %v7402_v47  ;;  %v7450_v47 = vld [vmem:[%s9198_s1 + $0xe08] sm:$0xff]  }
 0x1a1   :  { %6801 = vmatpush3.bf16.msra.mxu1 %v7403_v48  ;;  %6808 = vmatprep.subr.bf16.mxu0 %v7408_v54  ;;  %v7451_v48 = vld [vmem:[%s9198_s1 + $0xe88] sm:$0xff]   ;;  %v7457_v54 = vld [vmem:[%s9198_s1 + $0xed8] sm:$0xff]  }
 0x1a2   :  { %6830 = vmatprep.subr.bf16.mxu1 %v7409_v56  ;;  %v7459_v56 = vld [vmem:[%s9198_s1 + $0xe98] sm:$0xff]  }
 0x1a3   :  { %5367 = vmatmul.mubr.bf16.vlgmr.msra.gmra.mrb[48].mxu0 %v5708_v51  ;;  %v7454_v51 = vld [vmem:[%s9198_s1 + $0xe10] sm:$0xff]  }
 0x1a4   :  { %5407 = vmatmul.mubr.bf16.vlgmr.msra.gmra.mrb[48].mxu1 %v5710_v53  ;;  %6809 = vmatpush3.bf16.msra.mxu0 %v7410_v57  ;;  %v7456_v53 = vld [vmem:[%s9198_s1 + $0xe58] sm:$0xff]   ;;  %v7460_v57 = vld [vmem:[%s9198_s1 + $0xe60] sm:$0xff]  }
 0x1a5   :  { %6831 = vmatpush3.bf16.msra.mxu1 %v7411_v58  ;;  %6810 = vmatprep.subr.bf16.mxu0 %v7412_v59  ;;  %v7461_v58 = vld [vmem:[%s9198_s1 + $0xee0] sm:$0xff]  }
 0x1a6   :  { %6832 = vmatprep.subr.bf16.mxu1 %v7413_v60  ;;  %5446 = vmatprep.mubr.bf16.mxu0 %v5713_v37  ;;  %v7462_v60 = vld [vmem:[%s9198_s1 + $0xe20] sm:$0xff]   ;;  %v7490_v37 = vld [vmem:[%s9198_s1 + $0xf10] sm:$0xff]  }
 0x1a7   :  { %5486 = vmatprep.mubr.bf16.mxu1 %v5715_v40  ;;  %v7493_v40 = vld [vmem:[%s9198_s1 + $0xfd8] sm:$0xff]  }
 0x1a8   :  { %6811 = vmatpush3.bf16.msra.mxu0 %v7414_v61 }
 0x1a9   :  { %6833 = vmatpush3.bf16.msra.mxu1 %v7415_v62  ;;  %6812 = vmatprep.subr.bf16.mxu0 %v7416_v63  ;;  %v7463_v62 = vld [vmem:[%s9198_s1 + $0xea0] sm:$0xff]  }
 0x1aa   :  { %6834 = vmatprep.subr.bf16.mxu1 %v7417_v0 }
 0x1ac   :  { %6813 = vmatpush3.bf16.msra.mxu0 %v7418_v1  ;;  %v7464_v1 = vld [vmem:[%s9198_s1 + $0xe68] sm:$0xff]  }
 0x1ad   :  { %6835 = vmatpush3.bf16.msra.mxu1 %v7419_v2  ;;  %6814 = vmatprep.subr.bf16.mxu0 %v7420_v3 }
 0x1ae   :  { %6836 = vmatprep.subr.bf16.mxu1 %v7421_v4  ;;  %v7465_v4 = vld [vmem:[%s9198_s1 + $0xee8] sm:$0xff]  }
 0x1b0   :  { %6815 = vmatpush3.bf16.msra.mxu0 %v7422_v5 }
 0x1b1   :  { %6837 = vmatpush3.bf16.msra.mxu1 %v7423_v6  ;;  %6816 = vmatprep.subr.bf16.mxu0 %v7424_v7  ;;  %v7466_v7 = vld [vmem:[%s9198_s1 + $0xe28] sm:$0xff]  }
 0x1b2   :  { %6838 = vmatprep.subr.bf16.mxu1 %v7425_v8 }
 0x1b4   :  { %6817 = vmatpush3.bf16.msra.mxu0 %v7426_v10 }
 0x1b5   :  { %6839 = vmatpush3.bf16.msra.mxu1 %v7427_v12  ;;  %6818 = vmatprep.subr.bf16.mxu0 %v7428_v15  ;;  %v7468_v12 = vld [vmem:[%s9198_s1 + $0xe70] sm:$0xff]  }
 0x1b6   :  { %v6516_v9 = vpop.f32.mrb[24].mxu0  ;;  %6840 = vmatprep.subr.bf16.mxu1 %v7429_v18  ;;  %v7470_v15 = vld [vmem:[%s9198_s1 + $0xe30] sm:$0xff]   ;;  %v7473_v18 = vld [vmem:[%s9198_s1 + $0xef8] sm:$0xff]  }
 0x1b7   :  { %v6538_v11 = vpop.f32.mrb[24].mxu1  ;;  %v6517_v13 = vpop.f32.mrb[25].mxu0 }
 0x1b8   :  { %v6539_v14 = vpop.f32.mrb[25].mxu1  ;;  %v6518_v16 = vadd.f32 %v6517_v13, %v6516_v9  ;;  %v6519_v19 = vpop.f32.mrb[26].mxu0  ;;  %6819 = vmatpush3.bf16.msra.mxu0 %v7430_v21  ;;  %v7467_v9 = vld [vmem:[%s9198_s1 + $0xea8] sm:$0xff]   ;;  %v43_v21 = vld [vmem:[%s9199_s0 + $0xe0] sm:$0xff] }
 0x1b9   :  { %v6540_v17 = vadd.f32 %v6539_v14, %v6538_v11  ;;  %v6541_v20 = vpop.f32.mrb[26].mxu1  ;;  %v6520_v24 = vpop.f32.mrb[27].mxu0  ;;  %6841 = vmatpush3.bf16.msra.mxu1 %v7431_v23  ;;  %6820 = vmatprep.subr.bf16.mxu0 %v7432_v26  ;;  %v7469_v14 = vld [vmem:[%s9198_s1 + $0xef0] sm:$0xff]   ;;  %v7474_v19 = vld [vmem:[%s9198_s1 + $0xe38] sm:$0xff]   ;;  %v5716_v23 = vcombine.low %v43_v21, %v43_v21 }
 0x1ba   :  { %v4889_v22 = vadd.f32 %v6518_v16, %v8850_v39  ;;  %v6542_v25 = vpop.f32.mrb[27].mxu1  ;;  %6842 = vmatprep.subr.bf16.mxu1 %v7433_v28  ;;  %v5714_v39 = vcombine.low %v42_v38, %v42_v38  ;;  %v7471_v16 = vld [vmem:[%s9198_s1 + $0xeb0] sm:$0xff]   ;;  %v7475_v20 = vld [vmem:[%s9198_s1 + $0xeb8] sm:$0xff]   ;;  %v5717_v24 = vcombine.high %v43_v21, %v43_v21  ;;  %v7481_v28 = vld [vmem:[%s9198_s1 + $0xfc0] sm:$0xff]  }
 0x1bb   :  { %v7491_v38 = vld [vmem:[%s9198_s1 + $0xf90] sm:$0xff]  }
 0x1bc   :  { %v8958_v27 = vadd.f32 %v6540_v17, %v4889_v22  ;;  %6821 = vmatpush3.bf16.msra.mxu0 %v7434_v29  ;;  %v7472_v17 = vld [vmem:[%s9198_s1 + $0xe78] sm:$0xff]   ;;  %v44_v22 = vld [vmem:[%s9199_s0 + $0xe8] sm:$0xff]  ;;  %v7482_v29 = vld [vmem:[%s9198_s1 + $0xf00] sm:$0xff]  }
 0x1bd   :  { %6843 = vmatpush3.bf16.msra.mxu1 %v7435_v30  ;;  %6822 = vmatprep.subr.bf16.mxu0 %v7436_v31  ;;  %v5718_v25 = vcombine.low %v44_v22, %v44_v22  ;;  %v5719_v26 = vcombine.high %v44_v22, %v44_v22  ;;  %v7483_v30 = vld [vmem:[%s9198_s1 + $0xf80] sm:$0xff]   ;;  %v7484_v31 = vld [vmem:[%s9198_s1 + $0xf48] sm:$0xff]  }
 0x1be   :  { %6844 = vmatprep.subr.bf16.mxu1 %v7437_v32  ;;  %v7485_v32 = vld [vmem:[%s9198_s1 + $0xfc8] sm:$0xff]  }
 0x1c0   :  { %6823 = vmatpush3.bf16.msra.mxu0 %v7438_v33  ;;  %v7486_v33 = vld [vmem:[%s9198_s1 + $0xf08] sm:$0xff]  }
 0x1c1   :  { %6845 = vmatpush3.bf16.msra.mxu1 %v7439_v34  ;;  %6852 = vmatprep.subr.bf16.mxu0 %v7444_v41  ;;  %v7487_v34 = vld [vmem:[%s9198_s1 + $0xf88] sm:$0xff]   ;;  %v7494_v41 = vld [vmem:[%s9198_s1 + $0xf18] sm:$0xff]  }
 0x1c2   :  { %6874 = vmatprep.subr.bf16.mxu1 %v7445_v42  ;;  %v7495_v42 = vld [vmem:[%s9198_s1 + $0xf98] sm:$0xff]  }
 0x1c3   :  { %5447 = vmatmul.mubr.bf16.vlgmr.msra.gmra.mrb[52].mxu0 %v5712_v36  ;;  %v7489_v36 = vld [vmem:[%s9198_s1 + $0xfd0] sm:$0xff]  }
 0x1c4   :  { %5487 = vmatmul.mubr.bf16.vlgmr.msra.gmra.mrb[52].mxu1 %v5714_v39  ;;  %6853 = vmatpush3.bf16.msra.mxu0 %v7446_v43  ;;  %v7492_v39 = vld [vmem:[%s9198_s1 + $0xf58] sm:$0xff]   ;;  %v7496_v43 = vld [vmem:[%s9198_s1 + $0xf60] sm:$0xff]  }
 0x1c5   :  { %6875 = vmatpush3.bf16.msra.mxu1 %v7447_v44  ;;  %6854 = vmatprep.subr.bf16.mxu0 %v7448_v45  ;;  %v7497_v44 = vld [vmem:[%s9198_s1 + $0xfe0] sm:$0xff]  }
 0x1c6   :  { %6876 = vmatprep.subr.bf16.mxu1 %v7449_v46  ;;  %5526 = vmatprep.mubr.bf16.mxu0 %v5717_v24  ;;  %v7498_v45 = vld [vmem:[%s9198_s1 + $0xf20] sm:$0xff]  }
 0x1c7   :  { %5566 = vmatprep.mubr.bf16.mxu1 %v5719_v26 }
 0x1c8   :  { %6855 = vmatpush3.bf16.msra.mxu0 %v7450_v47  ;;  %v7499_v47 = vld [vmem:[%s9198_s1 + $0xfa0] sm:$0xff]  }
 0x1c9   :  { %6877 = vmatpush3.bf16.msra.mxu1 %v7451_v48  ;;  %6856 = vmatprep.subr.bf16.mxu0 %v7452_v49 }
 0x1ca   :  { %6878 = vmatprep.subr.bf16.mxu1 %v7453_v50 }
 0x1cc   :  { %6857 = vmatpush3.bf16.msra.mxu0 %v7454_v51 }
 0x1cd   :  { %6879 = vmatpush3.bf16.msra.mxu1 %v7455_v52  ;;  %6858 = vmatprep.subr.bf16.mxu0 %v7456_v53  ;;  %v7500_v53 = vld [vmem:[%s9198_s1 + $0xf68] sm:$0xff]  }
 0x1ce   :  { %6880 = vmatprep.subr.bf16.mxu1 %v7457_v54 }
 0x1d0   :  { %6859 = vmatpush3.bf16.msra.mxu0 %v7458_v55  ;;  %v7501_v55 = vld [vmem:[%s9198_s1 + $0xfe8] sm:$0xff]  }
 0x1d1   :  { %6881 = vmatpush3.bf16.msra.mxu1 %v7459_v56  ;;  %6860 = vmatprep.subr.bf16.mxu0 %v7460_v57 }
 0x1d2   :  { %6882 = vmatprep.subr.bf16.mxu1 %v7461_v58  ;;  %v7502_v58 = vld [vmem:[%s9198_s1 + $0xf28] sm:$0xff]  }
 0x1d4   :  { %6861 = vmatpush3.bf16.msra.mxu0 %v7462_v60  ;;  %v7503_v60 = vld [vmem:[%s9198_s1 + $0xfa8] sm:$0xff]  }
 0x1d5   :  { %6883 = vmatpush3.bf16.msra.mxu1 %v7463_v62  ;;  %6862 = vmatprep.subr.bf16.mxu0 %v7464_v1  ;;  %v7506_v1 = vld [vmem:[%s9198_s1 + $0xf30] sm:$0xff]  }
 0x1d6   :  { %v6560_v59 = vpop.f32.mrb[28].mxu0  ;;  %6884 = vmatprep.subr.bf16.mxu1 %v7465_v4  ;;  %v7509_v4 = vld [vmem:[%s9198_s1 + $0xff8] sm:$0xff]  }
 0x1d7   :  { %v6582_v61 = vpop.f32.mrb[28].mxu1  ;;  %v6561_v63 = vpop.f32.mrb[29].mxu0 }
 0x1d8   :  { %v6583_v0 = vpop.f32.mrb[29].mxu1  ;;  %v6562_v2 = vadd.f32 %v6561_v63, %v6560_v59  ;;  %v6563_v5 = vpop.f32.mrb[30].mxu0  ;;  %6863 = vmatpush3.bf16.msra.mxu0 %v7466_v7  ;;  %v7504_v63 = vld [vmem:[%s9198_s1 + $0xf70] sm:$0xff]  }
 0x1d9   :  { %v6584_v3 = vadd.f32 %v6583_v0, %v6582_v61  ;;  %v6585_v6 = vpop.f32.mrb[30].mxu1  ;;  %v6564_v10 = vpop.f32.mrb[31].mxu0  ;;  %6885 = vmatpush3.bf16.msra.mxu1 %v7467_v9  ;;  %6864 = vmatprep.subr.bf16.mxu0 %v7468_v12  ;;  %v7505_v0 = vld [vmem:[%s9198_s1 + $0xff0] sm:$0xff]   ;;  %v7510_v5 = vld [vmem:[%s9198_s1 + $0xf38] sm:$0xff]  }
 0x1da   :  { %v4969_v8 = vadd.f32 %v6562_v2, %v8958_v27  ;;  %v6586_v11 = vpop.f32.mrb[31].mxu1  ;;  %6886 = vmatprep.subr.bf16.mxu1 %v7469_v14  ;;  %v7480_v27 = vld [vmem:[%s9198_s1 + $0xf40] sm:$0xff]   ;;  %v7507_v2 = vld [vmem:[%s9198_s1 + $0xfb0] sm:$0xff]   ;;  %v7511_v6 = vld [vmem:[%s9198_s1 + $0xfb8] sm:$0xff]  }
 0x1db   :  { %v45_v7 = vld [vmem:[%s9199_s0 + $0xf0] sm:$0xff] }
 0x1dc   :  { %v9063_v13 = vadd.f32 %v6584_v3, %v4969_v8  ;;  %6865 = vmatpush3.bf16.msra.mxu0 %v7470_v15  ;;  %v7508_v3 = vld [vmem:[%s9198_s1 + $0xf78] sm:$0xff]   ;;  %v5720_v9 = vcombine.low %v45_v7, %v45_v7  ;;  %v5721_v10 = vcombine.high %v45_v7, %v45_v7 }
 0x1dd   :  { %6887 = vmatpush3.bf16.msra.mxu1 %v7471_v16  ;;  %6866 = vmatprep.subr.bf16.mxu0 %v7472_v17  ;;  %v46_v8 = vld [vmem:[%s9199_s0 + $0xf8] sm:$0xff] }
 0x1de   :  { %6888 = vmatprep.subr.bf16.mxu1 %v7473_v18  ;;  %v5722_v11 = vcombine.low %v46_v8, %v46_v8  ;;  %v5723_v12 = vcombine.high %v46_v8, %v46_v8 }
 0x1e0   :  { %6867 = vmatpush3.bf16.msra.mxu0 %v7474_v19 }
 0x1e1   :  { %6889 = vmatpush3.bf16.msra.mxu1 %v7475_v20  ;;  %6896 = vmatprep.subr.bf16.mxu0 %v7480_v27 }
 0x1e2   :  { %6918 = vmatprep.subr.bf16.mxu1 %v7481_v28 }
 0x1e3   :  { %5527 = vmatmul.mubr.bf16.vlgmr.msra.gmra.mrb[56].mxu0 %v5716_v23 }
 0x1e4   :  { %5567 = vmatmul.mubr.bf16.vlgmr.msra.gmra.mrb[56].mxu1 %v5718_v25  ;;  %6897 = vmatpush3.bf16.msra.mxu0 %v7482_v29 }
 0x1e5   :  { %6919 = vmatpush3.bf16.msra.mxu1 %v7483_v30  ;;  %6898 = vmatprep.subr.bf16.mxu0 %v7484_v31 }
 0x1e6   :  { %6920 = vmatprep.subr.bf16.mxu1 %v7485_v32  ;;  %5606 = vmatprep.mubr.bf16.mxu0 %v5721_v10 }
 0x1e7   :  { %5646 = vmatprep.mubr.bf16.mxu1 %v5723_v12 }
 0x1e8   :  { %6899 = vmatpush3.bf16.msra.mxu0 %v7486_v33 }
 0x1e9   :  { %6921 = vmatpush3.bf16.msra.mxu1 %v7487_v34  ;;  %6900 = vmatprep.subr.bf16.mxu0 %v7488_v35 }
 0x1ea   :  { %6922 = vmatprep.subr.bf16.mxu1 %v7489_v36 }
 0x1ec   :  { %6901 = vmatpush3.bf16.msra.mxu0 %v7490_v37 }
 0x1ed   :  { %6923 = vmatpush3.bf16.msra.mxu1 %v7491_v38  ;;  %6902 = vmatprep.subr.bf16.mxu0 %v7492_v39 }
 0x1ee   :  { %6924 = vmatprep.subr.bf16.mxu1 %v7493_v40 }
 0x1f0   :  { %6903 = vmatpush3.bf16.msra.mxu0 %v7494_v41 }
 0x1f1   :  { %6925 = vmatpush3.bf16.msra.mxu1 %v7495_v42  ;;  %6904 = vmatprep.subr.bf16.mxu0 %v7496_v43 }
 0x1f2   :  { %6926 = vmatprep.subr.bf16.mxu1 %v7497_v44 }
 0x1f4   :  { %6905 = vmatpush3.bf16.msra.mxu0 %v7498_v45 }
 0x1f5   :  { %6927 = vmatpush3.bf16.msra.mxu1 %v7499_v47  ;;  %6906 = vmatprep.subr.bf16.mxu0 %v7500_v53 }
 0x1f6   :  { %v6604_v46 = vpop.f32.mrb[32].mxu0  ;;  %6928 = vmatprep.subr.bf16.mxu1 %v7501_v55 }
 0x1f7   :  { %v6626_v48 = vpop.f32.mrb[32].mxu1  ;;  %v6605_v49 = vpop.f32.mrb[33].mxu0 }
 0x1f8   :  { %v6627_v50 = vpop.f32.mrb[33].mxu1  ;;  %v6606_v51 = vadd.f32 %v6605_v49, %v6604_v46  ;;  %v6607_v54 = vpop.f32.mrb[34].mxu0  ;;  %6907 = vmatpush3.bf16.msra.mxu0 %v7502_v58 }
 0x1f9   :  { %v6628_v52 = vadd.f32 %v6627_v50, %v6626_v48  ;;  %v6629_v56 = vpop.f32.mrb[34].mxu1  ;;  %v6608_v59 = vpop.f32.mrb[35].mxu0  ;;  %6929 = vmatpush3.bf16.msra.mxu1 %v7503_v60  ;;  %6908 = vmatprep.subr.bf16.mxu0 %v7504_v63 }
 0x1fa   :  { %v5049_v57 = vadd.f32 %v6606_v51, %v9063_v13  ;;  %v6630_v61 = vpop.f32.mrb[35].mxu1  ;;  %6930 = vmatprep.subr.bf16.mxu1 %v7505_v0 }
 0x1fc   :  { %v5089_v62 = vadd.f32 %v6628_v52, %v5049_v57  ;;  %6909 = vmatpush3.bf16.msra.mxu0 %v7506_v1 }
 0x1fd   :  { %6931 = vmatpush3.bf16.msra.mxu1 %v7507_v2  ;;  %6910 = vmatprep.subr.bf16.mxu0 %v7508_v3 }
 0x1fe   :  { %6932 = vmatprep.subr.bf16.mxu1 %v7509_v4 }
 0x200   :  { %6911 = vmatpush3.bf16.msra.mxu0 %v7510_v5 }
 0x201   :  { %6933 = vmatpush3.bf16.msra.mxu1 %v7511_v6 }
 0x203   :  { %5607 = vmatmul.mubr.bf16.vlgmr.msra.gmra.mrb[60].mxu0 %v5720_v9 }
 0x204   :  { %5647 = vmatmul.mubr.bf16.vlgmr.msra.gmra.mrb[60].mxu1 %v5722_v11 }
 0x216   :  { %v6648_v13 = vpop.f32.mrb[36].mxu0 }
 0x217   :  { %v6670_v14 = vpop.f32.mrb[36].mxu1  ;;  %v6649_v15 = vpop.f32.mrb[37].mxu0 }
 0x218   :  { %v6650_v16 = vadd.f32 %v6649_v15, %v6648_v13  ;;  %v6671_v17 = vpop.f32.mrb[37].mxu1  ;;  %v6651_v18 = vpop.f32.mrb[38].mxu0 }
 0x219   :  { %v6672_v19 = vadd.f32 %v6671_v17, %v6670_v14  ;;  %v6673_v20 = vpop.f32.mrb[38].mxu1  ;;  %v6652_v21 = vpop.f32.mrb[39].mxu0 }
 0x21a   :  { %v5129_v22 = vadd.f32 %v6650_v16, %v5089_v62  ;;  %v6674_v23 = vpop.f32.mrb[39].mxu1 }
 0x21c   :  { %v5169_v24 = vadd.f32 %v6672_v19, %v5129_v22 }
 0x236   :  { %v6692_v25 = vpop.f32.mrb[40].mxu0 }
 0x237   :  { %v6714_v26 = vpop.f32.mrb[40].mxu1  ;;  %v6693_v27 = vpop.f32.mrb[41].mxu0 }
 0x238   :  { %v6715_v28 = vpop.f32.mrb[41].mxu1  ;;  %v6694_v29 = vadd.f32 %v6693_v27, %v6692_v25  ;;  %v6695_v31 = vpop.f32.mrb[42].mxu0 }
 0x239   :  { %v6716_v30 = vadd.f32 %v6715_v28, %v6714_v26  ;;  %v6717_v32 = vpop.f32.mrb[42].mxu1  ;;  %v6696_v33 = vpop.f32.mrb[43].mxu0 }
 0x23a   :  { %v6718_v34 = vpop.f32.mrb[43].mxu1  ;;  %v5209_v35 = vadd.f32 %v6694_v29, %v5169_v24 }
 0x23c   :  { %v5249_v36 = vadd.f32 %v6716_v30, %v5209_v35 }
 0x256   :  { %v6736_v37 = vpop.f32.mrb[44].mxu0 }
 0x257   :  { %v6758_v38 = vpop.f32.mrb[44].mxu1  ;;  %v6737_v39 = vpop.f32.mrb[45].mxu0 }
 0x258   :  { %v6738_v40 = vadd.f32 %v6737_v39, %v6736_v37  ;;  %v6759_v41 = vpop.f32.mrb[45].mxu1  ;;  %v6739_v42 = vpop.f32.mrb[46].mxu0 }
 0x259   :  { %v6760_v43 = vadd.f32 %v6759_v41, %v6758_v38  ;;  %v6761_v44 = vpop.f32.mrb[46].mxu1  ;;  %v6740_v45 = vpop.f32.mrb[47].mxu0 }
 0x25a   :  { %v5289_v46 = vadd.f32 %v6738_v40, %v5249_v36  ;;  %v6762_v47 = vpop.f32.mrb[47].mxu1 }
 0x25c   :  { %v5329_v48 = vadd.f32 %v6760_v43, %v5289_v46 }
 0x276   :  { %v6780_v49 = vpop.f32.mrb[48].mxu0 }
 0x277   :  { %v6802_v50 = vpop.f32.mrb[48].mxu1  ;;  %v6781_v51 = vpop.f32.mrb[49].mxu0 }
 0x278   :  { %v6782_v52 = vadd.f32 %v6781_v51, %v6780_v49  ;;  %v6803_v53 = vpop.f32.mrb[49].mxu1  ;;  %v6783_v54 = vpop.f32.mrb[50].mxu0 }
 0x279   :  { %v6804_v55 = vadd.f32 %v6803_v53, %v6802_v50  ;;  %v6805_v56 = vpop.f32.mrb[50].mxu1  ;;  %v6784_v57 = vpop.f32.mrb[51].mxu0 }
 0x27a   :  { %v5369_v58 = vadd.f32 %v6782_v52, %v5329_v48  ;;  %v6806_v59 = vpop.f32.mrb[51].mxu1 }
 0x27c   :  { %v5409_v60 = vadd.f32 %v6804_v55, %v5369_v58 }
 0x296   :  { %v6824_v61 = vpop.f32.mrb[52].mxu0 }
 0x297   :  { %v6846_v62 = vpop.f32.mrb[52].mxu1  ;;  %v6825_v63 = vpop.f32.mrb[53].mxu0 }
 0x298   :  { %v6847_v0 = vpop.f32.mrb[53].mxu1  ;;  %v6826_v1 = vadd.f32 %v6825_v63, %v6824_v61  ;;  %v6827_v3 = vpop.f32.mrb[54].mxu0 }
 0x299   :  { %v6848_v2 = vadd.f32 %v6847_v0, %v6846_v62  ;;  %v6849_v4 = vpop.f32.mrb[54].mxu1  ;;  %v6828_v5 = vpop.f32.mrb[55].mxu0 }
 0x29a   :  { %v6850_v6 = vpop.f32.mrb[55].mxu1  ;;  %v5449_v7 = vadd.f32 %v6826_v1, %v5409_v60 }
 0x29c   :  { %v5489_v8 = vadd.f32 %v6848_v2, %v5449_v7 }
 0x2b6   :  { %v6868_v9 = vpop.f32.mrb[56].mxu0 }
 0x2b7   :  { %v6890_v10 = vpop.f32.mrb[56].mxu1  ;;  %v6869_v11 = vpop.f32.mrb[57].mxu0 }
 0x2b8   :  { %v6870_v12 = vadd.f32 %v6869_v11, %v6868_v9  ;;  %v6891_v13 = vpop.f32.mrb[57].mxu1  ;;  %v6871_v14 = vpop.f32.mrb[58].mxu0 }
 0x2b9   :  { %v6892_v15 = vadd.f32 %v6891_v13, %v6890_v10  ;;  %v6893_v16 = vpop.f32.mrb[58].mxu1  ;;  %v6872_v17 = vpop.f32.mrb[59].mxu0 }
 0x2ba   :  { %v5529_v18 = vadd.f32 %v6870_v12, %v5489_v8  ;;  %v6894_v19 = vpop.f32.mrb[59].mxu1 }
 0x2bc   :  { %v5569_v20 = vadd.f32 %v6892_v15, %v5529_v18 }
 0x2d6   :  { %v6912_v21 = vpop.f32.mrb[60].mxu0 }
 0x2d7   :  { %v6934_v22 = vpop.f32.mrb[60].mxu1  ;;  %v6913_v23 = vpop.f32.mrb[61].mxu0 }
 0x2d8   :  { %v6914_v24 = vadd.f32 %v6913_v23, %v6912_v21  ;;  %v6935_v25 = vpop.f32.mrb[61].mxu1  ;;  %v6915_v26 = vpop.f32.mrb[62].mxu0 }
 0x2d9   :  { %v6936_v27 = vadd.f32 %v6935_v25, %v6934_v22  ;;  %v6937_v28 = vpop.f32.mrb[62].mxu1  ;;  %v6916_v29 = vpop.f32.mrb[63].mxu0 }
 0x2da   :  { %v5609_v30 = vadd.f32 %v6914_v24, %v5569_v20  ;;  %v6938_v31 = vpop.f32.mrb[63].mxu1 }
 0x2dc   :  { %v5649_v32 = vadd.f32 %v6936_v27, %v5609_v30 }
 0x2de   :  { %5654 = vst [vmem:[%s9201_s3] sm:$0xff] %v5649_v32 }

</bundles_post_ra>
